<compile_context>
chip_gen: v7x
topology: tpu7x:2x2x1
jax: 0.10.0
libtpu: 0.0.40
codegen_flags: <defaults>
</compile_context>

<pallas_src>
import functools

import jax
import jax.numpy as jnp
from jax import lax
from jax.experimental import pallas as pl
from jax.experimental.pallas import tpu as pltpu


def _round_up(x, m):
    return ((x + m - 1) // m) * m


def _pick_tile_h(H, halo, target=64):
    """Largest row tile that divides H, is <= target, and is compatible with the
    shrinking-halo scheme (halo <= tile_h <= H - halo). Whole image otherwise."""
    if H <= target:
        return H
    best = H
    for d in range(1, target + 1):
        if H % d == 0 and halo <= d <= H - halo:
            best = d
    return best


def _fused_reg_head_kernel(x_hbm, wh_ref, bh_ref, wo_ref, bo_ref, o_ref,
                           stage, buf0, buf1, sem, *, tile_h, W, n_hidden):
    """Fused 5-conv head for one (batch, row-tile) grid point.

    x_hbm : (N, H + 2*halo, W, Cp)  f32, HBM (pl.ANY), rows pre-padded by halo
    wh_ref: (n_hidden, 9, Cp, Cp)   bf16
    bh_ref: (n_hidden, 1, Cp)       f32
    wo_ref: (9, Cp, Cop)            bf16
    bo_ref: (1, Cop)                f32
    o_ref : (1, tile_h, W, Cop)     f32 (lane-dense padded output slab)
    stage : VMEM (slab, W, Cp)      f32   staged input row slab
    buf0/1: VMEM (slab, W+2, Cp)    f32   ping-pong activations (1-col zero halo)
    """
    n_conv = n_hidden + 1
    halo = n_conv
    slab = tile_h + 2 * halo
    Cp = buf0.shape[-1]

    n = pl.program_id(0)
    i = pl.program_id(1)
    n_tiles = pl.num_programs(1)

    # DMA the row slab of image n. The wrapper added `halo` zero rows on each
    # side, so [i*tile_h, i*tile_h + slab) is always in bounds.
    copy = pltpu.make_async_copy(
        x_hbm.at[n, pl.ds(i * tile_h, slab), :, :], stage, sem)
    copy.start()

    # Zero both buffers once: keeps the 1-column halo (cols 0 and W+1) exactly
    # zero for every layer ("same" padding along W). Overlaps with the DMA.
    buf0[...] = jnp.zeros_like(buf0)
    buf1[...] = jnp.zeros_like(buf1)

    copy.wait()
    buf0[:, 1:W + 1, :] = stage[...]

    bufs = (buf0, buf1)
    for l in range(n_conv):
        src = bufs[l % 2]
        dst = bufs[(l + 1) % 2]
        last = (l == n_conv - 1)
        # Valid rows shrink by one on each side per conv layer.
        r_out = tile_h + 2 * (halo - l - 1)
        cout = wo_ref.shape[-1] if last else Cp

        acc = jnp.zeros((r_out * W, cout), jnp.float32)
        for k in range(9):                      # statically unrolled 3x3 taps
            dy, dx = divmod(k, 3)
            patch = src[l + dy:l + dy + r_out, dx:dx + W, :]
            patch = patch.astype(jnp.bfloat16).reshape(r_out * W, Cp)
            w_tap = wo_ref[k] if last else wh_ref[l, k]
            acc = acc + jnp.dot(patch, w_tap,
                                preferred_element_type=jnp.float32)
        acc = acc + (bo_ref[...] if last else bh_ref[l])

        if last:
            # r_out == tile_h: exactly the output tile, lane-dense store.
            o_ref[0] = acc.reshape(tile_h, W, cout).astype(o_ref.dtype)
        else:
            acc = jnp.maximum(acc, 0.0)
            dst[l + 1:l + 1 + r_out, 1:W + 1, :] = (
                acc.reshape(r_out, W, Cp).astype(dst.dtype))

            # Re-impose the true per-layer zero ROW padding at the image
            # top/bottom: halo rows outside the image must be exactly 0 (not
            # the conv of the zero-padded input).
            zrows = halo - (l + 1)
            if zrows > 0:
                zeros = jnp.zeros((zrows, W + 2, Cp), dst.dtype)

                @pl.when(i == 0)
                def _zero_top():
                    dst[l + 1:l + 1 + zrows, :, :] = zeros

                @pl.when(i == n_tiles - 1)
                def _zero_bottom():
                    dst[tile_h + halo:tile_h + halo + zrows, :, :] = zeros


def init_retina_reg_head_params(key, inplanes, num_anchors, num_layers=4,
                                std=0.01):
    """PyTorch-layout params: list of (weight OIHW, bias); weight ~ N(0, std),
    bias = 0 (matches the nn.Module init for std=0.01)."""
    params = []
    keys = jax.random.split(key, num_layers + 1)
    for i in range(num_layers):
        w = jax.random.normal(keys[i], (inplanes, inplanes, 3, 3),
                              jnp.float32) * std
        params.append((w, jnp.zeros((inplanes,), jnp.float32)))
    cout = num_anchors * 4
    w = jax.random.normal(keys[num_layers], (cout, inplanes, 3, 3),
                          jnp.float32) * std
    params.append((w, jnp.zeros((cout,), jnp.float32)))
    return params


def pack_retina_reg_head_params(params):
    """One-time conversion to the kernel layout: OIHW -> (9, Cin, Cout) taps,
    channels zero-padded to a multiple of 128, weights cast to bf16."""
    hidden = params[:-1]
    w_out, b_out = params[-1]
    C = params[0][0].shape[1]          # inplanes
    cout = w_out.shape[0]              # num_anchors * 4
    Cp = _round_up(C, 128)
    Cop = _round_up(cout, 128)

    wh, bh = [], []
    for w, b in hidden:
        w9 = jnp.transpose(w, (2, 3, 1, 0)).reshape(9, C, C)
        wh.append(jnp.pad(w9, ((0, 0), (0, Cp - C), (0, Cp - C))))
        bh.append(jnp.pad(b, (0, Cp - C)).reshape(1, Cp))
    wo = jnp.transpose(w_out, (2, 3, 1, 0)).reshape(9, C, cout)
    wo = jnp.pad(wo, ((0, 0), (0, Cp - C), (0, Cop - cout)))
    bo = jnp.pad(b_out, (0, Cop - cout)).reshape(1, Cop)

    return {
        "w_hidden": jnp.stack(wh).astype(jnp.bfloat16),   # (L, 9, Cp, Cp)
        "b_hidden": jnp.stack(bh).astype(jnp.float32),    # (L, 1, Cp)
        "w_out": wo.astype(jnp.bfloat16),                 # (9, Cp, Cop)
        "b_out": bo.astype(jnp.float32),                  # (1, Cop)
        "cout": cout,
    }


def retina_reg_head_forward(x_nchw, packed, tile_h=None):
    """Matches RetinaRegHead.forward: NCHW in, NCHW out."""
    wh, bh = packed["w_hidden"], packed["b_hidden"]
    wo, bo = packed["w_out"], packed["b_out"]
    cout = packed["cout"]

    n_hidden = wh.shape[0]
    Cp = wh.shape[-1]
    Cop = wo.shape[-1]
    halo = n_hidden + 1                          # total number of conv layers

    N, Cin, H, W = x_nchw.shape
    x = jnp.transpose(x_nchw, (0, 2, 3, 1)).astype(jnp.float32)   # -> NHWC
    if Cin != Cp:                                # lane-pad channels (no-op for C%128==0)
        x = jnp.pad(x, ((0, 0), (0, 0), (0, 0), (0, Cp - Cin)))
    # Single zero row-halo pad; per-layer padding is reconstructed in-kernel.
    x = jnp.pad(x, ((0, 0), (halo, halo), (0, 0), (0, 0)))

    th = tile_h if tile_h is not None else _pick_tile_h(H, halo)
    assert H % th == 0, (H, th)
    n_tiles = H // th
    assert n_tiles == 1 or (halo <= th <= H - halo), (H, th, halo)
    slab = th + 2 * halo

    kernel = functools.partial(_fused_reg_head_kernel,
                               tile_h=th, W=W, n_hidden=n_hidden)

    out = pl.pallas_call(
        kernel,
        out_shape=jax.ShapeDtypeStruct((N, H, W, Cop), jnp.float32),
        grid=(N, n_tiles),
        in_specs=[
            pl.BlockSpec(memory_space=pl.ANY),                        # x stays in HBM
            pl.BlockSpec((n_hidden, 9, Cp, Cp), lambda n, i: (0, 0, 0, 0)),
            pl.BlockSpec((n_hidden, 1, Cp), lambda n, i: (0, 0, 0)),
            pl.BlockSpec((9, Cp, Cop), lambda n, i: (0, 0, 0)),
            pl.BlockSpec((1, Cop), lambda n, i: (0, 0)),
        ],
        out_specs=pl.BlockSpec((1, th, W, Cop), lambda n, i: (n, i, 0, 0)),
        scratch_shapes=[
            pltpu.VMEM((slab, W, Cp), jnp.float32),       # staged input row slab
            pltpu.VMEM((slab, W + 2, Cp), jnp.float32),   # ping activation buffer
            pltpu.VMEM((slab, W + 2, Cp), jnp.float32),   # pong activation buffer
            pltpu.SemaphoreType.DMA,
        ],
        compiler_params=pltpu.CompilerParams(
            dimension_semantics=("parallel", "parallel"),
            vmem_limit_bytes=40 * 1024 * 1024,
        ),
    )(x, wh, bh, wo, bo)

    out = out[..., :cout]                         # drop lane padding
    return jnp.transpose(out, (0, 3, 1, 2))       # -> NCHW


def _reference_forward(x_nchw, params, matmul_dtype=jnp.float32):
    """Pure-JAX reference (NCHW / OIHW, like PyTorch). With matmul_dtype=bfloat16
    it mirrors the kernel's precision (bf16 MXU inputs, f32 accumulation)."""
    x = x_nchw
    n = len(params)
    for idx, (w, b) in enumerate(params):
        y = lax.conv_general_dilated(
            x.astype(matmul_dtype), w.astype(matmul_dtype),
            window_strides=(1, 1), padding=((1, 1), (1, 1)),
            dimension_numbers=("NCHW", "OIHW", "NCHW"),
            preferred_element_type=jnp.float32)
        y = y + b[None, :, None, None]
        if idx < n - 1:
            y = jnp.maximum(y, 0.0)
        x = y
    return x


if __name__ == "__main__":
    inplanes = 4
    num_anchors = 3
    num_layers = 4
    N, H, W = 2, 16, 16

    key = jax.random.PRNGKey(0)
    k_x, k_p = jax.random.split(key)
    x = jax.random.normal(k_x, (N, inplanes, H, W), jnp.float32)

    # std=0.2 (instead of the module's 0.01) keeps activations O(1) through all
    # 5 layers so the numerical checks below are meaningful; the kernel itself
    # is initialization-agnostic.
    params = init_retina_reg_head_params(k_p, inplanes, num_anchors,
                                         num_layers, std=0.2)
    packed = pack_retina_reg_head_params(params)

    # Default path: single row tile per image.
    out = jax.block_until_ready(retina_reg_head_forward(x, packed))
    assert out.shape == (N, num_anchors * 4, H, W), out.shape

    # Tiled path: 2 row tiles per image (exercises halo + boundary zeroing).
    out_tiled = jax.block_until_ready(
        retina_reg_head_forward(x, packed, tile_h=8))

    # Strict check vs. a precision-matched reference (bf16 inputs, f32 accum).
    ref_bf16 = jax.block_until_ready(_reference_forward(x, params, jnp.bfloat16))
    assert jnp.allclose(out, ref_bf16, atol=1e-2, rtol=1e-2), \
        f"max abs diff vs bf16 ref: {jnp.max(jnp.abs(out - ref_bf16))}"
    assert jnp.allclose(out_tiled, ref_bf16, atol=1e-2, rtol=1e-2), \
        f"tiled max abs diff vs bf16 ref: {jnp.max(jnp.abs(out_tiled - ref_bf16))}"

    # Loose sanity check vs. the full-f32 reference.
    ref_f32 = jax.block_until_ready(_reference_forward(x, params, jnp.float32))
    assert jnp.allclose(out, ref_f32, atol=1e-1, rtol=1e-1), \
        f"max abs diff vs f32 ref: {jnp.max(jnp.abs(out - ref_f32))}"

    print("KERNEL_OK")
</pallas_src>

<mosaic_0001>
module attributes {stable_mosaic.version = 11 : i64} {
  func.func @_fused_reg_head_kernel(%arg0: i32, %arg1: i32, %arg2: memref<2x26x16x128xf32, #tpu.memory_space<any>>, %arg3: memref<4x9x128x128xbf16, #tpu.memory_space<vmem>>, %arg4: memref<4x1x128xf32, #tpu.memory_space<vmem>>, %arg5: memref<9x128x128xbf16, #tpu.memory_space<vmem>>, %arg6: memref<1x128xf32, #tpu.memory_space<vmem>>, %arg7: memref<1x16x16x128xf32, #tpu.memory_space<vmem>>, %arg8: memref<26x16x128xf32, #tpu.memory_space<vmem>>, %arg9: memref<26x18x128xf32, #tpu.memory_space<vmem>>, %arg10: memref<26x18x128xf32, #tpu.memory_space<vmem>>, %arg11: memref<!tpu.dma_semaphore, #tpu.memory_space<semaphore_mem>>) attributes {dimension_semantics = [#tpu.dimension_semantics<parallel>, #tpu.dimension_semantics<parallel>], iteration_bounds = array<i64: 2, 1>, scalar_prefetch = 0 : i64, scratch_operands = 4 : i64, tpu.core_type = #tpu.core_type<tc>, window_params = [{}, {pipeline_mode = #tpu.pipeline_mode<synchronous>, transform_indices = @transform_1, window_bounds = array<i64: 4, 9, 128, 128>}, {pipeline_mode = #tpu.pipeline_mode<synchronous>, transform_indices = @transform_2, window_bounds = array<i64: 4, 1, 128>}, {pipeline_mode = #tpu.pipeline_mode<synchronous>, transform_indices = @transform_3, window_bounds = array<i64: 9, 128, 128>}, {pipeline_mode = #tpu.pipeline_mode<synchronous>, transform_indices = @transform_4, window_bounds = array<i64: 1, 128>}, {transform_indices = @transform_5, window_bounds = array<i64: 1, 16, 16, 128>}]} {
    %c16_i32 = arith.constant 16 : i32
    %0 = arith.muli %arg1, %c16_i32 : i32
    %c0_i32 = arith.constant 0 : i32
    %c0_i32_0 = arith.constant 0 : i32
    %1 = tpu.memref_slice %arg2[%arg0, %0, %c0_i32, %c0_i32_0] : memref<2x26x16x128xf32, #tpu.memory_space<any>> -> memref<1x26x16x128xf32, #tpu.memory_space<any>>
    %2 = tpu.memref_squeeze %1 : memref<1x26x16x128xf32, #tpu.memory_space<any>> -> memref<26x16x128xf32, #tpu.memory_space<any>>
    tpu.enqueue_dma source(%2 : memref<26x16x128xf32, #tpu.memory_space<any>>) target(%arg8 : memref<26x16x128xf32, #tpu.memory_space<vmem>>) target_semaphore(%arg11 : memref<!tpu.dma_semaphore, #tpu.memory_space<semaphore_mem>>)
    %cst = arith.constant 0.000000e+00 : f32
    %3 = vector.broadcast %cst : f32 to vector<26x18x128xf32>
    %c0 = arith.constant 0 : index
    %c0_1 = arith.constant 0 : index
    %c0_2 = arith.constant 0 : index
    %4 = vector.load %arg9[%c0, %c0_1, %c0_2] : memref<26x18x128xf32, #tpu.memory_space<vmem>>, vector<26x18x128xf32>
    tpu.vector_store %arg9[%c0, %c0_1, %c0_2], %3 {strides = array<i32>} : memref<26x18x128xf32, #tpu.memory_space<vmem>>, vector<26x18x128xf32>,
    %cst_3 = arith.constant 0.000000e+00 : f32
    %5 = vector.broadcast %cst_3 : f32 to vector<26x18x128xf32>
    %c0_4 = arith.constant 0 : index
    %c0_5 = arith.constant 0 : index
    %c0_6 = arith.constant 0 : index
    %6 = vector.load %arg10[%c0_4, %c0_5, %c0_6] : memref<26x18x128xf32, #tpu.memory_space<vmem>>, vector<26x18x128xf32>
    tpu.vector_store %arg10[%c0_4, %c0_5, %c0_6], %5 {strides = array<i32>} : memref<26x18x128xf32, #tpu.memory_space<vmem>>, vector<26x18x128xf32>,
    %c0_i32_7 = arith.constant 0 : i32
    %c0_i32_8 = arith.constant 0 : i32
    %7 = tpu.memref_slice %arg2[%arg0, %0, %c0_i32_7, %c0_i32_8] : memref<2x26x16x128xf32, #tpu.memory_space<any>> -> memref<1x26x16x128xf32, #tpu.memory_space<any>>
    %8 = tpu.memref_squeeze %7 : memref<1x26x16x128xf32, #tpu.memory_space<any>> -> memref<26x16x128xf32, #tpu.memory_space<any>>
    tpu.wait_dma2 semaphore(%arg11 : memref<!tpu.dma_semaphore, #tpu.memory_space<semaphore_mem>>) src(%8 : memref<26x16x128xf32, #tpu.memory_space<any>>) dst(%arg8 : memref<26x16x128xf32, #tpu.memory_space<vmem>>)
    %c0_9 = arith.constant 0 : index
    %c0_10 = arith.constant 0 : index
    %c0_11 = arith.constant 0 : index
    %9 = vector.load %arg8[%c0_9, %c0_10, %c0_11] : memref<26x16x128xf32, #tpu.memory_space<vmem>>, vector<26x16x128xf32>
    %c0_12 = arith.constant 0 : index
    %c1 = arith.constant 1 : index
    %c0_13 = arith.constant 0 : index
    %10 = vector.load %arg9[%c0_12, %c1, %c0_13] : memref<26x18x128xf32, #tpu.memory_space<vmem>>, vector<26x16x128xf32>
    tpu.vector_store %arg9[%c0_12, %c1, %c0_13], %9 {strides = array<i32>} : memref<26x18x128xf32, #tpu.memory_space<vmem>>, vector<26x16x128xf32>,
    %cst_14 = arith.constant 0.000000e+00 : f32
    %11 = vector.broadcast %cst_14 : f32 to vector<384x128xf32>
    %c0_15 = arith.constant 0 : index
    %c0_16 = arith.constant 0 : index
    %c0_17 = arith.constant 0 : index
    %12 = vector.load %arg9[%c0_15, %c0_16, %c0_17] : memref<26x18x128xf32, #tpu.memory_space<vmem>>, vector<24x16x128xf32>
    %13 = arith.truncf %12 : vector<24x16x128xf32> to vector<24x16x128xbf16>
    %14 = vector.shape_cast %13 : vector<24x16x128xbf16> to vector<384x128xbf16>
    %c0_18 = arith.constant 0 : index
    %c0_19 = arith.constant 0 : index
    %c0_20 = arith.constant 0 : index
    %c0_21 = arith.constant 0 : index
    %15 = vector.load %arg3[%c0_18, %c0_19, %c0_20, %c0_21] : memref<4x9x128x128xbf16, #tpu.memory_space<vmem>>, vector<1x1x128x128xbf16>
    %16 = vector.shape_cast %15 : vector<1x1x128x128xbf16> to vector<128x128xbf16>
    %cst_22 = arith.constant dense<0.000000e+00> : vector<384x128xf32>
    %17 = tpu.matmul %14, %16, %cst_22 {dimension_numbers = #tpu.dot_dimension_numbers<[1], [0], [0], [1], [0, 0, 1, 1], [], []>} : vector<384x128xbf16>, vector<128x128xbf16>, vector<384x128xf32> -> vector<384x128xf32>
    %18 = arith.addf %11, %17 : vector<384x128xf32>
    %c0_23 = arith.constant 0 : index
    %c1_24 = arith.constant 1 : index
    %c0_25 = arith.constant 0 : index
    %19 = vector.load %arg9[%c0_23, %c1_24, %c0_25] : memref<26x18x128xf32, #tpu.memory_space<vmem>>, vector<24x16x128xf32>
    %20 = arith.truncf %19 : vector<24x16x128xf32> to vector<24x16x128xbf16>
    %21 = vector.shape_cast %20 : vector<24x16x128xbf16> to vector<384x128xbf16>
    %c0_26 = arith.constant 0 : index
    %c1_27 = arith.constant 1 : index
    %c0_28 = arith.constant 0 : index
    %c0_29 = arith.constant 0 : index
    %22 = vector.load %arg3[%c0_26, %c1_27, %c0_28, %c0_29] : memref<4x9x128x128xbf16, #tpu.memory_space<vmem>>, vector<1x1x128x128xbf16>
    %23 = vector.shape_cast %22 : vector<1x1x128x128xbf16> to vector<128x128xbf16>
    %cst_30 = arith.constant dense<0.000000e+00> : vector<384x128xf32>
    %24 = tpu.matmul %21, %23, %cst_30 {dimension_numbers = #tpu.dot_dimension_numbers<[1], [0], [0], [1], [0, 0, 1, 1], [], []>} : vector<384x128xbf16>, vector<128x128xbf16>, vector<384x128xf32> -> vector<384x128xf32>
    %25 = arith.addf %18, %24 : vector<384x128xf32>
    %c0_31 = arith.constant 0 : index
    %c2 = arith.constant 2 : index
    %c0_32 = arith.constant 0 : index
    %26 = vector.load %arg9[%c0_31, %c2, %c0_32] : memref<26x18x128xf32, #tpu.memory_space<vmem>>, vector<24x16x128xf32>
    %27 = arith.truncf %26 : vector<24x16x128xf32> to vector<24x16x128xbf16>
    %28 = vector.shape_cast %27 : vector<24x16x128xbf16> to vector<384x128xbf16>
    %c0_33 = arith.constant 0 : index
    %c2_34 = arith.constant 2 : index
    %c0_35 = arith.constant 0 : index
    %c0_36 = arith.constant 0 : index
    %29 = vector.load %arg3[%c0_33, %c2_34, %c0_35, %c0_36] : memref<4x9x128x128xbf16, #tpu.memory_space<vmem>>, vector<1x1x128x128xbf16>
    %30 = vector.shape_cast %29 : vector<1x1x128x128xbf16> to vector<128x128xbf16>
    %cst_37 = arith.constant dense<0.000000e+00> : vector<384x128xf32>
    %31 = tpu.matmul %28, %30, %cst_37 {dimension_numbers = #tpu.dot_dimension_numbers<[1], [0], [0], [1], [0, 0, 1, 1], [], []>} : vector<384x128xbf16>, vector<128x128xbf16>, vector<384x128xf32> -> vector<384x128xf32>
    %32 = arith.addf %25, %31 : vector<384x128xf32>
    %c1_38 = arith.constant 1 : index
    %c0_39 = arith.constant 0 : index
    %c0_40 = arith.constant 0 : index
    %33 = vector.load %arg9[%c1_38, %c0_39, %c0_40] : memref<26x18x128xf32, #tpu.memory_space<vmem>>, vector<24x16x128xf32>
    %34 = arith.truncf %33 : vector<24x16x128xf32> to vector<24x16x128xbf16>
    %35 = vector.shape_cast %34 : vector<24x16x128xbf16> to vector<384x128xbf16>
    %c0_41 = arith.constant 0 : index
    %c3 = arith.constant 3 : index
    %c0_42 = arith.constant 0 : index
    %c0_43 = arith.constant 0 : index
    %36 = vector.load %arg3[%c0_41, %c3, %c0_42, %c0_43] : memref<4x9x128x128xbf16, #tpu.memory_space<vmem>>, vector<1x1x128x128xbf16>
    %37 = vector.shape_cast %36 : vector<1x1x128x128xbf16> to vector<128x128xbf16>
    %cst_44 = arith.constant dense<0.000000e+00> : vector<384x128xf32>
    %38 = tpu.matmul %35, %37, %cst_44 {dimension_numbers = #tpu.dot_dimension_numbers<[1], [0], [0], [1], [0, 0, 1, 1], [], []>} : vector<384x128xbf16>, vector<128x128xbf16>, vector<384x128xf32> -> vector<384x128xf32>
    %39 = arith.addf %32, %38 : vector<384x128xf32>
    %c1_45 = arith.constant 1 : index
    %c1_46 = arith.constant 1 : index
    %c0_47 = arith.constant 0 : index
    %40 = vector.load %arg9[%c1_45, %c1_46, %c0_47] : memref<26x18x128xf32, #tpu.memory_space<vmem>>, vector<24x16x128xf32>
    %41 = arith.truncf %40 : vector<24x16x128xf32> to vector<24x16x128xbf16>
    %42 = vector.shape_cast %41 : vector<24x16x128xbf16> to vector<384x128xbf16>
    %c0_48 = arith.constant 0 : index
    %c4 = arith.constant 4 : index
    %c0_49 = arith.constant 0 : index
    %c0_50 = arith.constant 0 : index
    %43 = vector.load %arg3[%c0_48, %c4, %c0_49, %c0_50] : memref<4x9x128x128xbf16, #tpu.memory_space<vmem>>, vector<1x1x128x128xbf16>
    %44 = vector.shape_cast %43 : vector<1x1x128x128xbf16> to vector<128x128xbf16>
    %cst_51 = arith.constant dense<0.000000e+00> : vector<384x128xf32>
    %45 = tpu.matmul %42, %44, %cst_51 {dimension_numbers = #tpu.dot_dimension_numbers<[1], [0], [0], [1], [0, 0, 1, 1], [], []>} : vector<384x128xbf16>, vector<128x128xbf16>, vector<384x128xf32> -> vector<384x128xf32>
    %46 = arith.addf %39, %45 : vector<384x128xf32>
    %c1_52 = arith.constant 1 : index
    %c2_53 = arith.constant 2 : index
    %c0_54 = arith.constant 0 : index
    %47 = vector.load %arg9[%c1_52, %c2_53, %c0_54] : memref<26x18x128xf32, #tpu.memory_space<vmem>>, vector<24x16x128xf32>
    %48 = arith.truncf %47 : vector<24x16x128xf32> to vector<24x16x128xbf16>
    %49 = vector.shape_cast %48 : vector<24x16x128xbf16> to vector<384x128xbf16>
    %c0_55 = arith.constant 0 : index
    %c5 = arith.constant 5 : index
    %c0_56 = arith.constant 0 : index
    %c0_57 = arith.constant 0 : index
    %50 = vector.load %arg3[%c0_55, %c5, %c0_56, %c0_57] : memref<4x9x128x128xbf16, #tpu.memory_space<vmem>>, vector<1x1x128x128xbf16>
    %51 = vector.shape_cast %50 : vector<1x1x128x128xbf16> to vector<128x128xbf16>
    %cst_58 = arith.constant dense<0.000000e+00> : vector<384x128xf32>
    %52 = tpu.matmul %49, %51, %cst_58 {dimension_numbers = #tpu.dot_dimension_numbers<[1], [0], [0], [1], [0, 0, 1, 1], [], []>} : vector<384x128xbf16>, vector<128x128xbf16>, vector<384x128xf32> -> vector<384x128xf32>
    %53 = arith.addf %46, %52 : vector<384x128xf32>
    %c2_59 = arith.constant 2 : index
    %c0_60 = arith.constant 0 : index
    %c0_61 = arith.constant 0 : index
    %54 = vector.load %arg9[%c2_59, %c0_60, %c0_61] : memref<26x18x128xf32, #tpu.memory_space<vmem>>, vector<24x16x128xf32>
    %55 = arith.truncf %54 : vector<24x16x128xf32> to vector<24x16x128xbf16>
    %56 = vector.shape_cast %55 : vector<24x16x128xbf16> to vector<384x128xbf16>
    %c0_62 = arith.constant 0 : index
    %c6 = arith.constant 6 : index
    %c0_63 = arith.constant 0 : index
    %c0_64 = arith.constant 0 : index
    %57 = vector.load %arg3[%c0_62, %c6, %c0_63, %c0_64] : memref<4x9x128x128xbf16, #tpu.memory_space<vmem>>, vector<1x1x128x128xbf16>
    %58 = vector.shape_cast %57 : vector<1x1x128x128xbf16> to vector<128x128xbf16>
    %cst_65 = arith.constant dense<0.000000e+00> : vector<384x128xf32>
    %59 = tpu.matmul %56, %58, %cst_65 {dimension_numbers = #tpu.dot_dimension_numbers<[1], [0], [0], [1], [0, 0, 1, 1], [], []>} : vector<384x128xbf16>, vector<128x128xbf16>, vector<384x128xf32> -> vector<384x128xf32>
    %60 = arith.addf %53, %59 : vector<384x128xf32>
    %c2_66 = arith.constant 2 : index
    %c1_67 = arith.constant 1 : index
    %c0_68 = arith.constant 0 : index
    %61 = vector.load %arg9[%c2_66, %c1_67, %c0_68] : memref<26x18x128xf32, #tpu.memory_space<vmem>>, vector<24x16x128xf32>
    %62 = arith.truncf %61 : vector<24x16x128xf32> to vector<24x16x128xbf16>
    %63 = vector.shape_cast %62 : vector<24x16x128xbf16> to vector<384x128xbf16>
    %c0_69 = arith.constant 0 : index
    %c7 = arith.constant 7 : index
    %c0_70 = arith.constant 0 : index
    %c0_71 = arith.constant 0 : index
    %64 = vector.load %arg3[%c0_69, %c7, %c0_70, %c0_71] : memref<4x9x128x128xbf16, #tpu.memory_space<vmem>>, vector<1x1x128x128xbf16>
    %65 = vector.shape_cast %64 : vector<1x1x128x128xbf16> to vector<128x128xbf16>
    %cst_72 = arith.constant dense<0.000000e+00> : vector<384x128xf32>
    %66 = tpu.matmul %63, %65, %cst_72 {dimension_numbers = #tpu.dot_dimension_numbers<[1], [0], [0], [1], [0, 0, 1, 1], [], []>} : vector<384x128xbf16>, vector<128x128xbf16>, vector<384x128xf32> -> vector<384x128xf32>
    %67 = arith.addf %60, %66 : vector<384x128xf32>
    %c2_73 = arith.constant 2 : index
    %c2_74 = arith.constant 2 : index
    %c0_75 = arith.constant 0 : index
    %68 = vector.load %arg9[%c2_73, %c2_74, %c0_75] : memref<26x18x128xf32, #tpu.memory_space<vmem>>, vector<24x16x128xf32>
    %69 = arith.truncf %68 : vector<24x16x128xf32> to vector<24x16x128xbf16>
    %70 = vector.shape_cast %69 : vector<24x16x128xbf16> to vector<384x128xbf16>
    %c0_76 = arith.constant 0 : index
    %c8 = arith.constant 8 : index
    %c0_77 = arith.constant 0 : index
    %c0_78 = arith.constant 0 : index
    %71 = vector.load %arg3[%c0_76, %c8, %c0_77, %c0_78] : memref<4x9x128x128xbf16, #tpu.memory_space<vmem>>, vector<1x1x128x128xbf16>
    %72 = vector.shape_cast %71 : vector<1x1x128x128xbf16> to vector<128x128xbf16>
    %cst_79 = arith.constant dense<0.000000e+00> : vector<384x128xf32>
    %73 = tpu.matmul %70, %72, %cst_79 {dimension_numbers = #tpu.dot_dimension_numbers<[1], [0], [0], [1], [0, 0, 1, 1], [], []>} : vector<384x128xbf16>, vector<128x128xbf16>, vector<384x128xf32> -> vector<384x128xf32>
    %74 = arith.addf %67, %73 : vector<384x128xf32>
    %c0_80 = arith.constant 0 : index
    %c0_81 = arith.constant 0 : index
    %c0_82 = arith.constant 0 : index
    %75 = vector.load %arg4[%c0_80, %c0_81, %c0_82] : memref<4x1x128xf32, #tpu.memory_space<vmem>>, vector<1x1x128xf32>
    %76 = vector.shape_cast %75 : vector<1x1x128xf32> to vector<1x128xf32>
    %77 = vector.broadcast %76 : vector<1x128xf32> to vector<384x128xf32>
    %78 = arith.addf %74, %77 : vector<384x128xf32>
    %cst_83 = arith.constant 0.000000e+00 : f32
    %79 = vector.broadcast %cst_83 : f32 to vector<384x128xf32>
    %80 = arith.maximumf %78, %79 : vector<384x128xf32>
    %81 = vector.shape_cast %80 : vector<384x128xf32> to vector<24x16x128xf32>
    %c1_84 = arith.constant 1 : index
    %c1_85 = arith.constant 1 : index
    %c0_86 = arith.constant 0 : index
    %82 = vector.load %arg10[%c1_84, %c1_85, %c0_86] : memref<26x18x128xf32, #tpu.memory_space<vmem>>, vector<24x16x128xf32>
    tpu.vector_store %arg10[%c1_84, %c1_85, %c0_86], %81 {strides = array<i32>} : memref<26x18x128xf32, #tpu.memory_space<vmem>>, vector<24x16x128xf32>,
    %cst_87 = arith.constant 0.000000e+00 : f32
    %83 = vector.broadcast %cst_87 : f32 to vector<4x18x128xf32>
    %c0_i32_88 = arith.constant 0 : i32
    %84 = arith.cmpi eq, %arg1, %c0_i32_88 : i32
    %85 = arith.extui %84 : i1 to i32
    %c0_i32_89 = arith.constant 0 : i32
    %86 = arith.cmpi ne, %85, %c0_i32_89 : i32
    scf.if %86 {
      %c1_417 = arith.constant 1 : index
      %c0_418 = arith.constant 0 : index
      %c0_419 = arith.constant 0 : index
      %398 = vector.load %arg10[%c1_417, %c0_418, %c0_419] : memref<26x18x128xf32, #tpu.memory_space<vmem>>, vector<4x18x128xf32>
      tpu.vector_store %arg10[%c1_417, %c0_418, %c0_419], %83 {strides = array<i32>} : memref<26x18x128xf32, #tpu.memory_space<vmem>>, vector<4x18x128xf32>,
    } else {
    }
    %c0_i32_90 = arith.constant 0 : i32
    %87 = arith.cmpi eq, %arg1, %c0_i32_90 : i32
    %88 = arith.extui %87 : i1 to i32
    %c0_i32_91 = arith.constant 0 : i32
    %89 = arith.cmpi ne, %88, %c0_i32_91 : i32
    scf.if %89 {
      %c21 = arith.constant 21 : index
      %c0_417 = arith.constant 0 : index
      %c0_418 = arith.constant 0 : index
      %398 = vector.load %arg10[%c21, %c0_417, %c0_418] : memref<26x18x128xf32, #tpu.memory_space<vmem>>, vector<4x18x128xf32>
      tpu.vector_store %arg10[%c21, %c0_417, %c0_418], %83 {strides = array<i32>} : memref<26x18x128xf32, #tpu.memory_space<vmem>>, vector<4x18x128xf32>,
    } else {
    }
    %cst_92 = arith.constant 0.000000e+00 : f32
    %90 = vector.broadcast %cst_92 : f32 to vector<352x128xf32>
    %c1_93 = arith.constant 1 : index
    %c0_94 = arith.constant 0 : index
    %c0_95 = arith.constant 0 : index
    %91 = vector.load %arg10[%c1_93, %c0_94, %c0_95] : memref<26x18x128xf32, #tpu.memory_space<vmem>>, vector<22x16x128xf32>
    %92 = arith.truncf %91 : vector<22x16x128xf32> to vector<22x16x128xbf16>
    %93 = vector.shape_cast %92 : vector<22x16x128xbf16> to vector<352x128xbf16>
    %c1_96 = arith.constant 1 : index
    %c0_97 = arith.constant 0 : index
    %c0_98 = arith.constant 0 : index
    %c0_99 = arith.constant 0 : index
    %94 = vector.load %arg3[%c1_96, %c0_97, %c0_98, %c0_99] : memref<4x9x128x128xbf16, #tpu.memory_space<vmem>>, vector<1x1x128x128xbf16>
    %95 = vector.shape_cast %94 : vector<1x1x128x128xbf16> to vector<128x128xbf16>
    %cst_100 = arith.constant dense<0.000000e+00> : vector<352x128xf32>
    %96 = tpu.matmul %93, %95, %cst_100 {dimension_numbers = #tpu.dot_dimension_numbers<[1], [0], [0], [1], [0, 0, 1, 1], [], []>} : vector<352x128xbf16>, vector<128x128xbf16>, vector<352x128xf32> -> vector<352x128xf32>
    %97 = arith.addf %90, %96 : vector<352x128xf32>
    %c1_101 = arith.constant 1 : index
    %c1_102 = arith.constant 1 : index
    %c0_103 = arith.constant 0 : index
    %98 = vector.load %arg10[%c1_101, %c1_102, %c0_103] : memref<26x18x128xf32, #tpu.memory_space<vmem>>, vector<22x16x128xf32>
    %99 = arith.truncf %98 : vector<22x16x128xf32> to vector<22x16x128xbf16>
    %100 = vector.shape_cast %99 : vector<22x16x128xbf16> to vector<352x128xbf16>
    %c1_104 = arith.constant 1 : index
    %c1_105 = arith.constant 1 : index
    %c0_106 = arith.constant 0 : index
    %c0_107 = arith.constant 0 : index
    %101 = vector.load %arg3[%c1_104, %c1_105, %c0_106, %c0_107] : memref<4x9x128x128xbf16, #tpu.memory_space<vmem>>, vector<1x1x128x128xbf16>
    %102 = vector.shape_cast %101 : vector<1x1x128x128xbf16> to vector<128x128xbf16>
    %cst_108 = arith.constant dense<0.000000e+00> : vector<352x128xf32>
    %103 = tpu.matmul %100, %102, %cst_108 {dimension_numbers = #tpu.dot_dimension_numbers<[1], [0], [0], [1], [0, 0, 1, 1], [], []>} : vector<352x128xbf16>, vector<128x128xbf16>, vector<352x128xf32> -> vector<352x128xf32>
    %104 = arith.addf %97, %103 : vector<352x128xf32>
    %c1_109 = arith.constant 1 : index
    %c2_110 = arith.constant 2 : index
    %c0_111 = arith.constant 0 : index
    %105 = vector.load %arg10[%c1_109, %c2_110, %c0_111] : memref<26x18x128xf32, #tpu.memory_space<vmem>>, vector<22x16x128xf32>
    %106 = arith.truncf %105 : vector<22x16x128xf32> to vector<22x16x128xbf16>
    %107 = vector.shape_cast %106 : vector<22x16x128xbf16> to vector<352x128xbf16>
    %c1_112 = arith.constant 1 : index
    %c2_113 = arith.constant 2 : index
    %c0_114 = arith.constant 0 : index
    %c0_115 = arith.constant 0 : index
    %108 = vector.load %arg3[%c1_112, %c2_113, %c0_114, %c0_115] : memref<4x9x128x128xbf16, #tpu.memory_space<vmem>>, vector<1x1x128x128xbf16>
    %109 = vector.shape_cast %108 : vector<1x1x128x128xbf16> to vector<128x128xbf16>
    %cst_116 = arith.constant dense<0.000000e+00> : vector<352x128xf32>
    %110 = tpu.matmul %107, %109, %cst_116 {dimension_numbers = #tpu.dot_dimension_numbers<[1], [0], [0], [1], [0, 0, 1, 1], [], []>} : vector<352x128xbf16>, vector<128x128xbf16>, vector<352x128xf32> -> vector<352x128xf32>
    %111 = arith.addf %104, %110 : vector<352x128xf32>
    %c2_117 = arith.constant 2 : index
    %c0_118 = arith.constant 0 : index
    %c0_119 = arith.constant 0 : index
    %112 = vector.load %arg10[%c2_117, %c0_118, %c0_119] : memref<26x18x128xf32, #tpu.memory_space<vmem>>, vector<22x16x128xf32>
    %113 = arith.truncf %112 : vector<22x16x128xf32> to vector<22x16x128xbf16>
    %114 = vector.shape_cast %113 : vector<22x16x128xbf16> to vector<352x128xbf16>
    %c1_120 = arith.constant 1 : index
    %c3_121 = arith.constant 3 : index
    %c0_122 = arith.constant 0 : index
    %c0_123 = arith.constant 0 : index
    %115 = vector.load %arg3[%c1_120, %c3_121, %c0_122, %c0_123] : memref<4x9x128x128xbf16, #tpu.memory_space<vmem>>, vector<1x1x128x128xbf16>
    %116 = vector.shape_cast %115 : vector<1x1x128x128xbf16> to vector<128x128xbf16>
    %cst_124 = arith.constant dense<0.000000e+00> : vector<352x128xf32>
    %117 = tpu.matmul %114, %116, %cst_124 {dimension_numbers = #tpu.dot_dimension_numbers<[1], [0], [0], [1], [0, 0, 1, 1], [], []>} : vector<352x128xbf16>, vector<128x128xbf16>, vector<352x128xf32> -> vector<352x128xf32>
    %118 = arith.addf %111, %117 : vector<352x128xf32>
    %c2_125 = arith.constant 2 : index
    %c1_126 = arith.constant 1 : index
    %c0_127 = arith.constant 0 : index
    %119 = vector.load %arg10[%c2_125, %c1_126, %c0_127] : memref<26x18x128xf32, #tpu.memory_space<vmem>>, vector<22x16x128xf32>
    %120 = arith.truncf %119 : vector<22x16x128xf32> to vector<22x16x128xbf16>
    %121 = vector.shape_cast %120 : vector<22x16x128xbf16> to vector<352x128xbf16>
    %c1_128 = arith.constant 1 : index
    %c4_129 = arith.constant 4 : index
    %c0_130 = arith.constant 0 : index
    %c0_131 = arith.constant 0 : index
    %122 = vector.load %arg3[%c1_128, %c4_129, %c0_130, %c0_131] : memref<4x9x128x128xbf16, #tpu.memory_space<vmem>>, vector<1x1x128x128xbf16>
    %123 = vector.shape_cast %122 : vector<1x1x128x128xbf16> to vector<128x128xbf16>
    %cst_132 = arith.constant dense<0.000000e+00> : vector<352x128xf32>
    %124 = tpu.matmul %121, %123, %cst_132 {dimension_numbers = #tpu.dot_dimension_numbers<[1], [0], [0], [1], [0, 0, 1, 1], [], []>} : vector<352x128xbf16>, vector<128x128xbf16>, vector<352x128xf32> -> vector<352x128xf32>
    %125 = arith.addf %118, %124 : vector<352x128xf32>
    %c2_133 = arith.constant 2 : index
    %c2_134 = arith.constant 2 : index
    %c0_135 = arith.constant 0 : index
    %126 = vector.load %arg10[%c2_133, %c2_134, %c0_135] : memref<26x18x128xf32, #tpu.memory_space<vmem>>, vector<22x16x128xf32>
    %127 = arith.truncf %126 : vector<22x16x128xf32> to vector<22x16x128xbf16>
    %128 = vector.shape_cast %127 : vector<22x16x128xbf16> to vector<352x128xbf16>
    %c1_136 = arith.constant 1 : index
    %c5_137 = arith.constant 5 : index
    %c0_138 = arith.constant 0 : index
    %c0_139 = arith.constant 0 : index
    %129 = vector.load %arg3[%c1_136, %c5_137, %c0_138, %c0_139] : memref<4x9x128x128xbf16, #tpu.memory_space<vmem>>, vector<1x1x128x128xbf16>
    %130 = vector.shape_cast %129 : vector<1x1x128x128xbf16> to vector<128x128xbf16>
    %cst_140 = arith.constant dense<0.000000e+00> : vector<352x128xf32>
    %131 = tpu.matmul %128, %130, %cst_140 {dimension_numbers = #tpu.dot_dimension_numbers<[1], [0], [0], [1], [0, 0, 1, 1], [], []>} : vector<352x128xbf16>, vector<128x128xbf16>, vector<352x128xf32> -> vector<352x128xf32>
    %132 = arith.addf %125, %131 : vector<352x128xf32>
    %c3_141 = arith.constant 3 : index
    %c0_142 = arith.constant 0 : index
    %c0_143 = arith.constant 0 : index
    %133 = vector.load %arg10[%c3_141, %c0_142, %c0_143] : memref<26x18x128xf32, #tpu.memory_space<vmem>>, vector<22x16x128xf32>
    %134 = arith.truncf %133 : vector<22x16x128xf32> to vector<22x16x128xbf16>
    %135 = vector.shape_cast %134 : vector<22x16x128xbf16> to vector<352x128xbf16>
    %c1_144 = arith.constant 1 : index
    %c6_145 = arith.constant 6 : index
    %c0_146 = arith.constant 0 : index
    %c0_147 = arith.constant 0 : index
    %136 = vector.load %arg3[%c1_144, %c6_145, %c0_146, %c0_147] : memref<4x9x128x128xbf16, #tpu.memory_space<vmem>>, vector<1x1x128x128xbf16>
    %137 = vector.shape_cast %136 : vector<1x1x128x128xbf16> to vector<128x128xbf16>
    %cst_148 = arith.constant dense<0.000000e+00> : vector<352x128xf32>
    %138 = tpu.matmul %135, %137, %cst_148 {dimension_numbers = #tpu.dot_dimension_numbers<[1], [0], [0], [1], [0, 0, 1, 1], [], []>} : vector<352x128xbf16>, vector<128x128xbf16>, vector<352x128xf32> -> vector<352x128xf32>
    %139 = arith.addf %132, %138 : vector<352x128xf32>
    %c3_149 = arith.constant 3 : index
    %c1_150 = arith.constant 1 : index
    %c0_151 = arith.constant 0 : index
    %140 = vector.load %arg10[%c3_149, %c1_150, %c0_151] : memref<26x18x128xf32, #tpu.memory_space<vmem>>, vector<22x16x128xf32>
    %141 = arith.truncf %140 : vector<22x16x128xf32> to vector<22x16x128xbf16>
    %142 = vector.shape_cast %141 : vector<22x16x128xbf16> to vector<352x128xbf16>
    %c1_152 = arith.constant 1 : index
    %c7_153 = arith.constant 7 : index
    %c0_154 = arith.constant 0 : index
    %c0_155 = arith.constant 0 : index
    %143 = vector.load %arg3[%c1_152, %c7_153, %c0_154, %c0_155] : memref<4x9x128x128xbf16, #tpu.memory_space<vmem>>, vector<1x1x128x128xbf16>
    %144 = vector.shape_cast %143 : vector<1x1x128x128xbf16> to vector<128x128xbf16>
    %cst_156 = arith.constant dense<0.000000e+00> : vector<352x128xf32>
    %145 = tpu.matmul %142, %144, %cst_156 {dimension_numbers = #tpu.dot_dimension_numbers<[1], [0], [0], [1], [0, 0, 1, 1], [], []>} : vector<352x128xbf16>, vector<128x128xbf16>, vector<352x128xf32> -> vector<352x128xf32>
    %146 = arith.addf %139, %145 : vector<352x128xf32>
    %c3_157 = arith.constant 3 : index
    %c2_158 = arith.constant 2 : index
    %c0_159 = arith.constant 0 : index
    %147 = vector.load %arg10[%c3_157, %c2_158, %c0_159] : memref<26x18x128xf32, #tpu.memory_space<vmem>>, vector<22x16x128xf32>
    %148 = arith.truncf %147 : vector<22x16x128xf32> to vector<22x16x128xbf16>
    %149 = vector.shape_cast %148 : vector<22x16x128xbf16> to vector<352x128xbf16>
    %c1_160 = arith.constant 1 : index
    %c8_161 = arith.constant 8 : index
    %c0_162 = arith.constant 0 : index
    %c0_163 = arith.constant 0 : index
    %150 = vector.load %arg3[%c1_160, %c8_161, %c0_162, %c0_163] : memref<4x9x128x128xbf16, #tpu.memory_space<vmem>>, vector<1x1x128x128xbf16>
    %151 = vector.shape_cast %150 : vector<1x1x128x128xbf16> to vector<128x128xbf16>
    %cst_164 = arith.constant dense<0.000000e+00> : vector<352x128xf32>
    %152 = tpu.matmul %149, %151, %cst_164 {dimension_numbers = #tpu.dot_dimension_numbers<[1], [0], [0], [1], [0, 0, 1, 1], [], []>} : vector<352x128xbf16>, vector<128x128xbf16>, vector<352x128xf32> -> vector<352x128xf32>
    %153 = arith.addf %146, %152 : vector<352x128xf32>
    %c1_165 = arith.constant 1 : index
    %c0_166 = arith.constant 0 : index
    %c0_167 = arith.constant 0 : index
    %154 = vector.load %arg4[%c1_165, %c0_166, %c0_167] : memref<4x1x128xf32, #tpu.memory_space<vmem>>, vector<1x1x128xf32>
    %155 = vector.shape_cast %154 : vector<1x1x128xf32> to vector<1x128xf32>
    %156 = vector.broadcast %155 : vector<1x128xf32> to vector<352x128xf32>
    %157 = arith.addf %153, %156 : vector<352x128xf32>
    %cst_168 = arith.constant 0.000000e+00 : f32
    %158 = vector.broadcast %cst_168 : f32 to vector<352x128xf32>
    %159 = arith.maximumf %157, %158 : vector<352x128xf32>
    %160 = vector.shape_cast %159 : vector<352x128xf32> to vector<22x16x128xf32>
    %c2_169 = arith.constant 2 : index
    %c1_170 = arith.constant 1 : index
    %c0_171 = arith.constant 0 : index
    %161 = vector.load %arg9[%c2_169, %c1_170, %c0_171] : memref<26x18x128xf32, #tpu.memory_space<vmem>>, vector<22x16x128xf32>
    tpu.vector_store %arg9[%c2_169, %c1_170, %c0_171], %160 {strides = array<i32>} : memref<26x18x128xf32, #tpu.memory_space<vmem>>, vector<22x16x128xf32>,
    %cst_172 = arith.constant 0.000000e+00 : f32
    %162 = vector.broadcast %cst_172 : f32 to vector<3x18x128xf32>
    %c0_i32_173 = arith.constant 0 : i32
    %163 = arith.cmpi eq, %arg1, %c0_i32_173 : i32
    %164 = arith.extui %163 : i1 to i32
    %c0_i32_174 = arith.constant 0 : i32
    %165 = arith.cmpi ne, %164, %c0_i32_174 : i32
    scf.if %165 {
      %c2_417 = arith.constant 2 : index
      %c0_418 = arith.constant 0 : index
      %c0_419 = arith.constant 0 : index
      %398 = vector.load %arg9[%c2_417, %c0_418, %c0_419] : memref<26x18x128xf32, #tpu.memory_space<vmem>>, vector<3x18x128xf32>
      tpu.vector_store %arg9[%c2_417, %c0_418, %c0_419], %162 {strides = array<i32>} : memref<26x18x128xf32, #tpu.memory_space<vmem>>, vector<3x18x128xf32>,
    } else {
    }
    %c0_i32_175 = arith.constant 0 : i32
    %166 = arith.cmpi eq, %arg1, %c0_i32_175 : i32
    %167 = arith.extui %166 : i1 to i32
    %c0_i32_176 = arith.constant 0 : i32
    %168 = arith.cmpi ne, %167, %c0_i32_176 : i32
    scf.if %168 {
      %c21 = arith.constant 21 : index
      %c0_417 = arith.constant 0 : index
      %c0_418 = arith.constant 0 : index
      %398 = vector.load %arg9[%c21, %c0_417, %c0_418] : memref<26x18x128xf32, #tpu.memory_space<vmem>>, vector<3x18x128xf32>
      tpu.vector_store %arg9[%c21, %c0_417, %c0_418], %162 {strides = array<i32>} : memref<26x18x128xf32, #tpu.memory_space<vmem>>, vector<3x18x128xf32>,
    } else {
    }
    %cst_177 = arith.constant 0.000000e+00 : f32
    %169 = vector.broadcast %cst_177 : f32 to vector<320x128xf32>
    %c2_178 = arith.constant 2 : index
    %c0_179 = arith.constant 0 : index
    %c0_180 = arith.constant 0 : index
    %170 = vector.load %arg9[%c2_178, %c0_179, %c0_180] : memref<26x18x128xf32, #tpu.memory_space<vmem>>, vector<20x16x128xf32>
    %171 = arith.truncf %170 : vector<20x16x128xf32> to vector<20x16x128xbf16>
    %172 = vector.shape_cast %171 : vector<20x16x128xbf16> to vector<320x128xbf16>
    %c2_181 = arith.constant 2 : index
    %c0_182 = arith.constant 0 : index
    %c0_183 = arith.constant 0 : index
    %c0_184 = arith.constant 0 : index
    %173 = vector.load %arg3[%c2_181, %c0_182, %c0_183, %c0_184] : memref<4x9x128x128xbf16, #tpu.memory_space<vmem>>, vector<1x1x128x128xbf16>
    %174 = vector.shape_cast %173 : vector<1x1x128x128xbf16> to vector<128x128xbf16>
    %cst_185 = arith.constant dense<0.000000e+00> : vector<320x128xf32>
    %175 = tpu.matmul %172, %174, %cst_185 {dimension_numbers = #tpu.dot_dimension_numbers<[1], [0], [0], [1], [0, 0, 1, 1], [], []>} : vector<320x128xbf16>, vector<128x128xbf16>, vector<320x128xf32> -> vector<320x128xf32>
    %176 = arith.addf %169, %175 : vector<320x128xf32>
    %c2_186 = arith.constant 2 : index
    %c1_187 = arith.constant 1 : index
    %c0_188 = arith.constant 0 : index
    %177 = vector.load %arg9[%c2_186, %c1_187, %c0_188] : memref<26x18x128xf32, #tpu.memory_space<vmem>>, vector<20x16x128xf32>
    %178 = arith.truncf %177 : vector<20x16x128xf32> to vector<20x16x128xbf16>
    %179 = vector.shape_cast %178 : vector<20x16x128xbf16> to vector<320x128xbf16>
    %c2_189 = arith.constant 2 : index
    %c1_190 = arith.constant 1 : index
    %c0_191 = arith.constant 0 : index
    %c0_192 = arith.constant 0 : index
    %180 = vector.load %arg3[%c2_189, %c1_190, %c0_191, %c0_192] : memref<4x9x128x128xbf16, #tpu.memory_space<vmem>>, vector<1x1x128x128xbf16>
    %181 = vector.shape_cast %180 : vector<1x1x128x128xbf16> to vector<128x128xbf16>
    %cst_193 = arith.constant dense<0.000000e+00> : vector<320x128xf32>
    %182 = tpu.matmul %179, %181, %cst_193 {dimension_numbers = #tpu.dot_dimension_numbers<[1], [0], [0], [1], [0, 0, 1, 1], [], []>} : vector<320x128xbf16>, vector<128x128xbf16>, vector<320x128xf32> -> vector<320x128xf32>
    %183 = arith.addf %176, %182 : vector<320x128xf32>
    %c2_194 = arith.constant 2 : index
    %c2_195 = arith.constant 2 : index
    %c0_196 = arith.constant 0 : index
    %184 = vector.load %arg9[%c2_194, %c2_195, %c0_196] : memref<26x18x128xf32, #tpu.memory_space<vmem>>, vector<20x16x128xf32>
    %185 = arith.truncf %184 : vector<20x16x128xf32> to vector<20x16x128xbf16>
    %186 = vector.shape_cast %185 : vector<20x16x128xbf16> to vector<320x128xbf16>
    %c2_197 = arith.constant 2 : index
    %c2_198 = arith.constant 2 : index
    %c0_199 = arith.constant 0 : index
    %c0_200 = arith.constant 0 : index
    %187 = vector.load %arg3[%c2_197, %c2_198, %c0_199, %c0_200] : memref<4x9x128x128xbf16, #tpu.memory_space<vmem>>, vector<1x1x128x128xbf16>
    %188 = vector.shape_cast %187 : vector<1x1x128x128xbf16> to vector<128x128xbf16>
    %cst_201 = arith.constant dense<0.000000e+00> : vector<320x128xf32>
    %189 = tpu.matmul %186, %188, %cst_201 {dimension_numbers = #tpu.dot_dimension_numbers<[1], [0], [0], [1], [0, 0, 1, 1], [], []>} : vector<320x128xbf16>, vector<128x128xbf16>, vector<320x128xf32> -> vector<320x128xf32>
    %190 = arith.addf %183, %189 : vector<320x128xf32>
    %c3_202 = arith.constant 3 : index
    %c0_203 = arith.constant 0 : index
    %c0_204 = arith.constant 0 : index
    %191 = vector.load %arg9[%c3_202, %c0_203, %c0_204] : memref<26x18x128xf32, #tpu.memory_space<vmem>>, vector<20x16x128xf32>
    %192 = arith.truncf %191 : vector<20x16x128xf32> to vector<20x16x128xbf16>
    %193 = vector.shape_cast %192 : vector<20x16x128xbf16> to vector<320x128xbf16>
    %c2_205 = arith.constant 2 : index
    %c3_206 = arith.constant 3 : index
    %c0_207 = arith.constant 0 : index
    %c0_208 = arith.constant 0 : index
    %194 = vector.load %arg3[%c2_205, %c3_206, %c0_207, %c0_208] : memref<4x9x128x128xbf16, #tpu.memory_space<vmem>>, vector<1x1x128x128xbf16>
    %195 = vector.shape_cast %194 : vector<1x1x128x128xbf16> to vector<128x128xbf16>
    %cst_209 = arith.constant dense<0.000000e+00> : vector<320x128xf32>
    %196 = tpu.matmul %193, %195, %cst_209 {dimension_numbers = #tpu.dot_dimension_numbers<[1], [0], [0], [1], [0, 0, 1, 1], [], []>} : vector<320x128xbf16>, vector<128x128xbf16>, vector<320x128xf32> -> vector<320x128xf32>
    %197 = arith.addf %190, %196 : vector<320x128xf32>
    %c3_210 = arith.constant 3 : index
    %c1_211 = arith.constant 1 : index
    %c0_212 = arith.constant 0 : index
    %198 = vector.load %arg9[%c3_210, %c1_211, %c0_212] : memref<26x18x128xf32, #tpu.memory_space<vmem>>, vector<20x16x128xf32>
    %199 = arith.truncf %198 : vector<20x16x128xf32> to vector<20x16x128xbf16>
    %200 = vector.shape_cast %199 : vector<20x16x128xbf16> to vector<320x128xbf16>
    %c2_213 = arith.constant 2 : index
    %c4_214 = arith.constant 4 : index
    %c0_215 = arith.constant 0 : index
    %c0_216 = arith.constant 0 : index
    %201 = vector.load %arg3[%c2_213, %c4_214, %c0_215, %c0_216] : memref<4x9x128x128xbf16, #tpu.memory_space<vmem>>, vector<1x1x128x128xbf16>
    %202 = vector.shape_cast %201 : vector<1x1x128x128xbf16> to vector<128x128xbf16>
    %cst_217 = arith.constant dense<0.000000e+00> : vector<320x128xf32>
    %203 = tpu.matmul %200, %202, %cst_217 {dimension_numbers = #tpu.dot_dimension_numbers<[1], [0], [0], [1], [0, 0, 1, 1], [], []>} : vector<320x128xbf16>, vector<128x128xbf16>, vector<320x128xf32> -> vector<320x128xf32>
    %204 = arith.addf %197, %203 : vector<320x128xf32>
    %c3_218 = arith.constant 3 : index
    %c2_219 = arith.constant 2 : index
    %c0_220 = arith.constant 0 : index
    %205 = vector.load %arg9[%c3_218, %c2_219, %c0_220] : memref<26x18x128xf32, #tpu.memory_space<vmem>>, vector<20x16x128xf32>
    %206 = arith.truncf %205 : vector<20x16x128xf32> to vector<20x16x128xbf16>
    %207 = vector.shape_cast %206 : vector<20x16x128xbf16> to vector<320x128xbf16>
    %c2_221 = arith.constant 2 : index
    %c5_222 = arith.constant 5 : index
    %c0_223 = arith.constant 0 : index
    %c0_224 = arith.constant 0 : index
    %208 = vector.load %arg3[%c2_221, %c5_222, %c0_223, %c0_224] : memref<4x9x128x128xbf16, #tpu.memory_space<vmem>>, vector<1x1x128x128xbf16>
    %209 = vector.shape_cast %208 : vector<1x1x128x128xbf16> to vector<128x128xbf16>
    %cst_225 = arith.constant dense<0.000000e+00> : vector<320x128xf32>
    %210 = tpu.matmul %207, %209, %cst_225 {dimension_numbers = #tpu.dot_dimension_numbers<[1], [0], [0], [1], [0, 0, 1, 1], [], []>} : vector<320x128xbf16>, vector<128x128xbf16>, vector<320x128xf32> -> vector<320x128xf32>
    %211 = arith.addf %204, %210 : vector<320x128xf32>
    %c4_226 = arith.constant 4 : index
    %c0_227 = arith.constant 0 : index
    %c0_228 = arith.constant 0 : index
    %212 = vector.load %arg9[%c4_226, %c0_227, %c0_228] : memref<26x18x128xf32, #tpu.memory_space<vmem>>, vector<20x16x128xf32>
    %213 = arith.truncf %212 : vector<20x16x128xf32> to vector<20x16x128xbf16>
    %214 = vector.shape_cast %213 : vector<20x16x128xbf16> to vector<320x128xbf16>
    %c2_229 = arith.constant 2 : index
    %c6_230 = arith.constant 6 : index
    %c0_231 = arith.constant 0 : index
    %c0_232 = arith.constant 0 : index
    %215 = vector.load %arg3[%c2_229, %c6_230, %c0_231, %c0_232] : memref<4x9x128x128xbf16, #tpu.memory_space<vmem>>, vector<1x1x128x128xbf16>
    %216 = vector.shape_cast %215 : vector<1x1x128x128xbf16> to vector<128x128xbf16>
    %cst_233 = arith.constant dense<0.000000e+00> : vector<320x128xf32>
    %217 = tpu.matmul %214, %216, %cst_233 {dimension_numbers = #tpu.dot_dimension_numbers<[1], [0], [0], [1], [0, 0, 1, 1], [], []>} : vector<320x128xbf16>, vector<128x128xbf16>, vector<320x128xf32> -> vector<320x128xf32>
    %218 = arith.addf %211, %217 : vector<320x128xf32>
    %c4_234 = arith.constant 4 : index
    %c1_235 = arith.constant 1 : index
    %c0_236 = arith.constant 0 : index
    %219 = vector.load %arg9[%c4_234, %c1_235, %c0_236] : memref<26x18x128xf32, #tpu.memory_space<vmem>>, vector<20x16x128xf32>
    %220 = arith.truncf %219 : vector<20x16x128xf32> to vector<20x16x128xbf16>
    %221 = vector.shape_cast %220 : vector<20x16x128xbf16> to vector<320x128xbf16>
    %c2_237 = arith.constant 2 : index
    %c7_238 = arith.constant 7 : index
    %c0_239 = arith.constant 0 : index
    %c0_240 = arith.constant 0 : index
    %222 = vector.load %arg3[%c2_237, %c7_238, %c0_239, %c0_240] : memref<4x9x128x128xbf16, #tpu.memory_space<vmem>>, vector<1x1x128x128xbf16>
    %223 = vector.shape_cast %222 : vector<1x1x128x128xbf16> to vector<128x128xbf16>
    %cst_241 = arith.constant dense<0.000000e+00> : vector<320x128xf32>
    %224 = tpu.matmul %221, %223, %cst_241 {dimension_numbers = #tpu.dot_dimension_numbers<[1], [0], [0], [1], [0, 0, 1, 1], [], []>} : vector<320x128xbf16>, vector<128x128xbf16>, vector<320x128xf32> -> vector<320x128xf32>
    %225 = arith.addf %218, %224 : vector<320x128xf32>
    %c4_242 = arith.constant 4 : index
    %c2_243 = arith.constant 2 : index
    %c0_244 = arith.constant 0 : index
    %226 = vector.load %arg9[%c4_242, %c2_243, %c0_244] : memref<26x18x128xf32, #tpu.memory_space<vmem>>, vector<20x16x128xf32>
    %227 = arith.truncf %226 : vector<20x16x128xf32> to vector<20x16x128xbf16>
    %228 = vector.shape_cast %227 : vector<20x16x128xbf16> to vector<320x128xbf16>
    %c2_245 = arith.constant 2 : index
    %c8_246 = arith.constant 8 : index
    %c0_247 = arith.constant 0 : index
    %c0_248 = arith.constant 0 : index
    %229 = vector.load %arg3[%c2_245, %c8_246, %c0_247, %c0_248] : memref<4x9x128x128xbf16, #tpu.memory_space<vmem>>, vector<1x1x128x128xbf16>
    %230 = vector.shape_cast %229 : vector<1x1x128x128xbf16> to vector<128x128xbf16>
    %cst_249 = arith.constant dense<0.000000e+00> : vector<320x128xf32>
    %231 = tpu.matmul %228, %230, %cst_249 {dimension_numbers = #tpu.dot_dimension_numbers<[1], [0], [0], [1], [0, 0, 1, 1], [], []>} : vector<320x128xbf16>, vector<128x128xbf16>, vector<320x128xf32> -> vector<320x128xf32>
    %232 = arith.addf %225, %231 : vector<320x128xf32>
    %c2_250 = arith.constant 2 : index
    %c0_251 = arith.constant 0 : index
    %c0_252 = arith.constant 0 : index
    %233 = vector.load %arg4[%c2_250, %c0_251, %c0_252] : memref<4x1x128xf32, #tpu.memory_space<vmem>>, vector<1x1x128xf32>
    %234 = vector.shape_cast %233 : vector<1x1x128xf32> to vector<1x128xf32>
    %235 = vector.broadcast %234 : vector<1x128xf32> to vector<320x128xf32>
    %236 = arith.addf %232, %235 : vector<320x128xf32>
    %cst_253 = arith.constant 0.000000e+00 : f32
    %237 = vector.broadcast %cst_253 : f32 to vector<320x128xf32>
    %238 = arith.maximumf %236, %237 : vector<320x128xf32>
    %239 = vector.shape_cast %238 : vector<320x128xf32> to vector<20x16x128xf32>
    %c3_254 = arith.constant 3 : index
    %c1_255 = arith.constant 1 : index
    %c0_256 = arith.constant 0 : index
    %240 = vector.load %arg10[%c3_254, %c1_255, %c0_256] : memref<26x18x128xf32, #tpu.memory_space<vmem>>, vector<20x16x128xf32>
    tpu.vector_store %arg10[%c3_254, %c1_255, %c0_256], %239 {strides = array<i32>} : memref<26x18x128xf32, #tpu.memory_space<vmem>>, vector<20x16x128xf32>,
    %cst_257 = arith.constant 0.000000e+00 : f32
    %241 = vector.broadcast %cst_257 : f32 to vector<2x18x128xf32>
    %c0_i32_258 = arith.constant 0 : i32
    %242 = arith.cmpi eq, %arg1, %c0_i32_258 : i32
    %243 = arith.extui %242 : i1 to i32
    %c0_i32_259 = arith.constant 0 : i32
    %244 = arith.cmpi ne, %243, %c0_i32_259 : i32
    scf.if %244 {
      %c3_417 = arith.constant 3 : index
      %c0_418 = arith.constant 0 : index
      %c0_419 = arith.constant 0 : index
      %398 = vector.load %arg10[%c3_417, %c0_418, %c0_419] : memref<26x18x128xf32, #tpu.memory_space<vmem>>, vector<2x18x128xf32>
      tpu.vector_store %arg10[%c3_417, %c0_418, %c0_419], %241 {strides = array<i32>} : memref<26x18x128xf32, #tpu.memory_space<vmem>>, vector<2x18x128xf32>,
    } else {
    }
    %c0_i32_260 = arith.constant 0 : i32
    %245 = arith.cmpi eq, %arg1, %c0_i32_260 : i32
    %246 = arith.extui %245 : i1 to i32
    %c0_i32_261 = arith.constant 0 : i32
    %247 = arith.cmpi ne, %246, %c0_i32_261 : i32
    scf.if %247 {
      %c21 = arith.constant 21 : index
      %c0_417 = arith.constant 0 : index
      %c0_418 = arith.constant 0 : index
      %398 = vector.load %arg10[%c21, %c0_417, %c0_418] : memref<26x18x128xf32, #tpu.memory_space<vmem>>, vector<2x18x128xf32>
      tpu.vector_store %arg10[%c21, %c0_417, %c0_418], %241 {strides = array<i32>} : memref<26x18x128xf32, #tpu.memory_space<vmem>>, vector<2x18x128xf32>,
    } else {
    }
    %cst_262 = arith.constant 0.000000e+00 : f32
    %248 = vector.broadcast %cst_262 : f32 to vector<288x128xf32>
    %c3_263 = arith.constant 3 : index
    %c0_264 = arith.constant 0 : index
    %c0_265 = arith.constant 0 : index
    %249 = vector.load %arg10[%c3_263, %c0_264, %c0_265] : memref<26x18x128xf32, #tpu.memory_space<vmem>>, vector<18x16x128xf32>
    %250 = arith.truncf %249 : vector<18x16x128xf32> to vector<18x16x128xbf16>
    %251 = vector.shape_cast %250 : vector<18x16x128xbf16> to vector<288x128xbf16>
    %c3_266 = arith.constant 3 : index
    %c0_267 = arith.constant 0 : index
    %c0_268 = arith.constant 0 : index
    %c0_269 = arith.constant 0 : index
    %252 = vector.load %arg3[%c3_266, %c0_267, %c0_268, %c0_269] : memref<4x9x128x128xbf16, #tpu.memory_space<vmem>>, vector<1x1x128x128xbf16>
    %253 = vector.shape_cast %252 : vector<1x1x128x128xbf16> to vector<128x128xbf16>
    %cst_270 = arith.constant dense<0.000000e+00> : vector<288x128xf32>
    %254 = tpu.matmul %251, %253, %cst_270 {dimension_numbers = #tpu.dot_dimension_numbers<[1], [0], [0], [1], [0, 0, 1, 1], [], []>} : vector<288x128xbf16>, vector<128x128xbf16>, vector<288x128xf32> -> vector<288x128xf32>
    %255 = arith.addf %248, %254 : vector<288x128xf32>
    %c3_271 = arith.constant 3 : index
    %c1_272 = arith.constant 1 : index
    %c0_273 = arith.constant 0 : index
    %256 = vector.load %arg10[%c3_271, %c1_272, %c0_273] : memref<26x18x128xf32, #tpu.memory_space<vmem>>, vector<18x16x128xf32>
    %257 = arith.truncf %256 : vector<18x16x128xf32> to vector<18x16x128xbf16>
    %258 = vector.shape_cast %257 : vector<18x16x128xbf16> to vector<288x128xbf16>
    %c3_274 = arith.constant 3 : index
    %c1_275 = arith.constant 1 : index
    %c0_276 = arith.constant 0 : index
    %c0_277 = arith.constant 0 : index
    %259 = vector.load %arg3[%c3_274, %c1_275, %c0_276, %c0_277] : memref<4x9x128x128xbf16, #tpu.memory_space<vmem>>, vector<1x1x128x128xbf16>
    %260 = vector.shape_cast %259 : vector<1x1x128x128xbf16> to vector<128x128xbf16>
    %cst_278 = arith.constant dense<0.000000e+00> : vector<288x128xf32>
    %261 = tpu.matmul %258, %260, %cst_278 {dimension_numbers = #tpu.dot_dimension_numbers<[1], [0], [0], [1], [0, 0, 1, 1], [], []>} : vector<288x128xbf16>, vector<128x128xbf16>, vector<288x128xf32> -> vector<288x128xf32>
    %262 = arith.addf %255, %261 : vector<288x128xf32>
    %c3_279 = arith.constant 3 : index
    %c2_280 = arith.constant 2 : index
    %c0_281 = arith.constant 0 : index
    %263 = vector.load %arg10[%c3_279, %c2_280, %c0_281] : memref<26x18x128xf32, #tpu.memory_space<vmem>>, vector<18x16x128xf32>
    %264 = arith.truncf %263 : vector<18x16x128xf32> to vector<18x16x128xbf16>
    %265 = vector.shape_cast %264 : vector<18x16x128xbf16> to vector<288x128xbf16>
    %c3_282 = arith.constant 3 : index
    %c2_283 = arith.constant 2 : index
    %c0_284 = arith.constant 0 : index
    %c0_285 = arith.constant 0 : index
    %266 = vector.load %arg3[%c3_282, %c2_283, %c0_284, %c0_285] : memref<4x9x128x128xbf16, #tpu.memory_space<vmem>>, vector<1x1x128x128xbf16>
    %267 = vector.shape_cast %266 : vector<1x1x128x128xbf16> to vector<128x128xbf16>
    %cst_286 = arith.constant dense<0.000000e+00> : vector<288x128xf32>
    %268 = tpu.matmul %265, %267, %cst_286 {dimension_numbers = #tpu.dot_dimension_numbers<[1], [0], [0], [1], [0, 0, 1, 1], [], []>} : vector<288x128xbf16>, vector<128x128xbf16>, vector<288x128xf32> -> vector<288x128xf32>
    %269 = arith.addf %262, %268 : vector<288x128xf32>
    %c4_287 = arith.constant 4 : index
    %c0_288 = arith.constant 0 : index
    %c0_289 = arith.constant 0 : index
    %270 = vector.load %arg10[%c4_287, %c0_288, %c0_289] : memref<26x18x128xf32, #tpu.memory_space<vmem>>, vector<18x16x128xf32>
    %271 = arith.truncf %270 : vector<18x16x128xf32> to vector<18x16x128xbf16>
    %272 = vector.shape_cast %271 : vector<18x16x128xbf16> to vector<288x128xbf16>
    %c3_290 = arith.constant 3 : index
    %c3_291 = arith.constant 3 : index
    %c0_292 = arith.constant 0 : index
    %c0_293 = arith.constant 0 : index
    %273 = vector.load %arg3[%c3_290, %c3_291, %c0_292, %c0_293] : memref<4x9x128x128xbf16, #tpu.memory_space<vmem>>, vector<1x1x128x128xbf16>
    %274 = vector.shape_cast %273 : vector<1x1x128x128xbf16> to vector<128x128xbf16>
    %cst_294 = arith.constant dense<0.000000e+00> : vector<288x128xf32>
    %275 = tpu.matmul %272, %274, %cst_294 {dimension_numbers = #tpu.dot_dimension_numbers<[1], [0], [0], [1], [0, 0, 1, 1], [], []>} : vector<288x128xbf16>, vector<128x128xbf16>, vector<288x128xf32> -> vector<288x128xf32>
    %276 = arith.addf %269, %275 : vector<288x128xf32>
    %c4_295 = arith.constant 4 : index
    %c1_296 = arith.constant 1 : index
    %c0_297 = arith.constant 0 : index
    %277 = vector.load %arg10[%c4_295, %c1_296, %c0_297] : memref<26x18x128xf32, #tpu.memory_space<vmem>>, vector<18x16x128xf32>
    %278 = arith.truncf %277 : vector<18x16x128xf32> to vector<18x16x128xbf16>
    %279 = vector.shape_cast %278 : vector<18x16x128xbf16> to vector<288x128xbf16>
    %c3_298 = arith.constant 3 : index
    %c4_299 = arith.constant 4 : index
    %c0_300 = arith.constant 0 : index
    %c0_301 = arith.constant 0 : index
    %280 = vector.load %arg3[%c3_298, %c4_299, %c0_300, %c0_301] : memref<4x9x128x128xbf16, #tpu.memory_space<vmem>>, vector<1x1x128x128xbf16>
    %281 = vector.shape_cast %280 : vector<1x1x128x128xbf16> to vector<128x128xbf16>
    %cst_302 = arith.constant dense<0.000000e+00> : vector<288x128xf32>
    %282 = tpu.matmul %279, %281, %cst_302 {dimension_numbers = #tpu.dot_dimension_numbers<[1], [0], [0], [1], [0, 0, 1, 1], [], []>} : vector<288x128xbf16>, vector<128x128xbf16>, vector<288x128xf32> -> vector<288x128xf32>
    %283 = arith.addf %276, %282 : vector<288x128xf32>
    %c4_303 = arith.constant 4 : index
    %c2_304 = arith.constant 2 : index
    %c0_305 = arith.constant 0 : index
    %284 = vector.load %arg10[%c4_303, %c2_304, %c0_305] : memref<26x18x128xf32, #tpu.memory_space<vmem>>, vector<18x16x128xf32>
    %285 = arith.truncf %284 : vector<18x16x128xf32> to vector<18x16x128xbf16>
    %286 = vector.shape_cast %285 : vector<18x16x128xbf16> to vector<288x128xbf16>
    %c3_306 = arith.constant 3 : index
    %c5_307 = arith.constant 5 : index
    %c0_308 = arith.constant 0 : index
    %c0_309 = arith.constant 0 : index
    %287 = vector.load %arg3[%c3_306, %c5_307, %c0_308, %c0_309] : memref<4x9x128x128xbf16, #tpu.memory_space<vmem>>, vector<1x1x128x128xbf16>
    %288 = vector.shape_cast %287 : vector<1x1x128x128xbf16> to vector<128x128xbf16>
    %cst_310 = arith.constant dense<0.000000e+00> : vector<288x128xf32>
    %289 = tpu.matmul %286, %288, %cst_310 {dimension_numbers = #tpu.dot_dimension_numbers<[1], [0], [0], [1], [0, 0, 1, 1], [], []>} : vector<288x128xbf16>, vector<128x128xbf16>, vector<288x128xf32> -> vector<288x128xf32>
    %290 = arith.addf %283, %289 : vector<288x128xf32>
    %c5_311 = arith.constant 5 : index
    %c0_312 = arith.constant 0 : index
    %c0_313 = arith.constant 0 : index
    %291 = vector.load %arg10[%c5_311, %c0_312, %c0_313] : memref<26x18x128xf32, #tpu.memory_space<vmem>>, vector<18x16x128xf32>
    %292 = arith.truncf %291 : vector<18x16x128xf32> to vector<18x16x128xbf16>
    %293 = vector.shape_cast %292 : vector<18x16x128xbf16> to vector<288x128xbf16>
    %c3_314 = arith.constant 3 : index
    %c6_315 = arith.constant 6 : index
    %c0_316 = arith.constant 0 : index
    %c0_317 = arith.constant 0 : index
    %294 = vector.load %arg3[%c3_314, %c6_315, %c0_316, %c0_317] : memref<4x9x128x128xbf16, #tpu.memory_space<vmem>>, vector<1x1x128x128xbf16>
    %295 = vector.shape_cast %294 : vector<1x1x128x128xbf16> to vector<128x128xbf16>
    %cst_318 = arith.constant dense<0.000000e+00> : vector<288x128xf32>
    %296 = tpu.matmul %293, %295, %cst_318 {dimension_numbers = #tpu.dot_dimension_numbers<[1], [0], [0], [1], [0, 0, 1, 1], [], []>} : vector<288x128xbf16>, vector<128x128xbf16>, vector<288x128xf32> -> vector<288x128xf32>
    %297 = arith.addf %290, %296 : vector<288x128xf32>
    %c5_319 = arith.constant 5 : index
    %c1_320 = arith.constant 1 : index
    %c0_321 = arith.constant 0 : index
    %298 = vector.load %arg10[%c5_319, %c1_320, %c0_321] : memref<26x18x128xf32, #tpu.memory_space<vmem>>, vector<18x16x128xf32>
    %299 = arith.truncf %298 : vector<18x16x128xf32> to vector<18x16x128xbf16>
    %300 = vector.shape_cast %299 : vector<18x16x128xbf16> to vector<288x128xbf16>
    %c3_322 = arith.constant 3 : index
    %c7_323 = arith.constant 7 : index
    %c0_324 = arith.constant 0 : index
    %c0_325 = arith.constant 0 : index
    %301 = vector.load %arg3[%c3_322, %c7_323, %c0_324, %c0_325] : memref<4x9x128x128xbf16, #tpu.memory_space<vmem>>, vector<1x1x128x128xbf16>
    %302 = vector.shape_cast %301 : vector<1x1x128x128xbf16> to vector<128x128xbf16>
    %cst_326 = arith.constant dense<0.000000e+00> : vector<288x128xf32>
    %303 = tpu.matmul %300, %302, %cst_326 {dimension_numbers = #tpu.dot_dimension_numbers<[1], [0], [0], [1], [0, 0, 1, 1], [], []>} : vector<288x128xbf16>, vector<128x128xbf16>, vector<288x128xf32> -> vector<288x128xf32>
    %304 = arith.addf %297, %303 : vector<288x128xf32>
    %c5_327 = arith.constant 5 : index
    %c2_328 = arith.constant 2 : index
    %c0_329 = arith.constant 0 : index
    %305 = vector.load %arg10[%c5_327, %c2_328, %c0_329] : memref<26x18x128xf32, #tpu.memory_space<vmem>>, vector<18x16x128xf32>
    %306 = arith.truncf %305 : vector<18x16x128xf32> to vector<18x16x128xbf16>
    %307 = vector.shape_cast %306 : vector<18x16x128xbf16> to vector<288x128xbf16>
    %c3_330 = arith.constant 3 : index
    %c8_331 = arith.constant 8 : index
    %c0_332 = arith.constant 0 : index
    %c0_333 = arith.constant 0 : index
    %308 = vector.load %arg3[%c3_330, %c8_331, %c0_332, %c0_333] : memref<4x9x128x128xbf16, #tpu.memory_space<vmem>>, vector<1x1x128x128xbf16>
    %309 = vector.shape_cast %308 : vector<1x1x128x128xbf16> to vector<128x128xbf16>
    %cst_334 = arith.constant dense<0.000000e+00> : vector<288x128xf32>
    %310 = tpu.matmul %307, %309, %cst_334 {dimension_numbers = #tpu.dot_dimension_numbers<[1], [0], [0], [1], [0, 0, 1, 1], [], []>} : vector<288x128xbf16>, vector<128x128xbf16>, vector<288x128xf32> -> vector<288x128xf32>
    %311 = arith.addf %304, %310 : vector<288x128xf32>
    %c3_335 = arith.constant 3 : index
    %c0_336 = arith.constant 0 : index
    %c0_337 = arith.constant 0 : index
    %312 = vector.load %arg4[%c3_335, %c0_336, %c0_337] : memref<4x1x128xf32, #tpu.memory_space<vmem>>, vector<1x1x128xf32>
    %313 = vector.shape_cast %312 : vector<1x1x128xf32> to vector<1x128xf32>
    %314 = vector.broadcast %313 : vector<1x128xf32> to vector<288x128xf32>
    %315 = arith.addf %311, %314 : vector<288x128xf32>
    %cst_338 = arith.constant 0.000000e+00 : f32
    %316 = vector.broadcast %cst_338 : f32 to vector<288x128xf32>
    %317 = arith.maximumf %315, %316 : vector<288x128xf32>
    %318 = vector.shape_cast %317 : vector<288x128xf32> to vector<18x16x128xf32>
    %c4_339 = arith.constant 4 : index
    %c1_340 = arith.constant 1 : index
    %c0_341 = arith.constant 0 : index
    %319 = vector.load %arg9[%c4_339, %c1_340, %c0_341] : memref<26x18x128xf32, #tpu.memory_space<vmem>>, vector<18x16x128xf32>
    tpu.vector_store %arg9[%c4_339, %c1_340, %c0_341], %318 {strides = array<i32>} : memref<26x18x128xf32, #tpu.memory_space<vmem>>, vector<18x16x128xf32>,
    %cst_342 = arith.constant 0.000000e+00 : f32
    %320 = vector.broadcast %cst_342 : f32 to vector<1x18x128xf32>
    %c0_i32_343 = arith.constant 0 : i32
    %321 = arith.cmpi eq, %arg1, %c0_i32_343 : i32
    %322 = arith.extui %321 : i1 to i32
    %c0_i32_344 = arith.constant 0 : i32
    %323 = arith.cmpi ne, %322, %c0_i32_344 : i32
    scf.if %323 {
      %c4_417 = arith.constant 4 : index
      %c0_418 = arith.constant 0 : index
      %c0_419 = arith.constant 0 : index
      %398 = vector.load %arg9[%c4_417, %c0_418, %c0_419] : memref<26x18x128xf32, #tpu.memory_space<vmem>>, vector<1x18x128xf32>
      tpu.vector_store %arg9[%c4_417, %c0_418, %c0_419], %320 {strides = array<i32>} : memref<26x18x128xf32, #tpu.memory_space<vmem>>, vector<1x18x128xf32>,
    } else {
    }
    %c0_i32_345 = arith.constant 0 : i32
    %324 = arith.cmpi eq, %arg1, %c0_i32_345 : i32
    %325 = arith.extui %324 : i1 to i32
    %c0_i32_346 = arith.constant 0 : i32
    %326 = arith.cmpi ne, %325, %c0_i32_346 : i32
    scf.if %326 {
      %c21 = arith.constant 21 : index
      %c0_417 = arith.constant 0 : index
      %c0_418 = arith.constant 0 : index
      %398 = vector.load %arg9[%c21, %c0_417, %c0_418] : memref<26x18x128xf32, #tpu.memory_space<vmem>>, vector<1x18x128xf32>
      tpu.vector_store %arg9[%c21, %c0_417, %c0_418], %320 {strides = array<i32>} : memref<26x18x128xf32, #tpu.memory_space<vmem>>, vector<1x18x128xf32>,
    } else {
    }
    %cst_347 = arith.constant 0.000000e+00 : f32
    %327 = vector.broadcast %cst_347 : f32 to vector<256x128xf32>
    %c4_348 = arith.constant 4 : index
    %c0_349 = arith.constant 0 : index
    %c0_350 = arith.constant 0 : index
    %328 = vector.load %arg9[%c4_348, %c0_349, %c0_350] : memref<26x18x128xf32, #tpu.memory_space<vmem>>, vector<16x16x128xf32>
    %329 = arith.truncf %328 : vector<16x16x128xf32> to vector<16x16x128xbf16>
    %330 = vector.shape_cast %329 : vector<16x16x128xbf16> to vector<256x128xbf16>
    %c0_351 = arith.constant 0 : index
    %c0_352 = arith.constant 0 : index
    %c0_353 = arith.constant 0 : index
    %331 = vector.load %arg5[%c0_351, %c0_352, %c0_353] : memref<9x128x128xbf16, #tpu.memory_space<vmem>>, vector<1x128x128xbf16>
    %332 = vector.shape_cast %331 : vector<1x128x128xbf16> to vector<128x128xbf16>
    %cst_354 = arith.constant dense<0.000000e+00> : vector<256x128xf32>
    %333 = tpu.matmul %330, %332, %cst_354 {dimension_numbers = #tpu.dot_dimension_numbers<[1], [0], [0], [1], [0, 0, 1, 1], [], []>} : vector<256x128xbf16>, vector<128x128xbf16>, vector<256x128xf32> -> vector<256x128xf32>
    %334 = arith.addf %327, %333 : vector<256x128xf32>
    %c4_355 = arith.constant 4 : index
    %c1_356 = arith.constant 1 : index
    %c0_357 = arith.constant 0 : index
    %335 = vector.load %arg9[%c4_355, %c1_356, %c0_357] : memref<26x18x128xf32, #tpu.memory_space<vmem>>, vector<16x16x128xf32>
    %336 = arith.truncf %335 : vector<16x16x128xf32> to vector<16x16x128xbf16>
    %337 = vector.shape_cast %336 : vector<16x16x128xbf16> to vector<256x128xbf16>
    %c1_358 = arith.constant 1 : index
    %c0_359 = arith.constant 0 : index
    %c0_360 = arith.constant 0 : index
    %338 = vector.load %arg5[%c1_358, %c0_359, %c0_360] : memref<9x128x128xbf16, #tpu.memory_space<vmem>>, vector<1x128x128xbf16>
    %339 = vector.shape_cast %338 : vector<1x128x128xbf16> to vector<128x128xbf16>
    %cst_361 = arith.constant dense<0.000000e+00> : vector<256x128xf32>
    %340 = tpu.matmul %337, %339, %cst_361 {dimension_numbers = #tpu.dot_dimension_numbers<[1], [0], [0], [1], [0, 0, 1, 1], [], []>} : vector<256x128xbf16>, vector<128x128xbf16>, vector<256x128xf32> -> vector<256x128xf32>
    %341 = arith.addf %334, %340 : vector<256x128xf32>
    %c4_362 = arith.constant 4 : index
    %c2_363 = arith.constant 2 : index
    %c0_364 = arith.constant 0 : index
    %342 = vector.load %arg9[%c4_362, %c2_363, %c0_364] : memref<26x18x128xf32, #tpu.memory_space<vmem>>, vector<16x16x128xf32>
    %343 = arith.truncf %342 : vector<16x16x128xf32> to vector<16x16x128xbf16>
    %344 = vector.shape_cast %343 : vector<16x16x128xbf16> to vector<256x128xbf16>
    %c2_365 = arith.constant 2 : index
    %c0_366 = arith.constant 0 : index
    %c0_367 = arith.constant 0 : index
    %345 = vector.load %arg5[%c2_365, %c0_366, %c0_367] : memref<9x128x128xbf16, #tpu.memory_space<vmem>>, vector<1x128x128xbf16>
    %346 = vector.shape_cast %345 : vector<1x128x128xbf16> to vector<128x128xbf16>
    %cst_368 = arith.constant dense<0.000000e+00> : vector<256x128xf32>
    %347 = tpu.matmul %344, %346, %cst_368 {dimension_numbers = #tpu.dot_dimension_numbers<[1], [0], [0], [1], [0, 0, 1, 1], [], []>} : vector<256x128xbf16>, vector<128x128xbf16>, vector<256x128xf32> -> vector<256x128xf32>
    %348 = arith.addf %341, %347 : vector<256x128xf32>
    %c5_369 = arith.constant 5 : index
    %c0_370 = arith.constant 0 : index
    %c0_371 = arith.constant 0 : index
    %349 = vector.load %arg9[%c5_369, %c0_370, %c0_371] : memref<26x18x128xf32, #tpu.memory_space<vmem>>, vector<16x16x128xf32>
    %350 = arith.truncf %349 : vector<16x16x128xf32> to vector<16x16x128xbf16>
    %351 = vector.shape_cast %350 : vector<16x16x128xbf16> to vector<256x128xbf16>
    %c3_372 = arith.constant 3 : index
    %c0_373 = arith.constant 0 : index
    %c0_374 = arith.constant 0 : index
    %352 = vector.load %arg5[%c3_372, %c0_373, %c0_374] : memref<9x128x128xbf16, #tpu.memory_space<vmem>>, vector<1x128x128xbf16>
    %353 = vector.shape_cast %352 : vector<1x128x128xbf16> to vector<128x128xbf16>
    %cst_375 = arith.constant dense<0.000000e+00> : vector<256x128xf32>
    %354 = tpu.matmul %351, %353, %cst_375 {dimension_numbers = #tpu.dot_dimension_numbers<[1], [0], [0], [1], [0, 0, 1, 1], [], []>} : vector<256x128xbf16>, vector<128x128xbf16>, vector<256x128xf32> -> vector<256x128xf32>
    %355 = arith.addf %348, %354 : vector<256x128xf32>
    %c5_376 = arith.constant 5 : index
    %c1_377 = arith.constant 1 : index
    %c0_378 = arith.constant 0 : index
    %356 = vector.load %arg9[%c5_376, %c1_377, %c0_378] : memref<26x18x128xf32, #tpu.memory_space<vmem>>, vector<16x16x128xf32>
    %357 = arith.truncf %356 : vector<16x16x128xf32> to vector<16x16x128xbf16>
    %358 = vector.shape_cast %357 : vector<16x16x128xbf16> to vector<256x128xbf16>
    %c4_379 = arith.constant 4 : index
    %c0_380 = arith.constant 0 : index
    %c0_381 = arith.constant 0 : index
    %359 = vector.load %arg5[%c4_379, %c0_380, %c0_381] : memref<9x128x128xbf16, #tpu.memory_space<vmem>>, vector<1x128x128xbf16>
    %360 = vector.shape_cast %359 : vector<1x128x128xbf16> to vector<128x128xbf16>
    %cst_382 = arith.constant dense<0.000000e+00> : vector<256x128xf32>
    %361 = tpu.matmul %358, %360, %cst_382 {dimension_numbers = #tpu.dot_dimension_numbers<[1], [0], [0], [1], [0, 0, 1, 1], [], []>} : vector<256x128xbf16>, vector<128x128xbf16>, vector<256x128xf32> -> vector<256x128xf32>
    %362 = arith.addf %355, %361 : vector<256x128xf32>
    %c5_383 = arith.constant 5 : index
    %c2_384 = arith.constant 2 : index
    %c0_385 = arith.constant 0 : index
    %363 = vector.load %arg9[%c5_383, %c2_384, %c0_385] : memref<26x18x128xf32, #tpu.memory_space<vmem>>, vector<16x16x128xf32>
    %364 = arith.truncf %363 : vector<16x16x128xf32> to vector<16x16x128xbf16>
    %365 = vector.shape_cast %364 : vector<16x16x128xbf16> to vector<256x128xbf16>
    %c5_386 = arith.constant 5 : index
    %c0_387 = arith.constant 0 : index
    %c0_388 = arith.constant 0 : index
    %366 = vector.load %arg5[%c5_386, %c0_387, %c0_388] : memref<9x128x128xbf16, #tpu.memory_space<vmem>>, vector<1x128x128xbf16>
    %367 = vector.shape_cast %366 : vector<1x128x128xbf16> to vector<128x128xbf16>
    %cst_389 = arith.constant dense<0.000000e+00> : vector<256x128xf32>
    %368 = tpu.matmul %365, %367, %cst_389 {dimension_numbers = #tpu.dot_dimension_numbers<[1], [0], [0], [1], [0, 0, 1, 1], [], []>} : vector<256x128xbf16>, vector<128x128xbf16>, vector<256x128xf32> -> vector<256x128xf32>
    %369 = arith.addf %362, %368 : vector<256x128xf32>
    %c6_390 = arith.constant 6 : index
    %c0_391 = arith.constant 0 : index
    %c0_392 = arith.constant 0 : index
    %370 = vector.load %arg9[%c6_390, %c0_391, %c0_392] : memref<26x18x128xf32, #tpu.memory_space<vmem>>, vector<16x16x128xf32>
    %371 = arith.truncf %370 : vector<16x16x128xf32> to vector<16x16x128xbf16>
    %372 = vector.shape_cast %371 : vector<16x16x128xbf16> to vector<256x128xbf16>
    %c6_393 = arith.constant 6 : index
    %c0_394 = arith.constant 0 : index
    %c0_395 = arith.constant 0 : index
    %373 = vector.load %arg5[%c6_393, %c0_394, %c0_395] : memref<9x128x128xbf16, #tpu.memory_space<vmem>>, vector<1x128x128xbf16>
    %374 = vector.shape_cast %373 : vector<1x128x128xbf16> to vector<128x128xbf16>
    %cst_396 = arith.constant dense<0.000000e+00> : vector<256x128xf32>
    %375 = tpu.matmul %372, %374, %cst_396 {dimension_numbers = #tpu.dot_dimension_numbers<[1], [0], [0], [1], [0, 0, 1, 1], [], []>} : vector<256x128xbf16>, vector<128x128xbf16>, vector<256x128xf32> -> vector<256x128xf32>
    %376 = arith.addf %369, %375 : vector<256x128xf32>
    %c6_397 = arith.constant 6 : index
    %c1_398 = arith.constant 1 : index
    %c0_399 = arith.constant 0 : index
    %377 = vector.load %arg9[%c6_397, %c1_398, %c0_399] : memref<26x18x128xf32, #tpu.memory_space<vmem>>, vector<16x16x128xf32>
    %378 = arith.truncf %377 : vector<16x16x128xf32> to vector<16x16x128xbf16>
    %379 = vector.shape_cast %378 : vector<16x16x128xbf16> to vector<256x128xbf16>
    %c7_400 = arith.constant 7 : index
    %c0_401 = arith.constant 0 : index
    %c0_402 = arith.constant 0 : index
    %380 = vector.load %arg5[%c7_400, %c0_401, %c0_402] : memref<9x128x128xbf16, #tpu.memory_space<vmem>>, vector<1x128x128xbf16>
    %381 = vector.shape_cast %380 : vector<1x128x128xbf16> to vector<128x128xbf16>
    %cst_403 = arith.constant dense<0.000000e+00> : vector<256x128xf32>
    %382 = tpu.matmul %379, %381, %cst_403 {dimension_numbers = #tpu.dot_dimension_numbers<[1], [0], [0], [1], [0, 0, 1, 1], [], []>} : vector<256x128xbf16>, vector<128x128xbf16>, vector<256x128xf32> -> vector<256x128xf32>
    %383 = arith.addf %376, %382 : vector<256x128xf32>
    %c6_404 = arith.constant 6 : index
    %c2_405 = arith.constant 2 : index
    %c0_406 = arith.constant 0 : index
    %384 = vector.load %arg9[%c6_404, %c2_405, %c0_406] : memref<26x18x128xf32, #tpu.memory_space<vmem>>, vector<16x16x128xf32>
    %385 = arith.truncf %384 : vector<16x16x128xf32> to vector<16x16x128xbf16>
    %386 = vector.shape_cast %385 : vector<16x16x128xbf16> to vector<256x128xbf16>
    %c8_407 = arith.constant 8 : index
    %c0_408 = arith.constant 0 : index
    %c0_409 = arith.constant 0 : index
    %387 = vector.load %arg5[%c8_407, %c0_408, %c0_409] : memref<9x128x128xbf16, #tpu.memory_space<vmem>>, vector<1x128x128xbf16>
    %388 = vector.shape_cast %387 : vector<1x128x128xbf16> to vector<128x128xbf16>
    %cst_410 = arith.constant dense<0.000000e+00> : vector<256x128xf32>
    %389 = tpu.matmul %386, %388, %cst_410 {dimension_numbers = #tpu.dot_dimension_numbers<[1], [0], [0], [1], [0, 0, 1, 1], [], []>} : vector<256x128xbf16>, vector<128x128xbf16>, vector<256x128xf32> -> vector<256x128xf32>
    %390 = arith.addf %383, %389 : vector<256x128xf32>
    %c0_411 = arith.constant 0 : index
    %c0_412 = arith.constant 0 : index
    %391 = vector.load %arg6[%c0_411, %c0_412] : memref<1x128xf32, #tpu.memory_space<vmem>>, vector<1x128xf32>
    %392 = vector.broadcast %391 : vector<1x128xf32> to vector<256x128xf32>
    %393 = arith.addf %390, %392 : vector<256x128xf32>
    %394 = vector.shape_cast %393 : vector<256x128xf32> to vector<16x16x128xf32>
    %c0_413 = arith.constant 0 : index
    %c0_414 = arith.constant 0 : index
    %c0_415 = arith.constant 0 : index
    %c0_416 = arith.constant 0 : index
    %395 = vector.load %arg7[%c0_413, %c0_414, %c0_415, %c0_416] : memref<1x16x16x128xf32, #tpu.memory_space<vmem>>, vector<1x16x16x128xf32>
    %396 = vector.shape_cast %395 : vector<1x16x16x128xf32> to vector<16x16x128xf32>
    %397 = vector.shape_cast %394 : vector<16x16x128xf32> to vector<1x16x16x128xf32>
    tpu.vector_store %arg7[%c0_413, %c0_414, %c0_415, %c0_416], %397 {strides = array<i32>} : memref<1x16x16x128xf32, #tpu.memory_space<vmem>>, vector<1x16x16x128xf32>,
    return
  }
  func.func @transform_1(%arg0: i32, %arg1: i32) -> (i32, i32, i32, i32) {
    %c0_i32 = arith.constant 0 : i32
    %c0_i32_0 = arith.constant 0 : i32
    %c0_i32_1 = arith.constant 0 : i32
    %c0_i32_2 = arith.constant 0 : i32
    %c0_i32_3 = arith.constant 0 : i32
    return %c0_i32, %c0_i32_0, %c0_i32_1, %c0_i32_2 : i32, i32, i32, i32
  }
  func.func @transform_2(%arg0: i32, %arg1: i32) -> (i32, i32, i32) {
    %c0_i32 = arith.constant 0 : i32
    %c0_i32_0 = arith.constant 0 : i32
    %c0_i32_1 = arith.constant 0 : i32
    %c0_i32_2 = arith.constant 0 : i32
    return %c0_i32, %c0_i32_0, %c0_i32_1 : i32, i32, i32
  }
  func.func @transform_3(%arg0: i32, %arg1: i32) -> (i32, i32, i32) {
    %c0_i32 = arith.constant 0 : i32
    %c0_i32_0 = arith.constant 0 : i32
    %c0_i32_1 = arith.constant 0 : i32
    %c0_i32_2 = arith.constant 0 : i32
    return %c0_i32, %c0_i32_0, %c0_i32_1 : i32, i32, i32
  }
  func.func @transform_4(%arg0: i32, %arg1: i32) -> (i32, i32) {
    %c0_i32 = arith.constant 0 : i32
    %c0_i32_0 = arith.constant 0 : i32
    %c0_i32_1 = arith.constant 0 : i32
    return %c0_i32, %c0_i32_0 : i32, i32
  }
  func.func @transform_5(%arg0: i32, %arg1: i32) -> (i32, i32, i32, i32) {
    %c0_i32 = arith.constant 0 : i32
    %c0_i32_0 = arith.constant 0 : i32
    %c0_i32_1 = arith.constant 0 : i32
    return %arg0, %arg1, %c0_i32, %c0_i32_0 : i32, i32, i32, i32
  }
}

</mosaic_0001>

<bundles_post_ra>
// kernel: tpu_custom_call.1
= control target key start
LH: loop header
LB: loop body
LE: loop exit
PB: predicated region body
PF: predicated region fallthrough
CT: control target
= control target key end

     0   :  { %s25736_s0 = inlined_call_operand.hbm [shape: f32[2,26,16,128], index: 0, kind: input, shape index: {}]   ;;  %s25737_s1 = inlined_call_operand.hbm [shape: bf16[4,9,128,128], index: 1, kind: input, shape index: {}]   ;;  %s25738_s2 = inlined_call_operand.hbm [shape: f32[4,1,128], index: 2, kind: input, shape index: {}]   ;;  %s25739_s3 = inlined_call_operand.hbm [shape: bf16[9,128,128], index: 3, kind: input, shape index: {}]   ;;  %s25740_s4 = inlined_call_operand.hbm [shape: f32[1,128], index: 4, kind: input, shape index: {}]   ;;  %s25741_s5 = inlined_call_operand.hbm [shape: f32[2,16,16,128], index: 5, kind: output, shape index: {}]  }
   0x1   :  { %25751 = sst [smem:[#allocation32_spill]] %s25738_s2 }
   0x2   :  { %10 = vsyncpa [#allocation7], 0 }
   0x3   :  { %11 = vsyncpa [#allocation10], 0 }
   0x4   :  { %12 = vsyncpa [#allocation13], 0 }
   0x5   :  { %13 = vsyncpa [#allocation8], 0 }
   0x6   :  { %15 = vsyncpa [#allocation8 + $0x1], 0  ;;  %s23573_s18 = smov 0   ;;  %s23575_s19 = smov 0  }
   0x7   :  { %s23577_s20 = smov 0   ;;  %s23579_s21 = smov 0  }
   0x8   :  { %s23581_s22 = smov 0   ;;  %s23583_s23 = smov 0  }
   0x9 LB: > { %25752 = sst [smem:[#allocation24_spill]] %s23515_s20  ;;  %s17063_s24 = sadd.s32 4294967295, %s23527_s23   ;;  %s23527_s23 = sphi %s23583_s23, %s21_s23   ;;  %s23523_s22 = sphi %s23581_s22, %s25779_s22   ;;  %s23519_s21 = sphi %s23579_s21, %s25778_s21   ;;  %s23515_s20 = sphi %s23577_s20, %s25777_s20   ;;  %s23511_s19 = sphi %s23575_s19, %s25781_s19   ;;  %s23507_s18 = sphi %s23573_s18, %s25780_s18  }
   0xa   : > { %25753 = sst [smem:[#allocation25_spill]] %s23523_s22  ;;  %s17064_s25 = sadd.s32 4294967294, %s23527_s23  }
   0xb   : > { %s33_s26 = sadd.s32 1, %s23523_s22  ;;  %s126_s27 = sadd.s32 1, %s23515_s20 }
   0xc   : > { %p35_p0 = scmp.ge.s32.totalorder %s33_s26, 2  ;;  %p136_p1 = scmp.ne.s32.totalorder %s23515_s20, %s23511_s19 }
   0xd   : > { %p137_p2 = scmp.eq.s32.totalorder %s17063_s24, 1  ;;  %p142_p3 = scmp.ne.s32.totalorder %s23511_s19, %s23507_s18 }
   0xe   : > { %s25783_s26 = smov (%p35_p0, %s33_s26), 0  ;;  %p143_p5 = scmp.eq.s32.totalorder %s17064_s25, 1 }
   0xf   : > { %25754 = sst [smem:[#allocation26_spill]] %s25783_s26  ;;  %p23613_p4 = por %p137_p2, %p136_p1 }
  0x10   : > { %s121_s29 = ssub.s32 %s23523_s22, %s25783_s26  ;;  %p17065_p6 = scmp.ge.s32.totalorder %s23527_s23, 1 }
  0x11   : > { %s25755_s28 = scalar_select %p23613_p4, 1, 0 }
  0x12   : > { %p124_p7 = scmp.eq.s32.totalorder %s121_s29, 0  ;;  %p23620_p8 = por %p143_p5, %p142_p3 }
  0x13   : > { %p150_p9 = scmp.lt.s32.totalorder %s23527_s23, 3  ;;  %p23632_p11 = scmp.eq.s32.totalorder %s17063_s24, 0 }
  0x14   : > { %s25756_s30 = scalar_select %p23620_p8, 1, 0 }
  0x15   : > { %s23626_s6 = scalar_select %p124_p7, %s23515_s20, %s126_s27  }
  0x16   : > { %p23628_p10 = pnand %p17065_p6, %p150_p9  ;;  %s23529_s9 = smov [#allocation9]  }
  0x17   : > { %25757 = sst [smem:[#allocation27_spill]] %s23626_s6  ;;  %s175_s10 = sshll.u32 %s23529_s9, 4  ;;  %s176_s10 = int_to_ptr.vmem [resolvable:$true] %s175_s10 }
  0x18   : > { %s25758_s7 = scalar_select %p23628_p10, 1, 0 }
  0x19   : > { %s25759_s8 = scalar_select %p23632_p11, 1, 0 }
  0x1a   : > { %p22848_p12 = pneg %p23628_p10  ;;  %s23530_s12 = smov [#allocation6]  }
  0x1b   : > { %s162_s13 = sshll.u32 %s23530_s12, 4  ;;  %s25761_s2 = sld [smem:[#allocation32_spill]]  ;;  %s163_s13 = int_to_ptr.vmem [resolvable:$true] %s162_s13 }
  0x1c   : > { %p23640_p13 = pnand %p23632_p11, %p22848_p12 }
  0x1e   : > { %p23652_p1 = pneg %p23640_p13 }
  0x21   : > { %s23299_s16 = scalar_lea.hbm %s25761_s2, 64 }
  0x22   : > { %p23300_p0 = scmp.ne.s32.totalorder %s25761_s2, %s23299_s16  ;;  %p23306_p5 = scmp.lt.u32.totalorder %s23299_s16, %s25761_s2 }
  0x24   : > { %p23302_p2 = pnand %p23652_p1, %p23300_p0 }
  0x26   : > { %p23303_p3 = pneg %p23302_p2 }
  0x28   : > { %p23308_p6 = pnand %p23306_p5, %p23303_p3 }
  0x2a   : > { %23311 = shalt.err (!%p23308_p6)
}
  0x2b   : > { %s23312_s9 = scalar_lea.vmem %s176_s10, 64  ;;  %p23320_p8 = scmp.lt.s32.totalorder %s176_s10, %s176_s10 }
  0x2c   : > { %p23313_p7 = scmp.ne.s32.totalorder %s176_s10, %s23312_s9  ;;  %p23321_p4 = scmp.lt.s32.totalorder %s23312_s9, %s23312_s9 }
  0x2e   : > { %p23315_p9 = pnand %p23313_p7, %p23652_p1  ;;  %p23322_p11 = por %p23321_p4, %p23320_p8 }
  0x30   : > { %p23316_p12 = pneg %p23315_p9 }
  0x32   : > { %p23323_p10 = pnand %p23322_p11, %p23316_p12 }
  0x34   : > { %23326 = shalt.err (!%p23323_p10)
}
  0x35   : > { %s23531_s12 = smov 16   ;;  %s23532_s14 = smov 1  }
  0x36   : > { %22854 = dma.hbm_to_vmem [thread:$0]  (!%p23640_p13), %s25761_s2, 64, %s176_s10, [#allocation10], %s23531_s12, %s23531_s12, %s23532_s14  }
  0x37   : > { %s23327_s27 = scalar_lea.hbm %s25737_s1, 36864 }
  0x38   : > { %p23328_p4 = scmp.ne.s32.totalorder %s25737_s1, %s23327_s27  ;;  %p23334_p11 = scmp.lt.u32.totalorder %s23327_s27, %s25737_s1 }
  0x3a   : > { %p23330_p8 = pnand %p23328_p4, %p23652_p1 }
  0x3c   : > { %p23331_p10 = pneg %p23330_p8 }
  0x3e   : > { %p23336_p0 = pnand %p23334_p11, %p23331_p10 }
  0x40   : > { %23339 = shalt.err (!%p23336_p0)
}
  0x41   : > { %s23340_s15 = scalar_lea.vmem %s163_s13, 36864  ;;  %p23348_p6 = scmp.lt.s32.totalorder %s163_s13, %s163_s13 }
  0x42   : > { %p23341_p2 = scmp.ne.s32.totalorder %s163_s13, %s23340_s15  ;;  %p23349_p7 = scmp.lt.s32.totalorder %s23340_s15, %s23340_s15 }
  0x44   : > { %p23343_p3 = pnand %p23341_p2, %p23652_p1  ;;  %p23350_p9 = por %p23349_p7, %p23348_p6 }
  0x46   : > { %p23344_p5 = pneg %p23343_p3 }
  0x48   : > { %p23351_p12 = pnand %p23350_p9, %p23344_p5 }
  0x4a   : > { %23354 = shalt.err (!%p23351_p12)
}
  0x4b   : > { %s23533_s26 = smov 64   ;;  %s23534_s10 = smov 4  }
  0x4c   : > { %22851 = dma.hbm_to_vmem [thread:$0]  (!%p23640_p13), %s25737_s1, 36864, %s163_s13, [#allocation7], %s23533_s26, %s23533_s26, %s23534_s10  }
  0x4d   : > { %s23535_s14 = smov [#allocation11]   ;;  %s23536_s17 = smov [#allocation12]  }
  0x4e   : > { %s188_s16 = sshll.u32 %s23535_s14, 4  ;;  %s202_s24 = sshll.u32 %s23536_s17, 4  ;;  %s189_s16 = int_to_ptr.vmem [resolvable:$true] %s188_s16  ;;  %s203_s24 = int_to_ptr.vmem [resolvable:$true] %s202_s24 }
  0x4f   : > { %s23355_s9 = scalar_lea.hbm %s25739_s3, 9216 }
  0x50   : > { %p23356_p4 = scmp.ne.s32.totalorder %s25739_s3, %s23355_s9  ;;  %p23362_p11 = scmp.lt.u32.totalorder %s23355_s9, %s25739_s3 }
  0x52   : > { %p23358_p8 = pnand %p23356_p4, %p23652_p1 }
  0x54   : > { %p23359_p10 = pneg %p23358_p8 }
  0x56   : > { %p23364_p0 = pnand %p23362_p11, %p23359_p10 }
  0x58   : > { %23367 = shalt.err (!%p23364_p0)
}
  0x59   : > { %s23368_s13 = scalar_lea.vmem %s189_s16, 9216  ;;  %p23376_p6 = scmp.lt.s32.totalorder %s189_s16, %s189_s16 }
  0x5a   : > { %p23369_p2 = scmp.ne.s32.totalorder %s189_s16, %s23368_s13  ;;  %p23377_p7 = scmp.lt.s32.totalorder %s23368_s13, %s23368_s13 }
  0x5c   : > { %p23371_p3 = pnand %p23369_p2, %p23652_p1  ;;  %p23378_p9 = por %p23377_p7, %p23376_p6 }
  0x5e   : > { %p23372_p5 = pneg %p23371_p3 }
  0x60   : > { %p23379_p12 = pnand %p23378_p9, %p23372_p5 }
  0x62   : > { %23382 = shalt.err (!%p23379_p12)
}
  0x63   : > { %22857 = dma.hbm_to_vmem [thread:$0]  (!%p23640_p13), %s25739_s3, 9216, %s189_s16, [#allocation10], %s23533_s26, %s23533_s26, %s23534_s10  }
  0x64   : > { %s23383_s12 = scalar_lea.hbm %s25740_s4, 16 }
  0x65   : > { %p23384_p4 = scmp.ne.s32.totalorder %s25740_s4, %s23383_s12  ;;  %p23390_p11 = scmp.lt.u32.totalorder %s23383_s12, %s25740_s4 }
  0x67   : > { %p23386_p8 = pnand %p23384_p4, %p23652_p1 }
  0x69   : > { %p23387_p10 = pneg %p23386_p8 }
  0x6b   : > { %p23392_p0 = pnand %p23390_p11, %p23387_p10 }
  0x6d   : > { %23395 = shalt.err (!%p23392_p0)
}
  0x6e   : > { %s23396_s9 = scalar_lea.vmem %s203_s24, 16  ;;  %s23403_s26 = scalar_lea.vmem %s203_s24, 32 }
  0x6f   : > { %p23397_p2 = scmp.ne.s32.totalorder %s203_s24, %s23396_s9  ;;  %p23404_p6 = scmp.lt.s32.totalorder %s203_s24, %s203_s24 }
  0x70   : > { %p23405_p7 = scmp.lt.s32.totalorder %s23403_s26, %s23396_s9 }
  0x71   : > { %p23399_p3 = pnand %p23397_p2, %p23652_p1 }
  0x72   : > { %p23406_p9 = por %p23405_p7, %p23404_p6 }
  0x73   : > { %p23400_p5 = pneg %p23399_p3 }
  0x75   : > { %p23407_p12 = pnand %p23406_p9, %p23400_p5 }
  0x77   : > { %23410 = shalt.err (!%p23407_p12)
}
  0x78   : > { %22860 = dma.hbm_to_vmem [thread:$0]  (!%p23640_p13), %s25740_s4, 16, %s203_s24, [#allocation13]  }
  0x79   : > { %p25763_p4 = scmp.ne.s32.totalorder %s25758_s7, 0 }
  0x7b   : > { %215 = sbr.rel (%p25763_p4) target bundleno = 4387 (0x1123), region = 36 }
  0x82   : > { %p25764_p8 = scmp.ne.s32.totalorder %s25759_s8, 0 }
  0x84   : > { %23488 = dma.done.wait (%p25764_p8), [#allocation7], 36864  }
  0x85   : > { %23490 = vsyncadd (%p25764_p8), [#allocation7], 4294930432 }
  0x86   : > { %23492 = dma.done.wait (%p25764_p8), [#allocation10], 9280  }
  0x87   : > { %23494 = vsyncadd (%p25764_p8), [#allocation10], 4294958016 }
  0x88   : > { %23496 = dma.done.wait (%p25764_p8), [#allocation13], 16  }
  0x89   : > { %23498 = vsyncadd (%p25764_p8), [#allocation13], 4294967280  ;;  %s245_s7 = sand.u32 1, %s23511_s19   ;;  %s17448_s11 = smul.u32 6656, %s23519_s21  ;;  %v25749_v0 = vmov 0.0  }
  0x8a   : > { %s23740_s25 = sshll.u32 %s245_s7, 8  ;;  %267 = vst [vmem:[#allocation3] sm:$0xff] %v25749_v0  ;;  %268 = vst [vmem:[#allocation3 + $0x8] sm:$0xff] %v25749_v0  ;;  %s23538_s13 = smov [#allocation2]  }
  0x8b   : > { %269 = vst [vmem:[#allocation3 + $0x10] sm:$0x3] %v25749_v0  ;;  %270 = vst [vmem:[#allocation3 + $0x18] sm:$0xff] %v25749_v0  ;;  %s255_s15 = scalar_lea.hbm %s25736_s0, %s17448_s11  ;;  %s263_s2 = sshll.u32 %s23538_s13, 4  ;;  %s264_s2 = int_to_ptr.vmem [resolvable:$true] %s263_s2 }
  0x8c   : > { %271 = vst [vmem:[#allocation3 + $0x20] sm:$0xff] %v25749_v0  ;;  %272 = vst [vmem:[#allocation3 + $0x28] sm:$0x3] %v25749_v0  ;;  %s23411_s22 = scalar_lea.hbm %s255_s15, 6656  ;;  %s23413_s12 = scalar_lea.hbm %s25736_s0, 13312 }
  0x8d   : > { %273 = vst [vmem:[#allocation3 + $0x30] sm:$0xff] %v25749_v0  ;;  %274 = vst [vmem:[#allocation3 + $0x38] sm:$0xff] %v25749_v0  ;;  %p23412_p13 = scmp.ne.s32.totalorder %s255_s15, %s23411_s22  ;;  %p23414_p1 = scmp.lt.u32.totalorder %s255_s15, %s25736_s0 }
  0x8e   : > { %275 = vst [vmem:[#allocation3 + $0x40] sm:$0x3] %v25749_v0  ;;  %276 = vst [vmem:[#allocation3 + $0x48] sm:$0xff] %v25749_v0  ;;  %p23415_p10 = scmp.lt.u32.totalorder %s23413_s12, %s23411_s22  ;;  %p23417_p0 = scmp.lt.u32.totalorder %s23411_s22, %s255_s15 }
  0x8f   : > { %277 = vst [vmem:[#allocation3 + $0x50] sm:$0xff] %v25749_v0  ;;  %278 = vst [vmem:[#allocation3 + $0x58] sm:$0x3] %v25749_v0 }
  0x90   : > { %279 = vst [vmem:[#allocation3 + $0x60] sm:$0xff] %v25749_v0  ;;  %280 = vst [vmem:[#allocation3 + $0x68] sm:$0xff] %v25749_v0  ;;  %p23416_p11 = por %p23415_p10, %p23414_p1 }
  0x91   : > { %281 = vst [vmem:[#allocation3 + $0x70] sm:$0x3] %v25749_v0  ;;  %282 = vst [vmem:[#allocation3 + $0x78] sm:$0xff] %v25749_v0 }
  0x92   : > { %283 = vst [vmem:[#allocation3 + $0x80] sm:$0xff] %v25749_v0  ;;  %284 = vst [vmem:[#allocation3 + $0x88] sm:$0x3] %v25749_v0  ;;  %p23418_p2 = por %p23417_p0, %p23416_p11 }
  0x93   : > { %285 = vst [vmem:[#allocation3 + $0x90] sm:$0xff] %v25749_v0  ;;  %286 = vst [vmem:[#allocation3 + $0x98] sm:$0xff] %v25749_v0 }
  0x94   : > { %287 = vst [vmem:[#allocation3 + $0xa0] sm:$0x3] %v25749_v0  ;;  %288 = vst [vmem:[#allocation3 + $0xa8] sm:$0xff] %v25749_v0  ;;  %p23419_p3 = pnand %p23418_p2, %p23412_p13 }
  0x95   : > { %289 = vst [vmem:[#allocation3 + $0xb0] sm:$0xff] %v25749_v0  ;;  %290 = vst [vmem:[#allocation3 + $0xb8] sm:$0x3] %v25749_v0 }
  0x96   : > { %291 = vst [vmem:[#allocation3 + $0xc0] sm:$0xff] %v25749_v0  ;;  %292 = vst [vmem:[#allocation3 + $0xc8] sm:$0xff] %v25749_v0 }
  0x97   : > { %293 = vst [vmem:[#allocation3 + $0xd0] sm:$0x3] %v25749_v0  ;;  %294 = vst [vmem:[#allocation3 + $0xd8] sm:$0xff] %v25749_v0 }
  0x98   : > { %295 = vst [vmem:[#allocation3 + $0xe0] sm:$0xff] %v25749_v0  ;;  %296 = vst [vmem:[#allocation3 + $0xe8] sm:$0x3] %v25749_v0 }
  0x99   : > { %297 = vst [vmem:[#allocation3 + $0xf0] sm:$0xff] %v25749_v0  ;;  %298 = vst [vmem:[#allocation3 + $0xf8] sm:$0xff] %v25749_v0 }
  0x9a   : > { %299 = vst [vmem:[#allocation3 + $0x100] sm:$0x3] %v25749_v0  ;;  %300 = vst [vmem:[#allocation3 + $0x108] sm:$0xff] %v25749_v0 }
  0x9b   : > { %301 = vst [vmem:[#allocation3 + $0x110] sm:$0xff] %v25749_v0  ;;  %302 = vst [vmem:[#allocation3 + $0x118] sm:$0x3] %v25749_v0 }
  0x9c   : > { %303 = vst [vmem:[#allocation3 + $0x120] sm:$0xff] %v25749_v0  ;;  %304 = vst [vmem:[#allocation3 + $0x128] sm:$0xff] %v25749_v0 }
  0x9d   : > { %305 = vst [vmem:[#allocation3 + $0x130] sm:$0x3] %v25749_v0  ;;  %306 = vst [vmem:[#allocation3 + $0x138] sm:$0xff] %v25749_v0 }
  0x9e   : > { %307 = vst [vmem:[#allocation3 + $0x140] sm:$0xff] %v25749_v0  ;;  %308 = vst [vmem:[#allocation3 + $0x148] sm:$0x3] %v25749_v0 }
  0x9f   : > { %309 = vst [vmem:[#allocation3 + $0x150] sm:$0xff] %v25749_v0  ;;  %310 = vst [vmem:[#allocation3 + $0x158] sm:$0xff] %v25749_v0 }
  0xa0   : > { %311 = vst [vmem:[#allocation3 + $0x160] sm:$0x3] %v25749_v0  ;;  %312 = vst [vmem:[#allocation3 + $0x168] sm:$0xff] %v25749_v0 }
  0xa1   : > { %313 = vst [vmem:[#allocation3 + $0x170] sm:$0xff] %v25749_v0  ;;  %314 = vst [vmem:[#allocation3 + $0x178] sm:$0x3] %v25749_v0 }
  0xa2   : > { %315 = vst [vmem:[#allocation3 + $0x180] sm:$0xff] %v25749_v0  ;;  %316 = vst [vmem:[#allocation3 + $0x188] sm:$0xff] %v25749_v0 }
  0xa3   : > { %317 = vst [vmem:[#allocation3 + $0x190] sm:$0x3] %v25749_v0  ;;  %318 = vst [vmem:[#allocation3 + $0x198] sm:$0xff] %v25749_v0 }
  0xa4   : > { %319 = vst [vmem:[#allocation3 + $0x1a0] sm:$0xff] %v25749_v0  ;;  %320 = vst [vmem:[#allocation3 + $0x1a8] sm:$0x3] %v25749_v0 }
  0xa5   : > { %321 = vst [vmem:[#allocation3 + $0x1b0] sm:$0xff] %v25749_v0  ;;  %322 = vst [vmem:[#allocation3 + $0x1b8] sm:$0xff] %v25749_v0 }
  0xa6   : > { %323 = vst [vmem:[#allocation3 + $0x1c0] sm:$0x3] %v25749_v0  ;;  %324 = vst [vmem:[#allocation3 + $0x1c8] sm:$0xff] %v25749_v0 }
  0xa7   : > { %325 = vst [vmem:[#allocation3 + $0x1d0] sm:$0xff] %v25749_v0  ;;  %326 = vst [vmem:[#allocation3 + $0x1d8] sm:$0x3] %v25749_v0 }
  0xa8   : > { %327 = vst [vmem:[#allocation3 + $0x1e0] sm:$0xff] %v25749_v0  ;;  %328 = vst [vmem:[#allocation3 + $0x1e8] sm:$0xff] %v25749_v0 }
  0xa9   : > { %329 = vst [vmem:[#allocation3 + $0x1f0] sm:$0x3] %v25749_v0  ;;  %330 = vst [vmem:[#allocation3 + $0x1f8] sm:$0xff] %v25749_v0 }
  0xaa   : > { %331 = vst [vmem:[#allocation3 + $0x200] sm:$0xff] %v25749_v0  ;;  %332 = vst [vmem:[#allocation3 + $0x208] sm:$0x3] %v25749_v0 }
  0xab   : > { %333 = vst [vmem:[#allocation3 + $0x210] sm:$0xff] %v25749_v0  ;;  %334 = vst [vmem:[#allocation3 + $0x218] sm:$0xff] %v25749_v0 }
  0xac   : > { %335 = vst [vmem:[#allocation3 + $0x220] sm:$0x3] %v25749_v0  ;;  %336 = vst [vmem:[#allocation3 + $0x228] sm:$0xff] %v25749_v0 }
  0xad   : > { %337 = vst [vmem:[#allocation3 + $0x230] sm:$0xff] %v25749_v0  ;;  %338 = vst [vmem:[#allocation3 + $0x238] sm:$0x3] %v25749_v0 }
  0xae   : > { %339 = vst [vmem:[#allocation3 + $0x240] sm:$0xff] %v25749_v0  ;;  %340 = vst [vmem:[#allocation3 + $0x248] sm:$0xff] %v25749_v0 }
  0xaf   : > { %341 = vst [vmem:[#allocation3 + $0x250] sm:$0x3] %v25749_v0  ;;  %342 = vst [vmem:[#allocation3 + $0x258] sm:$0xff] %v25749_v0 }
  0xb0   : > { %343 = vst [vmem:[#allocation3 + $0x260] sm:$0xff] %v25749_v0  ;;  %344 = vst [vmem:[#allocation3 + $0x268] sm:$0x3] %v25749_v0 }
  0xb1   : > { %348 = vst [vmem:[#allocation4 + $0x18] sm:$0xff] %v25749_v0  ;;  %349 = vst [vmem:[#allocation4 + $0x20] sm:$0xff] %v25749_v0 }
  0xb2   : > { %350 = vst [vmem:[#allocation4 + $0x28] sm:$0x3] %v25749_v0  ;;  %351 = vst [vmem:[#allocation4 + $0x30] sm:$0xff] %v25749_v0 }
  0xb3   : > { %352 = vst [vmem:[#allocation4 + $0x38] sm:$0xff] %v25749_v0  ;;  %353 = vst [vmem:[#allocation4 + $0x40] sm:$0x3] %v25749_v0 }
  0xb4   : > { %354 = vst [vmem:[#allocation4 + $0x48] sm:$0xff] %v25749_v0  ;;  %355 = vst [vmem:[#allocation4 + $0x50] sm:$0xff] %v25749_v0 }
  0xb5   : > { %356 = vst [vmem:[#allocation4 + $0x58] sm:$0x3] %v25749_v0  ;;  %357 = vst [vmem:[#allocation4 + $0x60] sm:$0xff] %v25749_v0 }
  0xb6   : > { %358 = vst [vmem:[#allocation4 + $0x68] sm:$0xff] %v25749_v0  ;;  %359 = vst [vmem:[#allocation4 + $0x70] sm:$0x3] %v25749_v0 }
  0xb7   : > { %360 = vst [vmem:[#allocation4 + $0x78] sm:$0xff] %v25749_v0  ;;  %361 = vst [vmem:[#allocation4 + $0x80] sm:$0xff] %v25749_v0 }
  0xb8   : > { %362 = vst [vmem:[#allocation4 + $0x88] sm:$0x3] %v25749_v0  ;;  %363 = vst [vmem:[#allocation4 + $0x90] sm:$0xff] %v25749_v0 }
  0xb9   : > { %364 = vst [vmem:[#allocation4 + $0x98] sm:$0xff] %v25749_v0  ;;  %365 = vst [vmem:[#allocation4 + $0xa0] sm:$0x3] %v25749_v0 }
  0xba   : > { %366 = vst [vmem:[#allocation4 + $0xa8] sm:$0xff] %v25749_v0  ;;  %367 = vst [vmem:[#allocation4 + $0xb0] sm:$0xff] %v25749_v0 }
  0xbb   : > { %368 = vst [vmem:[#allocation4 + $0xb8] sm:$0x3] %v25749_v0  ;;  %369 = vst [vmem:[#allocation4 + $0xc0] sm:$0xff] %v25749_v0 }
  0xbc   : > { %370 = vst [vmem:[#allocation4 + $0xc8] sm:$0xff] %v25749_v0  ;;  %371 = vst [vmem:[#allocation4 + $0xd0] sm:$0x3] %v25749_v0 }
  0xbd   : > { %372 = vst [vmem:[#allocation4 + $0xd8] sm:$0xff] %v25749_v0  ;;  %373 = vst [vmem:[#allocation4 + $0xe0] sm:$0xff] %v25749_v0 }
  0xbe   : > { %374 = vst [vmem:[#allocation4 + $0xe8] sm:$0x3] %v25749_v0  ;;  %375 = vst [vmem:[#allocation4 + $0xf0] sm:$0xff] %v25749_v0 }
  0xbf   : > { %376 = vst [vmem:[#allocation4 + $0xf8] sm:$0xff] %v25749_v0  ;;  %377 = vst [vmem:[#allocation4 + $0x100] sm:$0x3] %v25749_v0 }
  0xc0   : > { %378 = vst [vmem:[#allocation4 + $0x108] sm:$0xff] %v25749_v0  ;;  %379 = vst [vmem:[#allocation4 + $0x110] sm:$0xff] %v25749_v0 }
  0xc1   : > { %380 = vst [vmem:[#allocation4 + $0x118] sm:$0x3] %v25749_v0  ;;  %381 = vst [vmem:[#allocation4 + $0x120] sm:$0xff] %v25749_v0 }
  0xc2   : > { %382 = vst [vmem:[#allocation4 + $0x128] sm:$0xff] %v25749_v0  ;;  %383 = vst [vmem:[#allocation4 + $0x130] sm:$0x3] %v25749_v0 }
  0xc3   : > { %384 = vst [vmem:[#allocation4 + $0x138] sm:$0xff] %v25749_v0  ;;  %385 = vst [vmem:[#allocation4 + $0x140] sm:$0xff] %v25749_v0 }
  0xc4   : > { %386 = vst [vmem:[#allocation4 + $0x148] sm:$0x3] %v25749_v0  ;;  %387 = vst [vmem:[#allocation4 + $0x150] sm:$0xff] %v25749_v0 }
  0xc5   : > { %388 = vst [vmem:[#allocation4 + $0x158] sm:$0xff] %v25749_v0  ;;  %389 = vst [vmem:[#allocation4 + $0x160] sm:$0x3] %v25749_v0 }
  0xc6   : > { %390 = vst [vmem:[#allocation4 + $0x168] sm:$0xff] %v25749_v0  ;;  %391 = vst [vmem:[#allocation4 + $0x170] sm:$0xff] %v25749_v0 }
  0xc7   : > { %392 = vst [vmem:[#allocation4 + $0x178] sm:$0x3] %v25749_v0  ;;  %393 = vst [vmem:[#allocation4 + $0x180] sm:$0xff] %v25749_v0 }
  0xc8   : > { %394 = vst [vmem:[#allocation4 + $0x188] sm:$0xff] %v25749_v0  ;;  %395 = vst [vmem:[#allocation4 + $0x190] sm:$0x3] %v25749_v0 }
  0xc9   : > { %396 = vst [vmem:[#allocation4 + $0x198] sm:$0xff] %v25749_v0  ;;  %397 = vst [vmem:[#allocation4 + $0x1a0] sm:$0xff] %v25749_v0 }
  0xca   : > { %398 = vst [vmem:[#allocation4 + $0x1a8] sm:$0x3] %v25749_v0  ;;  %399 = vst [vmem:[#allocation4 + $0x1b0] sm:$0xff] %v25749_v0 }
  0xcb   : > { %400 = vst [vmem:[#allocation4 + $0x1b8] sm:$0xff] %v25749_v0  ;;  %401 = vst [vmem:[#allocation4 + $0x1c0] sm:$0x3] %v25749_v0 }
  0xcc   : > { %402 = vst [vmem:[#allocation4 + $0x1c8] sm:$0xff] %v25749_v0  ;;  %403 = vst [vmem:[#allocation4 + $0x1d0] sm:$0xff] %v25749_v0 }
  0xcd   : > { %404 = vst [vmem:[#allocation4 + $0x1d8] sm:$0x3] %v25749_v0  ;;  %405 = vst [vmem:[#allocation4 + $0x1e0] sm:$0xff] %v25749_v0 }
  0xce   : > { %406 = vst [vmem:[#allocation4 + $0x1e8] sm:$0xff] %v25749_v0  ;;  %407 = vst [vmem:[#allocation4 + $0x1f0] sm:$0x3] %v25749_v0 }
  0xcf   : > { %408 = vst [vmem:[#allocation4 + $0x1f8] sm:$0xff] %v25749_v0  ;;  %409 = vst [vmem:[#allocation4 + $0x200] sm:$0xff] %v25749_v0 }
  0xd0   : > { %410 = vst [vmem:[#allocation4 + $0x208] sm:$0x3] %v25749_v0  ;;  %411 = vst [vmem:[#allocation4 + $0x210] sm:$0xff] %v25749_v0 }
  0xd1   : > { %412 = vst [vmem:[#allocation4 + $0x218] sm:$0xff] %v25749_v0  ;;  %413 = vst [vmem:[#allocation4 + $0x220] sm:$0x3] %v25749_v0 }
  0xd2   : > { %414 = vst [vmem:[#allocation4 + $0x228] sm:$0xff] %v25749_v0  ;;  %415 = vst [vmem:[#allocation4 + $0x230] sm:$0xff] %v25749_v0 }
  0xd3   : > { %416 = vst [vmem:[#allocation4 + $0x238] sm:$0x3] %v25749_v0  ;;  %417 = vst [vmem:[#allocation4 + $0x240] sm:$0xff] %v25749_v0 }
  0xd4   : > { %418 = vst [vmem:[#allocation4 + $0x248] sm:$0xff] %v25749_v0  ;;  %419 = vst [vmem:[#allocation4 + $0x250] sm:$0x3] %v25749_v0 }
  0xd5   : > { %23422 = shalt.err (!%p23419_p3)  }
  0xd6   : > { %s23423_s27 = scalar_lea.vmem %s264_s2, 6656  ;;  %p23428_p6 = scmp.lt.s32.totalorder %s264_s2, %s264_s2 }
  0xd7   : > { %p23424_p5 = scmp.ne.s32.totalorder %s264_s2, %s23423_s27  ;;  %p23429_p7 = scmp.lt.s32.totalorder %s23423_s27, %s23423_s27 }
  0xd9   : > { %p23430_p9 = por %p23429_p7, %p23428_p6 }
  0xdb   : > { %p23431_p12 = pnand %p23430_p9, %p23424_p5 }
  0xdd   : > { %23434 = shalt.err (!%p23431_p12)  }
  0xde   : > { %266 = dma.hbm_to_vmem [thread:$0]  %s255_s15, 6656, %s264_s2, [#allocation5] }
  0xdf   : > { %s23904_s29 = scalar_lea.vmem [#allocation14], %s23740_s25 }
  0xe0   : > { %23499 = dma.done.wait [#allocation5], 6656 }
  0xe1   : > { %23500 = vsyncadd [#allocation5], 4294960640  ;;  %v22934_v1 = vld [vmem:[#allocation6 + $0xc0] sm:$0xff]   ;;  %v22935_v2 = vld [vmem:[#allocation6 + $0xc8] sm:$0xff]   ;;  %s17449_s9 = sshll.u32 %s23519_s21, 12  ;;  %s16950_s26 = sshll.u32 %s23904_s29, 4  ;;  %s25682_s26 = int_to_ptr.vmem [resolvable:$true] %s16950_s26 }
  0xe2   : > { %18902 = vmatprep.subr.bf16.mxu0 %v22934_v1  ;;  %v22936_v3 = vld [vmem:[#allocation6 + $0xd0] sm:$0xff]   ;;  %v22937_v4 = vld [vmem:[#allocation6 + $0xd8] sm:$0xff]   ;;  %v23910_v7 = vld [vmem:[#allocation2 + $0x20] sm:$0xff]  ;;  %s25680_s11 = scalar_lea.hbm %s25741_s5, %s17449_s9  ;;  %s25690_s21 = scalar_lea.sflag [#allocation8], %s245_s7 }
  0xe3   : > { %18903 = vmatpush3.bf16.msra.mxu0 %v22934_v1  ;;  %v23906_v5 = vld [vmem:[#allocation2 + $0x10] sm:$0xff]  ;;  %v23908_v6 = vld [vmem:[#allocation2 + $0x18] sm:$0xff]  ;;  %v23914_v8 = vld [vmem:[#allocation2 + $0x28] sm:$0xff]  ;;  %483 = vst [vmem:[#allocation3 + $0x31] sm:$0xff] %v23910_v7  ;;  %s23435_s25 = scalar_lea.vmem %s25682_s26, 4096  ;;  %p25774_p8 = scmp.ne.s32.totalorder %s25755_s28, 0 }
  0xe4   : > { %18904 = vmatprep.subr.bf16.mxu0 %v22935_v2  ;;  %481 = vst [vmem:[#allocation3 + $0x19] sm:$0xff] %v23906_v5  ;;  %482 = vst [vmem:[#allocation3 + $0x21] sm:$0xff] %v23908_v6  ;;  %v23918_v9 = vld [vmem:[#allocation2 + $0x30] sm:$0xff]  ;;  %v23920_v10 = vld [vmem:[#allocation2 + $0x38] sm:$0xff]  ;;  %p23436_p4 = scmp.ne.s32.totalorder %s25682_s26, %s23435_s25  ;;  %s23540_s8 = smov [#allocation14]  }
  0xe5   : > { %484 = vst [vmem:[#allocation3 + $0x39] sm:$0xff] %v23914_v8  ;;  %485 = vst [vmem:[#allocation3 + $0x49] sm:$0xff] %v23918_v9  ;;  %v23924_v11 = vld [vmem:[#allocation2 + $0x40] sm:$0xff]  ;;  %v23926_v12 = vld [vmem:[#allocation2 + $0x48] sm:$0xff]  ;;  %s23439_s24 = sshll.u32 %s23540_s8, 4  ;;  %s23440_s24 = int_to_ptr.vmem [resolvable:$false] %s23439_s24 }
  0xe6   : > { %486 = vst [vmem:[#allocation3 + $0x51] sm:$0xff] %v23920_v10  ;;  %v22938_v13 = vld [vmem:[#allocation6 + $0xe0] sm:$0xff]   ;;  %487 = vst [vmem:[#allocation3 + $0x61] sm:$0xff] %v23924_v11  ;;  %v437_v14 = vld [vmem:[#allocation2 + $0x50] sm:$0xff]  ;;  %p23437_p13 = pnand %p23436_p4, %p25774_p8  ;;  %s23441_s15 = scalar_lea.vmem %s23440_s24, 8192 }
  0xe7   : > { %18905 = vmatpush3.bf16.msra.mxu0 %v22935_v2  ;;  %488 = vst [vmem:[#allocation3 + $0x69] sm:$0xff] %v23926_v12  ;;  %v438_v15 = vld [vmem:[#allocation2 + $0x58] sm:$0xff]  ;;  %489 = vst [vmem:[#allocation3 + $0x79] sm:$0xff] %v437_v14  ;;  %v439_v16 = vld [vmem:[#allocation2 + $0x60] sm:$0xff]  ;;  %p23442_p10 = scmp.lt.s32.totalorder %s25682_s26, %s23440_s24  ;;  %p23443_p11 = scmp.lt.s32.totalorder %s23441_s15, %s23435_s25 }
  0xe8   : > { %18906 = vmatprep.subr.bf16.mxu0 %v22936_v3  ;;  %v440_v17 = vld [vmem:[#allocation2 + $0x68] sm:$0xff]  ;;  %490 = vst [vmem:[#allocation3 + $0x81] sm:$0xff] %v438_v15  ;;  %491 = vst [vmem:[#allocation3 + $0x91] sm:$0xff] %v439_v16  ;;  %v441_v18 = vld [vmem:[#allocation2 + $0x70] sm:$0xff]  ;;  %v23930_v21 = vpack.c.bf16 %v438_v15, %v437_v14  ;;  %p23438_p1 = pneg %p23437_p13 }
  0xe9   : > { %492 = vst [vmem:[#allocation3 + $0x99] sm:$0xff] %v440_v17  ;;  %v442_v19 = vld [vmem:[#allocation2 + $0x78] sm:$0xff]  ;;  %v443_v20 = vld [vmem:[#allocation2 + $0x80] sm:$0xff]  ;;  %v23932_v22 = vpack.c.bf16 %v440_v17, %v439_v16  ;;  %493 = vst [vmem:[#allocation3 + $0xa9] sm:$0xff] %v441_v18  ;;  %p23444_p0 = por %p23443_p11, %p23442_p10 }
  0xea   : > { %494 = vst [vmem:[#allocation3 + $0xb1] sm:$0xff] %v442_v19  ;;  %v444_v23 = vld [vmem:[#allocation2 + $0x88] sm:$0xff]  ;;  %495 = vst [vmem:[#allocation3 + $0xc1] sm:$0xff] %v443_v20  ;;  %v445_v28 = vld [vmem:[#allocation2 + $0x90] sm:$0xff]  ;;  %v23934_v30 = vpack.c.bf16 %v442_v19, %v441_v18 }
  0xeb   : > { %18907 = vmatpush3.bf16.msra.mxu0 %v22936_v3  ;;  %v22939_v24 = vld [vmem:[#allocation6 + $0xe8] sm:$0xff]   ;;  %v1665_v25 = vld [vmem:[#allocation3 + $0x18] sm:$0xff]  ;;  %v1666_v26 = vld [vmem:[#allocation3 + $0x20] sm:$0xff]  ;;  %496 = vst [vmem:[#allocation3 + $0xc9] sm:$0xff] %v444_v23  ;;  %v23936_v32 = vpack.c.bf16 %v444_v23, %v443_v20  ;;  %p23445_p2 = pnand %p23444_p0, %p23438_p1 }
  0xec   : > { %18908 = vmatprep.subr.bf16.mxu0 %v22937_v4  ;;  %v1713_v27 = vpack.c.bf16 %v1666_v26, %v1665_v25  ;;  %v446_v29 = vld [vmem:[#allocation2 + $0x98] sm:$0xff]  ;;  %497 = vst [vmem:[#allocation3 + $0xd9] sm:$0xff] %v445_v28  ;;  %v447_v31 = vld [vmem:[#allocation2 + $0xa0] sm:$0xff]  ;;  %v22940_v33 = vld [vmem:[#allocation6 + $0xf0] sm:$0xff]  }
  0xed   : > { %498 = vst [vmem:[#allocation3 + $0xe1] sm:$0xff] %v446_v29  ;;  %v448_v34 = vld [vmem:[#allocation2 + $0xa8] sm:$0xff]  ;;  %499 = vst [vmem:[#allocation3 + $0xf1] sm:$0xff] %v447_v31  ;;  %v22941_v35 = vld [vmem:[#allocation6 + $0xf8] sm:$0xff]   ;;  %v23945_v45 = vpack.c.bf16 %v446_v29, %v445_v28 }
  0xee   : > { %18918 = vmatprep.mubr.bf16.mxu0 %v1713_v27  ;;  %500 = vst [vmem:[#allocation3 + $0xf9] sm:$0xff] %v448_v34  ;;  %v449_v36 = vld [vmem:[#allocation2 + $0xb0] sm:$0xff]  ;;  %v450_v37 = vld [vmem:[#allocation2 + $0xb8] sm:$0xff]  ;;  %v451_v38 = vld [vmem:[#allocation2 + $0xc0] sm:$0xff]  ;;  %v23951_v48 = vpack.c.bf16 %v448_v34, %v447_v31 }
  0xef   : > { %18909 = vmatpush3.bf16.msra.mxu0 %v22937_v4  ;;  %501 = vst [vmem:[#allocation3 + $0x109] sm:$0xff] %v449_v36  ;;  %502 = vst [vmem:[#allocation3 + $0x111] sm:$0xff] %v450_v37  ;;  %v452_v39 = vld [vmem:[#allocation2 + $0xc8] sm:$0xff]  ;;  %v23938_v40 = vld [vmem:[#allocation2 + $0xd0] sm:$0xff]  ;;  %v23968_v1 = vpack.c.bf16 %v450_v37, %v449_v36 }
  0xf0   : > { %18910 = vmatprep.subr.bf16.mxu0 %v22938_v13  ;;  %503 = vst [vmem:[#allocation3 + $0x121] sm:$0xff] %v451_v38  ;;  %v1667_v41 = vld [vmem:[#allocation3 + $0x30] sm:$0xff]  ;;  %v22942_v42 = vld [vmem:[#allocation6 + $0x100] sm:$0xff]   ;;  %504 = vst [vmem:[#allocation3 + $0x129] sm:$0xff] %v452_v39 }
  0xf1   : > { %v23940_v43 = vld [vmem:[#allocation2 + $0xd8] sm:$0xff]  ;;  %505 = vst [vmem:[#allocation3 + $0x139] sm:$0xff] %v23938_v40  ;;  %v23943_v44 = vld [vmem:[#allocation2 + $0xe0] sm:$0xff]  ;;  %v23948_v47 = vld [vmem:[#allocation2 + $0xe8] sm:$0xff] }
  0xf2   : > { %v1668_v46 = vld [vmem:[#allocation3 + $0x38] sm:$0xff]  ;;  %506 = vst [vmem:[#allocation3 + $0x141] sm:$0xff] %v23940_v43  ;;  %507 = vst [vmem:[#allocation3 + $0x151] sm:$0xff] %v23943_v44  ;;  %v1669_v49 = vld [vmem:[#allocation3 + $0x48] sm:$0xff]  ;;  %v23996_v28 = vpack.c.bf16 %v23940_v43, %v23938_v40  ;;  %v24000_v34 = vpack.c.bf16 %v23948_v47, %v23943_v44 }
  0xf3   : > { %18911 = vmatpush3.bf16.msra.mxu0 %v22938_v13  ;;  %v1670_v50 = vld [vmem:[#allocation3 + $0x50] sm:$0xff]  ;;  %508 = vst [vmem:[#allocation3 + $0x159] sm:$0xff] %v23948_v47  ;;  %v23956_v52 = vld [vmem:[#allocation2 + $0xf8] sm:$0xff]  ;;  %v23958_v53 = vld [vmem:[#allocation2 + $0x100] sm:$0xff]  ;;  %v1714_v54 = vpack.c.bf16 %v1668_v46, %v1667_v41  ;;  %v23975_v13 = vpack.c.bf16 %v452_v39, %v451_v38 }
  0xf4   : > { %18912 = vmatprep.subr.bf16.mxu0 %v22939_v24  ;;  %v23954_v51 = vld [vmem:[#allocation2 + $0xf0] sm:$0xff]  ;;  %510 = vst [vmem:[#allocation3 + $0x171] sm:$0xff] %v23956_v52  ;;  %v23962_v55 = vld [vmem:[#allocation2 + $0x108] sm:$0xff]  ;;  %511 = vst [vmem:[#allocation3 + $0x181] sm:$0xff] %v23958_v53  ;;  %v1715_v56 = vpack.c.bf16 %v1670_v50, %v1669_v49 }
  0xf5   : > { %509 = vst [vmem:[#allocation3 + $0x169] sm:$0xff] %v23954_v51  ;;  %512 = vst [vmem:[#allocation3 + $0x189] sm:$0xff] %v23962_v55  ;;  %v22943_v57 = vld [vmem:[#allocation6 + $0x108] sm:$0xff]   ;;  %v1671_v58 = vld [vmem:[#allocation3 + $0x60] sm:$0xff] }
  0xf6   : > { %v22948_v59 = vld [vmem:[#allocation6 + $0x40] sm:$0xff]   ;;  %v1672_v60 = vld [vmem:[#allocation3 + $0x68] sm:$0xff]  ;;  %v1673_v61 = vld [vmem:[#allocation3 + $0x78] sm:$0xff] }
  0xf7   : > { %18913 = vmatpush3.bf16.msra.mxu0 %v22939_v24  ;;  %v22944_v62 = vld [vmem:[#allocation6 + $0x110] sm:$0xff]   ;;  %v1674_v2 = vld [vmem:[#allocation3 + $0x80] sm:$0xff]  ;;  %v23970_v3 = vld [vmem:[#allocation2 + $0x118] sm:$0xff]  ;;  %18710 = vmatprep.subr.bf16.mxu1 %v22948_v59  ;;  %v1716_v15 = vpack.c.bf16 %v1672_v60, %v1671_v58  ;;  %v24026_v60 = vpack.c.bf16 %v23962_v55, %v23958_v53 }
  0xf8   : > { %18914 = vmatprep.subr.bf16.mxu0 %v22940_v33  ;;  %v23966_v63 = vld [vmem:[#allocation2 + $0x110] sm:$0xff]  ;;  %v23973_v4 = vld [vmem:[#allocation2 + $0x120] sm:$0xff]  ;;  %514 = vst [vmem:[#allocation3 + $0x1a1] sm:$0xff] %v23970_v3  ;;  %v23978_v14 = vld [vmem:[#allocation2 + $0x128] sm:$0xff]  ;;  %18711 = vmatpush3.bf16.msra.mxu1 %v22948_v59  ;;  %v1717_v18 = vpack.c.bf16 %v1674_v2, %v1673_v61 }
  0xf9   : > { %513 = vst [vmem:[#allocation3 + $0x199] sm:$0xff] %v23966_v63  ;;  %515 = vst [vmem:[#allocation3 + $0x1b1] sm:$0xff] %v23973_v4  ;;  %v22945_v16 = vld [vmem:[#allocation6 + $0x118] sm:$0xff]   ;;  %v22949_v17 = vld [vmem:[#allocation6 + $0x48] sm:$0xff]  }
  0xfa   : > { %516 = vst [vmem:[#allocation3 + $0x1b9] sm:$0xff] %v23978_v14  ;;  %v22950_v19 = vld [vmem:[#allocation6 + $0x50] sm:$0xff]   ;;  %18712 = vmatprep.subr.bf16.mxu1 %v22949_v17  ;;  %v23984_v23 = vld [vmem:[#allocation2 + $0x138] sm:$0xff]  ;;  %v23987_v24 = vld [vmem:[#allocation2 + $0x140] sm:$0xff] }
  0xfb   : > { %18915 = vmatpush3.bf16.msra.mxu0 %v22940_v33  ;;  %v23982_v20 = vld [vmem:[#allocation2 + $0x130] sm:$0xff]  ;;  %v23989_v25 = vld [vmem:[#allocation2 + $0x148] sm:$0xff]  ;;  %518 = vst [vmem:[#allocation3 + $0x1d1] sm:$0xff] %v23984_v23  ;;  %519 = vst [vmem:[#allocation3 + $0x1e1] sm:$0xff] %v23987_v24 }
  0xfc   : > { %18916 = vmatprep.subr.bf16.mxu0 %v22941_v35  ;;  %517 = vst [vmem:[#allocation3 + $0x1c9] sm:$0xff] %v23982_v20  ;;  %v1675_v26 = vld [vmem:[#allocation3 + $0x90] sm:$0xff]  ;;  %18713 = vmatpush3.bf16.msra.mxu1 %v22949_v17  ;;  %520 = vst [vmem:[#allocation3 + $0x1e9] sm:$0xff] %v23989_v25  ;;  %v1676_v27 = vld [vmem:[#allocation3 + $0x98] sm:$0xff]  ;;  %v24036_v17 = vpack.c.bf16 %v23970_v3, %v23966_v63  ;;  %v24046_v3 = vpack.c.bf16 %v23908_v6, %v23906_v5 }
  0xfd   : > { %18714 = vmatprep.subr.bf16.mxu1 %v22950_v19  ;;  %v1677_v29 = vld [vmem:[#allocation3 + $0xa8] sm:$0xff]  ;;  %v1678_v31 = vld [vmem:[#allocation3 + $0xb0] sm:$0xff]  ;;  %v22952_v33 = vld [vmem:[#allocation6 + $0x58] sm:$0xff]   ;;  %v1718_v39 = vpack.c.bf16 %v1676_v27, %v1675_v26  ;;  %v24040_v27 = vpack.c.bf16 %v23978_v14, %v23973_v4  ;;  %v24059_v5 = vpack.c.bf16 %v23989_v25, %v23987_v24 }
  0xfe   : > { %v22953_v36 = vld [vmem:[#allocation6 + $0x60] sm:$0xff]   ;;  %v24002_v37 = vld [vmem:[#allocation2 + $0x150] sm:$0xff]  ;;  %v24004_v38 = vld [vmem:[#allocation2 + $0x158] sm:$0xff] }
  0xff   : > { %18917 = vmatpush3.bf16.msra.mxu0 %v22941_v35  ;;  %v22946_v35 = vld [vmem:[#allocation6 + $0x120] sm:$0xff]   ;;  %521 = vst [vmem:[#allocation3 + $0x1f9] sm:$0xff] %v24002_v37  ;;  %522 = vst [vmem:[#allocation3 + $0x201] sm:$0xff] %v24004_v38  ;;  %v24010_v41 = vld [vmem:[#allocation2 + $0x168] sm:$0xff] }
 0x100   : > { %18966 = vmatprep.subr.bf16.mxu0 %v22942_v42  ;;  %18715 = vmatpush3.bf16.msra.mxu1 %v22950_v19  ;;  %v24008_v40 = vld [vmem:[#allocation2 + $0x160] sm:$0xff]  ;;  %524 = vst [vmem:[#allocation3 + $0x219] sm:$0xff] %v24010_v41  ;;  %v22947_v43 = vld [vmem:[#allocation6 + $0x128] sm:$0xff]   ;;  %v1681_v47 = vld [vmem:[#allocation3 + $0xd8] sm:$0xff] }
 0x101   : > { %18716 = vmatprep.subr.bf16.mxu1 %v22952_v33  ;;  %523 = vst [vmem:[#allocation3 + $0x211] sm:$0xff] %v24008_v40  ;;  %v1679_v44 = vld [vmem:[#allocation3 + $0xc0] sm:$0xff]  ;;  %v1680_v46 = vld [vmem:[#allocation3 + $0xc8] sm:$0xff]  ;;  %v22951_v50 = vld [vmem:[#allocation6 + $0x130] sm:$0xff]  }
 0x102   : > { %18919 = vmatmul.mubr.bf16.vlgmr.msra.gmra.mrb[0].mxu0 %v1714_v54  ;;  %v1682_v49 = vld [vmem:[#allocation3 + $0xe0] sm:$0xff]  ;;  %v22954_v54 = vld [vmem:[#allocation6 + $0x68] sm:$0xff]   ;;  %v24020_v58 = vld [vmem:[#allocation2 + $0x178] sm:$0xff] }
 0x103   : > { %18967 = vmatpush3.bf16.msra.mxu0 %v22942_v42  ;;  %18922 = vmatprep.mubr.bf16.mxu0 %v1715_v56  ;;  %v1719_v42 = vpack.c.bf16 %v1678_v31, %v1677_v29  ;;  %v24016_v56 = vpack.c.bf16 %v23956_v52, %v23954_v51  ;;  %v24022_v59 = vld [vmem:[#allocation2 + $0x180] sm:$0xff]  ;;  %526 = vst [vmem:[#allocation3 + $0x231] sm:$0xff] %v24020_v58  ;;  %v24030_v61 = vld [vmem:[#allocation2 + $0x188] sm:$0xff]  ;;  %v22956_v52 = vld [vmem:[#allocation6 + $0x70] sm:$0xff]  }
 0x104   : > { %18968 = vmatprep.subr.bf16.mxu0 %v22943_v57  ;;  %18717 = vmatpush3.bf16.msra.mxu1 %v22952_v33  ;;  %527 = vst [vmem:[#allocation3 + $0x241] sm:$0xff] %v24022_v59  ;;  %528 = vst [vmem:[#allocation3 + $0x249] sm:$0xff] %v24030_v61  ;;  %v1720_v51 = vpack.c.bf16 %v1680_v46, %v1679_v44  ;;  %v1721_v2 = vpack.c.bf16 %v1682_v49, %v1681_v47  ;;  %v428_v53 = vld [vmem:[#allocation2 + $0x8] sm:$0xff]  ;;  %v22955_v55 = vld [vmem:[#allocation6 + $0x138] sm:$0xff]  }
 0x105   : > { %18718 = vmatprep.subr.bf16.mxu1 %v22953_v36  ;;  %480 = vst [vmem:[#allocation3 + $0x9] sm:$0xff] %v428_v53  ;;  %v1684_v19 = vld [vmem:[#allocation3 + $0xf8] sm:$0xff]  ;;  %v1685_v26 = vld [vmem:[#allocation3 + $0x108] sm:$0xff]  ;;  %v1686_v29 = vld [vmem:[#allocation3 + $0x110] sm:$0xff]  ;;  %v24055_v44 = vpack.c.bf16 %v23914_v8, %v23910_v7  ;;  %v24069_v49 = vpack.c.bf16 %v24004_v38, %v24002_v37 }
 0x106   : > { %v24042_v31 = vld [vmem:[#allocation6 + $0x140] sm:$0xff]   ;;  %v1688_v4 = vld [vmem:[#allocation3 + $0x128] sm:$0xff]  ;;  %v1689_v14 = vld [vmem:[#allocation3 + $0x138] sm:$0xff] }
 0x107   : > { %18969 = vmatpush3.bf16.msra.mxu0 %v22943_v57  ;;  %v24018_v57 = vld [vmem:[#allocation2 + $0x170] sm:$0xff]  ;;  %v22964_v63 = vld [vmem:[#allocation6] sm:$0xff]   ;;  %v1692_v7 = vld [vmem:[#allocation3 + $0x158] sm:$0xff] }
 0x108   : > { %18970 = vmatprep.subr.bf16.mxu0 %v22944_v62  ;;  %525 = vst [vmem:[#allocation3 + $0x229] sm:$0xff] %v24018_v57  ;;  %18719 = vmatpush3.bf16.msra.mxu1 %v22953_v36  ;;  %v1687_v36 = vld [vmem:[#allocation3 + $0x120] sm:$0xff]  ;;  %v22966_v6 = vld [vmem:[#allocation6 + $0x10] sm:$0xff]   ;;  %v1693_v8 = vld [vmem:[#allocation3 + $0x168] sm:$0xff] }
 0x109   : > { %18720 = vmatprep.subr.bf16.mxu1 %v22954_v54  ;;  %v1724_v46 = vpack.c.bf16 %v1688_v4, %v1687_v36  ;;  %v1694_v24 = vld [vmem:[#allocation3 + $0x170] sm:$0xff]  ;;  %v22968_v25 = vld [vmem:[#allocation6 + $0x18] sm:$0xff]   ;;  %v1695_v37 = vld [vmem:[#allocation3 + $0x180] sm:$0xff] }
 0x10a   : > { %18923 = vmatmul.mubr.bf16.gmra.mrb[4].mxu0 %v1716_v15  ;;  %v1696_v38 = vld [vmem:[#allocation3 + $0x188] sm:$0xff]  ;;  %v1707_v4 = vld [vmem:[#allocation3 + $0x210] sm:$0xff] }
 0x10b   : > { %18926 = vmatprep.mubr.bf16.mxu0 %v1717_v18  ;;  %18971 = vmatpush3.bf16.msra.mxu0 %v22944_v62  ;;  %v427_v62 = vld [vmem:[#allocation2] sm:$0xff]  ;;  %v1683_v18 = vld [vmem:[#allocation3 + $0xf0] sm:$0xff] }
 0x10c   : > { %18972 = vmatprep.subr.bf16.mxu0 %v22945_v16  ;;  %479 = vst [vmem:[#allocation3 + $0x1] sm:$0xff] %v427_v62  ;;  %v667_v15 = vpack.c.bf16 %v428_v53, %v427_v62  ;;  %18721 = vmatpush3.bf16.msra.mxu1 %v22954_v54  ;;  %v1722_v33 = vpack.c.bf16 %v1684_v19, %v1683_v18  ;;  %v22972_v62 = vld [vmem:[#allocation6 + $0x30] sm:$0xff]  }
 0x10d   : > { %18722 = vmatprep.subr.bf16.mxu1 %v22956_v52 }
 0x10e   : > { %18726 = vmatprep.mubr.bf16.mxu1 %v667_v15  ;;  %v1701_v15 = vld [vmem:[#allocation3 + $0x1c8] sm:$0xff] }
 0x10f   : > { %18973 = vmatpush3.bf16.msra.mxu0 %v22945_v16  ;;  %v22957_v16 = vld [vmem:[#allocation6 + $0x78] sm:$0xff]  }
 0x110   : > { %18974 = vmatprep.subr.bf16.mxu0 %v22946_v35  ;;  %18723 = vmatpush3.bf16.msra.mxu1 %v22956_v52  ;;  %v1697_v52 = vld [vmem:[#allocation3 + $0x198] sm:$0xff] }
 0x111   : > { %18724 = vmatprep.subr.bf16.mxu1 %v22957_v16 }
 0x112   : > { %18927 = vmatmul.mubr.bf16.gmra.mrb[8].mxu0 %v1718_v39  ;;  %v1690_v39 = vld [vmem:[#allocation3 + $0x140] sm:$0xff] }
 0x113   : > { %18930 = vmatprep.mubr.bf16.mxu0 %v1719_v42  ;;  %18975 = vmatpush3.bf16.msra.mxu0 %v22946_v35  ;;  %v1723_v35 = vpack.c.bf16 %v1686_v29, %v1685_v26  ;;  %v22965_v42 = vld [vmem:[#allocation6 + $0x8] sm:$0xff]   ;;  %v1725_v47 = vpack.c.bf16 %v1690_v39, %v1689_v14  ;;  %v1703_v26 = vld [vmem:[#allocation3 + $0x1e0] sm:$0xff]  ;;  %v1708_v14 = vld [vmem:[#allocation3 + $0x218] sm:$0xff] }
 0x114   : > { %18976 = vmatprep.subr.bf16.mxu0 %v22947_v43  ;;  %18725 = vmatpush3.bf16.msra.mxu1 %v22957_v16  ;;  %v1702_v16 = vld [vmem:[#allocation3 + $0x1d0] sm:$0xff]  ;;  %v1704_v29 = vld [vmem:[#allocation3 + $0x1e8] sm:$0xff] }
 0x115   : > { %18774 = vmatprep.subr.bf16.mxu1 %v22964_v63  ;;  %v1731_v19 = vpack.c.bf16 %v1702_v16, %v1701_v15  ;;  %v1709_v39 = vld [vmem:[#allocation3 + $0x228] sm:$0xff]  ;;  %v543_v15 = vld [vmem:[#allocation3 + $0x90] sm:$0xff]  ;;  %v544_v16 = vld [vmem:[#allocation3 + $0x98] sm:$0xff] }
 0x117   : > { %18977 = vmatpush3.bf16.msra.mxu0 %v22947_v43  ;;  %v24051_v43 = vpack.c.bf16 %v23984_v23, %v23982_v20  ;;  %18727 = vmatmul.mubr.bf16.vlgmr.msra.gmra.mrb[0].mxu1 %v24046_v3  ;;  %v24065_v20 = vpack.c.bf16 %v23920_v10, %v23918_v9  ;;  %v1691_v23 = vld [vmem:[#allocation3 + $0x150] sm:$0xff]  ;;  %v24077_v9 = vpack.c.bf16 %v24010_v41, %v24008_v40  ;;  %v22969_v10 = vld [vmem:[#allocation6 + $0x20] sm:$0xff]  }
 0x118   : > { %18978 = vmatprep.subr.bf16.mxu0 %v22951_v50  ;;  %18730 = vmatprep.mubr.bf16.mxu1 %v24055_v44  ;;  %v1726_v54 = vpack.c.bf16 %v1692_v7, %v1691_v23  ;;  %v24083_v40 = vpack.c.bf16 %v24020_v58, %v24018_v57  ;;  %v2146_v41 = vpack.c.bf16 %v24030_v61, %v24022_v59  ;;  %v1699_v57 = vld [vmem:[#allocation3 + $0x1b0] sm:$0xff]  ;;  %v1700_v58 = vld [vmem:[#allocation3 + $0x1b8] sm:$0xff]  ;;  %v1712_v23 = vld [vmem:[#allocation3 + $0x248] sm:$0xff] }
 0x119   : > { %18775 = vmatpush3.bf16.msra.mxu1 %v22964_v63  ;;  %v1730_v18 = vpack.c.bf16 %v1700_v58, %v1699_v57  ;;  %v1732_v63 = vpack.c.bf16 %v1704_v29, %v1703_v26  ;;  %v542_v58 = vld [vmem:[#allocation3 + $0x80] sm:$0xff]  ;;  %v24134_v26 = vpack.c.bf16 %v544_v16, %v543_v15  ;;  %v546_v29 = vld [vmem:[#allocation3 + $0xb0] sm:$0xff]  ;;  %v569_v15 = vld [vmem:[#allocation3 + $0x1c8] sm:$0xff] }
 0x11a   : > { %18931 = vmatmul.mubr.bf16.gmra.mrb[12].mxu0 %v1720_v51  ;;  %18776 = vmatprep.subr.bf16.mxu1 %v22965_v42  ;;  %v1727_v51 = vpack.c.bf16 %v1694_v24, %v1693_v8  ;;  %v22959_v8 = vld [vmem:[#allocation6 + $0x148] sm:$0xff]   ;;  %v22960_v24 = vld [vmem:[#allocation6 + $0x150] sm:$0xff]  }
 0x11b   : > { %18934 = vmatprep.mubr.bf16.mxu0 %v1721_v2  ;;  %18979 = vmatpush3.bf16.msra.mxu0 %v22951_v50  ;;  %v24073_v50 = vpack.c.bf16 %v23926_v12, %v23924_v11  ;;  %v1698_v11 = vld [vmem:[#allocation3 + $0x1a0] sm:$0xff]  ;;  %v22970_v12 = vld [vmem:[#allocation6 + $0x28] sm:$0xff]   ;;  %v1728_v2 = vpack.c.bf16 %v1696_v38, %v1695_v37  ;;  %v535_v37 = vld [vmem:[#allocation3 + $0x30] sm:$0xff] }
 0x11c   : > { %18980 = vmatprep.subr.bf16.mxu0 %v22955_v55  ;;  %v1729_v53 = vpack.c.bf16 %v1698_v11, %v1697_v52  ;;  %v536_v38 = vld [vmem:[#allocation3 + $0x38] sm:$0xff]  ;;  %v537_v11 = vld [vmem:[#allocation3 + $0x48] sm:$0xff]  ;;  %v570_v16 = vld [vmem:[#allocation3 + $0x1d0] sm:$0xff] }
 0x11d   : > { %18777 = vmatpush3.bf16.msra.mxu1 %v22965_v42  ;;  %v1710_v42 = vld [vmem:[#allocation3 + $0x230] sm:$0xff]  ;;  %v2491_v59 = vld [vmem:[#allocation3 + $0x62] sm:$0xff] }
 0x11e   : > { %18778 = vmatprep.subr.bf16.mxu1 %v22966_v6  ;;  %v2492_v61 = vld [vmem:[#allocation3 + $0x6a] sm:$0xff] }
 0x11f   : > { %18981 = vmatpush3.bf16.msra.mxu0 %v22955_v55  ;;  %18731 = vmatmul.mubr.bf16.gmra.mrb[4].mxu1 %v24065_v20  ;;  %v22973_v55 = vld [vmem:[#allocation6 + $0x38] sm:$0xff]  }
 0x120   : > { %19030 = vmatprep.subr.bf16.mxu0 %v24042_v31  ;;  %18734 = vmatprep.mubr.bf16.mxu1 %v24073_v50 }
 0x121   : > { %18779 = vmatpush3.bf16.msra.mxu1 %v22966_v6  ;;  %v1734_v6 = vpack.c.bf16 %v1708_v14, %v1707_v4  ;;  %v550_v14 = vld [vmem:[#allocation3 + $0xe0] sm:$0xff] }
 0x122   : > { %18935 = vmatmul.mubr.bf16.gmra.mrb[16].mxu0 %v1722_v33  ;;  %18780 = vmatprep.subr.bf16.mxu1 %v22968_v25  ;;  %v1705_v33 = vld [vmem:[#allocation3 + $0x1f8] sm:$0xff] }
 0x123   : > { %18938 = vmatprep.mubr.bf16.mxu0 %v1723_v35  ;;  %v1706_v35 = vld [vmem:[#allocation3 + $0x200] sm:$0xff] }
 0x124   : > { %v1733_v36 = vpack.c.bf16 %v1706_v35, %v1705_v33  ;;  %v547_v33 = vld [vmem:[#allocation3 + $0xc0] sm:$0xff]  ;;  %v548_v35 = vld [vmem:[#allocation3 + $0xc8] sm:$0xff] }
 0x125   : > { %18781 = vmatpush3.bf16.msra.mxu1 %v22968_v25  ;;  %v22961_v25 = vld [vmem:[#allocation6 + $0x158] sm:$0xff]   ;;  %v24142_v4 = vpack.c.bf16 %v548_v35, %v547_v33  ;;  %v24201_v35 = vpack.c.bf16 %v570_v16, %v569_v15  ;;  %v2507_v16 = vld [vmem:[#allocation3 + $0x122] sm:$0xff] }
 0x126   : > { %18782 = vmatprep.subr.bf16.mxu1 %v22969_v10 }
 0x127   : > { %18735 = vmatmul.mubr.bf16.gmra.mrb[8].mxu1 %v23930_v21 }
 0x128   : > { %18738 = vmatprep.mubr.bf16.mxu1 %v23932_v22 }
 0x129   : > { %18783 = vmatpush3.bf16.msra.mxu1 %v22969_v10 }
 0x12a   : > { %18939 = vmatmul.mubr.bf16.gmra.mrb[20].mxu0 %v1724_v46  ;;  %18784 = vmatprep.subr.bf16.mxu1 %v22970_v12  ;;  %v1735_v46 = vpack.c.bf16 %v1710_v42, %v1709_v39  ;;  %v551_v39 = vld [vmem:[#allocation3 + $0xf0] sm:$0xff]  ;;  %v552_v42 = vld [vmem:[#allocation3 + $0xf8] sm:$0xff] }
 0x12b   : > { %18942 = vmatprep.mubr.bf16.mxu0 %v1725_v47  ;;  %v1711_v47 = vld [vmem:[#allocation3 + $0x240] sm:$0xff] }
 0x12c   : > { %v1736_v7 = vpack.c.bf16 %v1712_v23, %v1711_v47  ;;  %v555_v47 = vld [vmem:[#allocation3 + $0x120] sm:$0xff]  ;;  %v556_v23 = vld [vmem:[#allocation3 + $0x128] sm:$0xff] }
 0x12d   : > { %18785 = vmatpush3.bf16.msra.mxu1 %v22970_v12  ;;  %v538_v12 = vld [vmem:[#allocation3 + $0x50] sm:$0xff] }
 0x12e   : > { %18786 = vmatprep.subr.bf16.mxu1 %v22972_v62 }
 0x12f   : > { %18739 = vmatmul.mubr.bf16.gmra.mrb[12].mxu1 %v23934_v30 }
 0x130   : > { %18742 = vmatprep.mubr.bf16.mxu1 %v23936_v32 }
 0x131   : > { %18787 = vmatpush3.bf16.msra.mxu1 %v22972_v62  ;;  %v539_v62 = vld [vmem:[#allocation3 + $0x60] sm:$0xff] }
 0x132   : > { %18943 = vmatmul.mubr.bf16.gmra.mrb[24].mxu0 %v1726_v54  ;;  %18788 = vmatprep.subr.bf16.mxu1 %v22973_v55  ;;  %v534_v54 = vld [vmem:[#allocation3 + $0x20] sm:$0xff] }
 0x133   : > { %18946 = vmatprep.mubr.bf16.mxu0 %v1727_v51  ;;  %v24116_v51 = vld [vmem:[#allocation6 + $0x180] sm:$0xff]  }
 0x135   : > { %18789 = vmatpush3.bf16.msra.mxu1 %v22973_v55  ;;  %v24124_v55 = vpack.c.bf16 %v538_v12, %v537_v11  ;;  %v568_v11 = vld [vmem:[#allocation3 + $0x1b8] sm:$0xff] }
 0x137   : > { %18743 = vmatmul.mubr.bf16.gmra.mrb[16].mxu1 %v23945_v45 }
 0x138   : > { %18746 = vmatprep.mubr.bf16.mxu1 %v23951_v48 }
 0x13a   : > { %18947 = vmatmul.mubr.bf16.gmra.mrb[28].mxu0 %v1728_v2  ;;  %v540_v2 = vld [vmem:[#allocation3 + $0x68] sm:$0xff] }
 0x13b   : > { %18950 = vmatprep.mubr.bf16.mxu0 %v1729_v53  ;;  %v22982_v53 = vld [vmem:[#allocation6 + $0x90] sm:$0xff]   ;;  %v24126_v57 = vpack.c.bf16 %v540_v2, %v539_v62  ;;  %v22975_v62 = vld [vmem:[#allocation6 + $0x188] sm:$0xff]  }
 0x13f   : > { %18747 = vmatmul.mubr.bf16.gmra.mrb[20].mxu1 %v23968_v1 }
 0x140   : > { %18750 = vmatprep.mubr.bf16.mxu1 %v23975_v13 }
 0x142   : > { %18951 = vmatmul.mubr.bf16.gmra.mrb[32].mxu0 %v1730_v18  ;;  %v22985_v18 = vld [vmem:[#allocation6 + $0xa0] sm:$0xff]  }
 0x143   : > { %18954 = vmatprep.mubr.bf16.mxu0 %v1731_v19 }
 0x147   : > { %18751 = vmatmul.mubr.bf16.gmra.mrb[24].mxu1 %v23996_v28 }
 0x148   : > { %18754 = vmatprep.mubr.bf16.mxu1 %v24000_v34 }
 0x14a   : > { %18955 = vmatmul.mubr.bf16.gmra.mrb[36].mxu0 %v1732_v63  ;;  %v22988_v63 = vld [vmem:[#allocation6 + $0xb0] sm:$0xff]  }
 0x14b   : > { %18958 = vmatprep.mubr.bf16.mxu0 %v1733_v36 }
 0x14f   : > { %18755 = vmatmul.mubr.bf16.gmra.mrb[28].mxu1 %v24016_v56 }
 0x150   : > { %18758 = vmatprep.mubr.bf16.mxu1 %v24026_v60 }
 0x152   : > { %18959 = vmatmul.mubr.bf16.gmra.mrb[40].mxu0 %v1734_v6 }
 0x153   : > { %18962 = vmatprep.mubr.bf16.mxu0 %v1735_v46  ;;  %v24150_v46 = vpack.c.bf16 %v552_v42, %v551_v39  ;;  %v22978_v39 = vld [vmem:[#allocation6 + $0x1a0] sm:$0xff]   ;;  %v573_v42 = vld [vmem:[#allocation3 + $0x1f8] sm:$0xff] }
 0x157   : > { %18759 = vmatmul.mubr.bf16.gmra.mrb[32].mxu1 %v24036_v17 }
 0x158   : > { %18762 = vmatprep.mubr.bf16.mxu1 %v24040_v27 }
 0x15a   : > { %18963 = vmatmul.mubr.bf16.gmra.mrb[44].mxu0 %v1736_v7 }
 0x15b   : > { %18982 = vmatprep.mubr.bf16.mxu0 %v24046_v3  ;;  %v22962_v3 = vld [vmem:[#allocation6 + $0x160] sm:$0xff]  }
 0x15f   : > { %18763 = vmatmul.mubr.bf16.gmra.mrb[36].mxu1 %v24051_v43 }
 0x160   : > { %18766 = vmatprep.mubr.bf16.mxu1 %v24059_v5 }
 0x162   : > { %18983 = vmatmul.mubr.bf16.vlgmr.msra.gmra.mrb[0].mxu0 %v24055_v44  ;;  %v22967_v44 = vld [vmem:[#allocation6 + $0x170] sm:$0xff]  }
 0x163   : > { %19031 = vmatpush3.bf16.msra.mxu0 %v24042_v31  ;;  %18986 = vmatprep.mubr.bf16.mxu0 %v24065_v20  ;;  %v22963_v31 = vld [vmem:[#allocation6 + $0x168] sm:$0xff]  }
 0x164   : > { %19032 = vmatprep.subr.bf16.mxu0 %v22959_v8  ;;  %v532_v20 = vld [vmem:[#allocation3 + $0x8] sm:$0xff] }
 0x167   : > { %19033 = vmatpush3.bf16.msra.mxu0 %v22959_v8  ;;  %18767 = vmatmul.mubr.bf16.gmra.mrb[40].mxu1 %v24069_v49  ;;  %v24158_v8 = vpack.c.bf16 %v556_v23, %v555_v47  ;;  %v576_v47 = vld [vmem:[#allocation3 + $0x218] sm:$0xff] }
 0x168   : > { %19034 = vmatprep.subr.bf16.mxu0 %v22960_v24  ;;  %18770 = vmatprep.mubr.bf16.mxu1 %v24077_v9 }
 0x16a   : > { %18987 = vmatmul.mubr.bf16.gmra.mrb[4].mxu0 %v24073_v50  ;;  %v22971_v50 = vld [vmem:[#allocation6 + $0x178] sm:$0xff]  }
 0x16b   : > { %18990 = vmatprep.mubr.bf16.mxu0 %v23930_v21  ;;  %19035 = vmatpush3.bf16.msra.mxu0 %v22960_v24  ;;  %v531_v21 = vld [vmem:[#allocation3] sm:$0xff]  ;;  %v557_v24 = vld [vmem:[#allocation3 + $0x138] sm:$0xff] }
 0x16c   : > { %19036 = vmatprep.subr.bf16.mxu0 %v22961_v25  ;;  %v579_v10 = vpack.c.bf16 %v532_v20, %v531_v21  ;;  %v2486_v21 = vld [vmem:[#allocation3 + $0x22] sm:$0xff] }
 0x16d   : > { %v563_v20 = vld [vmem:[#allocation3 + $0x180] sm:$0xff] }
 0x16f   : > { %19037 = vmatpush3.bf16.msra.mxu0 %v22961_v25  ;;  %18771 = vmatmul.mubr.bf16.gmra.mrb[44].mxu1 %v24083_v40  ;;  %v560_v25 = vld [vmem:[#allocation3 + $0x158] sm:$0xff] }
 0x170   : > { %19038 = vmatprep.subr.bf16.mxu0 %v22962_v3  ;;  %18790 = vmatprep.mubr.bf16.mxu1 %v579_v10 }
 0x172   : > { %18991 = vmatmul.mubr.bf16.gmra.mrb[8].mxu0 %v23932_v22  ;;  %v533_v22 = vld [vmem:[#allocation3 + $0x18] sm:$0xff] }
 0x173   : > { %18994 = vmatprep.mubr.bf16.mxu0 %v23934_v30  ;;  %19039 = vmatpush3.bf16.msra.mxu0 %v22962_v3  ;;  %v22980_v30 = vld [vmem:[#allocation6 + $0x80] sm:$0xff]   ;;  %v580_v52 = vpack.c.bf16 %v534_v54, %v533_v22 }
 0x174   : > { %19040 = vmatprep.subr.bf16.mxu0 %v22963_v31  ;;  %18838 = vmatprep.subr.bf16.mxu1 %v22980_v30  ;;  %v2488_v54 = vld [vmem:[#allocation3 + $0x3a] sm:$0xff] }
 0x177   : > { %19041 = vmatpush3.bf16.msra.mxu0 %v22963_v31  ;;  %18791 = vmatmul.mubr.bf16.vlgmr.msra.gmra.mrb[0].mxu1 %v580_v52  ;;  %v566_v52 = vld [vmem:[#allocation3 + $0x1a0] sm:$0xff] }
 0x178   : > { %19042 = vmatprep.subr.bf16.mxu0 %v22967_v44  ;;  %18839 = vmatpush3.bf16.msra.mxu1 %v22980_v30  ;;  %v2487_v30 = vld [vmem:[#allocation3 + $0x32] sm:$0xff] }
 0x179   : > { %v24184_v12 = vpack.c.bf16 %v2488_v54, %v2487_v30  ;;  %v578_v30 = vld [vmem:[#allocation3 + $0x230] sm:$0xff]  ;;  %v1254_v54 = vld [vmem:[#allocation3 + $0x2] sm:$0xff] }
 0x17a   : > { %18995 = vmatmul.mubr.bf16.gmra.mrb[12].mxu0 %v23936_v32  ;;  %v24119_v32 = vpack.c.bf16 %v536_v38, %v535_v37  ;;  %v565_v38 = vld [vmem:[#allocation3 + $0x198] sm:$0xff] }
 0x17b   : > { %18998 = vmatprep.mubr.bf16.mxu0 %v23945_v45  ;;  %19043 = vmatpush3.bf16.msra.mxu0 %v22967_v44  ;;  %v22981_v45 = vld [vmem:[#allocation6 + $0x88] sm:$0xff]   ;;  %v2485_v44 = vld [vmem:[#allocation3 + $0x1a] sm:$0xff] }
 0x17c   : > { %19044 = vmatprep.subr.bf16.mxu0 %v22971_v50  ;;  %18794 = vmatprep.mubr.bf16.mxu1 %v24119_v32  ;;  %v24172_v10 = vpack.c.bf16 %v2486_v21, %v2485_v44  ;;  %v2500_v44 = vld [vmem:[#allocation3 + $0xca] sm:$0xff] }
 0x17d   : > { %18840 = vmatprep.subr.bf16.mxu1 %v22981_v45 }
 0x17e   : > { %18841 = vmatpush3.bf16.msra.mxu1 %v22981_v45  ;;  %v567_v45 = vld [vmem:[#allocation3 + $0x1b0] sm:$0xff] }
 0x17f   : > { %19045 = vmatpush3.bf16.msra.mxu0 %v22971_v50  ;;  %18842 = vmatprep.subr.bf16.mxu1 %v22982_v53  ;;  %v564_v50 = vld [vmem:[#allocation3 + $0x188] sm:$0xff] }
 0x180   : > { %19094 = vmatprep.subr.bf16.mxu0 %v24116_v51  ;;  %18795 = vmatmul.mubr.bf16.gmra.mrb[4].mxu1 %v24124_v55  ;;  %v24176_v37 = vpack.c.bf16 %v564_v50, %v563_v20  ;;  %v22983_v20 = vld [vmem:[#allocation6 + $0x1b0] sm:$0xff]   ;;  %v577_v50 = vld [vmem:[#allocation3 + $0x228] sm:$0xff] }
 0x181   : > { %18798 = vmatprep.mubr.bf16.mxu1 %v24126_v57 }
 0x182   : > { %18999 = vmatmul.mubr.bf16.gmra.mrb[16].mxu0 %v23951_v48  ;;  %v22984_v48 = vld [vmem:[#allocation6 + $0x98] sm:$0xff]   ;;  %18843 = vmatpush3.bf16.msra.mxu1 %v22982_v53  ;;  %v24188_v53 = vpack.c.bf16 %v566_v52, %v565_v38 }
 0x183   : > { %19002 = vmatprep.mubr.bf16.mxu0 %v23968_v1  ;;  %v541_v1 = vld [vmem:[#allocation3 + $0x78] sm:$0xff]  ;;  %18844 = vmatprep.subr.bf16.mxu1 %v22984_v48 }
 0x184   : > { %v24132_v19 = vpack.c.bf16 %v542_v58, %v541_v1  ;;  %v2494_v1 = vld [vmem:[#allocation3 + $0x82] sm:$0xff]  ;;  %v22976_v58 = vld [vmem:[#allocation6 + $0x190] sm:$0xff]   ;;  %v22987_v38 = vld [vmem:[#allocation6 + $0x1b8] sm:$0xff]  }
 0x186   : > { %18845 = vmatpush3.bf16.msra.mxu1 %v22984_v48  ;;  %v2493_v48 = vld [vmem:[#allocation3 + $0x7a] sm:$0xff] }
 0x187   : > { %18846 = vmatprep.subr.bf16.mxu1 %v22985_v18  ;;  %v24199_v33 = vpack.c.bf16 %v2494_v1, %v2493_v48  ;;  %v2506_v48 = vld [vmem:[#allocation3 + $0x112] sm:$0xff]  ;;  %v24225_v1 = vld [vmem:[#allocation6 + $0x1c0] sm:$0xff]  }
 0x188   : > { %18799 = vmatmul.mubr.bf16.gmra.mrb[8].mxu1 %v24132_v19 }
 0x189   : > { %18802 = vmatprep.mubr.bf16.mxu1 %v24134_v26 }
 0x18a   : > { %19003 = vmatmul.mubr.bf16.gmra.mrb[20].mxu0 %v23975_v13  ;;  %v22986_v13 = vld [vmem:[#allocation6 + $0xa8] sm:$0xff]   ;;  %18847 = vmatpush3.bf16.msra.mxu1 %v22985_v18  ;;  %v571_v18 = vld [vmem:[#allocation3 + $0x1e0] sm:$0xff] }
 0x18b   : > { %19006 = vmatprep.mubr.bf16.mxu0 %v23996_v28  ;;  %v545_v28 = vld [vmem:[#allocation3 + $0xa8] sm:$0xff]  ;;  %18848 = vmatprep.subr.bf16.mxu1 %v22986_v13 }
 0x18c   : > { %v24140_v36 = vpack.c.bf16 %v546_v29, %v545_v28  ;;  %v24197_v28 = vpack.c.bf16 %v2492_v61, %v2491_v59  ;;  %v22977_v29 = vld [vmem:[#allocation6 + $0x198] sm:$0xff]   ;;  %v2505_v61 = vld [vmem:[#allocation3 + $0x10a] sm:$0xff] }
 0x18d   : > { %v2543_v15 = vpack.c.bf16 %v2506_v48, %v2505_v61  ;;  %v2528_v61 = vld [vmem:[#allocation3 + $0x21a] sm:$0xff]  ;;  %v2529_v48 = vld [vmem:[#allocation3 + $0x22a] sm:$0xff] }
 0x18e   : > { %18849 = vmatpush3.bf16.msra.mxu1 %v22986_v13  ;;  %v572_v13 = vld [vmem:[#allocation3 + $0x1e8] sm:$0xff] }
 0x18f   : > { %18850 = vmatprep.subr.bf16.mxu1 %v22988_v63 }
 0x190   : > { %18803 = vmatmul.mubr.bf16.gmra.mrb[12].mxu1 %v24140_v36 }
 0x191   : > { %18806 = vmatprep.mubr.bf16.mxu1 %v24142_v4 }
 0x192   : > { %19007 = vmatmul.mubr.bf16.gmra.mrb[24].mxu0 %v24000_v34  ;;  %v22989_v34 = vld [vmem:[#allocation6 + $0xb8] sm:$0xff]   ;;  %18851 = vmatpush3.bf16.msra.mxu1 %v22988_v63 }
 0x193   : > { %19010 = vmatprep.mubr.bf16.mxu0 %v24016_v56  ;;  %v549_v56 = vld [vmem:[#allocation3 + $0xd8] sm:$0xff]  ;;  %18852 = vmatprep.subr.bf16.mxu1 %v22989_v34 }
 0x194   : > { %v24148_v6 = vpack.c.bf16 %v550_v14, %v549_v56  ;;  %v2496_v63 = vld [vmem:[#allocation3 + $0x9a] sm:$0xff]  ;;  %v2497_v56 = vld [vmem:[#allocation3 + $0xaa] sm:$0xff]  ;;  %v2498_v14 = vld [vmem:[#allocation3 + $0xb2] sm:$0xff] }
 0x196   : > { %18853 = vmatpush3.bf16.msra.mxu1 %v22989_v34  ;;  %v24203_v34 = vpack.c.bf16 %v572_v13, %v571_v18  ;;  %v2508_v18 = vld [vmem:[#allocation3 + $0x12a] sm:$0xff]  ;;  %v2509_v13 = vld [vmem:[#allocation3 + $0x13a] sm:$0xff] }
 0x198   : > { %18807 = vmatmul.mubr.bf16.gmra.mrb[16].mxu1 %v24148_v6 }
 0x199   : > { %18810 = vmatprep.mubr.bf16.mxu1 %v24150_v46 }
 0x19a   : > { %19011 = vmatmul.mubr.bf16.gmra.mrb[28].mxu0 %v24026_v60  ;;  %v553_v60 = vld [vmem:[#allocation3 + $0x108] sm:$0xff] }
 0x19b   : > { %19014 = vmatprep.mubr.bf16.mxu0 %v24036_v17  ;;  %v554_v17 = vld [vmem:[#allocation3 + $0x110] sm:$0xff] }
 0x19c   : > { %v24156_v7 = vpack.c.bf16 %v554_v17, %v553_v60  ;;  %v574_v60 = vld [vmem:[#allocation3 + $0x200] sm:$0xff]  ;;  %v575_v17 = vld [vmem:[#allocation3 + $0x210] sm:$0xff] }
 0x19d   : > { %v24215_v21 = vpack.c.bf16 %v576_v47, %v575_v17  ;;  %v24234_v47 = vld [vmem:[#allocation2 + $0x190] sm:$0xff] }
 0x19e   : > { %529 = vst [vmem:[#allocation3 + $0x259] sm:$0xff] %v24234_v47 }
 0x1a0   : > { %18811 = vmatmul.mubr.bf16.gmra.mrb[20].mxu1 %v24156_v7 }
 0x1a1   : > { %18814 = vmatprep.mubr.bf16.mxu1 %v24158_v8 }
 0x1a2   : > { %19015 = vmatmul.mubr.bf16.gmra.mrb[32].mxu0 %v24040_v27  ;;  %v558_v27 = vld [vmem:[#allocation3 + $0x140] sm:$0xff] }
 0x1a3   : > { %19018 = vmatprep.mubr.bf16.mxu0 %v24051_v43  ;;  %v559_v43 = vld [vmem:[#allocation3 + $0x150] sm:$0xff]  ;;  %v24164_v3 = vpack.c.bf16 %v558_v27, %v557_v24  ;;  %v22979_v24 = vld [vmem:[#allocation6 + $0x1a8] sm:$0xff]   ;;  %v24211_v27 = vpack.c.bf16 %v2498_v14, %v2497_v56  ;;  %v2512_v14 = vld [vmem:[#allocation3 + $0x15a] sm:$0xff] }
 0x1a4   : > { %v24166_v31 = vpack.c.bf16 %v560_v25, %v559_v43  ;;  %v24213_v43 = vpack.c.bf16 %v574_v60, %v573_v42  ;;  %v2499_v25 = vld [vmem:[#allocation3 + $0xc2] sm:$0xff]  ;;  %v2511_v56 = vld [vmem:[#allocation3 + $0x152] sm:$0xff] }
 0x1a5   : > { %v2514_v42 = vld [vmem:[#allocation3 + $0x172] sm:$0xff]  ;;  %v2546_v60 = vpack.c.bf16 %v2512_v14, %v2511_v56 }
 0x1a6   : > { %v23000_v56 = vld [vmem:[#allocation6 + $0x210] sm:$0xff]  }
 0x1a8   : > { %18815 = vmatmul.mubr.bf16.gmra.mrb[24].mxu1 %v24164_v3 }
 0x1a9   : > { %18818 = vmatprep.mubr.bf16.mxu1 %v24166_v31 }
 0x1aa   : > { %19019 = vmatmul.mubr.bf16.gmra.mrb[36].mxu0 %v24059_v5  ;;  %v561_v5 = vld [vmem:[#allocation3 + $0x168] sm:$0xff] }
 0x1ab   : > { %19022 = vmatprep.mubr.bf16.mxu0 %v24069_v49  ;;  %v562_v49 = vld [vmem:[#allocation3 + $0x170] sm:$0xff] }
 0x1ac   : > { %v24174_v22 = vpack.c.bf16 %v562_v49, %v561_v5  ;;  %v2501_v5 = vld [vmem:[#allocation3 + $0xda] sm:$0xff]  ;;  %v2502_v49 = vld [vmem:[#allocation3 + $0xe2] sm:$0xff] }
 0x1ad   : > { %v24221_v52 = vpack.c.bf16 %v2502_v49, %v2501_v5  ;;  %v2519_v5 = vld [vmem:[#allocation3 + $0x1b2] sm:$0xff]  ;;  %v2520_v49 = vld [vmem:[#allocation3 + $0x1ba] sm:$0xff] }
 0x1b0   : > { %18819 = vmatmul.mubr.bf16.gmra.mrb[28].mxu1 %v24174_v22 }
 0x1b1   : > { %18822 = vmatprep.mubr.bf16.mxu1 %v24176_v37 }
 0x1b2   : > { %19023 = vmatmul.mubr.bf16.gmra.mrb[40].mxu0 %v24077_v9  ;;  %v2489_v9 = vld [vmem:[#allocation3 + $0x4a] sm:$0xff] }
 0x1b3   : > { %19026 = vmatprep.mubr.bf16.mxu0 %v24083_v40  ;;  %v2490_v40 = vld [vmem:[#allocation3 + $0x52] sm:$0xff] }
 0x1b4   : > { %v24186_v2 = vpack.c.bf16 %v2490_v40, %v2489_v9  ;;  %v1255_v9 = vld [vmem:[#allocation3 + $0xa] sm:$0xff]  ;;  %v2540_v40 = vpack.c.bf16 %v2500_v44, %v2499_v25  ;;  %v2517_v25 = vld [vmem:[#allocation3 + $0x19a] sm:$0xff]  ;;  %v2518_v44 = vld [vmem:[#allocation3 + $0x1a2] sm:$0xff] }
 0x1b5   : > { %v1302_v59 = vpack.c.bf16 %v1255_v9, %v1254_v54  ;;  %v2523_v9 = vld [vmem:[#allocation3 + $0x1e2] sm:$0xff] }
 0x1b8   : > { %18823 = vmatmul.mubr.bf16.gmra.mrb[32].mxu1 %v24188_v53 }
 0x1ba   : > { %19027 = vmatmul.mubr.bf16.gmra.mrb[44].mxu0 %v2146_v41  ;;  %v24190_v41 = vpack.c.bf16 %v568_v11, %v567_v45  ;;  %v24223_v45 = vpack.c.bf16 %v578_v30, %v577_v50  ;;  %v2503_v11 = vld [vmem:[#allocation3 + $0xf2] sm:$0xff]  ;;  %v2550_v30 = vpack.c.bf16 %v2520_v49, %v2519_v5  ;;  %v3321_v49 = vld [vmem:[#allocation3 + $0xe1] sm:$0xff] }
 0x1bb   : > { %19046 = vmatprep.mubr.bf16.mxu0 %v24172_v10  ;;  %v2522_v50 = vld [vmem:[#allocation3 + $0x1d2] sm:$0xff] }
 0x1bc   : > { %18826 = vmatprep.mubr.bf16.mxu1 %v24190_v41  ;;  %v3320_v5 = vld [vmem:[#allocation3 + $0xd9] sm:$0xff] }
 0x1c0   : > { %18827 = vmatmul.mubr.bf16.gmra.mrb[36].mxu1 %v24201_v35 }
 0x1c1   : > { %18830 = vmatprep.mubr.bf16.mxu1 %v24203_v34 }
 0x1c2   : > { %19047 = vmatmul.mubr.bf16.vlgmr.msra.gmra.mrb[0].mxu0 %v24184_v12 }
 0x1c3   : > { %19095 = vmatpush3.bf16.msra.mxu0 %v24116_v51  ;;  %19050 = vmatprep.mubr.bf16.mxu0 %v24186_v2  ;;  %v2495_v51 = vld [vmem:[#allocation3 + $0x92] sm:$0xff] }
 0x1c4   : > { %19096 = vmatprep.subr.bf16.mxu0 %v22975_v62  ;;  %v24209_v23 = vpack.c.bf16 %v2496_v63, %v2495_v51  ;;  %v2544_v51 = vpack.c.bf16 %v2508_v18, %v2507_v16  ;;  %v2531_v18 = vld [vmem:[#allocation3 + $0x242] sm:$0xff] }
 0x1c7   : > { %19097 = vmatpush3.bf16.msra.mxu0 %v22975_v62  ;;  %v2504_v62 = vld [vmem:[#allocation3 + $0xfa] sm:$0xff] }
 0x1c8   : > { %19098 = vmatprep.subr.bf16.mxu0 %v22976_v58  ;;  %18831 = vmatmul.mubr.bf16.gmra.mrb[40].mxu1 %v24213_v43 }
 0x1c9   : > { %18834 = vmatprep.mubr.bf16.mxu1 %v24215_v21 }
 0x1ca   : > { %19051 = vmatmul.mubr.bf16.gmra.mrb[4].mxu0 %v24197_v28 }
 0x1cb   : > { %19054 = vmatprep.mubr.bf16.mxu0 %v24199_v33  ;;  %19099 = vmatpush3.bf16.msra.mxu0 %v22976_v58  ;;  %v2542_v58 = vpack.c.bf16 %v2504_v62, %v2503_v11  ;;  %v2526_v11 = vld [vmem:[#allocation3 + $0x202] sm:$0xff] }
 0x1cc   : > { %19100 = vmatprep.subr.bf16.mxu0 %v22977_v29 }
 0x1cf   : > { %19101 = vmatpush3.bf16.msra.mxu0 %v22977_v29  ;;  %v2510_v29 = vld [vmem:[#allocation3 + $0x142] sm:$0xff] }
 0x1d0   : > { %19102 = vmatprep.subr.bf16.mxu0 %v22978_v39  ;;  %18835 = vmatmul.mubr.bf16.gmra.mrb[44].mxu1 %v24223_v45  ;;  %v2545_v63 = vpack.c.bf16 %v2510_v29, %v2509_v13  ;;  %v2532_v13 = vld [vmem:[#allocation3 + $0x24a] sm:$0xff]  ;;  %v22993_v29 = vld [vmem:[#allocation6 + $0x1d8] sm:$0xff]  }
 0x1d1   : > { %18854 = vmatprep.mubr.bf16.mxu1 %v1302_v59  ;;  %v2527_v59 = vld [vmem:[#allocation3 + $0x212] sm:$0xff] }
 0x1d2   : > { %19055 = vmatmul.mubr.bf16.gmra.mrb[8].mxu0 %v24209_v23 }
 0x1d3   : > { %19058 = vmatprep.mubr.bf16.mxu0 %v24211_v27  ;;  %19103 = vmatpush3.bf16.msra.mxu0 %v22978_v39  ;;  %v2513_v39 = vld [vmem:[#allocation3 + $0x16a] sm:$0xff] }
 0x1d4   : > { %19104 = vmatprep.subr.bf16.mxu0 %v22979_v24  ;;  %v2547_v17 = vpack.c.bf16 %v2514_v42, %v2513_v39  ;;  %v23001_v42 = vld [vmem:[#allocation6 + $0x218] sm:$0xff]  }
 0x1d7   : > { %19105 = vmatpush3.bf16.msra.mxu0 %v22979_v24  ;;  %v24236_v24 = vld [vmem:[#allocation2 + $0x198] sm:$0xff] }
 0x1d8   : > { %19106 = vmatprep.subr.bf16.mxu0 %v22983_v20  ;;  %18855 = vmatmul.mubr.bf16.vlgmr.msra.gmra.mrb[0].mxu1 %v24172_v10  ;;  %530 = vst [vmem:[#allocation3 + $0x261] sm:$0xff] %v24236_v24  ;;  %v2515_v10 = vld [vmem:[#allocation3 + $0x182] sm:$0xff] }
 0x1d9   : > { %18858 = vmatprep.mubr.bf16.mxu1 %v24184_v12  ;;  %v2516_v12 = vld [vmem:[#allocation3 + $0x18a] sm:$0xff] }
 0x1da   : > { %19059 = vmatmul.mubr.bf16.gmra.mrb[12].mxu0 %v2540_v40 }
 0x1db   : > { %19062 = vmatprep.mubr.bf16.mxu0 %v24221_v52  ;;  %19107 = vmatpush3.bf16.msra.mxu0 %v22983_v20  ;;  %v2521_v20 = vld [vmem:[#allocation3 + $0x1ca] sm:$0xff] }
 0x1dc   : > { %19108 = vmatprep.subr.bf16.mxu0 %v22987_v38  ;;  %v2551_v54 = vpack.c.bf16 %v2522_v50, %v2521_v20  ;;  %v3322_v20 = vld [vmem:[#allocation3 + $0xf1] sm:$0xff]  ;;  %v3323_v50 = vld [vmem:[#allocation3 + $0xf9] sm:$0xff] }
 0x1df   : > { %19109 = vmatpush3.bf16.msra.mxu0 %v22987_v38  ;;  %v2524_v38 = vld [vmem:[#allocation3 + $0x1ea] sm:$0xff] }
 0x1e0   : > { %19158 = vmatprep.subr.bf16.mxu0 %v24225_v1  ;;  %18859 = vmatmul.mubr.bf16.gmra.mrb[4].mxu1 %v24186_v2  ;;  %v2548_v2 = vpack.c.bf16 %v2516_v12, %v2515_v10  ;;  %v3318_v10 = vld [vmem:[#allocation3 + $0xc1] sm:$0xff]  ;;  %v3319_v12 = vld [vmem:[#allocation3 + $0xc9] sm:$0xff] }
 0x1e1   : > { %18862 = vmatprep.mubr.bf16.mxu1 %v24197_v28  ;;  %v2549_v28 = vpack.c.bf16 %v2518_v44, %v2517_v25  ;;  %v23002_v25 = vld [vmem:[#allocation6 + $0x220] sm:$0xff]  }
 0x1e2   : > { %19063 = vmatmul.mubr.bf16.gmra.mrb[16].mxu0 %v2542_v58 }
 0x1e3   : > { %19066 = vmatprep.mubr.bf16.mxu0 %v2543_v15 }
 0x1e8   : > { %18863 = vmatmul.mubr.bf16.gmra.mrb[8].mxu1 %v24199_v33  ;;  %v2525_v33 = vld [vmem:[#allocation3 + $0x1fa] sm:$0xff] }
 0x1e9   : > { %18866 = vmatprep.mubr.bf16.mxu1 %v24209_v23  ;;  %v2552_v23 = vpack.c.bf16 %v2524_v38, %v2523_v9  ;;  %v2553_v62 = vpack.c.bf16 %v2526_v11, %v2525_v33  ;;  %v3362_v9 = vpack.c.bf16 %v3323_v50, %v3322_v20  ;;  %v23005_v38 = vld [vmem:[#allocation6 + $0x238] sm:$0xff]   ;;  %v3324_v33 = vld [vmem:[#allocation3 + $0x109] sm:$0xff] }
 0x1ea   : > { %19067 = vmatmul.mubr.bf16.gmra.mrb[20].mxu0 %v2544_v51  ;;  %v3325_v11 = vld [vmem:[#allocation3 + $0x111] sm:$0xff]  ;;  %v23011_v20 = vld [vmem:[#allocation6 + $0x2a8] sm:$0xff]  }
 0x1eb   : > { %19070 = vmatprep.mubr.bf16.mxu0 %v2545_v63  ;;  %v3348_v50 = vld [vmem:[#allocation3 + $0x229] sm:$0xff] }
 0x1f0   : > { %18867 = vmatmul.mubr.bf16.gmra.mrb[12].mxu1 %v24211_v27  ;;  %v2530_v27 = vld [vmem:[#allocation3 + $0x232] sm:$0xff] }
 0x1f1   : > { %18870 = vmatprep.mubr.bf16.mxu1 %v2540_v40  ;;  %v2554_v40 = vpack.c.bf16 %v2528_v61, %v2527_v59  ;;  %v24244_v16 = vpack.c.bf16 %v2530_v27, %v2529_v48  ;;  %v3363_v59 = vpack.c.bf16 %v3325_v11, %v3324_v33  ;;  %v3328_v48 = vld [vmem:[#allocation3 + $0x139] sm:$0xff]  ;;  %v3329_v27 = vld [vmem:[#allocation3 + $0x141] sm:$0xff]  ;;  %v23012_v33 = vld [vmem:[#allocation6 + $0x2b0] sm:$0xff]  }
 0x1f2   : > { %19071 = vmatmul.mubr.bf16.gmra.mrb[24].mxu0 %v2546_v60 }
 0x1f3   : > { %19074 = vmatprep.mubr.bf16.mxu0 %v2547_v17 }
 0x1f8   : > { %18871 = vmatmul.mubr.bf16.gmra.mrb[16].mxu1 %v24221_v52  ;;  %v24247_v52 = vpack.c.bf16 %v2532_v13, %v2531_v18  ;;  %v3331_v18 = vld [vmem:[#allocation3 + $0x159] sm:$0xff]  ;;  %v3365_v13 = vpack.c.bf16 %v3329_v27, %v3328_v48 }
 0x1f9   : > { %18874 = vmatprep.mubr.bf16.mxu1 %v2542_v58  ;;  %v22991_v58 = vld [vmem:[#allocation6 + $0x1c8] sm:$0xff]   ;;  %v3716_v48 = vld [vmem:[#allocation3 + $0x32] sm:$0xff]  ;;  %v3717_v27 = vld [vmem:[#allocation3 + $0x3a] sm:$0xff] }
 0x1fa   : > { %19075 = vmatmul.mubr.bf16.gmra.mrb[28].mxu0 %v2548_v2 }
 0x1fb   : > { %19078 = vmatprep.mubr.bf16.mxu0 %v2549_v28 }
 0x200   : > { %18875 = vmatmul.mubr.bf16.gmra.mrb[20].mxu1 %v2543_v15  ;;  %v22992_v15 = vld [vmem:[#allocation6 + $0x1d0] sm:$0xff]  }
 0x201   : > { %18878 = vmatprep.mubr.bf16.mxu1 %v2544_v51  ;;  %v3314_v51 = vld [vmem:[#allocation3 + $0x91] sm:$0xff] }
 0x202   : > { %19079 = vmatmul.mubr.bf16.gmra.mrb[32].mxu0 %v2550_v30 }
 0x203   : > { %19082 = vmatprep.mubr.bf16.mxu0 %v2551_v54 }
 0x208   : > { %18879 = vmatmul.mubr.bf16.gmra.mrb[24].mxu1 %v2545_v63  ;;  %v3315_v63 = vld [vmem:[#allocation3 + $0x99] sm:$0xff] }
 0x209   : > { %18882 = vmatprep.mubr.bf16.mxu1 %v2546_v60  ;;  %v3358_v39 = vpack.c.bf16 %v3315_v63, %v3314_v51  ;;  %v3316_v60 = vld [vmem:[#allocation3 + $0xa9] sm:$0xff] }
 0x20a   : > { %19083 = vmatmul.mubr.bf16.gmra.mrb[36].mxu0 %v2552_v23 }
 0x20b   : > { %19086 = vmatprep.mubr.bf16.mxu0 %v2553_v62 }
 0x210   : > { %18883 = vmatmul.mubr.bf16.gmra.mrb[28].mxu1 %v2547_v17  ;;  %v3317_v17 = vld [vmem:[#allocation3 + $0xb1] sm:$0xff] }
 0x211   : > { %18886 = vmatprep.mubr.bf16.mxu1 %v2548_v2  ;;  %v3359_v44 = vpack.c.bf16 %v3317_v17, %v3316_v60  ;;  %v3360_v2 = vpack.c.bf16 %v3319_v12, %v3318_v10  ;;  %v3345_v60 = vld [vmem:[#allocation3 + $0x201] sm:$0xff]  ;;  %v3346_v17 = vld [vmem:[#allocation3 + $0x211] sm:$0xff]  ;;  %v3347_v10 = vld [vmem:[#allocation3 + $0x219] sm:$0xff] }
 0x212   : > { %19087 = vmatmul.mubr.bf16.gmra.mrb[40].mxu0 %v2554_v40 }
 0x213   : > { %19090 = vmatprep.mubr.bf16.mxu0 %v24244_v16 }
 0x218   : > { %18887 = vmatmul.mubr.bf16.gmra.mrb[32].mxu1 %v2549_v28  ;;  %v23003_v28 = vld [vmem:[#allocation6 + $0x228] sm:$0xff]  }
 0x219   : > { %18890 = vmatprep.mubr.bf16.mxu1 %v2550_v30  ;;  %v23004_v30 = vld [vmem:[#allocation6 + $0x230] sm:$0xff]  }
 0x21a   : > { %19091 = vmatmul.mubr.bf16.gmra.mrb[44].mxu0 %v24247_v52 }
 0x21b   : > { %19110 = vmatprep.mubr.bf16.mxu0 %v24119_v32  ;;  %v22994_v32 = vld [vmem:[#allocation6 + $0x1e0] sm:$0xff]  }
 0x220   : > { %18891 = vmatmul.mubr.bf16.gmra.mrb[36].mxu1 %v2551_v54  ;;  %v3361_v54 = vpack.c.bf16 %v3321_v49, %v3320_v5 }
 0x221   : > { %18894 = vmatprep.mubr.bf16.mxu1 %v2552_v23  ;;  %v3326_v23 = vld [vmem:[#allocation3 + $0x121] sm:$0xff] }
 0x222   : > { %19111 = vmatmul.mubr.bf16.vlgmr.msra.gmra.mrb[0].mxu0 %v24124_v55  ;;  %v22995_v55 = vld [vmem:[#allocation6 + $0x1e8] sm:$0xff]  }
 0x223   : > { %19159 = vmatpush3.bf16.msra.mxu0 %v24225_v1  ;;  %19114 = vmatprep.mubr.bf16.mxu0 %v24126_v57  ;;  %v22996_v57 = vld [vmem:[#allocation6 + $0x1f0] sm:$0xff]   ;;  %v3313_v1 = vld [vmem:[#allocation3 + $0x81] sm:$0xff] }
 0x224   : > { %19160 = vmatprep.subr.bf16.mxu0 %v22991_v58 }
 0x227   : > { %19161 = vmatpush3.bf16.msra.mxu0 %v22991_v58 }
 0x228   : > { %19162 = vmatprep.subr.bf16.mxu0 %v22992_v15  ;;  %18895 = vmatmul.mubr.bf16.gmra.mrb[40].mxu1 %v2553_v62  ;;  %v3327_v62 = vld [vmem:[#allocation3 + $0x129] sm:$0xff] }
 0x229   : > { %18898 = vmatprep.mubr.bf16.mxu1 %v2554_v40  ;;  %v3364_v61 = vpack.c.bf16 %v3327_v62, %v3326_v23  ;;  %v3330_v40 = vld [vmem:[#allocation3 + $0x151] sm:$0xff] }
 0x22a   : > { %19115 = vmatmul.mubr.bf16.gmra.mrb[4].mxu0 %v24132_v19  ;;  %v22997_v19 = vld [vmem:[#allocation6 + $0x1f8] sm:$0xff]   ;;  %v3366_v58 = vpack.c.bf16 %v3331_v18, %v3330_v40  ;;  %v3377_v40 = vpack.c.bf16 %v24236_v24, %v24234_v47  ;;  %v3764_v18 = vpack.c.bf16 %v3717_v27, %v3716_v48 }
 0x22b   : > { %19118 = vmatprep.mubr.bf16.mxu0 %v24134_v26  ;;  %19163 = vmatpush3.bf16.msra.mxu0 %v22992_v15  ;;  %v22998_v26 = vld [vmem:[#allocation6 + $0x200] sm:$0xff]   ;;  %v3332_v15 = vld [vmem:[#allocation3 + $0x169] sm:$0xff] }
 0x22c   : > { %19164 = vmatprep.subr.bf16.mxu0 %v22993_v29 }
 0x22f   : > { %19165 = vmatpush3.bf16.msra.mxu0 %v22993_v29  ;;  %v3333_v29 = vld [vmem:[#allocation3 + $0x171] sm:$0xff] }
 0x230   : > { %19166 = vmatprep.subr.bf16.mxu0 %v22994_v32  ;;  %18899 = vmatmul.mubr.bf16.gmra.mrb[44].mxu1 %v24244_v16 }
 0x232   : > { %19119 = vmatmul.mubr.bf16.gmra.mrb[8].mxu0 %v24140_v36  ;;  %v2940_v36 = vld [vmem:[#allocation3 + $0x240] sm:$0xff] }
 0x233   : > { %19122 = vmatprep.mubr.bf16.mxu0 %v24142_v4  ;;  %19167 = vmatpush3.bf16.msra.mxu0 %v22994_v32  ;;  %v2941_v4 = vld [vmem:[#allocation3 + $0x248] sm:$0xff] }
 0x234   : > { %19168 = vmatprep.subr.bf16.mxu0 %v22995_v55  ;;  %v3334_v32 = vld [vmem:[#allocation3 + $0x181] sm:$0xff] }
 0x237   : > { %19169 = vmatpush3.bf16.msra.mxu0 %v22995_v55  ;;  %v3335_v55 = vld [vmem:[#allocation3 + $0x189] sm:$0xff] }
 0x238   : > { %19170 = vmatprep.subr.bf16.mxu0 %v22996_v57 }
 0x23a   : > { %19123 = vmatmul.mubr.bf16.gmra.mrb[12].mxu0 %v24148_v6  ;;  %v2966_v6 = vpack.c.bf16 %v2941_v4, %v2940_v36  ;;  %v3337_v36 = vld [vmem:[#allocation3 + $0x1a1] sm:$0xff]  ;;  %v3338_v4 = vld [vmem:[#allocation3 + $0x1b1] sm:$0xff] }
 0x23b   : > { %19126 = vmatprep.mubr.bf16.mxu0 %v24150_v46  ;;  %19171 = vmatpush3.bf16.msra.mxu0 %v22996_v57  ;;  %v2942_v46 = vld [vmem:[#allocation3 + $0x258] sm:$0xff]  ;;  %v3367_v57 = vpack.c.bf16 %v3333_v29, %v3332_v15 }
 0x23c   : > { %19172 = vmatprep.subr.bf16.mxu0 %v22997_v19 }
 0x23f   : > { %19173 = vmatpush3.bf16.msra.mxu0 %v22997_v19  ;;  %v3368_v19 = vpack.c.bf16 %v3335_v55, %v3334_v32  ;;  %v3718_v32 = vld [vmem:[#allocation3 + $0x4a] sm:$0xff]  ;;  %v3719_v55 = vld [vmem:[#allocation3 + $0x52] sm:$0xff] }
 0x240   : > { %19222 = vmatprep.subr.bf16.mxu0 %v22998_v26 }
 0x242   : > { %19127 = vmatmul.mubr.bf16.gmra.mrb[16].mxu0 %v24156_v7  ;;  %v2943_v7 = vld [vmem:[#allocation3 + $0x260] sm:$0xff] }
 0x243   : > { %19130 = vmatprep.mubr.bf16.mxu0 %v24158_v8  ;;  %v3306_v8 = vld [vmem:[#allocation3 + $0x31] sm:$0xff] }
 0x24a   : > { %19131 = vmatmul.mubr.bf16.gmra.mrb[20].mxu0 %v24164_v3  ;;  %v3307_v3 = vld [vmem:[#allocation3 + $0x39] sm:$0xff] }
 0x24b   : > { %19134 = vmatprep.mubr.bf16.mxu0 %v24166_v31  ;;  %v2967_v31 = vpack.c.bf16 %v2943_v7, %v2942_v46 }
 0x252   : > { %19135 = vmatmul.mubr.bf16.gmra.mrb[24].mxu0 %v24174_v22  ;;  %v3354_v22 = vpack.c.bf16 %v3307_v3, %v3306_v8 }
 0x253   : > { %19138 = vmatprep.mubr.bf16.mxu0 %v24176_v37  ;;  %v3308_v37 = vld [vmem:[#allocation3 + $0x49] sm:$0xff] }
 0x25a   : > { %19139 = vmatmul.mubr.bf16.gmra.mrb[28].mxu0 %v24188_v53  ;;  %v3309_v53 = vld [vmem:[#allocation3 + $0x51] sm:$0xff] }
 0x25b   : > { %19142 = vmatprep.mubr.bf16.mxu0 %v24190_v41  ;;  %v3310_v41 = vld [vmem:[#allocation3 + $0x61] sm:$0xff] }
 0x262   : > { %19143 = vmatmul.mubr.bf16.gmra.mrb[32].mxu0 %v24201_v35  ;;  %v3311_v35 = vld [vmem:[#allocation3 + $0x69] sm:$0xff] }
 0x263   : > { %19146 = vmatprep.mubr.bf16.mxu0 %v24203_v34  ;;  %v3355_v34 = vpack.c.bf16 %v3309_v53, %v3308_v37  ;;  %v23006_v37 = vld [vmem:[#allocation6 + $0x280] sm:$0xff]   ;;  %v23007_v53 = vld [vmem:[#allocation6 + $0x288] sm:$0xff]  }
 0x264   : > { %19286 = vmatprep.subr.bf16.mxu1 %v23006_v37 }
 0x265   : > { %19287 = vmatpush3.bf16.msra.mxu1 %v23006_v37  ;;  %v3724_v37 = vld [vmem:[#allocation3 + $0x92] sm:$0xff] }
 0x266   : > { %19288 = vmatprep.subr.bf16.mxu1 %v23007_v53 }
 0x269   : > { %19289 = vmatpush3.bf16.msra.mxu1 %v23007_v53  ;;  %v3725_v53 = vld [vmem:[#allocation3 + $0x9a] sm:$0xff] }
 0x26a   : > { %19147 = vmatmul.mubr.bf16.gmra.mrb[36].mxu0 %v24213_v43  ;;  %v3356_v43 = vpack.c.bf16 %v3311_v35, %v3310_v41  ;;  %v3340_v41 = vld [vmem:[#allocation3 + $0x1c9] sm:$0xff]  ;;  %v3341_v35 = vld [vmem:[#allocation3 + $0x1d1] sm:$0xff] }
 0x26b   : > { %19150 = vmatprep.mubr.bf16.mxu0 %v24215_v21  ;;  %v22999_v21 = vld [vmem:[#allocation6 + $0x208] sm:$0xff]  }
 0x272   : > { %19151 = vmatmul.mubr.bf16.gmra.mrb[40].mxu0 %v24223_v45  ;;  %v3312_v45 = vld [vmem:[#allocation3 + $0x79] sm:$0xff] }
 0x273   : > { %19154 = vmatprep.mubr.bf16.mxu0 %v2966_v6  ;;  %v3357_v14 = vpack.c.bf16 %v3313_v1, %v3312_v45  ;;  %v3339_v6 = vld [vmem:[#allocation3 + $0x1b9] sm:$0xff]  ;;  %v23008_v45 = vld [vmem:[#allocation6 + $0x290] sm:$0xff]  }
 0x274   : > { %v3370_v7 = vpack.c.bf16 %v3339_v6, %v3338_v4  ;;  %19290 = vmatprep.subr.bf16.mxu1 %v23008_v45 }
 0x275   : > { %19291 = vmatpush3.bf16.msra.mxu1 %v23008_v45 }
 0x27a   : > { %19155 = vmatmul.mubr.bf16.gmra.mrb[44].mxu0 %v2967_v31 }
 0x27b   : > { %19174 = vmatprep.mubr.bf16.mxu0 %v3354_v22 }
 0x282   : > { %19175 = vmatmul.mubr.bf16.vlgmr.msra.gmra.mrb[0].mxu0 %v3355_v34  ;;  %v3342_v34 = vld [vmem:[#allocation3 + $0x1e1] sm:$0xff] }
 0x283   : > { %19223 = vmatpush3.bf16.msra.mxu0 %v22998_v26  ;;  %19178 = vmatprep.mubr.bf16.mxu0 %v3356_v43  ;;  %v3336_v26 = vld [vmem:[#allocation3 + $0x199] sm:$0xff]  ;;  %v3343_v43 = vld [vmem:[#allocation3 + $0x1e9] sm:$0xff] }
 0x284   : > { %19224 = vmatprep.subr.bf16.mxu0 %v22999_v21  ;;  %v3369_v46 = vpack.c.bf16 %v3337_v36, %v3336_v26  ;;  %v3372_v1 = vpack.c.bf16 %v3343_v43, %v3342_v34  ;;  %v3765_v26 = vpack.c.bf16 %v3719_v55, %v3718_v32  ;;  %v3735_v32 = vld [vmem:[#allocation3 + $0x112] sm:$0xff]  ;;  %v3736_v55 = vld [vmem:[#allocation3 + $0x122] sm:$0xff] }
 0x287   : > { %19225 = vmatpush3.bf16.msra.mxu0 %v22999_v21  ;;  %v3371_v21 = vpack.c.bf16 %v3341_v35, %v3340_v41  ;;  %v3768_v35 = vpack.c.bf16 %v3725_v53, %v3724_v37  ;;  %v3738_v53 = vld [vmem:[#allocation3 + $0x13a] sm:$0xff] }
 0x288   : > { %19226 = vmatprep.subr.bf16.mxu0 %v23000_v56 }
 0x28a   : > { %19179 = vmatmul.mubr.bf16.gmra.mrb[4].mxu0 %v3357_v14 }
 0x28b   : > { %19182 = vmatprep.mubr.bf16.mxu0 %v3358_v39  ;;  %19227 = vmatpush3.bf16.msra.mxu0 %v23000_v56  ;;  %v23009_v39 = vld [vmem:[#allocation6 + $0x298] sm:$0xff]  }
 0x28c   : > { %19228 = vmatprep.subr.bf16.mxu0 %v23001_v42  ;;  %19292 = vmatprep.subr.bf16.mxu1 %v23009_v39 }
 0x28d   : > { %19293 = vmatpush3.bf16.msra.mxu1 %v23009_v39  ;;  %v3727_v39 = vld [vmem:[#allocation3 + $0xb2] sm:$0xff] }
 0x28f   : > { %19229 = vmatpush3.bf16.msra.mxu0 %v23001_v42  ;;  %v3344_v42 = vld [vmem:[#allocation3 + $0x1f9] sm:$0xff] }
 0x290   : > { %19230 = vmatprep.subr.bf16.mxu0 %v23002_v25  ;;  %v3373_v12 = vpack.c.bf16 %v3345_v60, %v3344_v42  ;;  %v3728_v42 = vld [vmem:[#allocation3 + $0xc2] sm:$0xff]  ;;  %v3729_v60 = vld [vmem:[#allocation3 + $0xca] sm:$0xff] }
 0x292   : > { %19183 = vmatmul.mubr.bf16.gmra.mrb[8].mxu0 %v3359_v44  ;;  %v3374_v44 = vpack.c.bf16 %v3347_v10, %v3346_v17  ;;  %v3770_v10 = vpack.c.bf16 %v3729_v60, %v3728_v42 }
 0x293   : > { %19186 = vmatprep.mubr.bf16.mxu0 %v3360_v2  ;;  %19231 = vmatpush3.bf16.msra.mxu0 %v23002_v25  ;;  %v23010_v25 = vld [vmem:[#allocation6 + $0x2a0] sm:$0xff]  }
 0x294   : > { %19232 = vmatprep.subr.bf16.mxu0 %v23003_v28  ;;  %19294 = vmatprep.subr.bf16.mxu1 %v23010_v25 }
 0x295   : > { %19295 = vmatpush3.bf16.msra.mxu1 %v23010_v25 }
 0x296   : > { %19296 = vmatprep.subr.bf16.mxu1 %v23011_v20 }
 0x297   : > { %19233 = vmatpush3.bf16.msra.mxu0 %v23003_v28 }
 0x298   : > { %19234 = vmatprep.subr.bf16.mxu0 %v23004_v30 }
 0x299   : > { %19297 = vmatpush3.bf16.msra.mxu1 %v23011_v20 }
 0x29a   : > { %19187 = vmatmul.mubr.bf16.gmra.mrb[12].mxu0 %v3361_v54  ;;  %v3350_v54 = vld [vmem:[#allocation3 + $0x241] sm:$0xff]  ;;  %19298 = vmatprep.subr.bf16.mxu1 %v23012_v33 }
 0x29b   : > { %19190 = vmatprep.mubr.bf16.mxu0 %v3362_v9  ;;  %19235 = vmatpush3.bf16.msra.mxu0 %v23004_v30  ;;  %v3349_v30 = vld [vmem:[#allocation3 + $0x231] sm:$0xff]  ;;  %v3351_v9 = vld [vmem:[#allocation3 + $0x249] sm:$0xff] }
 0x29c   : > { %19236 = vmatprep.subr.bf16.mxu0 %v23005_v38  ;;  %v3376_v11 = vpack.c.bf16 %v3351_v9, %v3350_v54  ;;  %v3732_v54 = vld [vmem:[#allocation3 + $0xf2] sm:$0xff]  ;;  %v3733_v9 = vld [vmem:[#allocation3 + $0xfa] sm:$0xff] }
 0x29d   : > { %19299 = vmatpush3.bf16.msra.mxu1 %v23012_v33  ;;  %v3772_v33 = vpack.c.bf16 %v3733_v9, %v3732_v54  ;;  %v3743_v54 = vld [vmem:[#allocation3 + $0x172] sm:$0xff]  ;;  %v3744_v9 = vld [vmem:[#allocation3 + $0x182] sm:$0xff] }
 0x29f   : > { %19237 = vmatpush3.bf16.msra.mxu0 %v23005_v38  ;;  %v3375_v38 = vpack.c.bf16 %v3349_v30, %v3348_v50  ;;  %v3730_v50 = vld [vmem:[#allocation3 + $0xda] sm:$0xff]  ;;  %v3731_v30 = vld [vmem:[#allocation3 + $0xe2] sm:$0xff] }
 0x2a2   : > { %19191 = vmatmul.mubr.bf16.gmra.mrb[16].mxu0 %v3363_v59 }
 0x2a3   : > { %19194 = vmatprep.mubr.bf16.mxu0 %v3364_v61 }
 0x2aa   : > { %19195 = vmatmul.mubr.bf16.gmra.mrb[20].mxu0 %v3365_v13 }
 0x2ab   : > { %19198 = vmatprep.mubr.bf16.mxu0 %v3366_v58  ;;  %v24274_v8 = vpop.f32.mrb[0].mxu1 }
 0x2ac   : > { %v24276_v3 = vpop.f32.mrb[1].mxu1 }
 0x2ad   : > { %v24278_v31 = vpop.f32.mrb[2].mxu1 }
 0x2ae   : > { %v24280_v22 = vpop.f32.mrb[3].mxu1 }
 0x2b2   : > { %19199 = vmatmul.mubr.bf16.gmra.mrb[24].mxu0 %v3367_v57  ;;  %v3720_v57 = vld [vmem:[#allocation3 + $0x62] sm:$0xff] }
 0x2b3   : > { %19202 = vmatprep.mubr.bf16.mxu0 %v3368_v19  ;;  %v24282_v51 = vpop.f32.mrb[4].mxu1  ;;  %v3721_v19 = vld [vmem:[#allocation3 + $0x6a] sm:$0xff] }
 0x2b4   : > { %v24284_v63 = vpop.f32.mrb[5].mxu1  ;;  %v3766_v36 = vpack.c.bf16 %v3721_v19, %v3720_v57  ;;  %v3737_v57 = vld [vmem:[#allocation3 + $0x12a] sm:$0xff] }
 0x2b5   : > { %v24286_v56 = vpop.f32.mrb[6].mxu1 }
 0x2b6   : > { %v24288_v14 = vpop.f32.mrb[7].mxu1 }
 0x2ba   : > { %19203 = vmatmul.mubr.bf16.gmra.mrb[28].mxu0 %v3369_v46  ;;  %v3722_v46 = vld [vmem:[#allocation3 + $0x7a] sm:$0xff] }
 0x2bb   : > { %19206 = vmatprep.mubr.bf16.mxu0 %v3370_v7  ;;  %v24290_v2 = vpop.f32.mrb[8].mxu1  ;;  %v3723_v7 = vld [vmem:[#allocation3 + $0x82] sm:$0xff] }
 0x2bc   : > { %v24292_v28 = vpop.f32.mrb[9].mxu1  ;;  %v3767_v41 = vpack.c.bf16 %v3723_v7, %v3722_v46 }
 0x2bd   : > { %v24294_v5 = vpop.f32.mrb[10].mxu1 }
 0x2be   : > { %v24296_v49 = vpop.f32.mrb[11].mxu1 }
 0x2c2   : > { %19207 = vmatmul.mubr.bf16.gmra.mrb[32].mxu0 %v3371_v21 }
 0x2c3   : > { %19210 = vmatprep.mubr.bf16.mxu0 %v3372_v1  ;;  %v24298_v23 = vpop.f32.mrb[12].mxu1  ;;  %v3726_v1 = vld [vmem:[#allocation3 + $0xaa] sm:$0xff] }
 0x2c4   : > { %v24300_v62 = vpop.f32.mrb[13].mxu1  ;;  %v3769_v17 = vpack.c.bf16 %v3727_v39, %v3726_v1  ;;  %v3741_v1 = vld [vmem:[#allocation3 + $0x15a] sm:$0xff] }
 0x2c5   : > { %v24302_v59 = vpop.f32.mrb[14].mxu1 }
 0x2c6   : > { %v24304_v61 = vpop.f32.mrb[15].mxu1 }
 0x2ca   : > { %19211 = vmatmul.mubr.bf16.gmra.mrb[36].mxu0 %v3373_v12 }
 0x2cb   : > { %19214 = vmatprep.mubr.bf16.mxu0 %v3374_v44  ;;  %v24308_v13 = vpop.f32.mrb[16].mxu1 }
 0x2cc   : > { %v24310_v58 = vpop.f32.mrb[17].mxu1 }
 0x2cd   : > { %v24312_v15 = vpop.f32.mrb[18].mxu1 }
 0x2ce   : > { %v24314_v29 = vpop.f32.mrb[19].mxu1 }
 0x2d2   : > { %19215 = vmatmul.mubr.bf16.gmra.mrb[40].mxu0 %v3375_v38  ;;  %v3771_v38 = vpack.c.bf16 %v3731_v30, %v3730_v50  ;;  %v3742_v30 = vld [vmem:[#allocation3 + $0x16a] sm:$0xff] }
 0x2d3   : > { %19218 = vmatprep.mubr.bf16.mxu0 %v3376_v11  ;;  %v24316_v4 = vpop.f32.mrb[20].mxu1 }
 0x2d4   : > { %v24318_v47 = vpop.f32.mrb[21].mxu1 }
 0x2d5   : > { %v24320_v24 = vpop.f32.mrb[22].mxu1 }
 0x2d6   : > { %v24322_v6 = vpop.f32.mrb[23].mxu1 }
 0x2da   : > { %19219 = vmatmul.mubr.bf16.gmra.mrb[44].mxu0 %v3377_v40 }
 0x2db   : > { %19238 = vmatprep.mubr.bf16.mxu0 %v3764_v18  ;;  %v24324_v34 = vpop.f32.mrb[24].mxu1  ;;  %v3734_v18 = vld [vmem:[#allocation3 + $0x10a] sm:$0xff] }
 0x2dc   : > { %v24326_v43 = vpop.f32.mrb[25].mxu1  ;;  %v3773_v19 = vpack.c.bf16 %v3735_v32, %v3734_v18 }
 0x2dd   : > { %v24328_v21 = vpop.f32.mrb[26].mxu1 }
 0x2de   : > { %v24330_v45 = vpop.f32.mrb[27].mxu1 }
 0x2e2   : > { %19239 = vmatmul.mubr.bf16.vlgmr.msra.gmra.mrb[0].mxu0 %v3765_v26  ;;  %v3774_v26 = vpack.c.bf16 %v3737_v57, %v3736_v55 }
 0x2e3   : > { %19242 = vmatprep.mubr.bf16.mxu0 %v3766_v36  ;;  %v24332_v12 = vpop.f32.mrb[28].mxu1 }
 0x2e4   : > { %v24334_v25 = vpop.f32.mrb[29].mxu1 }
 0x2e5   : > { %v24336_v44 = vpop.f32.mrb[30].mxu1 }
 0x2e6   : > { %v24338_v20 = vpop.f32.mrb[31].mxu1 }
 0x2ea   : > { %19243 = vmatmul.mubr.bf16.gmra.mrb[4].mxu0 %v3767_v41  ;;  %v3739_v41 = vld [vmem:[#allocation3 + $0x142] sm:$0xff] }
 0x2eb   : > { %19246 = vmatprep.mubr.bf16.mxu0 %v3768_v35  ;;  %v24340_v11 = vpop.f32.mrb[32].mxu1  ;;  %v3740_v35 = vld [vmem:[#allocation3 + $0x152] sm:$0xff]  ;;  %v3775_v39 = vpack.c.bf16 %v3739_v41, %v3738_v53  ;;  %v3747_v53 = vld [vmem:[#allocation3 + $0x1a2] sm:$0xff] }
 0x2ec   : > { %v24342_v48 = vpop.f32.mrb[33].mxu1  ;;  %v3776_v42 = vpack.c.bf16 %v3741_v1, %v3740_v35  ;;  %v3748_v41 = vld [vmem:[#allocation3 + $0x1b2] sm:$0xff]  ;;  %v3749_v35 = vld [vmem:[#allocation3 + $0x1ba] sm:$0xff] }
 0x2ed   : > { %v24344_v27 = vpop.f32.mrb[34].mxu1 }
 0x2ee   : > { %v24346_v40 = vpop.f32.mrb[35].mxu1 }
 0x2f2   : > { %19247 = vmatmul.mubr.bf16.gmra.mrb[8].mxu0 %v3769_v17 }
 0x2f3   : > { %19250 = vmatprep.mubr.bf16.mxu0 %v3770_v10  ;;  %v24348_v36 = vpop.f32.mrb[36].mxu1 }
 0x2f4   : > { %v24350_v46 = vpop.f32.mrb[37].mxu1 }
 0x2f5   : > { %v24352_v7 = vpop.f32.mrb[38].mxu1 }
 0x2f6   : > { %v24354_v37 = vpop.f32.mrb[39].mxu1 }
 0x2fa   : > { %19251 = vmatmul.mubr.bf16.gmra.mrb[12].mxu0 %v3771_v38  ;;  %v3745_v38 = vld [vmem:[#allocation3 + $0x18a] sm:$0xff] }
 0x2fb   : > { %19254 = vmatprep.mubr.bf16.mxu0 %v3772_v33  ;;  %v24356_v60 = vpop.f32.mrb[40].mxu1  ;;  %v3777_v33 = vpack.c.bf16 %v3743_v54, %v3742_v30  ;;  %v3778_v18 = vpack.c.bf16 %v3745_v38, %v3744_v9  ;;  %v3751_v30 = vld [vmem:[#allocation3 + $0x1d2] sm:$0xff]  ;;  %v3752_v54 = vld [vmem:[#allocation3 + $0x1e2] sm:$0xff]  ;;  %v3753_v9 = vld [vmem:[#allocation3 + $0x1ea] sm:$0xff] }
 0x2fc   : > { %v24358_v17 = vpop.f32.mrb[41].mxu1  ;;  %v3782_v0 = vpack.c.bf16 %v3753_v9, %v3752_v54 }
 0x2fd   : > { %v24360_v10 = vpop.f32.mrb[42].mxu1 }
 0x2fe   : > { %v24362_v50 = vpop.f32.mrb[43].mxu1 }
 0x302   : > { %19255 = vmatmul.mubr.bf16.gmra.mrb[16].mxu0 %v3773_v19 }
 0x303   : > { %19258 = vmatprep.mubr.bf16.mxu0 %v3774_v26  ;;  %v24364_v32 = vpop.f32.mrb[44].mxu1  ;;  %v3746_v26 = vld [vmem:[#allocation3 + $0x19a] sm:$0xff] }
 0x304   : > { %25765 = vst [vmem:[#allocation28_spill] sm:$0xff] %v24364_v32  ;;  %v24366_v55 = vpop.f32.mrb[45].mxu1  ;;  %v3779_v1 = vpack.c.bf16 %v3747_v53, %v3746_v26  ;;  %v3762_v26 = vld [vmem:[#allocation3 + $0x25a] sm:$0xff]  ;;  %v3763_v53 = vld [vmem:[#allocation3 + $0x262] sm:$0xff] }
 0x305   : > { %25766 = vst [vmem:[#allocation29_spill] sm:$0xff] %v24366_v55  ;;  %v24368_v57 = vpop.f32.mrb[46].mxu1 }
 0x306   : > { %25767 = vst [vmem:[#allocation30_spill] sm:$0xff] %v24368_v57  ;;  %v24370_v19 = vpop.f32.mrb[47].mxu1  ;;  %v3755_v57 = vld [vmem:[#allocation3 + $0x202] sm:$0xff] }
 0x307   : > { %25768 = vst [vmem:[#allocation31_spill] sm:$0xff] %v24370_v19  ;;  %v3756_v19 = vld [vmem:[#allocation3 + $0x212] sm:$0xff] }
 0x30a   : > { %19259 = vmatmul.mubr.bf16.gmra.mrb[20].mxu0 %v3775_v39  ;;  %v3780_v39 = vpack.c.bf16 %v3749_v35, %v3748_v41  ;;  %v3787_v41 = vpack.c.bf16 %v3763_v53, %v3762_v26  ;;  %v23013_v35 = vld [vmem:[#allocation6 + $0x2b8] sm:$0xff]   ;;  %v25769_v26 = vmov 0.0  }
 0x30b   : > { %19262 = vmatprep.mubr.bf16.mxu0 %v3776_v42  ;;  %v3750_v42 = vld [vmem:[#allocation3 + $0x1ca] sm:$0xff]  ;;  %19300 = vmatprep.subr.bf16.mxu1 %v23013_v35 }
 0x30c   : > { %v3781_v38 = vpack.c.bf16 %v3751_v30, %v3750_v42  ;;  %19301 = vmatpush3.bf16.msra.mxu1 %v23013_v35 }
 0x312   : > { %19263 = vmatmul.mubr.bf16.gmra.mrb[24].mxu0 %v3777_v33  ;;  %v3754_v33 = vld [vmem:[#allocation3 + $0x1fa] sm:$0xff] }
 0x313   : > { %19266 = vmatprep.mubr.bf16.mxu0 %v3778_v18  ;;  %v3757_v18 = vld [vmem:[#allocation3 + $0x21a] sm:$0xff]  ;;  %v3783_v55 = vpack.c.bf16 %v3755_v57, %v3754_v33 }
 0x314   : > { %v3784_v32 = vpack.c.bf16 %v3757_v18, %v3756_v19  ;;  %v24377_v57 = vld [vmem:[#allocation9] ss:$0 sm:$0xff] }
 0x31a   : > { %19267 = vmatmul.mubr.bf16.gmra.mrb[28].mxu0 %v3779_v1 }
 0x31b   : > { %19270 = vmatprep.mubr.bf16.mxu0 %v3780_v39 }
 0x322   : > { %19271 = vmatmul.mubr.bf16.gmra.mrb[32].mxu0 %v3781_v38 }
 0x323   : > { %19274 = vmatprep.mubr.bf16.mxu0 %v3782_v0  ;;  %v24374_v0 = vld [vmem:[#allocation6 + $0x240] sm:$0xff]  }
 0x324   : > { %19346 = vmatprep.subr.bf16.mxu1 %v24374_v0 }
 0x32a   : > { %19275 = vmatmul.mubr.bf16.gmra.mrb[36].mxu0 %v3783_v55 }
 0x32b   : > { %19278 = vmatprep.mubr.bf16.mxu0 %v3784_v32 }
 0x332   : > { %19279 = vmatmul.mubr.bf16.gmra.mrb[40].mxu0 %v24244_v16 }
 0x333   : > { %19282 = vmatprep.mubr.bf16.mxu0 %v24247_v52 }
 0x33a   : > { %19283 = vmatmul.mubr.bf16.gmra.mrb[44].mxu0 %v3787_v41 }
 0x3b5   : > { %v19240_v1 = vpop.f32.mrb[0].mxu0 }
 0x3b6   : > { %v21230_v32 = vadd.f32 %v19240_v1, %v24274_v8  ;;  %v3887_v55 = vpop.f32.mrb[1].mxu0 }
 0x3b7   : > { %v21231_v16 = vadd.f32 %v3887_v55, %v24276_v3  ;;  %v19241_v52 = vpop.f32.mrb[2].mxu0 }
 0x3b8   : > { %v4135_v19 = vadd.f32 %v21230_v32, %v24377_v57  ;;  %v21232_v39 = vadd.f32 %v19241_v52, %v24278_v31  ;;  %v3890_v42 = vpop.f32.mrb[3].mxu0 }
 0x3b9   : > { %v4133_v30 = vadd.f32 %v21231_v16, %v24377_v57  ;;  %v21233_v54 = vadd.f32 %v3890_v42, %v24280_v22 }
 0x3ba   : > { %v4183_v9 = vmax.f32 %v4135_v19, 0.0  ;;  %v4136_v38 = vadd.f32 %v21232_v39, %v24377_v57 }
 0x3bb   : > { %v4181_v33 = vmax.f32 %v4133_v30, 0.0  ;;  %v4134_v18 = vadd.f32 %v21233_v54, %v24377_v57 }
 0x3bc   : > { %4232 = vst [vmem:[#allocation4 + $0x31] sm:$0xff] %v4183_v9  ;;  %v4184_v8 = vmax.f32 %v4136_v38, 0.0 }
 0x3bd   : > { %4285 = vst [vmem:[#allocation4 + $0x30] sm:$0xff] %v25769_v26  ;;  %4230 = vst [vmem:[#allocation4 + $0x19] sm:$0xff] %v4181_v33  ;;  %v4182_v3 = vmax.f32 %v4134_v18, 0.0  ;;  %v19244_v53 = vpop.f32.mrb[4].mxu0 }
 0x3be   : > { %4282 = vst [vmem:[#allocation4 + $0x18] sm:$0xff] %v25769_v26  ;;  %4233 = vst [vmem:[#allocation4 + $0x39] sm:$0xff] %v4184_v8  ;;  %v21234_v31 = vadd.f32 %v19244_v53, %v24282_v51  ;;  %v3903_v41 = vpop.f32.mrb[5].mxu0 }
 0x3bf   : > { %4286 = vst [vmem:[#allocation4 + $0x38] sm:$0xff] %v25769_v26  ;;  %4287 = vst [vmem:[#allocation4 + $0x40] sm:$0x3] %v25769_v26  ;;  %v21235_v22 = vadd.f32 %v3903_v41, %v24284_v63  ;;  %v19245_v35 = vpop.f32.mrb[6].mxu0 }
 0x3c0   : > { %4231 = vst [vmem:[#allocation4 + $0x21] sm:$0xff] %v4182_v3  ;;  %v4139_v1 = vadd.f32 %v21234_v31, %v24377_v57  ;;  %v21236_v32 = vadd.f32 %v19245_v35, %v24286_v56  ;;  %v3906_v55 = vpop.f32.mrb[7].mxu0 }
 0x3c1   : > { %4283 = vst [vmem:[#allocation4 + $0x20] sm:$0xff] %v25769_v26  ;;  %4284 = vst [vmem:[#allocation4 + $0x28] sm:$0x3] %v25769_v26  ;;  %v4137_v51 = vadd.f32 %v21235_v22, %v24377_v57  ;;  %v21237_v16 = vadd.f32 %v3906_v55, %v24288_v14 }
 0x3c2   : > { %v4187_v52 = vmax.f32 %v4139_v1, 0.0  ;;  %v4140_v19 = vadd.f32 %v21236_v32, %v24377_v57  ;;  %v23015_v32 = vld [vmem:[#allocation6 + $0x248] sm:$0xff]  }
 0x3c3   : > { %v4185_v39 = vmax.f32 %v4137_v51, 0.0  ;;  %v4138_v63 = vadd.f32 %v21237_v16, %v24377_v57 }
 0x3c4   : > { %4236 = vst [vmem:[#allocation4 + $0x61] sm:$0xff] %v4187_v52  ;;  %v4188_v42 = vmax.f32 %v4140_v19, 0.0 }
 0x3c5   : > { %4291 = vst [vmem:[#allocation4 + $0x60] sm:$0xff] %v25769_v26  ;;  %4234 = vst [vmem:[#allocation4 + $0x49] sm:$0xff] %v4185_v39  ;;  %v4186_v30 = vmax.f32 %v4138_v63, 0.0  ;;  %v19248_v54 = vpop.f32.mrb[8].mxu0  ;;  %v23016_v39 = vld [vmem:[#allocation6 + $0x250] sm:$0xff]  }
 0x3c6   : > { %4288 = vst [vmem:[#allocation4 + $0x48] sm:$0xff] %v25769_v26  ;;  %4237 = vst [vmem:[#allocation4 + $0x69] sm:$0xff] %v4188_v42  ;;  %v21238_v56 = vadd.f32 %v19248_v54, %v24290_v2  ;;  %v3919_v9 = vpop.f32.mrb[9].mxu0  ;;  %v4392_v14 = vld [vmem:[#allocation4 + $0x31] sm:$0xff]  ;;  %v4393_v38 = vld [vmem:[#allocation4 + $0x39] sm:$0xff] }
 0x3c7   : > { %4292 = vst [vmem:[#allocation4 + $0x68] sm:$0xff] %v25769_v26  ;;  %4293 = vst [vmem:[#allocation4 + $0x70] sm:$0x3] %v25769_v26  ;;  %v21239_v33 = vadd.f32 %v3919_v9, %v24292_v28  ;;  %v19249_v18 = vpop.f32.mrb[10].mxu0  ;;  %v4435_v53 = vpack.c.bf16 %v4393_v38, %v4392_v14 }
 0x3c8   : > { %4235 = vst [vmem:[#allocation4 + $0x51] sm:$0xff] %v4186_v30  ;;  %v4390_v8 = vld [vmem:[#allocation4 + $0x19] sm:$0xff]  ;;  %v4391_v3 = vld [vmem:[#allocation4 + $0x21] sm:$0xff]  ;;  %v4143_v2 = vadd.f32 %v21238_v56, %v24377_v57  ;;  %v21240_v31 = vadd.f32 %v19249_v18, %v24294_v5  ;;  %v3922_v41 = vpop.f32.mrb[11].mxu0 }
 0x3c9   : > { %4289 = vst [vmem:[#allocation4 + $0x50] sm:$0xff] %v25769_v26  ;;  %4290 = vst [vmem:[#allocation4 + $0x58] sm:$0x3] %v25769_v26  ;;  %v4434_v22 = vpack.c.bf16 %v4391_v3, %v4390_v8  ;;  %v4141_v35 = vadd.f32 %v21239_v33, %v24377_v57  ;;  %v21241_v1 = vadd.f32 %v3922_v41, %v24296_v49 }
 0x3ca   : > { %v4191_v28 = vmax.f32 %v4143_v2, 0.0  ;;  %v4144_v55 = vadd.f32 %v21240_v31, %v24377_v57  ;;  %v23017_v31 = vld [vmem:[#allocation6 + $0x258] sm:$0xff]  }
 0x3cb   : > { %19302 = vmatprep.mubr.bf16.mxu1 %v4434_v22  ;;  %v4189_v51 = vmax.f32 %v4141_v35, 0.0  ;;  %v4142_v16 = vadd.f32 %v21241_v1, %v24377_v57 }
 0x3cc   : > { %19303 = vmatmul.mubr.bf16.vlgmr.msra.gmra.mrb[48].mxu1 %v4435_v53  ;;  %4240 = vst [vmem:[#allocation4 + $0x91] sm:$0xff] %v4191_v28  ;;  %v4192_v52 = vmax.f32 %v4144_v55, 0.0 }
 0x3cd   : > { %19347 = vmatpush3.bf16.msra.mxu1 %v24374_v0  ;;  %4238 = vst [vmem:[#allocation4 + $0x79] sm:$0xff] %v4189_v51  ;;  %v4190_v5 = vmax.f32 %v4142_v16, 0.0  ;;  %v19252_v19 = vpop.f32.mrb[12].mxu0 }
 0x3ce   : > { %19348 = vmatprep.subr.bf16.mxu1 %v23015_v32  ;;  %4241 = vst [vmem:[#allocation4 + $0x99] sm:$0xff] %v4192_v52  ;;  %v21242_v49 = vadd.f32 %v19252_v19, %v24298_v23  ;;  %v3935_v63 = vpop.f32.mrb[13].mxu0  ;;  %v4396_v42 = vld [vmem:[#allocation4 + $0x61] sm:$0xff]  ;;  %v4397_v30 = vld [vmem:[#allocation4 + $0x69] sm:$0xff]  ;;  %v4439_v54 = vpack.c.bf16 %v4192_v52, %v4191_v28 }
 0x3cf   : > { %4239 = vst [vmem:[#allocation4 + $0x81] sm:$0xff] %v4190_v5  ;;  %v21243_v56 = vadd.f32 %v3935_v63, %v24300_v62  ;;  %v19253_v9 = vpop.f32.mrb[14].mxu0  ;;  %v4437_v33 = vpack.c.bf16 %v4397_v30, %v4396_v42  ;;  %v4438_v0 = vpack.c.bf16 %v4190_v5, %v4189_v51  ;;  %v23018_v28 = vld [vmem:[#allocation6 + $0x260] sm:$0xff]   ;;  %v23019_v30 = vld [vmem:[#allocation6 + $0x268] sm:$0xff]  }
 0x3d0   : > { %v4394_v14 = vld [vmem:[#allocation4 + $0x49] sm:$0xff]  ;;  %v4395_v38 = vld [vmem:[#allocation4 + $0x51] sm:$0xff]  ;;  %v4147_v18 = vadd.f32 %v21242_v49, %v24377_v57  ;;  %v21244_v8 = vadd.f32 %v19253_v9, %v24302_v59  ;;  %v3938_v3 = vpop.f32.mrb[15].mxu0 }
 0x3d1   : > { %v4436_v53 = vpack.c.bf16 %v4395_v38, %v4394_v14  ;;  %19349 = vmatpush3.bf16.msra.mxu1 %v23015_v32  ;;  %v4145_v23 = vadd.f32 %v21243_v56, %v24377_v57  ;;  %v21245_v2 = vadd.f32 %v3938_v3, %v24304_v61 }
 0x3d2   : > { %19350 = vmatprep.subr.bf16.mxu1 %v23016_v39  ;;  %v4195_v41 = vmax.f32 %v4147_v18, 0.0  ;;  %v4148_v62 = vadd.f32 %v21244_v8, %v24377_v57 }
 0x3d3   : > { %19306 = vmatprep.mubr.bf16.mxu1 %v4436_v53  ;;  %v4193_v22 = vmax.f32 %v4145_v23, 0.0  ;;  %v4146_v35 = vadd.f32 %v21245_v2, %v24377_v57 }
 0x3d4   : > { %19307 = vmatmul.mubr.bf16.gmra.mrb[52].mxu1 %v4437_v33  ;;  %4244 = vst [vmem:[#allocation4 + $0xc1] sm:$0xff] %v4195_v41  ;;  %v4196_v1 = vmax.f32 %v4148_v62, 0.0  ;;  %v23020_v33 = vld [vmem:[#allocation6 + $0x270] sm:$0xff]   ;;  %v23021_v62 = vld [vmem:[#allocation6 + $0x278] sm:$0xff]  }
 0x3d5   : > { %19310 = vmatprep.mubr.bf16.mxu1 %v4438_v0  ;;  %19351 = vmatpush3.bf16.msra.mxu1 %v23016_v39  ;;  %4242 = vst [vmem:[#allocation4 + $0xa9] sm:$0xff] %v4193_v22  ;;  %v4194_v59 = vmax.f32 %v4146_v35, 0.0  ;;  %v19256_v32 = vpop.f32.mrb[16].mxu0 }
 0x3d6   : > { %19352 = vmatprep.subr.bf16.mxu1 %v23017_v31  ;;  %4245 = vst [vmem:[#allocation4 + $0xc9] sm:$0xff] %v4196_v1  ;;  %v21246_v61 = vadd.f32 %v19256_v32, %v24308_v13  ;;  %v3951_v55 = vpop.f32.mrb[17].mxu0  ;;  %v4441_v51 = vpack.c.bf16 %v4196_v1, %v4195_v41  ;;  %v24440_v32 = vld [vmem:[#allocation6 + $0x2c0] sm:$0xff]  }
 0x3d7   : > { %4243 = vst [vmem:[#allocation4 + $0xb1] sm:$0xff] %v4194_v59  ;;  %v21247_v16 = vadd.f32 %v3951_v55, %v24310_v58  ;;  %v19257_v52 = vpop.f32.mrb[18].mxu0  ;;  %v4440_v5 = vpack.c.bf16 %v4194_v59, %v4193_v22 }
 0x3d8   : > { %v4151_v19 = vadd.f32 %v21246_v61, %v24377_v57  ;;  %v21248_v49 = vadd.f32 %v19257_v52, %v24312_v15  ;;  %v3954_v39 = vpop.f32.mrb[19].mxu0 }
 0x3d9   : > { %19353 = vmatpush3.bf16.msra.mxu1 %v23017_v31  ;;  %v4149_v63 = vadd.f32 %v21247_v16, %v24377_v57  ;;  %v21249_v42 = vadd.f32 %v3954_v39, %v24314_v29 }
 0x3da   : > { %19354 = vmatprep.subr.bf16.mxu1 %v23018_v28  ;;  %v4199_v13 = vmax.f32 %v4151_v19, 0.0  ;;  %v4152_v56 = vadd.f32 %v21248_v49, %v24377_v57 }
 0x3db   : > { %v4197_v9 = vmax.f32 %v4149_v63, 0.0  ;;  %v4150_v58 = vadd.f32 %v21249_v42, %v24377_v57 }
 0x3dc   : > { %19311 = vmatmul.mubr.bf16.gmra.mrb[56].mxu1 %v4439_v54  ;;  %4248 = vst [vmem:[#allocation4 + $0xf1] sm:$0xff] %v4199_v13  ;;  %v4200_v14 = vmax.f32 %v4152_v56, 0.0 }
 0x3dd   : > { %19314 = vmatprep.mubr.bf16.mxu1 %v4440_v5  ;;  %19355 = vmatpush3.bf16.msra.mxu1 %v23018_v28  ;;  %4246 = vst [vmem:[#allocation4 + $0xd9] sm:$0xff] %v4197_v9  ;;  %v4198_v15 = vmax.f32 %v4150_v58, 0.0  ;;  %v19260_v38 = vpop.f32.mrb[20].mxu0 }
 0x3de   : > { %19356 = vmatprep.subr.bf16.mxu1 %v23019_v30  ;;  %4249 = vst [vmem:[#allocation4 + $0xf9] sm:$0xff] %v4200_v14  ;;  %v21250_v29 = vadd.f32 %v19260_v38, %v24316_v4  ;;  %v3967_v0 = vpop.f32.mrb[21].mxu0  ;;  %v4443_v18 = vpack.c.bf16 %v4200_v14, %v4199_v13 }
 0x3df   : > { %4247 = vst [vmem:[#allocation4 + $0xe1] sm:$0xff] %v4198_v15  ;;  %v21251_v8 = vadd.f32 %v3967_v0, %v24318_v47  ;;  %v19261_v3 = vpop.f32.mrb[22].mxu0  ;;  %v4442_v53 = vpack.c.bf16 %v4198_v15, %v4197_v9 }
 0x3e0   : > { %v4155_v54 = vadd.f32 %v21250_v29, %v24377_v57  ;;  %v21252_v23 = vadd.f32 %v19261_v3, %v24320_v24  ;;  %v3970_v2 = vpop.f32.mrb[23].mxu0 }
 0x3e1   : > { %19357 = vmatpush3.bf16.msra.mxu1 %v23019_v30  ;;  %v4153_v31 = vadd.f32 %v21251_v8, %v24377_v57  ;;  %v21253_v41 = vadd.f32 %v3970_v2, %v24322_v6 }
 0x3e2   : > { %19358 = vmatprep.subr.bf16.mxu1 %v23020_v33  ;;  %v4203_v4 = vmax.f32 %v4155_v54, 0.0  ;;  %v4156_v22 = vadd.f32 %v21252_v23, %v24377_v57 }
 0x3e3   : > { %v4201_v35 = vmax.f32 %v4153_v31, 0.0  ;;  %v4154_v47 = vadd.f32 %v21253_v41, %v24377_v57 }
 0x3e4   : > { %19315 = vmatmul.mubr.bf16.gmra.mrb[60].mxu1 %v4441_v51  ;;  %4252 = vst [vmem:[#allocation4 + $0x121] sm:$0xff] %v4203_v4  ;;  %v4204_v1 = vmax.f32 %v4156_v22, 0.0 }
 0x3e5   : > { %19318 = vmatprep.mubr.bf16.mxu1 %v4442_v53  ;;  %19359 = vmatpush3.bf16.msra.mxu1 %v23020_v33  ;;  %4250 = vst [vmem:[#allocation4 + $0x109] sm:$0xff] %v4201_v35  ;;  %v4202_v24 = vmax.f32 %v4154_v47, 0.0  ;;  %v19264_v59 = vpop.f32.mrb[24].mxu0 }
 0x3e6   : > { %19360 = vmatprep.subr.bf16.mxu1 %v23021_v62  ;;  %4253 = vst [vmem:[#allocation4 + $0x129] sm:$0xff] %v4204_v1  ;;  %v21254_v6 = vadd.f32 %v19264_v59, %v24324_v34  ;;  %v3983_v28 = vpop.f32.mrb[25].mxu0  ;;  %v4445_v61 = vpack.c.bf16 %v4204_v1, %v4203_v4 }
 0x3e7   : > { %4251 = vst [vmem:[#allocation4 + $0x111] sm:$0xff] %v4202_v24  ;;  %v21255_v55 = vadd.f32 %v3983_v28, %v24326_v43  ;;  %v19265_v16 = vpop.f32.mrb[26].mxu0  ;;  %v4444_v51 = vpack.c.bf16 %v4202_v24, %v4201_v35 }
 0x3e8   : > { %v4159_v52 = vadd.f32 %v21254_v6, %v24377_v57  ;;  %v21256_v5 = vadd.f32 %v19265_v16, %v24328_v21  ;;  %v3986_v19 = vpop.f32.mrb[27].mxu0 }
 0x3e9   : > { %19361 = vmatpush3.bf16.msra.mxu1 %v23021_v62  ;;  %v4157_v49 = vadd.f32 %v21255_v55, %v24377_v57  ;;  %v21257_v39 = vadd.f32 %v3986_v19, %v24330_v45 }
 0x3ea   : > { %19406 = vmatprep.subr.bf16.mxu1 %v24440_v32  ;;  %v4207_v34 = vmax.f32 %v4159_v52, 0.0  ;;  %v4160_v63 = vadd.f32 %v21256_v5, %v24377_v57 }
 0x3eb   : > { %v4205_v42 = vmax.f32 %v4157_v49, 0.0  ;;  %v4158_v43 = vadd.f32 %v21257_v39, %v24377_v57 }
 0x3ec   : > { %19319 = vmatmul.mubr.bf16.gmra.mrb[64].mxu1 %v4443_v18  ;;  %4256 = vst [vmem:[#allocation4 + $0x151] sm:$0xff] %v4207_v34  ;;  %v4208_v30 = vmax.f32 %v4160_v63, 0.0 }
 0x3ed   : > { %19322 = vmatprep.mubr.bf16.mxu1 %v4444_v51  ;;  %4254 = vst [vmem:[#allocation4 + $0x139] sm:$0xff] %v4205_v42  ;;  %v4206_v21 = vmax.f32 %v4158_v43, 0.0  ;;  %v19268_v13 = vpop.f32.mrb[28].mxu0 }
 0x3ee   : > { %4257 = vst [vmem:[#allocation4 + $0x159] sm:$0xff] %v4208_v30  ;;  %v21258_v56 = vadd.f32 %v19268_v13, %v24332_v12  ;;  %v3999_v9 = vpop.f32.mrb[29].mxu0  ;;  %v4447_v45 = vpack.c.bf16 %v4208_v30, %v4207_v34 }
 0x3ef   : > { %4255 = vst [vmem:[#allocation4 + $0x141] sm:$0xff] %v4206_v21  ;;  %v21259_v58 = vadd.f32 %v3999_v9, %v24334_v25  ;;  %v19269_v14 = vpop.f32.mrb[30].mxu0  ;;  %v4446_v15 = vpack.c.bf16 %v4206_v21, %v4205_v42 }
 0x3f0   : > { %v4163_v38 = vadd.f32 %v21258_v56, %v24377_v57  ;;  %v21260_v33 = vadd.f32 %v19269_v14, %v24336_v44  ;;  %v4002_v29 = vpop.f32.mrb[31].mxu0 }
 0x3f1   : > { %v4161_v0 = vadd.f32 %v21259_v58, %v24377_v57  ;;  %v21261_v18 = vadd.f32 %v4002_v29, %v24338_v20 }
 0x3f2   : > { %v4211_v8 = vmax.f32 %v4163_v38, 0.0  ;;  %v4164_v3 = vadd.f32 %v21260_v33, %v24377_v57 }
 0x3f3   : > { %v4209_v12 = vmax.f32 %v4161_v0, 0.0  ;;  %v4162_v53 = vadd.f32 %v21261_v18, %v24377_v57 }
 0x3f4   : > { %19323 = vmatmul.mubr.bf16.gmra.mrb[68].mxu1 %v4445_v61  ;;  %4260 = vst [vmem:[#allocation4 + $0x181] sm:$0xff] %v4211_v8  ;;  %v4212_v25 = vmax.f32 %v4164_v3, 0.0  ;;  %v25770_v3 = vld [vmem:[#allocation28_spill] sm:$0xff] }
 0x3f5   : > { %19326 = vmatprep.mubr.bf16.mxu1 %v4446_v15  ;;  %4258 = vst [vmem:[#allocation4 + $0x169] sm:$0xff] %v4209_v12  ;;  %v4210_v54 = vmax.f32 %v4162_v53, 0.0  ;;  %v19272_v23 = vpop.f32.mrb[32].mxu0  ;;  %v25771_v53 = vld [vmem:[#allocation29_spill] sm:$0xff] }
 0x3f6   : > { %4261 = vst [vmem:[#allocation4 + $0x189] sm:$0xff] %v4212_v25  ;;  %v21262_v44 = vadd.f32 %v19272_v23, %v24340_v11  ;;  %v4015_v2 = vpop.f32.mrb[33].mxu0  ;;  %v4449_v31 = vpack.c.bf16 %v4212_v25, %v4211_v8 }
 0x3f7   : > { %4259 = vst [vmem:[#allocation4 + $0x171] sm:$0xff] %v4210_v54  ;;  %v21263_v20 = vadd.f32 %v4015_v2, %v24342_v48  ;;  %v19273_v41 = vpop.f32.mrb[34].mxu0  ;;  %v4448_v62 = vpack.c.bf16 %v4210_v54, %v4209_v12 }
 0x3f8   : > { %v4167_v4 = vadd.f32 %v21262_v44, %v24377_v57  ;;  %v21264_v22 = vadd.f32 %v19273_v41, %v24344_v27  ;;  %v4018_v35 = vpop.f32.mrb[35].mxu0  ;;  %v25772_v44 = vld [vmem:[#allocation30_spill] sm:$0xff]  ;;  %v25773_v41 = vld [vmem:[#allocation31_spill] sm:$0xff] }
 0x3f9   : > { %v4165_v47 = vadd.f32 %v21263_v20, %v24377_v57  ;;  %v21265_v1 = vadd.f32 %v4018_v35, %v24346_v40 }
 0x3fa   : > { %v4215_v24 = vmax.f32 %v4167_v4, 0.0  ;;  %v4168_v59 = vadd.f32 %v21264_v22, %v24377_v57 }
 0x3fb   : > { %v4213_v11 = vmax.f32 %v4165_v47, 0.0  ;;  %v4166_v6 = vadd.f32 %v21265_v1, %v24377_v57 }
 0x3fc   : > { %19327 = vmatmul.mubr.bf16.gmra.mrb[72].mxu1 %v4447_v45  ;;  %4264 = vst [vmem:[#allocation4 + $0x1b1] sm:$0xff] %v4215_v24  ;;  %v4216_v48 = vmax.f32 %v4168_v59, 0.0 }
 0x3fd   : > { %19330 = vmatprep.mubr.bf16.mxu1 %v4448_v62  ;;  %4262 = vst [vmem:[#allocation4 + $0x199] sm:$0xff] %v4213_v11  ;;  %v4214_v28 = vmax.f32 %v4166_v6, 0.0  ;;  %v19276_v61 = vpop.f32.mrb[36].mxu0 }
 0x3fe   : > { %4265 = vst [vmem:[#allocation4 + $0x1b9] sm:$0xff] %v4216_v48  ;;  %v21266_v27 = vadd.f32 %v19276_v61, %v24348_v36  ;;  %v4031_v55 = vpop.f32.mrb[37].mxu0  ;;  %v4451_v16 = vpack.c.bf16 %v4216_v48, %v4215_v24  ;;  %v23539_v61 = vmov 0.0|0.0  }
 0x3ff   : > { %4263 = vst [vmem:[#allocation4 + $0x1a1] sm:$0xff] %v4214_v28  ;;  %v21267_v40 = vadd.f32 %v4031_v55, %v24350_v46  ;;  %v19277_v51 = vpop.f32.mrb[38].mxu0  ;;  %v4450_v52 = vpack.c.bf16 %v4214_v28, %v4213_v11  ;;  %v23024_v55 = vld [vmem:[#allocation6 + $0x2d0] sm:$0xff]  }
 0x400   : > { %v4171_v5 = vadd.f32 %v21266_v27, %v24377_v57  ;;  %v21268_v19 = vadd.f32 %v19277_v51, %v24352_v7  ;;  %v4034_v49 = vpop.f32.mrb[39].mxu0  ;;  %v23023_v27 = vld [vmem:[#allocation6 + $0x2c8] sm:$0xff]  }
 0x401   : > { %v4169_v39 = vadd.f32 %v21267_v40, %v24377_v57  ;;  %v21269_v34 = vadd.f32 %v4034_v49, %v24354_v37  ;;  %v23025_v40 = vld [vmem:[#allocation6 + $0x2d8] sm:$0xff]  }
 0x402   : > { %v4219_v63 = vmax.f32 %v4171_v5, 0.0  ;;  %v4172_v42 = vadd.f32 %v21268_v19, %v24377_v57  ;;  %v4318_v5 = vld [vmem:[#allocation4 + $0x98] sm:$0xff]  ;;  %v4317_v19 = vld [vmem:[#allocation4 + $0x90] sm:$0xff] }
 0x403   : > { %v4217_v36 = vmax.f32 %v4169_v39, 0.0  ;;  %v4170_v43 = vadd.f32 %v21269_v34, %v24377_v57  ;;  %v24517_v49 = vpack.c.bf16 %v4318_v5, %v4317_v19  ;;  %v4319_v39 = vld [vmem:[#allocation4 + $0xa8] sm:$0xff]  ;;  %v23027_v34 = vld [vmem:[#allocation6 + $0x2e8] sm:$0xff]  }
 0x404   : > { %19331 = vmatmul.mubr.bf16.gmra.mrb[76].mxu1 %v4449_v31  ;;  %4268 = vst [vmem:[#allocation4 + $0x1e1] sm:$0xff] %v4219_v63  ;;  %v4220_v46 = vmax.f32 %v4172_v42, 0.0  ;;  %v23028_v42 = vld [vmem:[#allocation6 + $0x2f0] sm:$0xff]   ;;  %v4994_v5 = vld [vmem:[#allocation4 + $0x6a] sm:$0xff] }
 0x405   : > { %19334 = vmatprep.mubr.bf16.mxu1 %v4450_v52  ;;  %4266 = vst [vmem:[#allocation4 + $0x1c9] sm:$0xff] %v4217_v36  ;;  %v4218_v30 = vmax.f32 %v4170_v43, 0.0  ;;  %v19280_v21 = vpop.f32.mrb[40].mxu0  ;;  %v23026_v52 = vld [vmem:[#allocation6 + $0x2e0] sm:$0xff]   ;;  %v4324_v43 = vld [vmem:[#allocation4 + $0xe0] sm:$0xff] }
 0x406   : > { %4269 = vst [vmem:[#allocation4 + $0x1e9] sm:$0xff] %v4220_v46  ;;  %v21270_v7 = vadd.f32 %v19280_v21, %v24356_v60  ;;  %v4047_v13 = vpop.f32.mrb[41].mxu0  ;;  %v4453_v56 = vpack.c.bf16 %v4220_v46, %v4219_v63  ;;  %v4321_v46 = vld [vmem:[#allocation4 + $0xc0] sm:$0xff]  ;;  %v4323_v21 = vld [vmem:[#allocation4 + $0xd8] sm:$0xff] }
 0x407   : > { %4267 = vst [vmem:[#allocation4 + $0x1d1] sm:$0xff] %v4218_v30  ;;  %v21271_v37 = vadd.f32 %v4047_v13, %v24358_v17  ;;  %v19281_v9 = vpop.f32.mrb[42].mxu0  ;;  %v4452_v45 = vpack.c.bf16 %v4218_v30, %v4217_v36  ;;  %v4322_v36 = vld [vmem:[#allocation4 + $0xc8] sm:$0xff]  ;;  %v24525_v13 = vpack.c.bf16 %v4324_v43, %v4323_v21  ;;  %v4995_v19 = vld [vmem:[#allocation4 + $0x7a] sm:$0xff]  ;;  %v4997_v43 = vld [vmem:[#allocation4 + $0x92] sm:$0xff] }
 0x408   : > { %v4175_v58 = vadd.f32 %v21270_v7, %v24377_v57  ;;  %v21272_v14 = vadd.f32 %v19281_v9, %v24360_v10  ;;  %v4050_v15 = vpop.f32.mrb[43].mxu0  ;;  %v24523_v30 = vpack.c.bf16 %v4322_v36, %v4321_v46  ;;  %v23029_v7 = vld [vmem:[#allocation6 + $0x2f8] sm:$0xff]   ;;  %v4328_v9 = vld [vmem:[#allocation4 + $0x110] sm:$0xff]  ;;  %v4998_v46 = vld [vmem:[#allocation4 + $0x9a] sm:$0xff] }
 0x409   : > { %v4173_v38 = vadd.f32 %v21271_v37, %v24377_v57  ;;  %v21273_v33 = vadd.f32 %v4050_v15, %v24362_v50  ;;  %v4326_v37 = vld [vmem:[#allocation4 + $0xf8] sm:$0xff]  ;;  %v23034_v36 = vld [vmem:[#allocation6 + $0x320] sm:$0xff]  }
 0x40a   : > { %v4223_v29 = vmax.f32 %v4175_v58, 0.0  ;;  %v4176_v0 = vadd.f32 %v21272_v14, %v24377_v57  ;;  %v4327_v14 = vld [vmem:[#allocation4 + $0x108] sm:$0xff] }
 0x40b   : > { %v4221_v60 = vmax.f32 %v4173_v38, 0.0  ;;  %v4174_v18 = vadd.f32 %v21273_v33, %v24377_v57  ;;  %v24531_v15 = vpack.c.bf16 %v4328_v9, %v4327_v14  ;;  %v4330_v38 = vld [vmem:[#allocation4 + $0x128] sm:$0xff]  ;;  %v4332_v33 = vld [vmem:[#allocation4 + $0x140] sm:$0xff] }
 0x40c   : > { %19335 = vmatmul.mubr.bf16.gmra.mrb[80].mxu1 %v4451_v16  ;;  %4272 = vst [vmem:[#allocation4 + $0x211] sm:$0xff] %v4223_v29  ;;  %v4224_v17 = vmax.f32 %v4176_v0, 0.0  ;;  %v4316_v16 = vld [vmem:[#allocation4 + $0x80] sm:$0xff]  ;;  %v4999_v21 = vld [vmem:[#allocation4 + $0xaa] sm:$0xff] }
 0x40d   : > { %19338 = vmatprep.mubr.bf16.mxu1 %v4452_v45  ;;  %4298 = vst [vmem:[#allocation4 + $0x210] sm:$0xff] %v25769_v26  ;;  %4270 = vst [vmem:[#allocation4 + $0x1f9] sm:$0xff] %v4221_v60  ;;  %v4222_v8 = vmax.f32 %v4174_v18, 0.0  ;;  %v19284_v10 = vpop.f32.mrb[44].mxu0  ;;  %v4325_v45 = vld [vmem:[#allocation4 + $0xf0] sm:$0xff]  ;;  %v4329_v29 = vld [vmem:[#allocation4 + $0x120] sm:$0xff] }
 0x40e   : > { %4295 = vst [vmem:[#allocation4 + $0x1f8] sm:$0xff] %v25769_v26  ;;  %4273 = vst [vmem:[#allocation4 + $0x219] sm:$0xff] %v4224_v17  ;;  %v21274_v50 = vadd.f32 %v19284_v10, %v25770_v3  ;;  %v4063_v12 = vpop.f32.mrb[45].mxu0  ;;  %v24529_v58 = vpack.c.bf16 %v4326_v37, %v4325_v45  ;;  %v24535_v0 = vpack.c.bf16 %v4330_v38, %v4329_v29  ;;  %v4331_v60 = vld [vmem:[#allocation4 + $0x138] sm:$0xff]  ;;  %v4333_v10 = vld [vmem:[#allocation4 + $0x150] sm:$0xff] }
 0x40f   : > { %4299 = vst [vmem:[#allocation4 + $0x218] sm:$0xff] %v25769_v26  ;;  %4300 = vst [vmem:[#allocation4 + $0x220] sm:$0x3] %v25769_v26  ;;  %v21275_v25 = vadd.f32 %v4063_v12, %v25771_v53  ;;  %v19285_v54 = vpop.f32.mrb[46].mxu0  ;;  %v24537_v18 = vpack.c.bf16 %v4332_v33, %v4331_v60  ;;  %v4334_v17 = vld [vmem:[#allocation4 + $0x158] sm:$0xff]  ;;  %v4338_v53 = vld [vmem:[#allocation4 + $0x188] sm:$0xff] }
 0x410   : > { %4271 = vst [vmem:[#allocation4 + $0x201] sm:$0xff] %v4222_v8  ;;  %v4179_v23 = vadd.f32 %v21274_v50, %v24377_v57  ;;  %v21276_v2 = vadd.f32 %v19285_v54, %v25772_v44  ;;  %v4066_v31 = vpop.f32.mrb[47].mxu0  ;;  %v4336_v8 = vld [vmem:[#allocation4 + $0x170] sm:$0xff]  ;;  %v24541_v3 = vpack.c.bf16 %v4334_v17, %v4333_v10  ;;  %v4335_v50 = vld [vmem:[#allocation4 + $0x168] sm:$0xff]  ;;  %v4337_v54 = vld [vmem:[#allocation4 + $0x180] sm:$0xff] }
 0x411   : > { %4296 = vst [vmem:[#allocation4 + $0x200] sm:$0xff] %v25769_v26  ;;  %4297 = vst [vmem:[#allocation4 + $0x208] sm:$0x3] %v25769_v26  ;;  %v4177_v20 = vadd.f32 %v21275_v25, %v24377_v57  ;;  %v21277_v62 = vadd.f32 %v4066_v31, %v25773_v41  ;;  %v24543_v12 = vpack.c.bf16 %v4336_v8, %v4335_v50  ;;  %v4340_v25 = vld [vmem:[#allocation4 + $0x1a0] sm:$0xff]  ;;  %v4339_v44 = vld [vmem:[#allocation4 + $0x198] sm:$0xff] }
 0x412   : > { %v4227_v4 = vmax.f32 %v4179_v23, 0.0  ;;  %v4180_v22 = vadd.f32 %v21276_v2, %v24377_v57  ;;  %v24547_v23 = vpack.c.bf16 %v4338_v53, %v4337_v54  ;;  %v24549_v2 = vpack.c.bf16 %v4340_v25, %v4339_v44  ;;  %v4342_v31 = vld [vmem:[#allocation4 + $0x1b8] sm:$0xff]  ;;  %v4341_v41 = vld [vmem:[#allocation4 + $0x1b0] sm:$0xff]  ;;  %v23036_v45 = vld [vmem:[#allocation6 + $0x330] sm:$0xff]  }
 0x413   : > { %v4225_v35 = vmax.f32 %v4177_v20, 0.0  ;;  %v4178_v47 = vadd.f32 %v21277_v62, %v24377_v57  ;;  %v4344_v20 = vld [vmem:[#allocation4 + $0x1d0] sm:$0xff]  ;;  %v24553_v62 = vpack.c.bf16 %v4342_v31, %v4341_v41  ;;  %v23035_v37 = vld [vmem:[#allocation6 + $0x328] sm:$0xff]   ;;  %v5001_v14 = vld [vmem:[#allocation4 + $0xc2] sm:$0xff] }
 0x414   : > { %19339 = vmatmul.mubr.bf16.gmra.mrb[84].mxu1 %v4453_v56  ;;  %4276 = vst [vmem:[#allocation4 + $0x241] sm:$0xff] %v4227_v4  ;;  %v4228_v1 = vmax.f32 %v4180_v22, 0.0  ;;  %v23030_v56 = vld [vmem:[#allocation6 + $0x300] sm:$0xff]   ;;  %v4343_v4 = vld [vmem:[#allocation4 + $0x1c8] sm:$0xff]  ;;  %v5003_v33 = vld [vmem:[#allocation4 + $0xda] sm:$0xff] }
 0x415   : > { %4304 = vst [vmem:[#allocation4 + $0x240] sm:$0xff] %v25769_v26  ;;  %4274 = vst [vmem:[#allocation4 + $0x229] sm:$0xff] %v4225_v35  ;;  %v4226_v24 = vmax.f32 %v4178_v47, 0.0  ;;  %v24555_v22 = vpack.c.bf16 %v4344_v20, %v4343_v4  ;;  %v4346_v35 = vld [vmem:[#allocation4 + $0x1e8] sm:$0xff]  ;;  %v4345_v47 = vld [vmem:[#allocation4 + $0x1e0] sm:$0xff] }
 0x416   : > { %4301 = vst [vmem:[#allocation4 + $0x228] sm:$0xff] %v25769_v26  ;;  %4277 = vst [vmem:[#allocation4 + $0x249] sm:$0xff] %v4228_v1  ;;  %v4432_v59 = vld [vmem:[#allocation4 + $0x211] sm:$0xff]  ;;  %v4433_v11 = vld [vmem:[#allocation4 + $0x219] sm:$0xff]  ;;  %v24559_v1 = vpack.c.bf16 %v4346_v35, %v4345_v47 }
 0x417   : > { %4305 = vst [vmem:[#allocation4 + $0x248] sm:$0xff] %v25769_v26  ;;  %4306 = vst [vmem:[#allocation4 + $0x250] sm:$0x3] %v25769_v26  ;;  %v24501_v57 = vpack.c.bf16 %v4433_v11, %v4432_v59  ;;  %v4988_v59 = vld [vmem:[#allocation4 + $0x22] sm:$0xff]  ;;  %v5002_v38 = vld [vmem:[#allocation4 + $0xca] sm:$0xff] }
 0x418   : > { %4275 = vst [vmem:[#allocation4 + $0x231] sm:$0xff] %v4226_v24  ;;  %v4430_v6 = vld [vmem:[#allocation4 + $0x1f9] sm:$0xff]  ;;  %v4431_v48 = vld [vmem:[#allocation4 + $0x201] sm:$0xff]  ;;  %v24582_v60 = vpack.c.bf16 %v5002_v38, %v5001_v14  ;;  %v23038_v10 = vld [vmem:[#allocation6 + $0x340] sm:$0xff]  }
 0x419   : > { %4302 = vst [vmem:[#allocation4 + $0x230] sm:$0xff] %v25769_v26  ;;  %4303 = vst [vmem:[#allocation4 + $0x238] sm:$0x3] %v25769_v26  ;;  %v24505_v28 = vpack.c.bf16 %v4431_v48, %v4430_v6  ;;  %v4315_v26 = vld [vmem:[#allocation4 + $0x78] sm:$0xff]  ;;  %v5004_v29 = vld [vmem:[#allocation4 + $0xe2] sm:$0xff] }
 0x41a   : > { %v24513_v51 = vpack.c.bf16 %v4316_v16, %v4315_v26  ;;  %v4987_v24 = vld [vmem:[#allocation4 + $0x1a] sm:$0xff]  ;;  %v4989_v6 = vld [vmem:[#allocation4 + $0x32] sm:$0xff]  ;;  %v23037_v17 = vld [vmem:[#allocation6 + $0x338] sm:$0xff]   ;;  %v24584_v8 = vpack.c.bf16 %v5004_v29, %v5003_v33 }
 0x41b   : > { %19342 = vmatprep.mubr.bf16.mxu1 %v24505_v28  ;;  %v5031_v11 = vpack.c.bf16 %v4988_v59, %v4987_v24  ;;  %v4990_v48 = vld [vmem:[#allocation4 + $0x3a] sm:$0xff]  ;;  %v5005_v50 = vld [vmem:[#allocation4 + $0xf2] sm:$0xff]  ;;  %v5007_v25 = vld [vmem:[#allocation4 + $0x10a] sm:$0xff] }
 0x41c   : > { %19343 = vmatmul.mubr.bf16.gmra.mrb[88].mxu1 %v24501_v57  ;;  %v24564_v16 = vpack.c.bf16 %v4990_v48, %v4989_v6  ;;  %v5006_v53 = vld [vmem:[#allocation4 + $0xfa] sm:$0xff]  ;;  %v5008_v54 = vld [vmem:[#allocation4 + $0x112] sm:$0xff]  ;;  %v5009_v20 = vld [vmem:[#allocation4 + $0x122] sm:$0xff] }
 0x41d   : > { %19362 = vmatprep.mubr.bf16.mxu1 %v23539_v61  ;;  %v24588_v44 = vpack.c.bf16 %v5006_v53, %v5005_v50  ;;  %v24590_v31 = vpack.c.bf16 %v5008_v54, %v5007_v25  ;;  %v5010_v41 = vld [vmem:[#allocation4 + $0x12a] sm:$0xff]  ;;  %v5011_v4 = vld [vmem:[#allocation4 + $0x13a] sm:$0xff]  ;;  %v5012_v35 = vld [vmem:[#allocation4 + $0x142] sm:$0xff] }
 0x41e   : > { %v24594_v47 = vpack.c.bf16 %v5010_v41, %v5009_v20  ;;  %v24596_v24 = vpack.c.bf16 %v5012_v35, %v5011_v4  ;;  %v5013_v59 = vld [vmem:[#allocation4 + $0x152] sm:$0xff]  ;;  %v5015_v6 = vld [vmem:[#allocation4 + $0x16a] sm:$0xff]  ;;  %v5025_v14 = vld [vmem:[#allocation4 + $0x1e2] sm:$0xff] }
 0x41f   : > { %v5016_v48 = vld [vmem:[#allocation4 + $0x172] sm:$0xff]  ;;  %v5026_v38 = vld [vmem:[#allocation4 + $0x1ea] sm:$0xff]  ;;  %v5030_v50 = vld [vmem:[#allocation4 + $0x21a] sm:$0xff] }
 0x420   : > { %v24620_v29 = vpack.c.bf16 %v5026_v38, %v5025_v14  ;;  %v24626_v25 = vld [vmem:[#allocation4 + $0x30] sm:$0xff]  ;;  %v23039_v20 = vld [vmem:[#allocation6 + $0x348] sm:$0xff]   ;;  %v23040_v41 = vld [vmem:[#allocation6 + $0x350] sm:$0xff]  }
 0x421   : > { %v24630_v54 = vpack.c.bf16 %v24626_v25, %v24626_v25  ;;  %v23041_v4 = vld [vmem:[#allocation6 + $0x358] sm:$0xff]   ;;  %v23042_v35 = vld [vmem:[#allocation6 + $0x360] sm:$0xff]   ;;  %v5773_v38 = vld [vmem:[#allocation4 + $0xf9] sm:$0xff] }
 0x422   : > { %v5771_v14 = vld [vmem:[#allocation4 + $0xe1] sm:$0xff] }
 0x424   : > { %19363 = vmatmul.mubr.bf16.vlgmr.msra.gmra.mrb[48].mxu1 %v23539_v61 }
 0x425   : > { %19407 = vmatpush3.bf16.msra.mxu1 %v24440_v32  ;;  %19366 = vmatprep.mubr.bf16.mxu1 %v23539_v61  ;;  %v4320_v32 = vld [vmem:[#allocation4 + $0xb0] sm:$0xff] }
 0x426   : > { %19408 = vmatprep.subr.bf16.mxu1 %v23023_v27  ;;  %v24519_v63 = vpack.c.bf16 %v4320_v32, %v4319_v39  ;;  %v23032_v32 = vld [vmem:[#allocation6 + $0x310] sm:$0xff]  }
 0x427   : > { %v4996_v39 = vld [vmem:[#allocation4 + $0x82] sm:$0xff] }
 0x429   : > { %19409 = vmatpush3.bf16.msra.mxu1 %v23023_v27  ;;  %v4991_v27 = vld [vmem:[#allocation4 + $0x4a] sm:$0xff] }
 0x42a   : > { %19410 = vmatprep.subr.bf16.mxu1 %v23024_v55 }
 0x42c   : > { %19367 = vmatmul.mubr.bf16.gmra.mrb[52].mxu1 %v23539_v61 }
 0x42d   : > { %19370 = vmatprep.mubr.bf16.mxu1 %v24513_v51  ;;  %19411 = vmatpush3.bf16.msra.mxu1 %v23024_v55  ;;  %v4992_v55 = vld [vmem:[#allocation4 + $0x52] sm:$0xff] }
 0x42e   : > { %19412 = vmatprep.subr.bf16.mxu1 %v23025_v40  ;;  %v24566_v26 = vpack.c.bf16 %v4992_v55, %v4991_v27  ;;  %v24602_v55 = vpack.c.bf16 %v5016_v48, %v5015_v6  ;;  %v5764_v6 = vld [vmem:[#allocation4 + $0x91] sm:$0xff]  ;;  %v23049_v48 = vld [vmem:[#allocation6 + $0x398] sm:$0xff]  }
 0x431   : > { %19413 = vmatpush3.bf16.msra.mxu1 %v23025_v40  ;;  %v23031_v40 = vld [vmem:[#allocation6 + $0x308] sm:$0xff]  }
 0x432   : > { %19414 = vmatprep.subr.bf16.mxu1 %v23026_v52 }
 0x434   : > { %19371 = vmatmul.mubr.bf16.gmra.mrb[56].mxu1 %v24517_v49 }
 0x435   : > { %19374 = vmatprep.mubr.bf16.mxu1 %v24519_v63  ;;  %19415 = vmatpush3.bf16.msra.mxu1 %v23026_v52  ;;  %v4993_v52 = vld [vmem:[#allocation4 + $0x62] sm:$0xff] }
 0x436   : > { %19416 = vmatprep.subr.bf16.mxu1 %v23027_v34 }
 0x439   : > { %19417 = vmatpush3.bf16.msra.mxu1 %v23027_v34  ;;  %v23033_v34 = vld [vmem:[#allocation6 + $0x318] sm:$0xff]  }
 0x43a   : > { %19418 = vmatprep.subr.bf16.mxu1 %v23028_v42 }
 0x43c   : > { %19375 = vmatmul.mubr.bf16.gmra.mrb[60].mxu1 %v24523_v30 }
 0x43d   : > { %19378 = vmatprep.mubr.bf16.mxu1 %v24525_v13  ;;  %19419 = vmatpush3.bf16.msra.mxu1 %v23028_v42  ;;  %v24572_v42 = vpack.c.bf16 %v4996_v39, %v4995_v19 }
 0x43e   : > { %19420 = vmatprep.subr.bf16.mxu1 %v23029_v7 }
 0x441   : > { %19421 = vmatpush3.bf16.msra.mxu1 %v23029_v7  ;;  %v5000_v7 = vld [vmem:[#allocation4 + $0xb2] sm:$0xff] }
 0x442   : > { %19466 = vmatprep.subr.bf16.mxu1 %v23030_v56  ;;  %v24578_v9 = vpack.c.bf16 %v5000_v7, %v4999_v21 }
 0x444   : > { %19379 = vmatmul.mubr.bf16.gmra.mrb[64].mxu1 %v24529_v58 }
 0x445   : > { %19382 = vmatprep.mubr.bf16.mxu1 %v24531_v15 }
 0x44c   : > { %19383 = vmatmul.mubr.bf16.gmra.mrb[68].mxu1 %v24535_v0 }
 0x44d   : > { %19386 = vmatprep.mubr.bf16.mxu1 %v24537_v18 }
 0x454   : > { %19387 = vmatmul.mubr.bf16.gmra.mrb[72].mxu1 %v24541_v3 }
 0x455   : > { %19390 = vmatprep.mubr.bf16.mxu1 %v24543_v12 }
 0x45c   : > { %19391 = vmatmul.mubr.bf16.gmra.mrb[76].mxu1 %v24547_v23 }
 0x45d   : > { %19394 = vmatprep.mubr.bf16.mxu1 %v24549_v2 }
 0x464   : > { %19395 = vmatmul.mubr.bf16.gmra.mrb[80].mxu1 %v24553_v62 }
 0x465   : > { %19398 = vmatprep.mubr.bf16.mxu1 %v24555_v22 }
 0x46c   : > { %19399 = vmatmul.mubr.bf16.gmra.mrb[84].mxu1 %v24559_v1 }
 0x46d   : > { %19402 = vmatprep.mubr.bf16.mxu1 %v23539_v61 }
 0x474   : > { %19403 = vmatmul.mubr.bf16.gmra.mrb[88].mxu1 %v23539_v61  ;;  %v24570_v61 = vpack.c.bf16 %v4994_v5, %v4993_v52  ;;  %v5018_v52 = vld [vmem:[#allocation4 + $0x18a] sm:$0xff]  ;;  %v5019_v5 = vld [vmem:[#allocation4 + $0x19a] sm:$0xff] }
 0x475   : > { %19422 = vmatprep.mubr.bf16.mxu1 %v5031_v11  ;;  %v5014_v11 = vld [vmem:[#allocation4 + $0x15a] sm:$0xff] }
 0x476   : > { %v24600_v27 = vpack.c.bf16 %v5014_v11, %v5013_v59  ;;  %v23043_v59 = vld [vmem:[#allocation6 + $0x368] sm:$0xff]   ;;  %v23045_v11 = vld [vmem:[#allocation6 + $0x378] sm:$0xff]  }
 0x47c   : > { %19423 = vmatmul.mubr.bf16.vlgmr.msra.gmra.mrb[48].mxu1 %v24564_v16 }
 0x47d   : > { %19467 = vmatpush3.bf16.msra.mxu1 %v23030_v56  ;;  %19426 = vmatprep.mubr.bf16.mxu1 %v24566_v26  ;;  %v24576_v56 = vpack.c.bf16 %v4998_v46, %v4997_v43  ;;  %v5023_v43 = vld [vmem:[#allocation4 + $0x1ca] sm:$0xff]  ;;  %v5024_v46 = vld [vmem:[#allocation4 + $0x1d2] sm:$0xff] }
 0x47e   : > { %19468 = vmatprep.subr.bf16.mxu1 %v23031_v40  ;;  %v24614_v7 = vpack.c.bf16 %v5024_v46, %v5023_v43  ;;  %v5768_v43 = vld [vmem:[#allocation4 + $0xc1] sm:$0xff]  ;;  %v23051_v46 = vld [vmem:[#allocation6 + $0x3a8] sm:$0xff]  }
 0x481   : > { %19469 = vmatpush3.bf16.msra.mxu1 %v23031_v40  ;;  %v5017_v40 = vld [vmem:[#allocation4 + $0x182] sm:$0xff] }
 0x482   : > { %19470 = vmatprep.subr.bf16.mxu1 %v23032_v32  ;;  %v24606_v19 = vpack.c.bf16 %v5018_v52, %v5017_v40  ;;  %v23050_v52 = vld [vmem:[#allocation6 + $0x3a0] sm:$0xff]  }
 0x484   : > { %19427 = vmatmul.mubr.bf16.gmra.mrb[52].mxu1 %v24570_v61 }
 0x485   : > { %19430 = vmatprep.mubr.bf16.mxu1 %v24572_v42  ;;  %19471 = vmatpush3.bf16.msra.mxu1 %v23032_v32  ;;  %v5020_v32 = vld [vmem:[#allocation4 + $0x1a2] sm:$0xff] }
 0x486   : > { %19472 = vmatprep.subr.bf16.mxu1 %v23033_v34  ;;  %v24608_v39 = vpack.c.bf16 %v5020_v32, %v5019_v5  ;;  %v5767_v5 = vld [vmem:[#allocation4 + $0xb1] sm:$0xff]  ;;  %v5769_v32 = vld [vmem:[#allocation4 + $0xc9] sm:$0xff] }
 0x489   : > { %19473 = vmatpush3.bf16.msra.mxu1 %v23033_v34  ;;  %v5021_v34 = vld [vmem:[#allocation4 + $0x1b2] sm:$0xff] }
 0x48a   : > { %19474 = vmatprep.subr.bf16.mxu1 %v23034_v36 }
 0x48c   : > { %19431 = vmatmul.mubr.bf16.gmra.mrb[56].mxu1 %v24576_v56 }
 0x48d   : > { %19434 = vmatprep.mubr.bf16.mxu1 %v24578_v9  ;;  %19475 = vmatpush3.bf16.msra.mxu1 %v23034_v36  ;;  %v5022_v36 = vld [vmem:[#allocation4 + $0x1ba] sm:$0xff] }
 0x48e   : > { %19476 = vmatprep.subr.bf16.mxu1 %v23035_v37  ;;  %v24612_v21 = vpack.c.bf16 %v5022_v36, %v5021_v34  ;;  %v5766_v34 = vld [vmem:[#allocation4 + $0xa9] sm:$0xff] }
 0x48f   : > { %v24667_v36 = vpack.c.bf16 %v5767_v5, %v5766_v34  ;;  %v5789_v5 = vld [vmem:[#allocation4 + $0x1b9] sm:$0xff] }
 0x491   : > { %19477 = vmatpush3.bf16.msra.mxu1 %v23035_v37  ;;  %v5027_v37 = vld [vmem:[#allocation4 + $0x1fa] sm:$0xff] }
 0x492   : > { %19478 = vmatprep.subr.bf16.mxu1 %v23036_v45 }
 0x494   : > { %19435 = vmatmul.mubr.bf16.gmra.mrb[60].mxu1 %v24582_v60 }
 0x495   : > { %19438 = vmatprep.mubr.bf16.mxu1 %v24584_v8  ;;  %19479 = vmatpush3.bf16.msra.mxu1 %v23036_v45  ;;  %v5028_v45 = vld [vmem:[#allocation4 + $0x202] sm:$0xff] }
 0x496   : > { %19480 = vmatprep.subr.bf16.mxu1 %v23037_v17  ;;  %v24618_v33 = vpack.c.bf16 %v5028_v45, %v5027_v37  ;;  %v24669_v37 = vpack.c.bf16 %v5769_v32, %v5768_v43  ;;  %v23052_v45 = vld [vmem:[#allocation6 + $0x3b0] sm:$0xff]   ;;  %v5788_v43 = vld [vmem:[#allocation4 + $0x1b1] sm:$0xff] }
 0x497   : > { %v5786_v32 = vld [vmem:[#allocation4 + $0x199] sm:$0xff] }
 0x499   : > { %19481 = vmatpush3.bf16.msra.mxu1 %v23037_v17  ;;  %v5029_v17 = vld [vmem:[#allocation4 + $0x212] sm:$0xff] }
 0x49a   : > { %19526 = vmatprep.subr.bf16.mxu1 %v23038_v10  ;;  %v24624_v53 = vpack.c.bf16 %v5030_v50, %v5029_v17  ;;  %v5770_v17 = vld [vmem:[#allocation4 + $0xd9] sm:$0xff] }
 0x49b   : > { %v24673_v50 = vpack.c.bf16 %v5771_v14, %v5770_v17  ;;  %v5793_v14 = vld [vmem:[#allocation4 + $0x1e9] sm:$0xff] }
 0x49c   : > { %19439 = vmatmul.mubr.bf16.gmra.mrb[64].mxu1 %v24588_v44 }
 0x49d   : > { %19442 = vmatprep.mubr.bf16.mxu1 %v24590_v31 }
 0x4a4   : > { %19443 = vmatmul.mubr.bf16.gmra.mrb[68].mxu1 %v24594_v47 }
 0x4a5   : > { %19446 = vmatprep.mubr.bf16.mxu1 %v24596_v24 }
 0x4ac   : > { %19447 = vmatmul.mubr.bf16.gmra.mrb[72].mxu1 %v24600_v27 }
 0x4ad   : > { %19450 = vmatprep.mubr.bf16.mxu1 %v24602_v55 }
 0x4b4   : > { %19451 = vmatmul.mubr.bf16.gmra.mrb[76].mxu1 %v24606_v19 }
 0x4b5   : > { %19454 = vmatprep.mubr.bf16.mxu1 %v24608_v39 }
 0x4bc   : > { %19455 = vmatmul.mubr.bf16.gmra.mrb[80].mxu1 %v24612_v21 }
 0x4bd   : > { %19458 = vmatprep.mubr.bf16.mxu1 %v24614_v7 }
 0x4c4   : > { %19459 = vmatmul.mubr.bf16.gmra.mrb[84].mxu1 %v24620_v29 }
 0x4c5   : > { %19462 = vmatprep.mubr.bf16.mxu1 %v24618_v33 }
 0x4cc   : > { %19463 = vmatmul.mubr.bf16.gmra.mrb[88].mxu1 %v24624_v53 }
 0x4cd   : > { %19482 = vmatprep.mubr.bf16.mxu1 %v24630_v54 }
 0x4d4   : > { %19483 = vmatmul.mubr.bf16.vlgmr.msra.gmra.mrb[48].mxu1 %v24630_v54 }
 0x4d5   : > { %19527 = vmatpush3.bf16.msra.mxu1 %v23038_v10  ;;  %19486 = vmatprep.mubr.bf16.mxu1 %v24630_v54  ;;  %v23044_v10 = vld [vmem:[#allocation6 + $0x370] sm:$0xff]  }
 0x4d6   : > { %19528 = vmatprep.subr.bf16.mxu1 %v23039_v20 }
 0x4d9   : > { %19529 = vmatpush3.bf16.msra.mxu1 %v23039_v20  ;;  %v5772_v20 = vld [vmem:[#allocation4 + $0xf1] sm:$0xff] }
 0x4da   : > { %19530 = vmatprep.subr.bf16.mxu1 %v23040_v41 }
 0x4dc   : > { %19487 = vmatmul.mubr.bf16.gmra.mrb[52].mxu1 %v24513_v51  ;;  %v23046_v51 = vld [vmem:[#allocation6 + $0x380] sm:$0xff]  }
 0x4dd   : > { %19490 = vmatprep.mubr.bf16.mxu1 %v24517_v49  ;;  %19531 = vmatpush3.bf16.msra.mxu1 %v23040_v41  ;;  %v5756_v49 = vld [vmem:[#allocation4 + $0x31] sm:$0xff]  ;;  %v23053_v41 = vld [vmem:[#allocation6 + $0x3b8] sm:$0xff]  }
 0x4de   : > { %19532 = vmatprep.subr.bf16.mxu1 %v23041_v4 }
 0x4e1   : > { %19533 = vmatpush3.bf16.msra.mxu1 %v23041_v4  ;;  %v24675_v4 = vpack.c.bf16 %v5773_v38, %v5772_v20  ;;  %v5790_v38 = vld [vmem:[#allocation4 + $0x1c9] sm:$0xff]  ;;  %v5792_v20 = vld [vmem:[#allocation4 + $0x1e1] sm:$0xff] }
 0x4e2   : > { %19534 = vmatprep.subr.bf16.mxu1 %v23042_v35 }
 0x4e4   : > { %19491 = vmatmul.mubr.bf16.gmra.mrb[56].mxu1 %v24519_v63  ;;  %v5757_v63 = vld [vmem:[#allocation4 + $0x39] sm:$0xff] }
 0x4e5   : > { %19494 = vmatprep.mubr.bf16.mxu1 %v24523_v30  ;;  %19535 = vmatpush3.bf16.msra.mxu1 %v23042_v35  ;;  %v5800_v30 = vpack.c.bf16 %v5757_v63, %v5756_v49  ;;  %v23054_v35 = vld [vmem:[#allocation6 + $0x3c0] sm:$0xff]   ;;  %v5776_v49 = vld [vmem:[#allocation4 + $0x121] sm:$0xff] }
 0x4e6   : > { %19536 = vmatprep.subr.bf16.mxu1 %v23043_v59 }
 0x4e9   : > { %19537 = vmatpush3.bf16.msra.mxu1 %v23043_v59  ;;  %v5775_v59 = vld [vmem:[#allocation4 + $0x111] sm:$0xff] }
 0x4ea   : > { %19538 = vmatprep.subr.bf16.mxu1 %v23044_v10 }
 0x4ec   : > { %19495 = vmatmul.mubr.bf16.gmra.mrb[60].mxu1 %v24525_v13  ;;  %v5758_v13 = vld [vmem:[#allocation4 + $0x49] sm:$0xff] }
 0x4ed   : > { %19498 = vmatprep.mubr.bf16.mxu1 %v24529_v58  ;;  %19539 = vmatpush3.bf16.msra.mxu1 %v23044_v10  ;;  %v5759_v58 = vld [vmem:[#allocation4 + $0x51] sm:$0xff]  ;;  %v5777_v10 = vld [vmem:[#allocation4 + $0x129] sm:$0xff] }
 0x4ee   : > { %19540 = vmatprep.subr.bf16.mxu1 %v23045_v11  ;;  %v24681_v63 = vpack.c.bf16 %v5777_v10, %v5776_v49  ;;  %v5799_v10 = vld [vmem:[#allocation4 + $0x231] sm:$0xff] }
 0x4ef   : > { %v23055_v49 = vld [vmem:[#allocation6 + $0x3c8] sm:$0xff]  }
 0x4f1   : > { %19541 = vmatpush3.bf16.msra.mxu1 %v23045_v11  ;;  %v5774_v11 = vld [vmem:[#allocation4 + $0x109] sm:$0xff] }
 0x4f2   : > { %19586 = vmatprep.subr.bf16.mxu1 %v23046_v51 }
 0x4f4   : > { %19499 = vmatmul.mubr.bf16.gmra.mrb[64].mxu1 %v24531_v15  ;;  %v5760_v15 = vld [vmem:[#allocation4 + $0x61] sm:$0xff] }
 0x4f5   : > { %19502 = vmatprep.mubr.bf16.mxu1 %v24535_v0  ;;  %v5761_v0 = vld [vmem:[#allocation4 + $0x69] sm:$0xff] }
 0x4fc   : > { %19503 = vmatmul.mubr.bf16.gmra.mrb[68].mxu1 %v24537_v18  ;;  %v24655_v18 = vpack.c.bf16 %v5759_v58, %v5758_v13  ;;  %v5781_v13 = vld [vmem:[#allocation4 + $0x159] sm:$0xff] }
 0x4fd   : > { %19506 = vmatprep.mubr.bf16.mxu1 %v24541_v3  ;;  %v24657_v3 = vpack.c.bf16 %v5761_v0, %v5760_v15  ;;  %v5778_v58 = vld [vmem:[#allocation4 + $0x139] sm:$0xff]  ;;  %v5780_v0 = vld [vmem:[#allocation4 + $0x151] sm:$0xff] }
 0x504   : > { %19507 = vmatmul.mubr.bf16.gmra.mrb[72].mxu1 %v24543_v12  ;;  %v23047_v12 = vld [vmem:[#allocation6 + $0x388] sm:$0xff]  }
 0x505   : > { %19510 = vmatprep.mubr.bf16.mxu1 %v24547_v23  ;;  %v23048_v23 = vld [vmem:[#allocation6 + $0x390] sm:$0xff]  }
 0x50c   : > { %19511 = vmatmul.mubr.bf16.gmra.mrb[76].mxu1 %v24549_v2  ;;  %v5763_v2 = vld [vmem:[#allocation4 + $0x81] sm:$0xff] }
 0x50d   : > { %19514 = vmatprep.mubr.bf16.mxu1 %v24553_v62  ;;  %v5765_v62 = vld [vmem:[#allocation4 + $0x99] sm:$0xff] }
 0x50e   : > { %v24663_v40 = vpack.c.bf16 %v5765_v62, %v5764_v6  ;;  %v5782_v62 = vld [vmem:[#allocation4 + $0x169] sm:$0xff]  ;;  %v5784_v6 = vld [vmem:[#allocation4 + $0x181] sm:$0xff] }
 0x514   : > { %19515 = vmatmul.mubr.bf16.gmra.mrb[80].mxu1 %v24555_v22  ;;  %v5762_v22 = vld [vmem:[#allocation4 + $0x79] sm:$0xff] }
 0x515   : > { %19518 = vmatprep.mubr.bf16.mxu1 %v24559_v1  ;;  %v24661_v1 = vpack.c.bf16 %v5763_v2, %v5762_v22  ;;  %v5785_v2 = vld [vmem:[#allocation4 + $0x189] sm:$0xff] }
 0x51c   : > { %19519 = vmatmul.mubr.bf16.gmra.mrb[84].mxu1 %v24630_v54 }
 0x51d   : > { %19522 = vmatprep.mubr.bf16.mxu1 %v24630_v54 }
 0x524   : > { %19523 = vmatmul.mubr.bf16.gmra.mrb[88].mxu1 %v24630_v54 }
 0x525   : > { %19542 = vmatprep.mubr.bf16.mxu1 %v5800_v30  ;;  %v5779_v30 = vld [vmem:[#allocation4 + $0x141] sm:$0xff] }
 0x526   : > { %v24685_v15 = vpack.c.bf16 %v5779_v30, %v5778_v58  ;;  %v23056_v30 = vld [vmem:[#allocation6 + $0x3d0] sm:$0xff]  }
 0x52c   : > { %19543 = vmatmul.mubr.bf16.vlgmr.msra.gmra.mrb[48].mxu1 %v24655_v18 }
 0x52d   : > { %19587 = vmatpush3.bf16.msra.mxu1 %v23046_v51  ;;  %19546 = vmatprep.mubr.bf16.mxu1 %v24657_v3  ;;  %v24679_v51 = vpack.c.bf16 %v5775_v59, %v5774_v11  ;;  %v5798_v59 = vld [vmem:[#allocation4 + $0x229] sm:$0xff] }
 0x52e   : > { %19588 = vmatprep.subr.bf16.mxu1 %v23047_v12  ;;  %v24711_v11 = vpack.c.bf16 %v5799_v10, %v5798_v59  ;;  %v6546_v59 = vld [vmem:[#allocation4 + $0x140] sm:$0xff] }
 0x52f   : > { %v6543_v10 = vld [vmem:[#allocation4 + $0x120] sm:$0xff] }
 0x531   : > { %19589 = vmatpush3.bf16.msra.mxu1 %v23047_v12  ;;  %v24687_v12 = vpack.c.bf16 %v5781_v13, %v5780_v0  ;;  %v6535_v13 = vld [vmem:[#allocation4 + $0xc0] sm:$0xff]  ;;  %v6537_v0 = vld [vmem:[#allocation4 + $0xd8] sm:$0xff] }
 0x532   : > { %19590 = vmatprep.subr.bf16.mxu1 %v23048_v23 }
 0x534   : > { %19547 = vmatmul.mubr.bf16.gmra.mrb[52].mxu1 %v24661_v1 }
 0x535   : > { %19550 = vmatprep.mubr.bf16.mxu1 %v24663_v40  ;;  %19591 = vmatpush3.bf16.msra.mxu1 %v23048_v23  ;;  %v5783_v23 = vld [vmem:[#allocation4 + $0x171] sm:$0xff] }
 0x536   : > { %19592 = vmatprep.subr.bf16.mxu1 %v23049_v48  ;;  %v24691_v22 = vpack.c.bf16 %v5783_v23, %v5782_v62  ;;  %v23067_v23 = vld [vmem:[#allocation6 + $0x428] sm:$0xff]   ;;  %v23068_v62 = vld [vmem:[#allocation6 + $0x430] sm:$0xff]  }
 0x539   : > { %19593 = vmatpush3.bf16.msra.mxu1 %v23049_v48  ;;  %v24693_v48 = vpack.c.bf16 %v5785_v2, %v5784_v6  ;;  %v6540_v6 = vld [vmem:[#allocation4 + $0xf8] sm:$0xff] }
 0x53a   : > { %19594 = vmatprep.subr.bf16.mxu1 %v23050_v52 }
 0x53c   : > { %19551 = vmatmul.mubr.bf16.gmra.mrb[56].mxu1 %v24667_v36 }
 0x53d   : > { %19554 = vmatprep.mubr.bf16.mxu1 %v24669_v37  ;;  %19595 = vmatpush3.bf16.msra.mxu1 %v23050_v52  ;;  %v5787_v52 = vld [vmem:[#allocation4 + $0x1a1] sm:$0xff] }
 0x53e   : > { %19596 = vmatprep.subr.bf16.mxu1 %v23051_v46  ;;  %v24697_v34 = vpack.c.bf16 %v5787_v52, %v5786_v32  ;;  %v6542_v52 = vld [vmem:[#allocation4 + $0x110] sm:$0xff] }
 0x541   : > { %19597 = vmatpush3.bf16.msra.mxu1 %v23051_v46  ;;  %v24699_v46 = vpack.c.bf16 %v5789_v5, %v5788_v43  ;;  %v6539_v5 = vld [vmem:[#allocation4 + $0xf0] sm:$0xff]  ;;  %v6541_v43 = vld [vmem:[#allocation4 + $0x108] sm:$0xff] }
 0x542   : > { %19598 = vmatprep.subr.bf16.mxu1 %v23052_v45  ;;  %v6576_v32 = vpack.c.bf16 %v6540_v6, %v6539_v5  ;;  %v7300_v5 = vld [vmem:[#allocation4 + $0x9a] sm:$0xff] }
 0x544   : > { %19555 = vmatmul.mubr.bf16.gmra.mrb[60].mxu1 %v24673_v50 }
 0x545   : > { %19558 = vmatprep.mubr.bf16.mxu1 %v24675_v4  ;;  %19599 = vmatpush3.bf16.msra.mxu1 %v23052_v45  ;;  %v5791_v45 = vld [vmem:[#allocation4 + $0x1d1] sm:$0xff] }
 0x546   : > { %19600 = vmatprep.subr.bf16.mxu1 %v23053_v41  ;;  %v24703_v17 = vpack.c.bf16 %v5791_v45, %v5790_v38  ;;  %v23069_v45 = vld [vmem:[#allocation6 + $0x438] sm:$0xff]   ;;  %v23070_v38 = vld [vmem:[#allocation6 + $0x440] sm:$0xff]  }
 0x549   : > { %19601 = vmatpush3.bf16.msra.mxu1 %v23053_v41  ;;  %v24705_v41 = vpack.c.bf16 %v5793_v14, %v5792_v20  ;;  %v6577_v14 = vpack.c.bf16 %v6542_v52, %v6541_v43  ;;  %v6544_v20 = vld [vmem:[#allocation4 + $0x128] sm:$0xff]  ;;  %v7299_v52 = vld [vmem:[#allocation4 + $0x92] sm:$0xff] }
 0x54a   : > { %19646 = vmatprep.subr.bf16.mxu1 %v23054_v35  ;;  %v7302_v43 = vld [vmem:[#allocation4 + $0xb2] sm:$0xff] }
 0x54c   : > { %19559 = vmatmul.mubr.bf16.gmra.mrb[64].mxu1 %v24679_v51 }
 0x54d   : > { %19562 = vmatprep.mubr.bf16.mxu1 %v24681_v63 }
 0x554   : > { %19563 = vmatmul.mubr.bf16.gmra.mrb[68].mxu1 %v24685_v15 }
 0x555   : > { %19566 = vmatprep.mubr.bf16.mxu1 %v24687_v12 }
 0x55c   : > { %19567 = vmatmul.mubr.bf16.gmra.mrb[72].mxu1 %v24691_v22 }
 0x55d   : > { %19570 = vmatprep.mubr.bf16.mxu1 %v24693_v48 }
 0x564   : > { %19571 = vmatmul.mubr.bf16.gmra.mrb[76].mxu1 %v24697_v34 }
 0x565   : > { %19574 = vmatprep.mubr.bf16.mxu1 %v24699_v46 }
 0x56c   : > { %19575 = vmatmul.mubr.bf16.gmra.mrb[80].mxu1 %v24703_v17 }
 0x56d   : > { %19578 = vmatprep.mubr.bf16.mxu1 %v24705_v41 }
 0x574   : > { %19579 = vmatmul.mubr.bf16.gmra.mrb[84].mxu1 %v24505_v28  ;;  %v23057_v28 = vld [vmem:[#allocation6 + $0x3d8] sm:$0xff]  }
 0x575   : > { %19582 = vmatprep.mubr.bf16.mxu1 %v24501_v57  ;;  %v23058_v57 = vld [vmem:[#allocation6 + $0x3e0] sm:$0xff]  }
 0x57c   : > { %19583 = vmatmul.mubr.bf16.gmra.mrb[88].mxu1 %v24711_v11 }
 0x57d   : > { %19602 = vmatprep.mubr.bf16.mxu1 %v24564_v16  ;;  %v23059_v16 = vld [vmem:[#allocation6 + $0x3e8] sm:$0xff]  }
 0x584   : > { %19603 = vmatmul.mubr.bf16.vlgmr.msra.gmra.mrb[48].mxu1 %v24566_v26  ;;  %v23060_v26 = vld [vmem:[#allocation6 + $0x3f0] sm:$0xff]  }
 0x585   : > { %19647 = vmatpush3.bf16.msra.mxu1 %v23054_v35  ;;  %19606 = vmatprep.mubr.bf16.mxu1 %v24570_v61  ;;  %v23061_v61 = vld [vmem:[#allocation6 + $0x3f8] sm:$0xff]   ;;  %v6538_v35 = vld [vmem:[#allocation4 + $0xe0] sm:$0xff] }
 0x586   : > { %19648 = vmatprep.subr.bf16.mxu1 %v23055_v49  ;;  %v6575_v2 = vpack.c.bf16 %v6538_v35, %v6537_v0  ;;  %v23071_v35 = vld [vmem:[#allocation6 + $0x448] sm:$0xff]   ;;  %v7296_v0 = vld [vmem:[#allocation4 + $0x6a] sm:$0xff] }
 0x589   : > { %19649 = vmatpush3.bf16.msra.mxu1 %v23055_v49  ;;  %v6578_v49 = vpack.c.bf16 %v6544_v20, %v6543_v10  ;;  %v23082_v20 = vld [vmem:[#allocation6 + $0x4e0] sm:$0xff]  }
 0x58a   : > { %19650 = vmatprep.subr.bf16.mxu1 %v23056_v30  ;;  %v7304_v10 = vld [vmem:[#allocation4 + $0xca] sm:$0xff] }
 0x58c   : > { %19607 = vmatmul.mubr.bf16.gmra.mrb[52].mxu1 %v24572_v42  ;;  %v23062_v42 = vld [vmem:[#allocation6 + $0x400] sm:$0xff]  }
 0x58d   : > { %19610 = vmatprep.mubr.bf16.mxu1 %v24576_v56  ;;  %19651 = vmatpush3.bf16.msra.mxu1 %v23056_v30  ;;  %v6182_v56 = vld [vmem:[#allocation4 + $0x22a] sm:$0xff]  ;;  %v6545_v30 = vld [vmem:[#allocation4 + $0x138] sm:$0xff] }
 0x58e   : > { %19652 = vmatprep.subr.bf16.mxu1 %v23057_v28 }
 0x591   : > { %19653 = vmatpush3.bf16.msra.mxu1 %v23057_v28  ;;  %v6579_v28 = vpack.c.bf16 %v6546_v59, %v6545_v30  ;;  %v7303_v59 = vld [vmem:[#allocation4 + $0xc2] sm:$0xff] }
 0x592   : > { %19654 = vmatprep.subr.bf16.mxu1 %v23058_v57  ;;  %v7306_v30 = vld [vmem:[#allocation4 + $0xe2] sm:$0xff] }
 0x594   : > { %19611 = vmatmul.mubr.bf16.gmra.mrb[56].mxu1 %v24578_v9  ;;  %v6183_v9 = vld [vmem:[#allocation4 + $0x232] sm:$0xff] }
 0x595   : > { %19614 = vmatprep.mubr.bf16.mxu1 %v24582_v60  ;;  %19655 = vmatpush3.bf16.msra.mxu1 %v23058_v57  ;;  %v24735_v60 = vpack.c.bf16 %v6183_v9, %v6182_v56  ;;  %v6548_v57 = vld [vmem:[#allocation4 + $0x158] sm:$0xff]  ;;  %v6552_v9 = vld [vmem:[#allocation4 + $0x188] sm:$0xff] }
 0x596   : > { %19656 = vmatprep.subr.bf16.mxu1 %v23059_v16 }
 0x599   : > { %19657 = vmatpush3.bf16.msra.mxu1 %v23059_v16  ;;  %v6550_v16 = vld [vmem:[#allocation4 + $0x170] sm:$0xff] }
 0x59a   : > { %19658 = vmatprep.subr.bf16.mxu1 %v23060_v26 }
 0x59c   : > { %19615 = vmatmul.mubr.bf16.gmra.mrb[60].mxu1 %v24584_v8  ;;  %v6530_v8 = vld [vmem:[#allocation4 + $0x80] sm:$0xff] }
 0x59d   : > { %19618 = vmatprep.mubr.bf16.mxu1 %v24588_v44  ;;  %19659 = vmatpush3.bf16.msra.mxu1 %v23060_v26  ;;  %v6529_v44 = vld [vmem:[#allocation4 + $0x78] sm:$0xff]  ;;  %v6547_v26 = vld [vmem:[#allocation4 + $0x150] sm:$0xff] }
 0x59e   : > { %19660 = vmatprep.subr.bf16.mxu1 %v23061_v61 }
 0x5a1   : > { %19661 = vmatpush3.bf16.msra.mxu1 %v23061_v61  ;;  %v6580_v61 = vpack.c.bf16 %v6548_v57, %v6547_v26  ;;  %v23083_v57 = vld [vmem:[#allocation6 + $0x4e8] sm:$0xff]   ;;  %v23084_v26 = vld [vmem:[#allocation6 + $0x4f0] sm:$0xff]  }
 0x5a2   : > { %19706 = vmatprep.subr.bf16.mxu1 %v23062_v42 }
 0x5a4   : > { %19619 = vmatmul.mubr.bf16.gmra.mrb[64].mxu1 %v24590_v31  ;;  %v23063_v31 = vld [vmem:[#allocation6 + $0x408] sm:$0xff]  }
 0x5a5   : > { %19622 = vmatprep.mubr.bf16.mxu1 %v24594_v47  ;;  %v6571_v47 = vpack.c.bf16 %v6530_v8, %v6529_v44  ;;  %v6554_v8 = vld [vmem:[#allocation4 + $0x1a0] sm:$0xff] }
 0x5a6   : > { %v6551_v44 = vld [vmem:[#allocation4 + $0x180] sm:$0xff] }
 0x5ac   : > { %19623 = vmatmul.mubr.bf16.gmra.mrb[68].mxu1 %v24596_v24  ;;  %v23064_v24 = vld [vmem:[#allocation6 + $0x410] sm:$0xff]  }
 0x5ad   : > { %19626 = vmatprep.mubr.bf16.mxu1 %v24600_v27  ;;  %v6532_v27 = vld [vmem:[#allocation4 + $0x98] sm:$0xff] }
 0x5b4   : > { %19627 = vmatmul.mubr.bf16.gmra.mrb[72].mxu1 %v24602_v55  ;;  %v6534_v55 = vld [vmem:[#allocation4 + $0xb0] sm:$0xff] }
 0x5b5   : > { %19630 = vmatprep.mubr.bf16.mxu1 %v24606_v19  ;;  %v6531_v19 = vld [vmem:[#allocation4 + $0x90] sm:$0xff] }
 0x5bc   : > { %19631 = vmatmul.mubr.bf16.gmra.mrb[76].mxu1 %v24608_v39  ;;  %v6572_v39 = vpack.c.bf16 %v6532_v27, %v6531_v19  ;;  %v6556_v27 = vld [vmem:[#allocation4 + $0x1b8] sm:$0xff]  ;;  %v6555_v19 = vld [vmem:[#allocation4 + $0x1b0] sm:$0xff] }
 0x5bd   : > { %19634 = vmatprep.mubr.bf16.mxu1 %v24612_v21  ;;  %v6533_v21 = vld [vmem:[#allocation4 + $0xa8] sm:$0xff] }
 0x5c4   : > { %19635 = vmatmul.mubr.bf16.gmra.mrb[80].mxu1 %v24614_v7  ;;  %v23065_v7 = vld [vmem:[#allocation6 + $0x418] sm:$0xff]  }
 0x5c5   : > { %19638 = vmatprep.mubr.bf16.mxu1 %v24620_v29  ;;  %v23066_v29 = vld [vmem:[#allocation6 + $0x420] sm:$0xff]  }
 0x5cc   : > { %19639 = vmatmul.mubr.bf16.gmra.mrb[84].mxu1 %v24618_v33  ;;  %v6573_v33 = vpack.c.bf16 %v6534_v55, %v6533_v21  ;;  %v6558_v55 = vld [vmem:[#allocation4 + $0x1d0] sm:$0xff]  ;;  %v6557_v21 = vld [vmem:[#allocation4 + $0x1c8] sm:$0xff] }
 0x5cd   : > { %19642 = vmatprep.mubr.bf16.mxu1 %v24624_v53  ;;  %v6536_v53 = vld [vmem:[#allocation4 + $0xc8] sm:$0xff] }
 0x5ce   : > { %v6574_v58 = vpack.c.bf16 %v6536_v53, %v6535_v13  ;;  %v23072_v13 = vld [vmem:[#allocation6 + $0x450] sm:$0xff]  }
 0x5d4   : > { %19643 = vmatmul.mubr.bf16.gmra.mrb[88].mxu1 %v24735_v60 }
 0x5d5   : > { %19662 = vmatprep.mubr.bf16.mxu1 %v24630_v54 }
 0x5dc   : > { %19663 = vmatmul.mubr.bf16.vlgmr.msra.gmra.mrb[48].mxu1 %v24630_v54 }
 0x5dd   : > { %19666 = vmatprep.mubr.bf16.mxu1 %v6571_v47  ;;  %19707 = vmatpush3.bf16.msra.mxu1 %v23062_v42  ;;  %v6549_v42 = vld [vmem:[#allocation4 + $0x168] sm:$0xff]  ;;  %v6553_v47 = vld [vmem:[#allocation4 + $0x198] sm:$0xff] }
 0x5de   : > { %19708 = vmatprep.subr.bf16.mxu1 %v23063_v31  ;;  %v6581_v56 = vpack.c.bf16 %v6550_v16, %v6549_v42  ;;  %v7308_v42 = vld [vmem:[#allocation4 + $0xfa] sm:$0xff] }
 0x5e1   : > { %19709 = vmatpush3.bf16.msra.mxu1 %v23063_v31  ;;  %v6582_v31 = vpack.c.bf16 %v6552_v9, %v6551_v44  ;;  %v7310_v9 = vld [vmem:[#allocation4 + $0x112] sm:$0xff] }
 0x5e2   : > { %19710 = vmatprep.subr.bf16.mxu1 %v23064_v24 }
 0x5e4   : > { %19667 = vmatmul.mubr.bf16.gmra.mrb[52].mxu1 %v6572_v39  ;;  %v6584_v39 = vpack.c.bf16 %v6556_v27, %v6555_v19  ;;  %v7314_v27 = vld [vmem:[#allocation4 + $0x142] sm:$0xff] }
 0x5e5   : > { %19670 = vmatprep.mubr.bf16.mxu1 %v6573_v33  ;;  %19711 = vmatpush3.bf16.msra.mxu1 %v23064_v24  ;;  %v6583_v24 = vpack.c.bf16 %v6554_v8, %v6553_v47  ;;  %v6560_v33 = vld [vmem:[#allocation4 + $0x1e8] sm:$0xff] }
 0x5e6   : > { %19712 = vmatprep.subr.bf16.mxu1 %v23065_v7  ;;  %v7312_v47 = vld [vmem:[#allocation4 + $0x12a] sm:$0xff] }
 0x5e9   : > { %19713 = vmatpush3.bf16.msra.mxu1 %v23065_v7  ;;  %v6585_v7 = vpack.c.bf16 %v6558_v55, %v6557_v21  ;;  %v7316_v21 = vld [vmem:[#allocation4 + $0x15a] sm:$0xff] }
 0x5ea   : > { %19714 = vmatprep.subr.bf16.mxu1 %v23066_v29 }
 0x5ec   : > { %19671 = vmatmul.mubr.bf16.gmra.mrb[56].mxu1 %v6574_v58  ;;  %v23073_v58 = vld [vmem:[#allocation6 + $0x458] sm:$0xff]  }
 0x5ed   : > { %19674 = vmatprep.mubr.bf16.mxu1 %v6575_v2  ;;  %19715 = vmatpush3.bf16.msra.mxu1 %v23066_v29  ;;  %v6559_v29 = vld [vmem:[#allocation4 + $0x1e0] sm:$0xff] }
 0x5ee   : > { %19716 = vmatprep.subr.bf16.mxu1 %v23067_v23  ;;  %v6586_v53 = vpack.c.bf16 %v6560_v33, %v6559_v29  ;;  %v7297_v2 = vld [vmem:[#allocation4 + $0x7a] sm:$0xff]  ;;  %v7318_v33 = vld [vmem:[#allocation4 + $0x172] sm:$0xff] }
 0x5f1   : > { %19717 = vmatpush3.bf16.msra.mxu1 %v23067_v23 }
 0x5f2   : > { %19718 = vmatprep.subr.bf16.mxu1 %v23068_v62 }
 0x5f4   : > { %19675 = vmatmul.mubr.bf16.gmra.mrb[60].mxu1 %v6576_v32  ;;  %v7301_v32 = vld [vmem:[#allocation4 + $0xaa] sm:$0xff] }
 0x5f5   : > { %19678 = vmatprep.mubr.bf16.mxu1 %v6577_v14  ;;  %19719 = vmatpush3.bf16.msra.mxu1 %v23068_v62  ;;  %v23079_v62 = vld [vmem:[#allocation6 + $0x4c8] sm:$0xff]   ;;  %v23081_v14 = vld [vmem:[#allocation6 + $0x4d8] sm:$0xff]  }
 0x5f6   : > { %19720 = vmatprep.subr.bf16.mxu1 %v23069_v45 }
 0x5f9   : > { %19721 = vmatpush3.bf16.msra.mxu1 %v23069_v45  ;;  %v7340_v45 = vpack.c.bf16 %v7300_v5, %v7299_v52 }
 0x5fa   : > { %19766 = vmatprep.subr.bf16.mxu1 %v23070_v38 }
 0x5fc   : > { %19679 = vmatmul.mubr.bf16.gmra.mrb[64].mxu1 %v6578_v49  ;;  %v7305_v49 = vld [vmem:[#allocation4 + $0xda] sm:$0xff] }
 0x5fd   : > { %19682 = vmatprep.mubr.bf16.mxu1 %v6579_v28  ;;  %v7342_v28 = vpack.c.bf16 %v7304_v10, %v7303_v59  ;;  %v7343_v16 = vpack.c.bf16 %v7306_v30, %v7305_v49 }
 0x604   : > { %19683 = vmatmul.mubr.bf16.gmra.mrb[68].mxu1 %v6580_v61  ;;  %v7307_v61 = vld [vmem:[#allocation4 + $0xf2] sm:$0xff] }
 0x605   : > { %19686 = vmatprep.mubr.bf16.mxu1 %v6581_v56  ;;  %v7309_v56 = vld [vmem:[#allocation4 + $0x10a] sm:$0xff]  ;;  %v7344_v8 = vpack.c.bf16 %v7308_v42, %v7307_v61 }
 0x606   : > { %v7345_v44 = vpack.c.bf16 %v7310_v9, %v7309_v56 }
 0x60c   : > { %19687 = vmatmul.mubr.bf16.gmra.mrb[72].mxu1 %v6582_v31  ;;  %v7311_v31 = vld [vmem:[#allocation4 + $0x122] sm:$0xff] }
 0x60d   : > { %19690 = vmatprep.mubr.bf16.mxu1 %v6583_v24  ;;  %v7313_v24 = vld [vmem:[#allocation4 + $0x13a] sm:$0xff]  ;;  %v7346_v55 = vpack.c.bf16 %v7312_v47, %v7311_v31 }
 0x60e   : > { %v7347_v19 = vpack.c.bf16 %v7314_v27, %v7313_v24 }
 0x614   : > { %19691 = vmatmul.mubr.bf16.gmra.mrb[76].mxu1 %v6584_v39  ;;  %v7315_v39 = vld [vmem:[#allocation4 + $0x152] sm:$0xff] }
 0x615   : > { %19694 = vmatprep.mubr.bf16.mxu1 %v6585_v7  ;;  %v7317_v7 = vld [vmem:[#allocation4 + $0x16a] sm:$0xff]  ;;  %v7348_v29 = vpack.c.bf16 %v7316_v21, %v7315_v39 }
 0x61c   : > { %19695 = vmatmul.mubr.bf16.gmra.mrb[80].mxu1 %v6586_v53  ;;  %v7349_v53 = vpack.c.bf16 %v7318_v33, %v7317_v7  ;;  %v24785_v7 = vld [vmem:[#allocation4 + $0x30] sm:$0xff] }
 0x61d   : > { %19698 = vmatprep.mubr.bf16.mxu1 %v24630_v54 }
 0x624   : > { %19699 = vmatmul.mubr.bf16.gmra.mrb[84].mxu1 %v24630_v54 }
 0x625   : > { %19702 = vmatprep.mubr.bf16.mxu1 %v24630_v54 }
 0x62c   : > { %19703 = vmatmul.mubr.bf16.gmra.mrb[88].mxu1 %v24630_v54  ;;  %v23074_v54 = vld [vmem:[#allocation6 + $0x460] sm:$0xff]  }
 0x62d   : > { %19722 = vmatprep.mubr.bf16.mxu1 %v24655_v18  ;;  %v23075_v18 = vld [vmem:[#allocation6 + $0x468] sm:$0xff]  }
 0x634   : > { %19723 = vmatmul.mubr.bf16.vlgmr.msra.gmra.mrb[48].mxu1 %v24657_v3  ;;  %v23076_v3 = vld [vmem:[#allocation6 + $0x470] sm:$0xff]  }
 0x635   : > { %19726 = vmatprep.mubr.bf16.mxu1 %v24661_v1  ;;  %19767 = vmatpush3.bf16.msra.mxu1 %v23070_v38  ;;  %v23077_v1 = vld [vmem:[#allocation6 + $0x478] sm:$0xff]   ;;  %v7341_v38 = vpack.c.bf16 %v7302_v43, %v7301_v32 }
 0x636   : > { %19768 = vmatprep.subr.bf16.mxu1 %v23071_v35 }
 0x639   : > { %19769 = vmatpush3.bf16.msra.mxu1 %v23071_v35  ;;  %v7319_v35 = vld [vmem:[#allocation4 + $0x182] sm:$0xff] }
 0x63a   : > { %19770 = vmatprep.subr.bf16.mxu1 %v23072_v13 }
 0x63c   : > { %19727 = vmatmul.mubr.bf16.gmra.mrb[52].mxu1 %v24663_v40  ;;  %v23078_v40 = vld [vmem:[#allocation6 + $0x4c0] sm:$0xff]  }
 0x63d   : > { %19730 = vmatprep.mubr.bf16.mxu1 %v24667_v36  ;;  %19771 = vmatpush3.bf16.msra.mxu1 %v23072_v13  ;;  %v6945_v36 = vld [vmem:[#allocation4 + $0x1f9] sm:$0xff]  ;;  %v7320_v13 = vld [vmem:[#allocation4 + $0x18a] sm:$0xff] }
 0x63e   : > { %19772 = vmatprep.subr.bf16.mxu1 %v23073_v58 }
 0x641   : > { %19773 = vmatpush3.bf16.msra.mxu1 %v23073_v58  ;;  %v7321_v58 = vld [vmem:[#allocation4 + $0x19a] sm:$0xff] }
 0x642   : > { %19774 = vmatprep.subr.bf16.mxu1 %v23074_v54 }
 0x644   : > { %19731 = vmatmul.mubr.bf16.gmra.mrb[56].mxu1 %v24669_v37  ;;  %v6946_v37 = vld [vmem:[#allocation4 + $0x201] sm:$0xff] }
 0x645   : > { %19734 = vmatprep.mubr.bf16.mxu1 %v24673_v50  ;;  %19775 = vmatpush3.bf16.msra.mxu1 %v23074_v54  ;;  %v6971_v50 = vpack.c.bf16 %v6946_v37, %v6945_v36  ;;  %v7322_v54 = vld [vmem:[#allocation4 + $0x1a2] sm:$0xff]  ;;  %v7325_v36 = vld [vmem:[#allocation4 + $0x1ca] sm:$0xff]  ;;  %v7326_v37 = vld [vmem:[#allocation4 + $0x1d2] sm:$0xff] }
 0x646   : > { %19776 = vmatprep.subr.bf16.mxu1 %v23075_v18 }
 0x649   : > { %19777 = vmatpush3.bf16.msra.mxu1 %v23075_v18  ;;  %v7350_v18 = vpack.c.bf16 %v7320_v13, %v7319_v35  ;;  %v23087_v35 = vld [vmem:[#allocation6 + $0x488] sm:$0xff]  }
 0x64a   : > { %19778 = vmatprep.subr.bf16.mxu1 %v23076_v3 }
 0x64c   : > { %19735 = vmatmul.mubr.bf16.gmra.mrb[60].mxu1 %v24675_v4  ;;  %v6947_v4 = vld [vmem:[#allocation4 + $0x211] sm:$0xff] }
 0x64d   : > { %19738 = vmatprep.mubr.bf16.mxu1 %v24679_v51  ;;  %19779 = vmatpush3.bf16.msra.mxu1 %v23076_v3  ;;  %v6948_v51 = vld [vmem:[#allocation4 + $0x219] sm:$0xff]  ;;  %v7351_v3 = vpack.c.bf16 %v7322_v54, %v7321_v58 }
 0x64e   : > { %19780 = vmatprep.subr.bf16.mxu1 %v23077_v1 }
 0x651   : > { %19781 = vmatpush3.bf16.msra.mxu1 %v23077_v1  ;;  %v7323_v1 = vld [vmem:[#allocation4 + $0x1b2] sm:$0xff] }
 0x652   : > { %19826 = vmatprep.subr.bf16.mxu1 %v23078_v40 }
 0x654   : > { %19739 = vmatmul.mubr.bf16.gmra.mrb[64].mxu1 %v24681_v63  ;;  %v6972_v63 = vpack.c.bf16 %v6948_v51, %v6947_v4  ;;  %v7353_v4 = vpack.c.bf16 %v7326_v37, %v7325_v36  ;;  %v7329_v51 = vld [vmem:[#allocation4 + $0x1fa] sm:$0xff] }
 0x655   : > { %19742 = vmatprep.mubr.bf16.mxu1 %v24685_v15  ;;  %v6951_v15 = vld [vmem:[#allocation4 + $0x241] sm:$0xff] }
 0x656   : > { %v23088_v36 = vld [vmem:[#allocation6 + $0x490] sm:$0xff]  }
 0x65c   : > { %19743 = vmatmul.mubr.bf16.gmra.mrb[68].mxu1 %v24687_v12  ;;  %v6952_v12 = vld [vmem:[#allocation4 + $0x249] sm:$0xff] }
 0x65d   : > { %19746 = vmatprep.mubr.bf16.mxu1 %v24691_v22  ;;  %v7293_v22 = vld [vmem:[#allocation4 + $0x4a] sm:$0xff] }
 0x664   : > { %19747 = vmatmul.mubr.bf16.gmra.mrb[72].mxu1 %v24693_v48  ;;  %v7294_v48 = vld [vmem:[#allocation4 + $0x52] sm:$0xff] }
 0x665   : > { %19750 = vmatprep.mubr.bf16.mxu1 %v24697_v34  ;;  %v6974_v34 = vpack.c.bf16 %v6952_v12, %v6951_v15  ;;  %v7327_v15 = vld [vmem:[#allocation4 + $0x1e2] sm:$0xff]  ;;  %v7328_v12 = vld [vmem:[#allocation4 + $0x1ea] sm:$0xff] }
 0x66c   : > { %19751 = vmatmul.mubr.bf16.gmra.mrb[76].mxu1 %v24699_v46  ;;  %v7337_v46 = vpack.c.bf16 %v7294_v48, %v7293_v22  ;;  %v7354_v48 = vpack.c.bf16 %v7328_v12, %v7327_v15 }
 0x66d   : > { %19754 = vmatprep.mubr.bf16.mxu1 %v24703_v17  ;;  %v7295_v17 = vld [vmem:[#allocation4 + $0x62] sm:$0xff] }
 0x66e   : > { %v7338_v23 = vpack.c.bf16 %v7296_v0, %v7295_v17  ;;  %v7335_v0 = vld [vmem:[#allocation4 + $0x242] sm:$0xff] }
 0x674   : > { %19755 = vmatmul.mubr.bf16.gmra.mrb[80].mxu1 %v24705_v41  ;;  %v7298_v41 = vld [vmem:[#allocation4 + $0x82] sm:$0xff] }
 0x675   : > { %19758 = vmatprep.mubr.bf16.mxu1 %v6971_v50  ;;  %v7339_v6 = vpack.c.bf16 %v7298_v41, %v7297_v2  ;;  %v23085_v41 = vld [vmem:[#allocation6 + $0x4f8] sm:$0xff]  }
 0x67c   : > { %19759 = vmatmul.mubr.bf16.gmra.mrb[84].mxu1 %v6972_v63  ;;  %v7330_v63 = vld [vmem:[#allocation4 + $0x202] sm:$0xff] }
 0x67d   : > { %19762 = vmatprep.mubr.bf16.mxu1 %v24711_v11  ;;  %v23080_v11 = vld [vmem:[#allocation6 + $0x4d0] sm:$0xff]   ;;  %v7355_v22 = vpack.c.bf16 %v7330_v63, %v7329_v51 }
 0x684   : > { %19763 = vmatmul.mubr.bf16.gmra.mrb[88].mxu1 %v6974_v34  ;;  %v7331_v34 = vld [vmem:[#allocation4 + $0x212] sm:$0xff] }
 0x685   : > { %19782 = vmatprep.mubr.bf16.mxu1 %v7337_v46  ;;  %v7332_v46 = vld [vmem:[#allocation4 + $0x21a] sm:$0xff] }
 0x686   : > { %v7356_v17 = vpack.c.bf16 %v7332_v46, %v7331_v34  ;;  %v23089_v46 = vld [vmem:[#allocation6 + $0x498] sm:$0xff]  }
 0x68c   : > { %19783 = vmatmul.mubr.bf16.vlgmr.msra.gmra.mrb[48].mxu1 %v7338_v23  ;;  %v7336_v23 = vld [vmem:[#allocation4 + $0x24a] sm:$0xff] }
 0x68d   : > { %19786 = vmatprep.mubr.bf16.mxu1 %v7339_v6  ;;  %19827 = vmatpush3.bf16.msra.mxu1 %v23078_v40  ;;  %v7324_v40 = vld [vmem:[#allocation4 + $0x1ba] sm:$0xff]  ;;  %v7358_v2 = vpack.c.bf16 %v7336_v23, %v7335_v0  ;;  %v24767_v6 = vld [vmem:[#allocation9 + $0x1] ss:$0 sm:$0xff] }
 0x68e   : > { %19828 = vmatprep.subr.bf16.mxu1 %v23079_v62  ;;  %v7352_v50 = vpack.c.bf16 %v7324_v40, %v7323_v1 }
 0x691   : > { %19829 = vmatpush3.bf16.msra.mxu1 %v23079_v62  ;;  %v24764_v62 = vld [vmem:[#allocation6 + $0x480] sm:$0xff]  }
 0x692   : > { %19830 = vmatprep.subr.bf16.mxu1 %v23080_v11 }
 0x694   : > { %19787 = vmatmul.mubr.bf16.gmra.mrb[52].mxu1 %v7340_v45 }
 0x695   : > { %19790 = vmatprep.mubr.bf16.mxu1 %v7341_v38  ;;  %19831 = vmatpush3.bf16.msra.mxu1 %v23080_v11 }
 0x696   : > { %19832 = vmatprep.subr.bf16.mxu1 %v23081_v14 }
 0x699   : > { %19833 = vmatpush3.bf16.msra.mxu1 %v23081_v14 }
 0x69a   : > { %19834 = vmatprep.subr.bf16.mxu1 %v23082_v20 }
 0x69c   : > { %19791 = vmatmul.mubr.bf16.gmra.mrb[56].mxu1 %v7342_v28 }
 0x69d   : > { %19794 = vmatprep.mubr.bf16.mxu1 %v7343_v16  ;;  %19835 = vmatpush3.bf16.msra.mxu1 %v23082_v20 }
 0x69e   : > { %19836 = vmatprep.subr.bf16.mxu1 %v23083_v57 }
 0x6a1   : > { %19837 = vmatpush3.bf16.msra.mxu1 %v23083_v57 }
 0x6a2   : > { %19838 = vmatprep.subr.bf16.mxu1 %v23084_v26 }
 0x6a4   : > { %19795 = vmatmul.mubr.bf16.gmra.mrb[60].mxu1 %v7344_v8 }
 0x6a5   : > { %19798 = vmatprep.mubr.bf16.mxu1 %v7345_v44  ;;  %19839 = vmatpush3.bf16.msra.mxu1 %v23084_v26 }
 0x6a6   : > { %19840 = vmatprep.subr.bf16.mxu1 %v23085_v41 }
 0x6a9   : > { %19841 = vmatpush3.bf16.msra.mxu1 %v23085_v41 }
 0x6aa   : > { %19882 = vmatprep.subr.bf16.mxu1 %v24764_v62 }
 0x6ac   : > { %19799 = vmatmul.mubr.bf16.gmra.mrb[64].mxu1 %v7346_v55 }
 0x6ad   : > { %19802 = vmatprep.mubr.bf16.mxu1 %v7347_v19 }
 0x6b4   : > { %19803 = vmatmul.mubr.bf16.gmra.mrb[68].mxu1 %v7348_v29 }
 0x6b5   : > { %19806 = vmatprep.mubr.bf16.mxu1 %v7349_v53 }
 0x6bc   : > { %19807 = vmatmul.mubr.bf16.gmra.mrb[72].mxu1 %v7350_v18 }
 0x6bd   : > { %19810 = vmatprep.mubr.bf16.mxu1 %v7351_v3 }
 0x6c4   : > { %19811 = vmatmul.mubr.bf16.gmra.mrb[76].mxu1 %v7352_v50 }
 0x6c5   : > { %19814 = vmatprep.mubr.bf16.mxu1 %v7353_v4 }
 0x6cc   : > { %19815 = vmatmul.mubr.bf16.gmra.mrb[80].mxu1 %v7354_v48 }
 0x6cd   : > { %19818 = vmatprep.mubr.bf16.mxu1 %v7355_v22 }
 0x6d4   : > { %19819 = vmatmul.mubr.bf16.gmra.mrb[84].mxu1 %v7356_v17 }
 0x6d5   : > { %19822 = vmatprep.mubr.bf16.mxu1 %v24735_v60 }
 0x6dc   : > { %19823 = vmatmul.mubr.bf16.gmra.mrb[88].mxu1 %v7358_v2 }
 0x75f   : > { %v19784_v11 = vpop.f32.mrb[48].mxu1 }
 0x760   : > { %v7687_v52 = vadd.f32 %v19784_v11, %v24767_v6  ;;  %v7458_v5 = vpop.f32.mrb[49].mxu1 }
 0x761   : > { %v7685_v32 = vadd.f32 %v24767_v6, %v7458_v5  ;;  %v19785_v60 = vpop.f32.mrb[50].mxu1 }
 0x762   : > { %v7731_v43 = vmax.f32 %v7687_v52, 0.0  ;;  %v7688_v45 = vadd.f32 %v19785_v60, %v24767_v6  ;;  %v7461_v14 = vpop.f32.mrb[51].mxu1  ;;  %v23090_v52 = vld [vmem:[#allocation6 + $0x4a0] sm:$0xff]  }
 0x763   : > { %v7729_v38 = vmax.f32 %v7685_v32, 0.0  ;;  %v7686_v20 = vadd.f32 %v24767_v6, %v7461_v14 }
 0x764   : > { %7775 = vst [vmem:[#allocation3 + $0x49] sm:$0xff] %v7731_v43  ;;  %v7732_v59 = vmax.f32 %v7688_v45, 0.0 }
 0x765   : > { %7773 = vst [vmem:[#allocation3 + $0x31] sm:$0xff] %v7729_v38  ;;  %7823 = vst [vmem:[#allocation3 + $0x48] sm:$0xff] %v24626_v25  ;;  %v7730_v10 = vmax.f32 %v7686_v20, 0.0  ;;  %v23091_v20 = vld [vmem:[#allocation6 + $0x4a8] sm:$0xff]  }
 0x766   : > { %7776 = vst [vmem:[#allocation3 + $0x51] sm:$0xff] %v7732_v59  ;;  %7820 = vst [vmem:[#allocation3 + $0x30] sm:$0xff] %v24626_v25 }
 0x767   : > { %7774 = vst [vmem:[#allocation3 + $0x39] sm:$0xff] %v7730_v10  ;;  %7824 = vst [vmem:[#allocation3 + $0x50] sm:$0xff] %v24626_v25  ;;  %v19788_v49 = vpop.f32.mrb[52].mxu1 }
 0x768   : > { %7825 = vst [vmem:[#allocation3 + $0x58] sm:$0x3] %v24626_v25  ;;  %v7691_v30 = vadd.f32 %v19788_v49, %v24767_v6  ;;  %7821 = vst [vmem:[#allocation3 + $0x38] sm:$0xff] %v24626_v25  ;;  %v7474_v28 = vpop.f32.mrb[53].mxu1 }
 0x769   : > { %7822 = vst [vmem:[#allocation3 + $0x40] sm:$0x3] %v24626_v25  ;;  %v7689_v57 = vadd.f32 %v24767_v6, %v7474_v28  ;;  %v19789_v16 = vpop.f32.mrb[54].mxu1 }
 0x76a   : > { %v7735_v26 = vmax.f32 %v7691_v30, 0.0  ;;  %v7692_v61 = vadd.f32 %v19789_v16, %v24767_v6  ;;  %v7477_v42 = vpop.f32.mrb[55].mxu1 }
 0x76b   : > { %v7733_v56 = vmax.f32 %v7689_v57, 0.0  ;;  %v7690_v9 = vadd.f32 %v24767_v6, %v7477_v42 }
 0x76c   : > { %7779 = vst [vmem:[#allocation3 + $0x79] sm:$0xff] %v7735_v26  ;;  %v7736_v8 = vmax.f32 %v7692_v61, 0.0 }
 0x76d   : > { %7777 = vst [vmem:[#allocation3 + $0x61] sm:$0xff] %v7733_v56  ;;  %v7734_v44 = vmax.f32 %v7690_v9, 0.0 }
 0x76e   : > { %7826 = vst [vmem:[#allocation3 + $0x60] sm:$0xff] %v24626_v25  ;;  %7780 = vst [vmem:[#allocation3 + $0x81] sm:$0xff] %v7736_v8  ;;  %v7918_v31 = vld [vmem:[#allocation3 + $0x49] sm:$0xff]  ;;  %v7959_v24 = vpack.c.bf16 %v7736_v8, %v7735_v26 }
 0x76f   : > { %v7919_v47 = vld [vmem:[#allocation3 + $0x51] sm:$0xff]  ;;  %7778 = vst [vmem:[#allocation3 + $0x69] sm:$0xff] %v7734_v44  ;;  %v19792_v27 = vpop.f32.mrb[56].mxu1 }
 0x770   : > { %v7916_v55 = vld [vmem:[#allocation3 + $0x31] sm:$0xff]  ;;  %v7917_v19 = vld [vmem:[#allocation3 + $0x39] sm:$0xff]  ;;  %v7957_v39 = vpack.c.bf16 %v7919_v47, %v7918_v31  ;;  %v7695_v21 = vadd.f32 %v19792_v27, %v24767_v6  ;;  %7827 = vst [vmem:[#allocation3 + $0x68] sm:$0xff] %v24785_v7  ;;  %7828 = vst [vmem:[#allocation3 + $0x70] sm:$0x3] %v24785_v7  ;;  %v7490_v33 = vpop.f32.mrb[57].mxu1 }
 0x771   : > { %v7956_v29 = vpack.c.bf16 %v7917_v19, %v7916_v55  ;;  %v7693_v25 = vadd.f32 %v24767_v6, %v7490_v33  ;;  %v19793_v53 = vpop.f32.mrb[58].mxu1  ;;  %v23092_v26 = vld [vmem:[#allocation6 + $0x4b0] sm:$0xff]   ;;  %v23093_v47 = vld [vmem:[#allocation6 + $0x4b8] sm:$0xff]  }
 0x772   : > { %v7739_v13 = vmax.f32 %v7695_v21, 0.0  ;;  %v7696_v58 = vadd.f32 %v19793_v53, %v24767_v6  ;;  %v7493_v54 = vpop.f32.mrb[59].mxu1 }
 0x773   : > { %19842 = vmatprep.mubr.bf16.mxu1 %v7956_v29  ;;  %v7737_v18 = vmax.f32 %v7693_v25, 0.0  ;;  %v7694_v3 = vadd.f32 %v24767_v6, %v7493_v54  ;;  %v24805_v29 = vld [vmem:[#allocation6 + $0x500] sm:$0xff]  }
 0x774   : > { %19843 = vmatmul.mubr.bf16.vlgmr.msra.gmra.mrb[92].mxu1 %v7957_v39  ;;  %7783 = vst [vmem:[#allocation3 + $0xa9] sm:$0xff] %v7739_v13  ;;  %v7740_v1 = vmax.f32 %v7696_v58, 0.0 }
 0x775   : > { %19883 = vmatpush3.bf16.msra.mxu1 %v24764_v62  ;;  %7781 = vst [vmem:[#allocation3 + $0x91] sm:$0xff] %v7737_v18  ;;  %v7738_v40 = vmax.f32 %v7694_v3, 0.0 }
 0x776   : > { %19884 = vmatprep.subr.bf16.mxu1 %v23087_v35  ;;  %7784 = vst [vmem:[#allocation3 + $0xb1] sm:$0xff] %v7740_v1  ;;  %v7961_v37 = vpack.c.bf16 %v7740_v1, %v7739_v13 }
 0x777   : > { %7782 = vst [vmem:[#allocation3 + $0x99] sm:$0xff] %v7738_v40  ;;  %v19796_v50 = vpop.f32.mrb[60].mxu1  ;;  %v7920_v4 = vld [vmem:[#allocation3 + $0x61] sm:$0xff]  ;;  %v7921_v51 = vld [vmem:[#allocation3 + $0x69] sm:$0xff]  ;;  %v7960_v63 = vpack.c.bf16 %v7738_v40, %v7737_v18 }
 0x778   : > { %v7699_v15 = vadd.f32 %v19796_v50, %v24767_v6  ;;  %v7506_v12 = vpop.f32.mrb[61].mxu1  ;;  %v7958_v22 = vpack.c.bf16 %v7921_v51, %v7920_v4 }
 0x779   : > { %19885 = vmatpush3.bf16.msra.mxu1 %v23087_v35  ;;  %v7697_v48 = vadd.f32 %v24767_v6, %v7506_v12  ;;  %v19797_v34 = vpop.f32.mrb[62].mxu1 }
 0x77a   : > { %19886 = vmatprep.subr.bf16.mxu1 %v23088_v36  ;;  %v7743_v17 = vmax.f32 %v7699_v15, 0.0  ;;  %v7700_v0 = vadd.f32 %v19797_v34, %v24767_v6  ;;  %v7509_v23 = vpop.f32.mrb[63].mxu1  ;;  %19846 = vmatprep.mubr.bf16.mxu1 %v7958_v22 }
 0x77b   : > { %v7741_v2 = vmax.f32 %v7697_v48, 0.0  ;;  %v7698_v41 = vadd.f32 %v24767_v6, %v7509_v23 }
 0x77c   : > { %19847 = vmatmul.mubr.bf16.gmra.mrb[96].mxu1 %v7959_v24  ;;  %7787 = vst [vmem:[#allocation3 + $0xd9] sm:$0xff] %v7743_v17  ;;  %v7744_v62 = vmax.f32 %v7700_v0, 0.0 }
 0x77d   : > { %19850 = vmatprep.mubr.bf16.mxu1 %v7960_v63  ;;  %19887 = vmatpush3.bf16.msra.mxu1 %v23088_v36  ;;  %7785 = vst [vmem:[#allocation3 + $0xc1] sm:$0xff] %v7741_v2  ;;  %v7742_v11 = vmax.f32 %v7698_v41, 0.0 }
 0x77e   : > { %19888 = vmatprep.subr.bf16.mxu1 %v23089_v46  ;;  %7788 = vst [vmem:[#allocation3 + $0xe1] sm:$0xff] %v7744_v62  ;;  %v7963_v5 = vpack.c.bf16 %v7744_v62, %v7743_v17 }
 0x77f   : > { %7786 = vst [vmem:[#allocation3 + $0xc9] sm:$0xff] %v7742_v11  ;;  %v19800_v32 = vpop.f32.mrb[64].mxu1  ;;  %v7962_v60 = vpack.c.bf16 %v7742_v11, %v7741_v2 }
 0x780   : > { %v7703_v43 = vadd.f32 %v19800_v32, %v24767_v6  ;;  %v7522_v45 = vpop.f32.mrb[65].mxu1 }
 0x781   : > { %19889 = vmatpush3.bf16.msra.mxu1 %v23089_v46  ;;  %v7701_v14 = vadd.f32 %v24767_v6, %v7522_v45  ;;  %v19801_v38 = vpop.f32.mrb[66].mxu1 }
 0x782   : > { %19890 = vmatprep.subr.bf16.mxu1 %v23090_v52  ;;  %v7747_v59 = vmax.f32 %v7703_v43, 0.0  ;;  %v7704_v10 = vadd.f32 %v19801_v38, %v24767_v6  ;;  %v7525_v49 = vpop.f32.mrb[67].mxu1 }
 0x783   : > { %v7745_v30 = vmax.f32 %v7701_v14, 0.0  ;;  %v7702_v28 = vadd.f32 %v24767_v6, %v7525_v49 }
 0x784   : > { %19851 = vmatmul.mubr.bf16.gmra.mrb[100].mxu1 %v7961_v37  ;;  %7791 = vst [vmem:[#allocation3 + $0x109] sm:$0xff] %v7747_v59  ;;  %v7748_v57 = vmax.f32 %v7704_v10, 0.0 }
 0x785   : > { %19854 = vmatprep.mubr.bf16.mxu1 %v7962_v60  ;;  %19891 = vmatpush3.bf16.msra.mxu1 %v23090_v52  ;;  %7789 = vst [vmem:[#allocation3 + $0xf1] sm:$0xff] %v7745_v30  ;;  %v7746_v16 = vmax.f32 %v7702_v28, 0.0 }
 0x786   : > { %19892 = vmatprep.subr.bf16.mxu1 %v23091_v20  ;;  %7792 = vst [vmem:[#allocation3 + $0x111] sm:$0xff] %v7748_v57  ;;  %v7965_v61 = vpack.c.bf16 %v7748_v57, %v7747_v59 }
 0x787   : > { %7790 = vst [vmem:[#allocation3 + $0xf9] sm:$0xff] %v7746_v16  ;;  %v19804_v42 = vpop.f32.mrb[68].mxu1  ;;  %v7964_v56 = vpack.c.bf16 %v7746_v16, %v7745_v30 }
 0x788   : > { %v7707_v9 = vadd.f32 %v19804_v42, %v24767_v6  ;;  %v7538_v8 = vpop.f32.mrb[69].mxu1 }
 0x789   : > { %19893 = vmatpush3.bf16.msra.mxu1 %v23091_v20  ;;  %v7705_v44 = vadd.f32 %v24767_v6, %v7538_v8  ;;  %v19805_v31 = vpop.f32.mrb[70].mxu1 }
 0x78a   : > { %19894 = vmatprep.subr.bf16.mxu1 %v23092_v26  ;;  %v7751_v24 = vmax.f32 %v7707_v9, 0.0  ;;  %v7708_v27 = vadd.f32 %v19805_v31, %v24767_v6  ;;  %v7541_v55 = vpop.f32.mrb[71].mxu1 }
 0x78b   : > { %v7749_v19 = vmax.f32 %v7705_v44, 0.0  ;;  %v7706_v39 = vadd.f32 %v24767_v6, %v7541_v55 }
 0x78c   : > { %19855 = vmatmul.mubr.bf16.gmra.mrb[104].mxu1 %v7963_v5  ;;  %7795 = vst [vmem:[#allocation3 + $0x139] sm:$0xff] %v7751_v24  ;;  %v7752_v21 = vmax.f32 %v7708_v27, 0.0 }
 0x78d   : > { %19858 = vmatprep.mubr.bf16.mxu1 %v7964_v56  ;;  %19895 = vmatpush3.bf16.msra.mxu1 %v23092_v26  ;;  %7793 = vst [vmem:[#allocation3 + $0x121] sm:$0xff] %v7749_v19  ;;  %v7750_v33 = vmax.f32 %v7706_v39, 0.0 }
 0x78e   : > { %19896 = vmatprep.subr.bf16.mxu1 %v23093_v47  ;;  %7796 = vst [vmem:[#allocation3 + $0x141] sm:$0xff] %v7752_v21  ;;  %v7967_v25 = vpack.c.bf16 %v7752_v21, %v7751_v24 }
 0x78f   : > { %7794 = vst [vmem:[#allocation3 + $0x129] sm:$0xff] %v7750_v33  ;;  %v19808_v53 = vpop.f32.mrb[72].mxu1  ;;  %v7966_v35 = vpack.c.bf16 %v7750_v33, %v7749_v19 }
 0x790   : > { %v7711_v13 = vadd.f32 %v19808_v53, %v24767_v6  ;;  %v7554_v58 = vpop.f32.mrb[73].mxu1 }
 0x791   : > { %19897 = vmatpush3.bf16.msra.mxu1 %v23093_v47  ;;  %v7709_v54 = vadd.f32 %v24767_v6, %v7554_v58  ;;  %v19809_v18 = vpop.f32.mrb[74].mxu1 }
 0x792   : > { %19938 = vmatprep.subr.bf16.mxu1 %v24805_v29  ;;  %v7755_v3 = vmax.f32 %v7711_v13, 0.0  ;;  %v7712_v1 = vadd.f32 %v19809_v18, %v24767_v6  ;;  %v7557_v40 = vpop.f32.mrb[75].mxu1 }
 0x793   : > { %v7753_v36 = vmax.f32 %v7709_v54, 0.0  ;;  %v7710_v37 = vadd.f32 %v24767_v6, %v7557_v40 }
 0x794   : > { %19859 = vmatmul.mubr.bf16.gmra.mrb[108].mxu1 %v7965_v61  ;;  %7799 = vst [vmem:[#allocation3 + $0x169] sm:$0xff] %v7755_v3  ;;  %v7756_v50 = vmax.f32 %v7712_v1, 0.0 }
 0x795   : > { %19862 = vmatprep.mubr.bf16.mxu1 %v7966_v35  ;;  %7797 = vst [vmem:[#allocation3 + $0x151] sm:$0xff] %v7753_v36  ;;  %v7754_v4 = vmax.f32 %v7710_v37, 0.0  ;;  %v23095_v37 = vld [vmem:[#allocation6 + $0x508] sm:$0xff]  }
 0x796   : > { %7800 = vst [vmem:[#allocation3 + $0x171] sm:$0xff] %v7756_v50  ;;  %v7969_v51 = vpack.c.bf16 %v7756_v50, %v7755_v3  ;;  %v23096_v50 = vld [vmem:[#allocation6 + $0x510] sm:$0xff]  }
 0x797   : > { %7798 = vst [vmem:[#allocation3 + $0x159] sm:$0xff] %v7754_v4  ;;  %v19812_v63 = vpop.f32.mrb[76].mxu1  ;;  %v7968_v15 = vpack.c.bf16 %v7754_v4, %v7753_v36  ;;  %v7846_v4 = vld [vmem:[#allocation3 + $0x80] sm:$0xff] }
 0x798   : > { %v7715_v12 = vadd.f32 %v19812_v63, %v24767_v6  ;;  %v7570_v22 = vpop.f32.mrb[77].mxu1  ;;  %v7845_v63 = vld [vmem:[#allocation3 + $0x78] sm:$0xff] }
 0x799   : > { %v7713_v48 = vadd.f32 %v24767_v6, %v7570_v22  ;;  %v19813_v34 = vpop.f32.mrb[78].mxu1 }
 0x79a   : > { %v7759_v46 = vmax.f32 %v7715_v12, 0.0  ;;  %v7716_v17 = vadd.f32 %v19813_v34, %v24767_v6  ;;  %v7573_v0 = vpop.f32.mrb[79].mxu1  ;;  %v23097_v12 = vld [vmem:[#allocation6 + $0x518] sm:$0xff]   ;;  %v7852_v34 = vld [vmem:[#allocation3 + $0xc8] sm:$0xff] }
 0x79b   : > { %v7757_v23 = vmax.f32 %v7713_v48, 0.0  ;;  %v7714_v2 = vadd.f32 %v24767_v6, %v7573_v0  ;;  %v7850_v48 = vld [vmem:[#allocation3 + $0xb0] sm:$0xff]  ;;  %v7851_v0 = vld [vmem:[#allocation3 + $0xc0] sm:$0xff] }
 0x79c   : > { %19863 = vmatmul.mubr.bf16.gmra.mrb[112].mxu1 %v7967_v25  ;;  %7803 = vst [vmem:[#allocation3 + $0x199] sm:$0xff] %v7759_v46  ;;  %v7760_v41 = vmax.f32 %v7716_v17, 0.0 }
 0x79d   : > { %19866 = vmatprep.mubr.bf16.mxu1 %v7968_v15  ;;  %7801 = vst [vmem:[#allocation3 + $0x181] sm:$0xff] %v7757_v23  ;;  %v7758_v62 = vmax.f32 %v7714_v2, 0.0  ;;  %v24848_v15 = vpack.c.bf16 %v7846_v4, %v7845_v63  ;;  %v24856_v2 = vpack.c.bf16 %v7852_v34, %v7851_v0  ;;  %v23104_v63 = vld [vmem:[#allocation6 + $0x550] sm:$0xff]  }
 0x79e   : > { %7804 = vst [vmem:[#allocation3 + $0x1a1] sm:$0xff] %v7760_v41  ;;  %v7971_v11 = vpack.c.bf16 %v7760_v41, %v7759_v46  ;;  %v7849_v46 = vld [vmem:[#allocation3 + $0xa8] sm:$0xff]  ;;  %v23100_v41 = vld [vmem:[#allocation6 + $0x530] sm:$0xff]  }
 0x79f   : > { %7802 = vst [vmem:[#allocation3 + $0x189] sm:$0xff] %v7758_v62  ;;  %v19816_v52 = vpop.f32.mrb[80].mxu1  ;;  %v7970_v5 = vpack.c.bf16 %v7758_v62, %v7757_v23  ;;  %v24854_v17 = vpack.c.bf16 %v7850_v48, %v7849_v46  ;;  %v23099_v23 = vld [vmem:[#allocation6 + $0x528] sm:$0xff]   ;;  %v7854_v62 = vld [vmem:[#allocation3 + $0xe0] sm:$0xff]  ;;  %v23105_v46 = vld [vmem:[#allocation6 + $0x558] sm:$0xff]  }
 0x7a0   : > { %v7719_v32 = vadd.f32 %v19816_v52, %v24767_v6  ;;  %v7586_v60 = vpop.f32.mrb[81].mxu1  ;;  %v7853_v52 = vld [vmem:[#allocation3 + $0xd8] sm:$0xff] }
 0x7a1   : > { %v7717_v43 = vadd.f32 %v24767_v6, %v7586_v60  ;;  %v19817_v45 = vpop.f32.mrb[82].mxu1  ;;  %v23101_v60 = vld [vmem:[#allocation6 + $0x538] sm:$0xff]  }
 0x7a2   : > { %v7763_v14 = vmax.f32 %v7719_v32, 0.0  ;;  %v7720_v38 = vadd.f32 %v19817_v45, %v24767_v6  ;;  %v7589_v20 = vpop.f32.mrb[83].mxu1  ;;  %v7855_v32 = vld [vmem:[#allocation3 + $0xf0] sm:$0xff]  ;;  %v23102_v45 = vld [vmem:[#allocation6 + $0x540] sm:$0xff]  }
 0x7a3   : > { %v7761_v59 = vmax.f32 %v7717_v43, 0.0  ;;  %v7718_v10 = vadd.f32 %v24767_v6, %v7589_v20  ;;  %v7857_v20 = vld [vmem:[#allocation3 + $0x108] sm:$0xff]  ;;  %v8484_v48 = vld [vmem:[#allocation3 + $0x9a] sm:$0xff] }
 0x7a4   : > { %19867 = vmatmul.mubr.bf16.gmra.mrb[116].mxu1 %v7969_v51  ;;  %7807 = vst [vmem:[#allocation3 + $0x1c9] sm:$0xff] %v7763_v14  ;;  %v7764_v49 = vmax.f32 %v7720_v38, 0.0  ;;  %v7848_v51 = vld [vmem:[#allocation3 + $0x98] sm:$0xff]  ;;  %v7860_v38 = vld [vmem:[#allocation3 + $0x128] sm:$0xff] }
 0x7a5   : > { %19870 = vmatprep.mubr.bf16.mxu1 %v7970_v5  ;;  %7805 = vst [vmem:[#allocation3 + $0x1b1] sm:$0xff] %v7761_v59  ;;  %v7762_v30 = vmax.f32 %v7718_v10, 0.0  ;;  %v24860_v5 = vpack.c.bf16 %v7854_v62, %v7853_v52  ;;  %v7859_v10 = vld [vmem:[#allocation3 + $0x120] sm:$0xff]  ;;  %v8486_v62 = vld [vmem:[#allocation3 + $0xb2] sm:$0xff]  ;;  %v8488_v52 = vld [vmem:[#allocation3 + $0xca] sm:$0xff] }
 0x7a6   : > { %7808 = vst [vmem:[#allocation3 + $0x1d1] sm:$0xff] %v7764_v49  ;;  %v7973_v28 = vpack.c.bf16 %v7764_v49, %v7763_v14  ;;  %v7858_v14 = vld [vmem:[#allocation3 + $0x110] sm:$0xff]  ;;  %v24868_v49 = vpack.c.bf16 %v7860_v38, %v7859_v10  ;;  %v8489_v38 = vld [vmem:[#allocation3 + $0xda] sm:$0xff] }
 0x7a7   : > { %7806 = vst [vmem:[#allocation3 + $0x1b9] sm:$0xff] %v7762_v30  ;;  %v19820_v57 = vpop.f32.mrb[84].mxu1  ;;  %v7972_v16 = vpack.c.bf16 %v7762_v30, %v7761_v59  ;;  %v24866_v59 = vpack.c.bf16 %v7858_v14, %v7857_v20  ;;  %v7862_v30 = vld [vmem:[#allocation3 + $0x140] sm:$0xff]  ;;  %v23108_v14 = vld [vmem:[#allocation6 + $0x570] sm:$0xff]  }
 0x7a8   : > { %v7723_v26 = vadd.f32 %v19820_v57, %v24767_v6  ;;  %v7602_v61 = vpop.f32.mrb[85].mxu1  ;;  %v7861_v57 = vld [vmem:[#allocation3 + $0x138] sm:$0xff]  ;;  %v8490_v20 = vld [vmem:[#allocation3 + $0xe2] sm:$0xff] }
 0x7a9   : > { %v7721_v42 = vadd.f32 %v24767_v6, %v7602_v61  ;;  %v19821_v56 = vpop.f32.mrb[86].mxu1  ;;  %v8491_v10 = vld [vmem:[#allocation3 + $0xf2] sm:$0xff] }
 0x7aa   : > { %v7767_v9 = vmax.f32 %v7723_v26, 0.0  ;;  %v7724_v8 = vadd.f32 %v19821_v56, %v24767_v6  ;;  %v7605_v44 = vpop.f32.mrb[87].mxu1  ;;  %v7863_v26 = vld [vmem:[#allocation3 + $0x150] sm:$0xff]  ;;  %v7868_v56 = vld [vmem:[#allocation3 + $0x188] sm:$0xff] }
 0x7ab   : > { %v7765_v31 = vmax.f32 %v7721_v42, 0.0  ;;  %v7722_v47 = vadd.f32 %v24767_v6, %v7605_v44  ;;  %v7866_v42 = vld [vmem:[#allocation3 + $0x170] sm:$0xff]  ;;  %v7867_v44 = vld [vmem:[#allocation3 + $0x180] sm:$0xff] }
 0x7ac   : > { %19871 = vmatmul.mubr.bf16.gmra.mrb[120].mxu1 %v7971_v11  ;;  %7811 = vst [vmem:[#allocation3 + $0x1f9] sm:$0xff] %v7767_v9  ;;  %v7768_v24 = vmax.f32 %v7724_v8, 0.0  ;;  %v7856_v11 = vld [vmem:[#allocation3 + $0xf8] sm:$0xff]  ;;  %v7865_v9 = vld [vmem:[#allocation3 + $0x168] sm:$0xff] }
 0x7ad   : > { %19874 = vmatprep.mubr.bf16.mxu1 %v7972_v16  ;;  %7809 = vst [vmem:[#allocation3 + $0x1e1] sm:$0xff] %v7765_v31  ;;  %7830 = vst [vmem:[#allocation3 + $0x1f8] sm:$0xff] %v24785_v7  ;;  %v7766_v27 = vmax.f32 %v7722_v47, 0.0  ;;  %v24862_v43 = vpack.c.bf16 %v7856_v11, %v7855_v32  ;;  %v24872_v16 = vpack.c.bf16 %v7862_v30, %v7861_v57  ;;  %v7870_v47 = vld [vmem:[#allocation3 + $0x1a0] sm:$0xff]  ;;  %v23109_v57 = vld [vmem:[#allocation6 + $0x578] sm:$0xff]  }
 0x7ae   : > { %7812 = vst [vmem:[#allocation3 + $0x201] sm:$0xff] %v7768_v24  ;;  %v24878_v8 = vpack.c.bf16 %v7866_v42, %v7865_v9  ;;  %v7872_v24 = vld [vmem:[#allocation3 + $0x1b8] sm:$0xff]  ;;  %v8487_v11 = vld [vmem:[#allocation3 + $0xc2] sm:$0xff] }
 0x7af   : > { %7831 = vst [vmem:[#allocation3 + $0x200] sm:$0xff] %v24785_v7  ;;  %7832 = vst [vmem:[#allocation3 + $0x208] sm:$0x3] %v24785_v7  ;;  %v19824_v55 = vpop.f32.mrb[88].mxu1  ;;  %v7974_v19 = vpack.c.bf16 %v7766_v27, %v7765_v31  ;;  %v24880_v31 = vpack.c.bf16 %v7868_v56, %v7867_v44  ;;  %v8492_v30 = vld [vmem:[#allocation3 + $0xfa] sm:$0xff]  ;;  %v8493_v56 = vld [vmem:[#allocation3 + $0x10a] sm:$0xff] }
 0x7b0   : > { %7810 = vst [vmem:[#allocation3 + $0x1e9] sm:$0xff] %v7766_v27  ;;  %v7727_v39 = vadd.f32 %v19824_v55, %v24767_v6  ;;  %v7618_v21 = vpop.f32.mrb[89].mxu1  ;;  %v7869_v27 = vld [vmem:[#allocation3 + $0x198] sm:$0xff]  ;;  %v23110_v42 = vld [vmem:[#allocation6 + $0x580] sm:$0xff]  }
 0x7b1   : > { %v7725_v33 = vadd.f32 %v24767_v6, %v7618_v21  ;;  %v19825_v25 = vpop.f32.mrb[90].mxu1  ;;  %v24884_v55 = vpack.c.bf16 %v7870_v47, %v7869_v27  ;;  %v7874_v21 = vld [vmem:[#allocation3 + $0x1d0] sm:$0xff]  ;;  %v8495_v44 = vld [vmem:[#allocation3 + $0x122] sm:$0xff] }
 0x7b2   : > { %v7771_v53 = vmax.f32 %v7727_v39, 0.0  ;;  %v7728_v35 = vadd.f32 %v19825_v25, %v24767_v6  ;;  %v7621_v13 = vpop.f32.mrb[91].mxu1  ;;  %v7873_v25 = vld [vmem:[#allocation3 + $0x1c8] sm:$0xff]  ;;  %v8494_v9 = vld [vmem:[#allocation3 + $0x112] sm:$0xff] }
 0x7b3   : > { %v7769_v58 = vmax.f32 %v7725_v33, 0.0  ;;  %v7726_v54 = vadd.f32 %v24767_v6, %v7621_v13  ;;  %v24841_v6 = vpack.c.bf16 %v24785_v7, %v24785_v7  ;;  %v8496_v47 = vld [vmem:[#allocation3 + $0x12a] sm:$0xff] }
 0x7b4   : > { %19875 = vmatmul.mubr.bf16.gmra.mrb[124].mxu1 %v7973_v28  ;;  %7815 = vst [vmem:[#allocation3 + $0x229] sm:$0xff] %v7771_v53  ;;  %v7772_v18 = vmax.f32 %v7728_v35, 0.0  ;;  %v7864_v28 = vld [vmem:[#allocation3 + $0x158] sm:$0xff]  ;;  %v24890_v53 = vpack.c.bf16 %v7874_v21, %v7873_v25  ;;  %v7875_v35 = vld [vmem:[#allocation3 + $0x1e0] sm:$0xff]  ;;  %v24923_v27 = vpack.c.bf16 %v8496_v47, %v8495_v44 }
 0x7b5   : > { %19878 = vmatprep.mubr.bf16.mxu1 %v7974_v19  ;;  %7836 = vst [vmem:[#allocation3 + $0x228] sm:$0xff] %v24785_v7  ;;  %7813 = vst [vmem:[#allocation3 + $0x211] sm:$0xff] %v7769_v58  ;;  %v7770_v3 = vmax.f32 %v7726_v54, 0.0  ;;  %v24874_v61 = vpack.c.bf16 %v7864_v28, %v7863_v26  ;;  %v7871_v19 = vld [vmem:[#allocation3 + $0x1b0] sm:$0xff]  ;;  %v8476_v54 = vld [vmem:[#allocation3 + $0x3a] sm:$0xff]  ;;  %v24915_v28 = vpack.c.bf16 %v8490_v20, %v8489_v38 }
 0x7b6   : > { %7833 = vst [vmem:[#allocation3 + $0x210] sm:$0xff] %v24785_v7  ;;  %7816 = vst [vmem:[#allocation3 + $0x231] sm:$0xff] %v7772_v18  ;;  %v7954_v1 = vld [vmem:[#allocation3 + $0x1f9] sm:$0xff]  ;;  %v7955_v40 = vld [vmem:[#allocation3 + $0x201] sm:$0xff]  ;;  %v24886_v39 = vpack.c.bf16 %v7872_v24, %v7871_v19  ;;  %v24917_v26 = vpack.c.bf16 %v8492_v30, %v8491_v10  ;;  %v24921_v24 = vpack.c.bf16 %v8494_v9, %v8493_v56 }
 0x7b7   : > { %7837 = vst [vmem:[#allocation3 + $0x230] sm:$0xff] %v24785_v7  ;;  %7838 = vst [vmem:[#allocation3 + $0x238] sm:$0x3] %v24785_v7  ;;  %v24835_v36 = vpack.c.bf16 %v7955_v40, %v7954_v1  ;;  %v7876_v33 = vld [vmem:[#allocation3 + $0x1e8] sm:$0xff]  ;;  %v8475_v58 = vld [vmem:[#allocation3 + $0x32] sm:$0xff] }
 0x7b8   : > { %7814 = vst [vmem:[#allocation3 + $0x219] sm:$0xff] %v7770_v3  ;;  %v24892_v13 = vpack.c.bf16 %v7876_v33, %v7875_v35  ;;  %v8515_v18 = vpack.c.bf16 %v8476_v54, %v8475_v58  ;;  %v8477_v3 = vld [vmem:[#allocation3 + $0x4a] sm:$0xff]  ;;  %v8478_v1 = vld [vmem:[#allocation3 + $0x52] sm:$0xff]  ;;  %v8479_v40 = vld [vmem:[#allocation3 + $0x62] sm:$0xff] }
 0x7b9   : > { %7834 = vst [vmem:[#allocation3 + $0x218] sm:$0xff] %v24785_v7  ;;  %7835 = vst [vmem:[#allocation3 + $0x220] sm:$0x3] %v24785_v7  ;;  %v7847_v7 = vld [vmem:[#allocation3 + $0x90] sm:$0xff]  ;;  %v8497_v19 = vld [vmem:[#allocation3 + $0x13a] sm:$0xff] }
 0x7ba   : > { %v24850_v22 = vpack.c.bf16 %v7848_v51, %v7847_v7  ;;  %v23103_v51 = vld [vmem:[#allocation6 + $0x548] sm:$0xff]   ;;  %v8481_v7 = vld [vmem:[#allocation3 + $0x7a] sm:$0xff]  ;;  %v8499_v33 = vld [vmem:[#allocation3 + $0x152] sm:$0xff] }
 0x7bb   : > { %v8498_v21 = vld [vmem:[#allocation3 + $0x142] sm:$0xff]  ;;  %v8500_v25 = vld [vmem:[#allocation3 + $0x15a] sm:$0xff]  ;;  %v8501_v54 = vld [vmem:[#allocation3 + $0x16a] sm:$0xff] }
 0x7bc   : > { %19879 = vmatmul.mubr.bf16.gmra.mrb[128].mxu1 %v24835_v36  ;;  %v24927_v35 = vpack.c.bf16 %v8498_v21, %v8497_v19  ;;  %v24929_v58 = vpack.c.bf16 %v8500_v25, %v8499_v33  ;;  %v23111_v20 = vld [vmem:[#allocation6 + $0x588] sm:$0xff]   ;;  %v23112_v10 = vld [vmem:[#allocation6 + $0x590] sm:$0xff]   ;;  %v23113_v30 = vld [vmem:[#allocation6 + $0x598] sm:$0xff]  }
 0x7bd   : > { %19898 = vmatprep.mubr.bf16.mxu1 %v24841_v6  ;;  %v23115_v56 = vld [vmem:[#allocation6 + $0x5a8] sm:$0xff]   ;;  %v23121_v44 = vld [vmem:[#allocation6 + $0x5d8] sm:$0xff]   ;;  %v23122_v19 = vld [vmem:[#allocation6 + $0x5e0] sm:$0xff]  }
 0x7be   : > { %v9200_v9 = vld [vmem:[#allocation3 + $0xa9] sm:$0xff]  ;;  %v9205_v33 = vld [vmem:[#allocation3 + $0xe1] sm:$0xff] }
 0x7bf   : > { %v9203_v21 = vld [vmem:[#allocation3 + $0xc9] sm:$0xff]  ;;  %v9202_v25 = vld [vmem:[#allocation3 + $0xc1] sm:$0xff] }
 0x7c4   : > { %19899 = vmatmul.mubr.bf16.vlgmr.msra.gmra.mrb[92].mxu1 %v24841_v6 }
 0x7c5   : > { %19939 = vmatpush3.bf16.msra.mxu1 %v24805_v29  ;;  %19902 = vmatprep.mubr.bf16.mxu1 %v24841_v6  ;;  %v23098_v29 = vld [vmem:[#allocation6 + $0x520] sm:$0xff]  }
 0x7c6   : > { %19940 = vmatprep.subr.bf16.mxu1 %v23095_v37 }
 0x7c9   : > { %19941 = vmatpush3.bf16.msra.mxu1 %v23095_v37  ;;  %v8480_v37 = vld [vmem:[#allocation3 + $0x6a] sm:$0xff] }
 0x7ca   : > { %19942 = vmatprep.subr.bf16.mxu1 %v23096_v50  ;;  %v24899_v4 = vpack.c.bf16 %v8480_v37, %v8479_v40 }
 0x7cc   : > { %19903 = vmatmul.mubr.bf16.gmra.mrb[96].mxu1 %v24848_v15 }
 0x7cd   : > { %19906 = vmatprep.mubr.bf16.mxu1 %v24850_v22  ;;  %19943 = vmatpush3.bf16.msra.mxu1 %v23096_v50  ;;  %v24897_v50 = vpack.c.bf16 %v8478_v1, %v8477_v3  ;;  %v8503_v3 = vld [vmem:[#allocation3 + $0x182] sm:$0xff]  ;;  %v8504_v1 = vld [vmem:[#allocation3 + $0x18a] sm:$0xff] }
 0x7ce   : > { %19944 = vmatprep.subr.bf16.mxu1 %v23097_v12  ;;  %v24935_v37 = vpack.c.bf16 %v8504_v1, %v8503_v3  ;;  %v23123_v3 = vld [vmem:[#allocation6 + $0x5e8] sm:$0xff]  }
 0x7d1   : > { %19945 = vmatpush3.bf16.msra.mxu1 %v23097_v12  ;;  %v8482_v12 = vld [vmem:[#allocation3 + $0x82] sm:$0xff] }
 0x7d2   : > { %19946 = vmatprep.subr.bf16.mxu1 %v23098_v29  ;;  %v24903_v34 = vpack.c.bf16 %v8482_v12, %v8481_v7  ;;  %v8507_v7 = vld [vmem:[#allocation3 + $0x1b2] sm:$0xff]  ;;  %v8508_v12 = vld [vmem:[#allocation3 + $0x1ba] sm:$0xff] }
 0x7d4   : > { %19907 = vmatmul.mubr.bf16.gmra.mrb[100].mxu1 %v24854_v17 }
 0x7d5   : > { %19910 = vmatprep.mubr.bf16.mxu1 %v24856_v2  ;;  %19947 = vmatpush3.bf16.msra.mxu1 %v23098_v29  ;;  %v8483_v29 = vld [vmem:[#allocation3 + $0x92] sm:$0xff] }
 0x7d6   : > { %19948 = vmatprep.subr.bf16.mxu1 %v23099_v23  ;;  %v24905_v0 = vpack.c.bf16 %v8484_v48, %v8483_v29  ;;  %v24941_v48 = vpack.c.bf16 %v8508_v12, %v8507_v7  ;;  %v9209_v7 = vld [vmem:[#allocation3 + $0x111] sm:$0xff] }
 0x7d7   : > { %v9206_v12 = vld [vmem:[#allocation3 + $0xf1] sm:$0xff] }
 0x7d9   : > { %19949 = vmatpush3.bf16.msra.mxu1 %v23099_v23  ;;  %v23106_v23 = vld [vmem:[#allocation6 + $0x560] sm:$0xff]  }
 0x7da   : > { %19950 = vmatprep.subr.bf16.mxu1 %v23100_v41 }
 0x7dc   : > { %19911 = vmatmul.mubr.bf16.gmra.mrb[104].mxu1 %v24860_v5 }
 0x7dd   : > { %19914 = vmatprep.mubr.bf16.mxu1 %v24862_v43  ;;  %19951 = vmatpush3.bf16.msra.mxu1 %v23100_v41  ;;  %v8485_v41 = vld [vmem:[#allocation3 + $0xaa] sm:$0xff] }
 0x7de   : > { %19952 = vmatprep.subr.bf16.mxu1 %v23101_v60  ;;  %v24909_v32 = vpack.c.bf16 %v8486_v62, %v8485_v41  ;;  %v8511_v41 = vld [vmem:[#allocation3 + $0x1e2] sm:$0xff]  ;;  %v8512_v62 = vld [vmem:[#allocation3 + $0x1ea] sm:$0xff] }
 0x7e1   : > { %19953 = vmatpush3.bf16.msra.mxu1 %v23101_v60  ;;  %v23107_v60 = vld [vmem:[#allocation6 + $0x568] sm:$0xff]  }
 0x7e2   : > { %19994 = vmatprep.subr.bf16.mxu1 %v23102_v45 }
 0x7e4   : > { %19915 = vmatmul.mubr.bf16.gmra.mrb[108].mxu1 %v24866_v59 }
 0x7e5   : > { %19918 = vmatprep.mubr.bf16.mxu1 %v24868_v49 }
 0x7ec   : > { %19919 = vmatmul.mubr.bf16.gmra.mrb[112].mxu1 %v24872_v16 }
 0x7ed   : > { %19922 = vmatprep.mubr.bf16.mxu1 %v24874_v61 }
 0x7f4   : > { %19923 = vmatmul.mubr.bf16.gmra.mrb[116].mxu1 %v24878_v8 }
 0x7f5   : > { %19926 = vmatprep.mubr.bf16.mxu1 %v24880_v31 }
 0x7fc   : > { %19927 = vmatmul.mubr.bf16.gmra.mrb[120].mxu1 %v24884_v55 }
 0x7fd   : > { %19930 = vmatprep.mubr.bf16.mxu1 %v24886_v39 }
 0x804   : > { %19931 = vmatmul.mubr.bf16.gmra.mrb[124].mxu1 %v24890_v53 }
 0x805   : > { %19934 = vmatprep.mubr.bf16.mxu1 %v24892_v13 }
 0x80c   : > { %19935 = vmatmul.mubr.bf16.gmra.mrb[128].mxu1 %v24841_v6 }
 0x80d   : > { %19954 = vmatprep.mubr.bf16.mxu1 %v8515_v18  ;;  %v8502_v18 = vld [vmem:[#allocation3 + $0x172] sm:$0xff] }
 0x80e   : > { %v24933_v40 = vpack.c.bf16 %v8502_v18, %v8501_v54  ;;  %v24986_v54 = vpack.c.bf16 %v9203_v21, %v9202_v25  ;;  %v9204_v18 = vld [vmem:[#allocation3 + $0xd9] sm:$0xff]  ;;  %v9227_v21 = vld [vmem:[#allocation3 + $0x1e9] sm:$0xff] }
 0x80f   : > { %v24988_v1 = vpack.c.bf16 %v9205_v33, %v9204_v18  ;;  %v9226_v33 = vld [vmem:[#allocation3 + $0x1e1] sm:$0xff]  ;;  %v9230_v18 = vld [vmem:[#allocation3 + $0x211] sm:$0xff] }
 0x810   : > { %v25022_v25 = vpack.c.bf16 %v9227_v21, %v9226_v33  ;;  %v23141_v21 = vld [vmem:[#allocation6 + $0x678] sm:$0xff]  }
 0x814   : > { %19955 = vmatmul.mubr.bf16.vlgmr.msra.gmra.mrb[92].mxu1 %v24897_v50 }
 0x815   : > { %19995 = vmatpush3.bf16.msra.mxu1 %v23102_v45  ;;  %19958 = vmatprep.mubr.bf16.mxu1 %v24899_v4  ;;  %v24911_v45 = vpack.c.bf16 %v8488_v52, %v8487_v11  ;;  %v24947_v52 = vpack.c.bf16 %v8512_v62, %v8511_v41  ;;  %v23125_v41 = vld [vmem:[#allocation6 + $0x5f8] sm:$0xff]  }
 0x816   : > { %19996 = vmatprep.subr.bf16.mxu1 %v23103_v51 }
 0x819   : > { %19997 = vmatpush3.bf16.msra.mxu1 %v23103_v51  ;;  %v8505_v51 = vld [vmem:[#allocation3 + $0x19a] sm:$0xff] }
 0x81a   : > { %19998 = vmatprep.subr.bf16.mxu1 %v23104_v63 }
 0x81c   : > { %19959 = vmatmul.mubr.bf16.gmra.mrb[96].mxu1 %v24903_v34 }
 0x81d   : > { %19962 = vmatprep.mubr.bf16.mxu1 %v24905_v0  ;;  %19999 = vmatpush3.bf16.msra.mxu1 %v23104_v63  ;;  %v8506_v63 = vld [vmem:[#allocation3 + $0x1a2] sm:$0xff] }
 0x81e   : > { %20000 = vmatprep.subr.bf16.mxu1 %v23105_v46  ;;  %v24939_v29 = vpack.c.bf16 %v8506_v63, %v8505_v51  ;;  %v23124_v51 = vld [vmem:[#allocation6 + $0x5f0] sm:$0xff]   ;;  %v9207_v63 = vld [vmem:[#allocation3 + $0xf9] sm:$0xff] }
 0x821   : > { %20001 = vmatpush3.bf16.msra.mxu1 %v23105_v46  ;;  %v8509_v46 = vld [vmem:[#allocation3 + $0x1ca] sm:$0xff] }
 0x822   : > { %20002 = vmatprep.subr.bf16.mxu1 %v23106_v23 }
 0x824   : > { %19963 = vmatmul.mubr.bf16.gmra.mrb[100].mxu1 %v24909_v32 }
 0x825   : > { %19966 = vmatprep.mubr.bf16.mxu1 %v24911_v45  ;;  %20003 = vmatpush3.bf16.msra.mxu1 %v23106_v23  ;;  %v8510_v23 = vld [vmem:[#allocation3 + $0x1d2] sm:$0xff] }
 0x826   : > { %20004 = vmatprep.subr.bf16.mxu1 %v23107_v60  ;;  %v24945_v11 = vpack.c.bf16 %v8510_v23, %v8509_v46  ;;  %v24992_v46 = vpack.c.bf16 %v9207_v63, %v9206_v12  ;;  %v9208_v23 = vld [vmem:[#allocation3 + $0x109] sm:$0xff]  ;;  %v23129_v12 = vld [vmem:[#allocation6 + $0x618] sm:$0xff]  }
 0x827   : > { %v24994_v62 = vpack.c.bf16 %v9209_v7, %v9208_v23  ;;  %v23127_v63 = vld [vmem:[#allocation6 + $0x608] sm:$0xff]   ;;  %v23128_v7 = vld [vmem:[#allocation6 + $0x610] sm:$0xff]  }
 0x828   : > { %v9915_v23 = vld [vmem:[#allocation3 + $0xa8] sm:$0xff] }
 0x829   : > { %20005 = vmatpush3.bf16.msra.mxu1 %v23107_v60  ;;  %v8513_v60 = vld [vmem:[#allocation3 + $0x1fa] sm:$0xff] }
 0x82a   : > { %20006 = vmatprep.subr.bf16.mxu1 %v23108_v14 }
 0x82c   : > { %19967 = vmatmul.mubr.bf16.gmra.mrb[104].mxu1 %v24915_v28 }
 0x82d   : > { %19970 = vmatprep.mubr.bf16.mxu1 %v24917_v26  ;;  %20007 = vmatpush3.bf16.msra.mxu1 %v23108_v14  ;;  %v8514_v14 = vld [vmem:[#allocation3 + $0x202] sm:$0xff] }
 0x82e   : > { %20008 = vmatprep.subr.bf16.mxu1 %v23109_v57  ;;  %v24951_v38 = vpack.c.bf16 %v8514_v14, %v8513_v60  ;;  %v23126_v60 = vld [vmem:[#allocation6 + $0x600] sm:$0xff]   ;;  %v9211_v14 = vld [vmem:[#allocation3 + $0x129] sm:$0xff] }
 0x831   : > { %20009 = vmatpush3.bf16.msra.mxu1 %v23109_v57  ;;  %v23114_v57 = vld [vmem:[#allocation6 + $0x5a0] sm:$0xff]  }
 0x832   : > { %20050 = vmatprep.subr.bf16.mxu1 %v23110_v42 }
 0x834   : > { %19971 = vmatmul.mubr.bf16.gmra.mrb[108].mxu1 %v24921_v24 }
 0x835   : > { %19974 = vmatprep.mubr.bf16.mxu1 %v24923_v27 }
 0x83c   : > { %19975 = vmatmul.mubr.bf16.gmra.mrb[112].mxu1 %v24927_v35 }
 0x83d   : > { %19978 = vmatprep.mubr.bf16.mxu1 %v24929_v58 }
 0x844   : > { %19979 = vmatmul.mubr.bf16.gmra.mrb[116].mxu1 %v24933_v40 }
 0x845   : > { %19982 = vmatprep.mubr.bf16.mxu1 %v24935_v37 }
 0x84c   : > { %19983 = vmatmul.mubr.bf16.gmra.mrb[120].mxu1 %v24939_v29 }
 0x84d   : > { %19986 = vmatprep.mubr.bf16.mxu1 %v24941_v48 }
 0x854   : > { %19987 = vmatmul.mubr.bf16.gmra.mrb[124].mxu1 %v24945_v11 }
 0x855   : > { %19990 = vmatprep.mubr.bf16.mxu1 %v24947_v52 }
 0x85c   : > { %19991 = vmatmul.mubr.bf16.gmra.mrb[128].mxu1 %v24951_v38 }
 0x85d   : > { %20010 = vmatprep.mubr.bf16.mxu1 %v24841_v6 }
 0x864   : > { %20011 = vmatmul.mubr.bf16.vlgmr.msra.gmra.mrb[92].mxu1 %v24841_v6 }
 0x865   : > { %20014 = vmatprep.mubr.bf16.mxu1 %v24848_v15  ;;  %20051 = vmatpush3.bf16.msra.mxu1 %v23110_v42  ;;  %v23116_v15 = vld [vmem:[#allocation6 + $0x5b0] sm:$0xff]   ;;  %v23117_v42 = vld [vmem:[#allocation6 + $0x5b8] sm:$0xff]  }
 0x866   : > { %20052 = vmatprep.subr.bf16.mxu1 %v23111_v20 }
 0x869   : > { %20053 = vmatpush3.bf16.msra.mxu1 %v23111_v20  ;;  %v9213_v20 = vld [vmem:[#allocation3 + $0x141] sm:$0xff] }
 0x86a   : > { %20054 = vmatprep.subr.bf16.mxu1 %v23112_v10 }
 0x86c   : > { %20015 = vmatmul.mubr.bf16.gmra.mrb[96].mxu1 %v24850_v22  ;;  %v23118_v22 = vld [vmem:[#allocation6 + $0x5c0] sm:$0xff]  }
 0x86d   : > { %20018 = vmatprep.mubr.bf16.mxu1 %v24854_v17  ;;  %20055 = vmatpush3.bf16.msra.mxu1 %v23112_v10  ;;  %v9192_v17 = vld [vmem:[#allocation3 + $0x49] sm:$0xff]  ;;  %v9210_v10 = vld [vmem:[#allocation3 + $0x121] sm:$0xff] }
 0x86e   : > { %20056 = vmatprep.subr.bf16.mxu1 %v23113_v30 }
 0x871   : > { %20057 = vmatpush3.bf16.msra.mxu1 %v23113_v30  ;;  %v24998_v30 = vpack.c.bf16 %v9211_v14, %v9210_v10  ;;  %v23137_v14 = vld [vmem:[#allocation6 + $0x658] sm:$0xff]   ;;  %v23138_v10 = vld [vmem:[#allocation6 + $0x660] sm:$0xff]  }
 0x872   : > { %20058 = vmatprep.subr.bf16.mxu1 %v23114_v57 }
 0x874   : > { %20019 = vmatmul.mubr.bf16.gmra.mrb[100].mxu1 %v24856_v2  ;;  %v9193_v2 = vld [vmem:[#allocation3 + $0x51] sm:$0xff] }
 0x875   : > { %20022 = vmatprep.mubr.bf16.mxu1 %v24860_v5  ;;  %20059 = vmatpush3.bf16.msra.mxu1 %v23114_v57  ;;  %v9232_v5 = vpack.c.bf16 %v9193_v2, %v9192_v17  ;;  %v9212_v57 = vld [vmem:[#allocation3 + $0x139] sm:$0xff]  ;;  %v9216_v2 = vld [vmem:[#allocation3 + $0x169] sm:$0xff] }
 0x876   : > { %20060 = vmatprep.subr.bf16.mxu1 %v23115_v56 }
 0x879   : > { %20061 = vmatpush3.bf16.msra.mxu1 %v23115_v56  ;;  %v25000_v56 = vpack.c.bf16 %v9213_v20, %v9212_v57  ;;  %v9920_v57 = vld [vmem:[#allocation3 + $0xe0] sm:$0xff] }
 0x87a   : > { %20062 = vmatprep.subr.bf16.mxu1 %v23116_v15 }
 0x87c   : > { %20023 = vmatmul.mubr.bf16.gmra.mrb[104].mxu1 %v24862_v43  ;;  %v9194_v43 = vld [vmem:[#allocation3 + $0x61] sm:$0xff] }
 0x87d   : > { %20026 = vmatprep.mubr.bf16.mxu1 %v24866_v59  ;;  %20063 = vmatpush3.bf16.msra.mxu1 %v23116_v15  ;;  %v9195_v59 = vld [vmem:[#allocation3 + $0x69] sm:$0xff]  ;;  %v9215_v15 = vld [vmem:[#allocation3 + $0x159] sm:$0xff] }
 0x87e   : > { %20064 = vmatprep.subr.bf16.mxu1 %v23117_v42 }
 0x881   : > { %20065 = vmatpush3.bf16.msra.mxu1 %v23117_v42  ;;  %v9217_v42 = vld [vmem:[#allocation3 + $0x171] sm:$0xff] }
 0x882   : > { %20106 = vmatprep.subr.bf16.mxu1 %v23118_v22 }
 0x884   : > { %20027 = vmatmul.mubr.bf16.gmra.mrb[108].mxu1 %v24868_v49  ;;  %v24974_v49 = vpack.c.bf16 %v9195_v59, %v9194_v43  ;;  %v9219_v43 = vld [vmem:[#allocation3 + $0x189] sm:$0xff]  ;;  %v9221_v59 = vld [vmem:[#allocation3 + $0x1a1] sm:$0xff] }
 0x885   : > { %20030 = vmatprep.mubr.bf16.mxu1 %v24872_v16  ;;  %v9197_v16 = vld [vmem:[#allocation3 + $0x81] sm:$0xff] }
 0x88c   : > { %20031 = vmatmul.mubr.bf16.gmra.mrb[112].mxu1 %v24874_v61  ;;  %v9196_v61 = vld [vmem:[#allocation3 + $0x79] sm:$0xff] }
 0x88d   : > { %20034 = vmatprep.mubr.bf16.mxu1 %v24878_v8  ;;  %v23119_v8 = vld [vmem:[#allocation6 + $0x5c8] sm:$0xff]  }
 0x894   : > { %20035 = vmatmul.mubr.bf16.gmra.mrb[116].mxu1 %v24880_v31  ;;  %v24976_v31 = vpack.c.bf16 %v9197_v16, %v9196_v61  ;;  %v9218_v16 = vld [vmem:[#allocation3 + $0x181] sm:$0xff] }
 0x895   : > { %20038 = vmatprep.mubr.bf16.mxu1 %v24884_v55  ;;  %v23120_v55 = vld [vmem:[#allocation6 + $0x5d0] sm:$0xff]   ;;  %v25010_v61 = vpack.c.bf16 %v9219_v43, %v9218_v16  ;;  %v23139_v43 = vld [vmem:[#allocation6 + $0x668] sm:$0xff]  }
 0x896   : > { %v23140_v16 = vld [vmem:[#allocation6 + $0x670] sm:$0xff]  }
 0x89c   : > { %20039 = vmatmul.mubr.bf16.gmra.mrb[120].mxu1 %v24886_v39  ;;  %v9199_v39 = vld [vmem:[#allocation3 + $0x99] sm:$0xff] }
 0x89d   : > { %20042 = vmatprep.mubr.bf16.mxu1 %v24890_v53  ;;  %v9201_v53 = vld [vmem:[#allocation3 + $0xb1] sm:$0xff] }
 0x89e   : > { %v24982_v47 = vpack.c.bf16 %v9201_v53, %v9200_v9  ;;  %v9225_v53 = vld [vmem:[#allocation3 + $0x1d1] sm:$0xff] }
 0x8a4   : > { %20043 = vmatmul.mubr.bf16.gmra.mrb[124].mxu1 %v24892_v13 }
 0x8a5   : > { %20046 = vmatprep.mubr.bf16.mxu1 %v24841_v6 }
 0x8ac   : > { %20047 = vmatmul.mubr.bf16.gmra.mrb[128].mxu1 %v24841_v6  ;;  %v9198_v6 = vld [vmem:[#allocation3 + $0x91] sm:$0xff] }
 0x8ad   : > { %20066 = vmatprep.mubr.bf16.mxu1 %v9232_v5  ;;  %v24980_v13 = vpack.c.bf16 %v9199_v39, %v9198_v6  ;;  %v25006_v5 = vpack.c.bf16 %v9217_v42, %v9216_v2  ;;  %v9223_v39 = vld [vmem:[#allocation3 + $0x1b9] sm:$0xff]  ;;  %v9222_v6 = vld [vmem:[#allocation3 + $0x1b1] sm:$0xff] }
 0x8ae   : > { %v25016_v9 = vpack.c.bf16 %v9223_v39, %v9222_v6  ;;  %v9919_v42 = vld [vmem:[#allocation3 + $0xd8] sm:$0xff]  ;;  %v9921_v2 = vld [vmem:[#allocation3 + $0xf0] sm:$0xff]  ;;  %v9926_v39 = vld [vmem:[#allocation3 + $0x128] sm:$0xff] }
 0x8b4   : > { %20067 = vmatmul.mubr.bf16.vlgmr.msra.gmra.mrb[92].mxu1 %v24974_v49 }
 0x8b5   : > { %20070 = vmatprep.mubr.bf16.mxu1 %v24976_v31  ;;  %20107 = vmatpush3.bf16.msra.mxu1 %v23118_v22  ;;  %v9214_v22 = vld [vmem:[#allocation3 + $0x151] sm:$0xff] }
 0x8b6   : > { %20108 = vmatprep.subr.bf16.mxu1 %v23119_v8  ;;  %v25004_v17 = vpack.c.bf16 %v9215_v15, %v9214_v22  ;;  %v9922_v15 = vld [vmem:[#allocation3 + $0xf8] sm:$0xff]  ;;  %v9954_v22 = vpack.c.bf16 %v9920_v57, %v9919_v42  ;;  %v23146_v57 = vld [vmem:[#allocation6 + $0x6a0] sm:$0xff]  }
 0x8b7   : > { %v10306_v42 = vld [vmem:[#allocation3 + $0x231] sm:$0xff] }
 0x8b9   : > { %20109 = vmatpush3.bf16.msra.mxu1 %v23119_v8  ;;  %v9220_v8 = vld [vmem:[#allocation3 + $0x199] sm:$0xff] }
 0x8ba   : > { %20110 = vmatprep.subr.bf16.mxu1 %v23120_v55 }
 0x8bc   : > { %20071 = vmatmul.mubr.bf16.gmra.mrb[96].mxu1 %v24980_v13 }
 0x8bd   : > { %20074 = vmatprep.mubr.bf16.mxu1 %v24982_v47  ;;  %20111 = vmatpush3.bf16.msra.mxu1 %v23120_v55  ;;  %v25012_v55 = vpack.c.bf16 %v9221_v59, %v9220_v8  ;;  %v9955_v59 = vpack.c.bf16 %v9922_v15, %v9921_v2  ;;  %v9924_v8 = vld [vmem:[#allocation3 + $0x110] sm:$0xff] }
 0x8be   : > { %20112 = vmatprep.subr.bf16.mxu1 %v23121_v44  ;;  %v23156_v15 = vld [vmem:[#allocation6 + $0x730] sm:$0xff]  }
 0x8bf   : > { %v10626_v2 = vld [vmem:[#allocation3 + $0x6a] sm:$0xff] }
 0x8c1   : > { %20113 = vmatpush3.bf16.msra.mxu1 %v23121_v44  ;;  %v9224_v44 = vld [vmem:[#allocation3 + $0x1c9] sm:$0xff] }
 0x8c2   : > { %20114 = vmatprep.subr.bf16.mxu1 %v23122_v19 }
 0x8c4   : > { %20075 = vmatmul.mubr.bf16.gmra.mrb[100].mxu1 %v24986_v54 }
 0x8c5   : > { %20078 = vmatprep.mubr.bf16.mxu1 %v24988_v1  ;;  %20115 = vmatpush3.bf16.msra.mxu1 %v23122_v19  ;;  %v25018_v19 = vpack.c.bf16 %v9225_v53, %v9224_v44  ;;  %v9923_v53 = vld [vmem:[#allocation3 + $0x108] sm:$0xff]  ;;  %v9925_v44 = vld [vmem:[#allocation3 + $0x120] sm:$0xff] }
 0x8c6   : > { %20116 = vmatprep.subr.bf16.mxu1 %v23123_v3  ;;  %v9956_v6 = vpack.c.bf16 %v9924_v8, %v9923_v53  ;;  %v9957_v33 = vpack.c.bf16 %v9926_v39, %v9925_v44  ;;  %v10631_v39 = vld [vmem:[#allocation3 + $0xaa] sm:$0xff]  ;;  %v10632_v53 = vld [vmem:[#allocation3 + $0xb2] sm:$0xff] }
 0x8c7   : > { %v10668_v44 = vpack.c.bf16 %v10632_v53, %v10631_v39 }
 0x8c9   : > { %20117 = vmatpush3.bf16.msra.mxu1 %v23123_v3  ;;  %v9231_v3 = vld [vmem:[#allocation3 + $0x219] sm:$0xff] }
 0x8ca   : > { %20118 = vmatprep.subr.bf16.mxu1 %v23124_v51 }
 0x8cc   : > { %20079 = vmatmul.mubr.bf16.gmra.mrb[104].mxu1 %v24992_v46 }
 0x8cd   : > { %20082 = vmatprep.mubr.bf16.mxu1 %v24994_v62  ;;  %20119 = vmatpush3.bf16.msra.mxu1 %v23124_v51  ;;  %v25026_v51 = vpack.c.bf16 %v9231_v3, %v9230_v18  ;;  %v23142_v18 = vld [vmem:[#allocation6 + $0x680] sm:$0xff]  }
 0x8ce   : > { %20120 = vmatprep.subr.bf16.mxu1 %v23125_v41  ;;  %v9928_v3 = vld [vmem:[#allocation3 + $0x140] sm:$0xff] }
 0x8d1   : > { %20121 = vmatpush3.bf16.msra.mxu1 %v23125_v41 }
 0x8d2   : > { %20162 = vmatprep.subr.bf16.mxu1 %v23126_v60 }
 0x8d4   : > { %20083 = vmatmul.mubr.bf16.gmra.mrb[108].mxu1 %v24998_v30 }
 0x8d5   : > { %20086 = vmatprep.mubr.bf16.mxu1 %v25000_v56 }
 0x8dc   : > { %20087 = vmatmul.mubr.bf16.gmra.mrb[112].mxu1 %v25004_v17 }
 0x8dd   : > { %20090 = vmatprep.mubr.bf16.mxu1 %v25006_v5 }
 0x8e4   : > { %20091 = vmatmul.mubr.bf16.gmra.mrb[116].mxu1 %v25010_v61 }
 0x8e5   : > { %20094 = vmatprep.mubr.bf16.mxu1 %v25012_v55 }
 0x8ec   : > { %20095 = vmatmul.mubr.bf16.gmra.mrb[120].mxu1 %v25016_v9 }
 0x8ed   : > { %20098 = vmatprep.mubr.bf16.mxu1 %v25018_v19 }
 0x8f4   : > { %20099 = vmatmul.mubr.bf16.gmra.mrb[124].mxu1 %v25022_v25 }
 0x8f5   : > { %20102 = vmatprep.mubr.bf16.mxu1 %v24835_v36  ;;  %v23130_v36 = vld [vmem:[#allocation6 + $0x620] sm:$0xff]  }
 0x8fc   : > { %20103 = vmatmul.mubr.bf16.gmra.mrb[128].mxu1 %v25026_v51 }
 0x8fd   : > { %20122 = vmatprep.mubr.bf16.mxu1 %v24897_v50  ;;  %v23131_v50 = vld [vmem:[#allocation6 + $0x628] sm:$0xff]  }
 0x904   : > { %20123 = vmatmul.mubr.bf16.vlgmr.msra.gmra.mrb[92].mxu1 %v24899_v4  ;;  %v23132_v4 = vld [vmem:[#allocation6 + $0x630] sm:$0xff]  }
 0x905   : > { %20126 = vmatprep.mubr.bf16.mxu1 %v24903_v34  ;;  %20163 = vmatpush3.bf16.msra.mxu1 %v23126_v60  ;;  %v23133_v34 = vld [vmem:[#allocation6 + $0x638] sm:$0xff]   ;;  %v9917_v60 = vld [vmem:[#allocation3 + $0xc0] sm:$0xff] }
 0x906   : > { %20164 = vmatprep.subr.bf16.mxu1 %v23127_v63 }
 0x909   : > { %20165 = vmatpush3.bf16.msra.mxu1 %v23127_v63  ;;  %v9930_v63 = vld [vmem:[#allocation3 + $0x158] sm:$0xff] }
 0x90a   : > { %20166 = vmatprep.subr.bf16.mxu1 %v23128_v7 }
 0x90c   : > { %20127 = vmatmul.mubr.bf16.gmra.mrb[96].mxu1 %v24905_v0  ;;  %v23134_v0 = vld [vmem:[#allocation6 + $0x640] sm:$0xff]  }
 0x90d   : > { %20130 = vmatprep.mubr.bf16.mxu1 %v24909_v32  ;;  %20167 = vmatpush3.bf16.msra.mxu1 %v23128_v7  ;;  %v9588_v32 = vld [vmem:[#allocation3 + $0x212] sm:$0xff] }
 0x90e   : > { %20168 = vmatprep.subr.bf16.mxu1 %v23129_v12  ;;  %v9927_v7 = vld [vmem:[#allocation3 + $0x138] sm:$0xff] }
 0x911   : > { %20169 = vmatpush3.bf16.msra.mxu1 %v23129_v12  ;;  %v9958_v12 = vpack.c.bf16 %v9928_v3, %v9927_v7  ;;  %v10637_v3 = vld [vmem:[#allocation3 + $0xf2] sm:$0xff] }
 0x912   : > { %20170 = vmatprep.subr.bf16.mxu1 %v23130_v36 }
 0x914   : > { %20131 = vmatmul.mubr.bf16.gmra.mrb[100].mxu1 %v24911_v45  ;;  %v9589_v45 = vld [vmem:[#allocation3 + $0x21a] sm:$0xff] }
 0x915   : > { %20134 = vmatprep.mubr.bf16.mxu1 %v24915_v28  ;;  %20171 = vmatpush3.bf16.msra.mxu1 %v23130_v36  ;;  %v25048_v28 = vpack.c.bf16 %v9589_v45, %v9588_v32  ;;  %v9929_v36 = vld [vmem:[#allocation3 + $0x150] sm:$0xff]  ;;  %v9933_v45 = vld [vmem:[#allocation3 + $0x180] sm:$0xff] }
 0x916   : > { %20172 = vmatprep.subr.bf16.mxu1 %v23131_v50 }
 0x919   : > { %20173 = vmatpush3.bf16.msra.mxu1 %v23131_v50  ;;  %v9959_v50 = vpack.c.bf16 %v9930_v63, %v9929_v36  ;;  %v10638_v63 = vld [vmem:[#allocation3 + $0xfa] sm:$0xff]  ;;  %v10639_v36 = vld [vmem:[#allocation3 + $0x10a] sm:$0xff] }
 0x91a   : > { %20174 = vmatprep.subr.bf16.mxu1 %v23132_v4 }
 0x91c   : > { %20135 = vmatmul.mubr.bf16.gmra.mrb[104].mxu1 %v24917_v26  ;;  %v25050_v26 = vld [vmem:[#allocation4 + $0x30] sm:$0xff] }
 0x91d   : > { %20138 = vmatprep.mubr.bf16.mxu1 %v24921_v24  ;;  %20175 = vmatpush3.bf16.msra.mxu1 %v23132_v4  ;;  %v25054_v24 = vpack.c.bf16 %v25050_v26, %v25050_v26  ;;  %v9932_v4 = vld [vmem:[#allocation3 + $0x170] sm:$0xff] }
 0x91e   : > { %20176 = vmatprep.subr.bf16.mxu1 %v23133_v34 }
 0x921   : > { %20177 = vmatpush3.bf16.msra.mxu1 %v23133_v34  ;;  %v9934_v34 = vld [vmem:[#allocation3 + $0x188] sm:$0xff] }
 0x922   : > { %20218 = vmatprep.subr.bf16.mxu1 %v23134_v0 }
 0x924   : > { %20139 = vmatmul.mubr.bf16.gmra.mrb[108].mxu1 %v24923_v27  ;;  %v9912_v27 = vld [vmem:[#allocation3 + $0x80] sm:$0xff] }
 0x925   : > { %20142 = vmatprep.mubr.bf16.mxu1 %v24927_v35  ;;  %v9914_v35 = vld [vmem:[#allocation3 + $0x98] sm:$0xff] }
 0x92c   : > { %20143 = vmatmul.mubr.bf16.gmra.mrb[112].mxu1 %v24929_v58  ;;  %v9911_v58 = vld [vmem:[#allocation3 + $0x78] sm:$0xff] }
 0x92d   : > { %20146 = vmatprep.mubr.bf16.mxu1 %v24933_v40  ;;  %v9950_v40 = vpack.c.bf16 %v9912_v27, %v9911_v58  ;;  %v9961_v27 = vpack.c.bf16 %v9934_v34, %v9933_v45  ;;  %v9938_v58 = vld [vmem:[#allocation3 + $0x1b8] sm:$0xff]  ;;  %v10642_v34 = vld [vmem:[#allocation3 + $0x12a] sm:$0xff] }
 0x92e   : > { %v10643_v45 = vld [vmem:[#allocation3 + $0x13a] sm:$0xff] }
 0x934   : > { %20147 = vmatmul.mubr.bf16.gmra.mrb[116].mxu1 %v24935_v37  ;;  %v9913_v37 = vld [vmem:[#allocation3 + $0x90] sm:$0xff] }
 0x935   : > { %20150 = vmatprep.mubr.bf16.mxu1 %v24939_v29  ;;  %v23135_v29 = vld [vmem:[#allocation6 + $0x648] sm:$0xff]  }
 0x93c   : > { %20151 = vmatmul.mubr.bf16.gmra.mrb[120].mxu1 %v24941_v48  ;;  %v9951_v48 = vpack.c.bf16 %v9914_v35, %v9913_v37  ;;  %v9936_v35 = vld [vmem:[#allocation3 + $0x1a0] sm:$0xff] }
 0x93d   : > { %20154 = vmatprep.mubr.bf16.mxu1 %v24945_v11  ;;  %v23136_v11 = vld [vmem:[#allocation6 + $0x650] sm:$0xff]  }
 0x944   : > { %20155 = vmatmul.mubr.bf16.gmra.mrb[124].mxu1 %v24947_v52  ;;  %v9916_v52 = vld [vmem:[#allocation3 + $0xb0] sm:$0xff] }
 0x945   : > { %20158 = vmatprep.mubr.bf16.mxu1 %v24951_v38  ;;  %v9918_v38 = vld [vmem:[#allocation3 + $0xc8] sm:$0xff]  ;;  %v9952_v41 = vpack.c.bf16 %v9916_v52, %v9915_v23 }
 0x946   : > { %v9953_v20 = vpack.c.bf16 %v9918_v38, %v9917_v60  ;;  %v9942_v52 = vld [vmem:[#allocation3 + $0x1e8] sm:$0xff] }
 0x947   : > { %v9939_v38 = vld [vmem:[#allocation3 + $0x1c8] sm:$0xff] }
 0x94c   : > { %20159 = vmatmul.mubr.bf16.gmra.mrb[128].mxu1 %v25048_v28 }
 0x94d   : > { %20178 = vmatprep.mubr.bf16.mxu1 %v25054_v24 }
 0x954   : > { %20179 = vmatmul.mubr.bf16.vlgmr.msra.gmra.mrb[92].mxu1 %v9950_v40  ;;  %v9935_v40 = vld [vmem:[#allocation3 + $0x198] sm:$0xff] }
 0x955   : > { %20182 = vmatprep.mubr.bf16.mxu1 %v9951_v48  ;;  %20219 = vmatpush3.bf16.msra.mxu1 %v23134_v0  ;;  %v9931_v0 = vld [vmem:[#allocation3 + $0x168] sm:$0xff]  ;;  %v9962_v37 = vpack.c.bf16 %v9936_v35, %v9935_v40  ;;  %v10645_v35 = vld [vmem:[#allocation3 + $0x152] sm:$0xff] }
 0x956   : > { %20220 = vmatprep.subr.bf16.mxu1 %v23135_v29  ;;  %v9960_v32 = vpack.c.bf16 %v9932_v4, %v9931_v0  ;;  %v10641_v4 = vld [vmem:[#allocation3 + $0x122] sm:$0xff] }
 0x959   : > { %20221 = vmatpush3.bf16.msra.mxu1 %v23135_v29  ;;  %v9937_v29 = vld [vmem:[#allocation3 + $0x1b0] sm:$0xff] }
 0x95a   : > { %20222 = vmatprep.subr.bf16.mxu1 %v23136_v11  ;;  %v9963_v48 = vpack.c.bf16 %v9938_v58, %v9937_v29  ;;  %v10646_v58 = vld [vmem:[#allocation3 + $0x15a] sm:$0xff]  ;;  %v10647_v29 = vld [vmem:[#allocation3 + $0x16a] sm:$0xff] }
 0x95c   : > { %20183 = vmatmul.mubr.bf16.gmra.mrb[96].mxu1 %v9952_v41  ;;  %v9941_v41 = vld [vmem:[#allocation3 + $0x1e0] sm:$0xff] }
 0x95d   : > { %20186 = vmatprep.mubr.bf16.mxu1 %v9953_v20  ;;  %20223 = vmatpush3.bf16.msra.mxu1 %v23136_v11  ;;  %v9940_v11 = vld [vmem:[#allocation3 + $0x1d0] sm:$0xff]  ;;  %v9965_v60 = vpack.c.bf16 %v9942_v52, %v9941_v41  ;;  %v10651_v41 = vld [vmem:[#allocation3 + $0x19a] sm:$0xff] }
 0x95e   : > { %20224 = vmatprep.subr.bf16.mxu1 %v23137_v14  ;;  %v9964_v23 = vpack.c.bf16 %v9940_v11, %v9939_v38  ;;  %v23144_v20 = vld [vmem:[#allocation6 + $0x690] sm:$0xff]   ;;  %v10649_v11 = vld [vmem:[#allocation3 + $0x182] sm:$0xff] }
 0x95f   : > { %v10650_v52 = vld [vmem:[#allocation3 + $0x18a] sm:$0xff] }
 0x961   : > { %20225 = vmatpush3.bf16.msra.mxu1 %v23137_v14  ;;  %v23143_v14 = vld [vmem:[#allocation6 + $0x688] sm:$0xff]  }
 0x962   : > { %20226 = vmatprep.subr.bf16.mxu1 %v23138_v10 }
 0x964   : > { %20187 = vmatmul.mubr.bf16.gmra.mrb[100].mxu1 %v9954_v22  ;;  %v10625_v22 = vld [vmem:[#allocation3 + $0x62] sm:$0xff] }
 0x965   : > { %20190 = vmatprep.mubr.bf16.mxu1 %v9955_v59  ;;  %20227 = vmatpush3.bf16.msra.mxu1 %v23138_v10  ;;  %v23145_v10 = vld [vmem:[#allocation6 + $0x698] sm:$0xff]   ;;  %v10628_v59 = vld [vmem:[#allocation3 + $0x82] sm:$0xff] }
 0x966   : > { %20228 = vmatprep.subr.bf16.mxu1 %v23139_v43 }
 0x969   : > { %20229 = vmatpush3.bf16.msra.mxu1 %v23139_v43 }
 0x96a   : > { %20230 = vmatprep.subr.bf16.mxu1 %v23140_v16 }
 0x96c   : > { %20191 = vmatmul.mubr.bf16.gmra.mrb[104].mxu1 %v9956_v6  ;;  %v10633_v6 = vld [vmem:[#allocation3 + $0xc2] sm:$0xff] }
 0x96d   : > { %20194 = vmatprep.mubr.bf16.mxu1 %v9957_v33  ;;  %20231 = vmatpush3.bf16.msra.mxu1 %v23140_v16  ;;  %v10629_v16 = vld [vmem:[#allocation3 + $0x92] sm:$0xff]  ;;  %v10635_v33 = vld [vmem:[#allocation3 + $0xda] sm:$0xff] }
 0x96e   : > { %20232 = vmatprep.subr.bf16.mxu1 %v23141_v21 }
 0x971   : > { %20233 = vmatpush3.bf16.msra.mxu1 %v23141_v21 }
 0x972   : > { %20274 = vmatprep.subr.bf16.mxu1 %v23142_v18 }
 0x974   : > { %20195 = vmatmul.mubr.bf16.gmra.mrb[108].mxu1 %v9958_v12  ;;  %v10671_v12 = vpack.c.bf16 %v10638_v63, %v10637_v3 }
 0x975   : > { %20198 = vmatprep.mubr.bf16.mxu1 %v9959_v50  ;;  %v10640_v50 = vld [vmem:[#allocation3 + $0x112] sm:$0xff] }
 0x976   : > { %v10672_v0 = vpack.c.bf16 %v10640_v50, %v10639_v36 }
 0x97c   : > { %20199 = vmatmul.mubr.bf16.gmra.mrb[112].mxu1 %v9960_v32  ;;  %v10673_v32 = vpack.c.bf16 %v10642_v34, %v10641_v4 }
 0x97d   : > { %20202 = vmatprep.mubr.bf16.mxu1 %v9961_v27  ;;  %v10644_v27 = vld [vmem:[#allocation3 + $0x142] sm:$0xff] }
 0x97e   : > { %v10674_v40 = vpack.c.bf16 %v10644_v27, %v10643_v45 }
 0x984   : > { %20203 = vmatmul.mubr.bf16.gmra.mrb[116].mxu1 %v9962_v37  ;;  %v10675_v37 = vpack.c.bf16 %v10646_v58, %v10645_v35 }
 0x985   : > { %20206 = vmatprep.mubr.bf16.mxu1 %v9963_v48  ;;  %v10648_v48 = vld [vmem:[#allocation3 + $0x172] sm:$0xff] }
 0x986   : > { %v10676_v38 = vpack.c.bf16 %v10648_v48, %v10647_v29 }
 0x98c   : > { %20207 = vmatmul.mubr.bf16.gmra.mrb[120].mxu1 %v9964_v23  ;;  %v10677_v23 = vpack.c.bf16 %v10650_v52, %v10649_v11  ;;  %v23159_v11 = vld [vmem:[#allocation6 + $0x6c8] sm:$0xff]  }
 0x98d   : > { %20210 = vmatprep.mubr.bf16.mxu1 %v9965_v60  ;;  %v10652_v60 = vld [vmem:[#allocation3 + $0x1a2] sm:$0xff] }
 0x994   : > { %20211 = vmatmul.mubr.bf16.gmra.mrb[124].mxu1 %v25054_v24 }
 0x995   : > { %20214 = vmatprep.mubr.bf16.mxu1 %v25054_v24 }
 0x99c   : > { %20215 = vmatmul.mubr.bf16.gmra.mrb[128].mxu1 %v25054_v24 }
 0x99d   : > { %20234 = vmatprep.mubr.bf16.mxu1 %v24974_v49  ;;  %v23147_v49 = vld [vmem:[#allocation6 + $0x6a8] sm:$0xff]  }
 0x9a4   : > { %20235 = vmatmul.mubr.bf16.vlgmr.msra.gmra.mrb[92].mxu1 %v24976_v31  ;;  %v23148_v31 = vld [vmem:[#allocation6 + $0x6b0] sm:$0xff]  }
 0x9a5   : > { %20238 = vmatprep.mubr.bf16.mxu1 %v24980_v13  ;;  %20275 = vmatpush3.bf16.msra.mxu1 %v23142_v18  ;;  %v23149_v13 = vld [vmem:[#allocation6 + $0x6b8] sm:$0xff]   ;;  %v10636_v18 = vld [vmem:[#allocation3 + $0xe2] sm:$0xff] }
 0x9a6   : > { %20276 = vmatprep.subr.bf16.mxu1 %v23143_v14  ;;  %v10670_v7 = vpack.c.bf16 %v10636_v18, %v10635_v33 }
 0x9a9   : > { %20277 = vmatpush3.bf16.msra.mxu1 %v23143_v14  ;;  %v10653_v14 = vld [vmem:[#allocation3 + $0x1b2] sm:$0xff] }
 0x9aa   : > { %20278 = vmatprep.subr.bf16.mxu1 %v23144_v20 }
 0x9ac   : > { %20239 = vmatmul.mubr.bf16.gmra.mrb[96].mxu1 %v24982_v47  ;;  %v23150_v47 = vld [vmem:[#allocation6 + $0x700] sm:$0xff]  }
 0x9ad   : > { %20242 = vmatprep.mubr.bf16.mxu1 %v24986_v54  ;;  %20279 = vmatpush3.bf16.msra.mxu1 %v23144_v20  ;;  %v23151_v54 = vld [vmem:[#allocation6 + $0x708] sm:$0xff]   ;;  %v10654_v20 = vld [vmem:[#allocation3 + $0x1ba] sm:$0xff] }
 0x9ae   : > { %20280 = vmatprep.subr.bf16.mxu1 %v23145_v10  ;;  %20330 = vmatprep.subr.bf16.mxu0 %v23150_v47 }
 0x9af   : > { %20331 = vmatpush3.bf16.msra.mxu0 %v23150_v47  ;;  %v10658_v47 = vld [vmem:[#allocation3 + $0x1ea] sm:$0xff] }
 0x9b0   : > { %20332 = vmatprep.subr.bf16.mxu0 %v23151_v54 }
 0x9b1   : > { %20281 = vmatpush3.bf16.msra.mxu1 %v23145_v10  ;;  %v10678_v10 = vpack.c.bf16 %v10652_v60, %v10651_v41 }
 0x9b2   : > { %20282 = vmatprep.subr.bf16.mxu1 %v23146_v57 }
 0x9b3   : > { %20333 = vmatpush3.bf16.msra.mxu0 %v23151_v54 }
 0x9b4   : > { %20243 = vmatmul.mubr.bf16.gmra.mrb[100].mxu1 %v24988_v1  ;;  %v23152_v1 = vld [vmem:[#allocation6 + $0x710] sm:$0xff]  }
 0x9b5   : > { %20246 = vmatprep.mubr.bf16.mxu1 %v24992_v46  ;;  %20283 = vmatpush3.bf16.msra.mxu1 %v23146_v57  ;;  %v23153_v46 = vld [vmem:[#allocation6 + $0x718] sm:$0xff]   ;;  %v10679_v57 = vpack.c.bf16 %v10654_v20, %v10653_v14 }
 0x9b6   : > { %20284 = vmatprep.subr.bf16.mxu1 %v23147_v49  ;;  %20334 = vmatprep.subr.bf16.mxu0 %v23152_v1 }
 0x9b7   : > { %20335 = vmatpush3.bf16.msra.mxu0 %v23152_v1 }
 0x9b8   : > { %20336 = vmatprep.subr.bf16.mxu0 %v23153_v46 }
 0x9b9   : > { %20285 = vmatpush3.bf16.msra.mxu1 %v23147_v49  ;;  %v10655_v49 = vld [vmem:[#allocation3 + $0x1ca] sm:$0xff] }
 0x9ba   : > { %20286 = vmatprep.subr.bf16.mxu1 %v23148_v31 }
 0x9bb   : > { %20337 = vmatpush3.bf16.msra.mxu0 %v23153_v46  ;;  %v10659_v46 = vld [vmem:[#allocation3 + $0x1fa] sm:$0xff] }
 0x9bc   : > { %20247 = vmatmul.mubr.bf16.gmra.mrb[104].mxu1 %v24994_v62  ;;  %v23154_v62 = vld [vmem:[#allocation6 + $0x720] sm:$0xff]  }
 0x9bd   : > { %20250 = vmatprep.mubr.bf16.mxu1 %v24998_v30  ;;  %20287 = vmatpush3.bf16.msra.mxu1 %v23148_v31  ;;  %v23155_v30 = vld [vmem:[#allocation6 + $0x728] sm:$0xff]   ;;  %v10656_v31 = vld [vmem:[#allocation3 + $0x1d2] sm:$0xff] }
 0x9be   : > { %20288 = vmatprep.subr.bf16.mxu1 %v23149_v13  ;;  %20338 = vmatprep.subr.bf16.mxu0 %v23154_v62  ;;  %v10680_v54 = vpack.c.bf16 %v10656_v31, %v10655_v49 }
 0x9bf   : > { %20339 = vmatpush3.bf16.msra.mxu0 %v23154_v62  ;;  %v10660_v62 = vld [vmem:[#allocation3 + $0x202] sm:$0xff] }
 0x9c0   : > { %20340 = vmatprep.subr.bf16.mxu0 %v23155_v30 }
 0x9c1   : > { %20289 = vmatpush3.bf16.msra.mxu1 %v23149_v13  ;;  %v10657_v13 = vld [vmem:[#allocation3 + $0x1e2] sm:$0xff] }
 0x9c2   : > { %v10681_v1 = vpack.c.bf16 %v10658_v47, %v10657_v13 }
 0x9c3   : > { %20341 = vmatpush3.bf16.msra.mxu0 %v23155_v30  ;;  %v10682_v30 = vpack.c.bf16 %v10660_v62, %v10659_v46  ;;  %v23161_v46 = vld [vmem:[#allocation6 + $0x6d8] sm:$0xff]  }
 0x9c4   : > { %20251 = vmatmul.mubr.bf16.gmra.mrb[108].mxu1 %v25000_v56  ;;  %20342 = vmatprep.subr.bf16.mxu0 %v23156_v15  ;;  %v10301_v56 = vld [vmem:[#allocation3 + $0x1f9] sm:$0xff] }
 0x9c5   : > { %20254 = vmatprep.mubr.bf16.mxu1 %v25004_v17  ;;  %v10302_v17 = vld [vmem:[#allocation3 + $0x201] sm:$0xff] }
 0x9c7   : > { %20343 = vmatpush3.bf16.msra.mxu0 %v23156_v15  ;;  %v10663_v15 = vld [vmem:[#allocation3 + $0x22a] sm:$0xff] }
 0x9cc   : > { %20255 = vmatmul.mubr.bf16.gmra.mrb[112].mxu1 %v25006_v5  ;;  %v10324_v5 = vpack.c.bf16 %v10302_v17, %v10301_v56  ;;  %v10664_v56 = vld [vmem:[#allocation3 + $0x232] sm:$0xff] }
 0x9cd   : > { %20258 = vmatprep.mubr.bf16.mxu1 %v25010_v61  ;;  %v10305_v61 = vld [vmem:[#allocation3 + $0x229] sm:$0xff]  ;;  %v10684_v17 = vpack.c.bf16 %v10664_v56, %v10663_v15 }
 0x9ce   : > { %v10326_v43 = vpack.c.bf16 %v10306_v42, %v10305_v61  ;;  %v25080_v61 = vld [vmem:[#allocation6 + $0x6c0] sm:$0xff]  }
 0x9cf   : > { %v25083_v42 = vld [vmem:[#allocation9 + $0x2] ss:$0 sm:$0xff] }
 0x9d4   : > { %20259 = vmatmul.mubr.bf16.gmra.mrb[116].mxu1 %v25012_v55  ;;  %v10665_v55 = vpack.c.bf16 %v10626_v2, %v10625_v22 }
 0x9d5   : > { %20262 = vmatprep.mubr.bf16.mxu1 %v25016_v9  ;;  %v10627_v9 = vld [vmem:[#allocation3 + $0x7a] sm:$0xff] }
 0x9d6   : > { %v10666_v8 = vpack.c.bf16 %v10628_v59, %v10627_v9 }
 0x9dc   : > { %20263 = vmatmul.mubr.bf16.gmra.mrb[120].mxu1 %v25018_v19  ;;  %v10630_v19 = vld [vmem:[#allocation3 + $0x9a] sm:$0xff] }
 0x9dd   : > { %20266 = vmatprep.mubr.bf16.mxu1 %v25022_v25  ;;  %v10667_v25 = vpack.c.bf16 %v10630_v19, %v10629_v16 }
 0x9e4   : > { %20267 = vmatmul.mubr.bf16.gmra.mrb[124].mxu1 %v10324_v5  ;;  %v23157_v5 = vld [vmem:[#allocation6 + $0x738] sm:$0xff]  }
 0x9e5   : > { %20270 = vmatprep.mubr.bf16.mxu1 %v25026_v51  ;;  %v10634_v51 = vld [vmem:[#allocation3 + $0xca] sm:$0xff]  ;;  %20344 = vmatprep.subr.bf16.mxu0 %v23157_v5 }
 0x9e6   : > { %v10669_v21 = vpack.c.bf16 %v10634_v51, %v10633_v6  ;;  %20345 = vmatpush3.bf16.msra.mxu0 %v23157_v5 }
 0x9e7   : > { %20382 = vmatprep.subr.bf16.mxu0 %v25080_v61 }
 0x9ec   : > { %20271 = vmatmul.mubr.bf16.gmra.mrb[128].mxu1 %v10326_v43 }
 0x9ed   : > { %20290 = vmatprep.mubr.bf16.mxu1 %v10665_v55 }
 0x9f4   : > { %20291 = vmatmul.mubr.bf16.vlgmr.msra.gmra.mrb[92].mxu1 %v10666_v8 }
 0x9f5   : > { %20294 = vmatprep.mubr.bf16.mxu1 %v10667_v25 }
 0x9fc   : > { %20295 = vmatmul.mubr.bf16.gmra.mrb[96].mxu1 %v10668_v44 }
 0x9fd   : > { %20298 = vmatprep.mubr.bf16.mxu1 %v10669_v21 }
 0xa04   : > { %20299 = vmatmul.mubr.bf16.gmra.mrb[100].mxu1 %v10670_v7 }
 0xa05   : > { %20302 = vmatprep.mubr.bf16.mxu1 %v10671_v12 }
 0xa0c   : > { %20303 = vmatmul.mubr.bf16.gmra.mrb[104].mxu1 %v10672_v0 }
 0xa0d   : > { %20306 = vmatprep.mubr.bf16.mxu1 %v10673_v32 }
 0xa14   : > { %20307 = vmatmul.mubr.bf16.gmra.mrb[108].mxu1 %v10674_v40 }
 0xa15   : > { %20310 = vmatprep.mubr.bf16.mxu1 %v10675_v37 }
 0xa1c   : > { %20311 = vmatmul.mubr.bf16.gmra.mrb[112].mxu1 %v10676_v38 }
 0xa1d   : > { %20314 = vmatprep.mubr.bf16.mxu1 %v10677_v23 }
 0xa24   : > { %20315 = vmatmul.mubr.bf16.gmra.mrb[116].mxu1 %v10678_v10  ;;  %v23160_v10 = vld [vmem:[#allocation6 + $0x6d0] sm:$0xff]  }
 0xa25   : > { %20318 = vmatprep.mubr.bf16.mxu1 %v10679_v57 }
 0xa2c   : > { %20319 = vmatmul.mubr.bf16.gmra.mrb[120].mxu1 %v10680_v54 }
 0xa2d   : > { %20322 = vmatprep.mubr.bf16.mxu1 %v10681_v1 }
 0xa34   : > { %20323 = vmatmul.mubr.bf16.gmra.mrb[124].mxu1 %v10682_v30 }
 0xa35   : > { %20326 = vmatprep.mubr.bf16.mxu1 %v25048_v28 }
 0xa3c   : > { %20327 = vmatmul.mubr.bf16.gmra.mrb[128].mxu1 %v10684_v17 }
 0xac7   : > { %v20292_v22 = vpop.f32.mrb[92].mxu1 }
 0xac8   : > { %v10993_v2 = vadd.f32 %v20292_v22, %v25083_v42  ;;  %v10784_v43 = vpop.f32.mrb[93].mxu1  ;;  %v23162_v22 = vld [vmem:[#allocation6 + $0x6e0] sm:$0xff]  }
 0xac9   : > { %v10991_v55 = vadd.f32 %v25083_v42, %v10784_v43  ;;  %v20293_v28 = vpop.f32.mrb[94].mxu1 }
 0xaca   : > { %v11033_v9 = vmax.f32 %v10993_v2, 0.0  ;;  %v10994_v59 = vadd.f32 %v20293_v28, %v25083_v42  ;;  %v10787_v16 = vpop.f32.mrb[95].mxu1 }
 0xacb   : > { %v11031_v19 = vmax.f32 %v10991_v55, 0.0  ;;  %v10992_v8 = vadd.f32 %v25083_v42, %v10787_v16 }
 0xacc   : > { %11073 = vst [vmem:[#allocation4 + $0x61] sm:$0xff] %v11033_v9  ;;  %v11034_v25 = vmax.f32 %v10994_v59, 0.0 }
 0xacd   : > { %11071 = vst [vmem:[#allocation4 + $0x49] sm:$0xff] %v11031_v19  ;;  %11117 = vst [vmem:[#allocation4 + $0x60] sm:$0xff] %v25050_v26  ;;  %v11032_v39 = vmax.f32 %v10992_v8, 0.0  ;;  %v23163_v19 = vld [vmem:[#allocation6 + $0x6e8] sm:$0xff]  }
 0xace   : > { %11074 = vst [vmem:[#allocation4 + $0x69] sm:$0xff] %v11034_v25  ;;  %11114 = vst [vmem:[#allocation4 + $0x48] sm:$0xff] %v25050_v26 }
 0xacf   : > { %11072 = vst [vmem:[#allocation4 + $0x51] sm:$0xff] %v11032_v39  ;;  %11118 = vst [vmem:[#allocation4 + $0x68] sm:$0xff] %v25050_v26  ;;  %v20296_v53 = vpop.f32.mrb[96].mxu1 }
 0xad0   : > { %11119 = vst [vmem:[#allocation4 + $0x70] sm:$0x3] %v25050_v26  ;;  %v10997_v6 = vadd.f32 %v20296_v53, %v25083_v42  ;;  %11115 = vst [vmem:[#allocation4 + $0x50] sm:$0xff] %v25050_v26  ;;  %v10800_v51 = vpop.f32.mrb[97].mxu1 }
 0xad1   : > { %11116 = vst [vmem:[#allocation4 + $0x58] sm:$0x3] %v25050_v26  ;;  %v10995_v44 = vadd.f32 %v25083_v42, %v10800_v51  ;;  %v20297_v21 = vpop.f32.mrb[98].mxu1 }
 0xad2   : > { %v11037_v33 = vmax.f32 %v10997_v6, 0.0  ;;  %v10998_v18 = vadd.f32 %v20297_v21, %v25083_v42  ;;  %v10803_v3 = vpop.f32.mrb[99].mxu1  ;;  %v23164_v21 = vld [vmem:[#allocation6 + $0x6f0] sm:$0xff]  }
 0xad3   : > { %v11035_v63 = vmax.f32 %v10995_v44, 0.0  ;;  %v10996_v7 = vadd.f32 %v25083_v42, %v10803_v3 }
 0xad4   : > { %11077 = vst [vmem:[#allocation4 + $0x91] sm:$0xff] %v11037_v33  ;;  %v11038_v12 = vmax.f32 %v10998_v18, 0.0 }
 0xad5   : > { %11075 = vst [vmem:[#allocation4 + $0x79] sm:$0xff] %v11035_v63  ;;  %v11036_v36 = vmax.f32 %v10996_v7, 0.0 }
 0xad6   : > { %11078 = vst [vmem:[#allocation4 + $0x99] sm:$0xff] %v11038_v12  ;;  %v11200_v50 = vld [vmem:[#allocation4 + $0x61] sm:$0xff]  ;;  %v11237_v34 = vpack.c.bf16 %v11038_v12, %v11037_v33 }
 0xad7   : > { %v11201_v4 = vld [vmem:[#allocation4 + $0x69] sm:$0xff]  ;;  %11076 = vst [vmem:[#allocation4 + $0x81] sm:$0xff] %v11036_v36  ;;  %v20300_v0 = vpop.f32.mrb[100].mxu1  ;;  %v11236_v35 = vpack.c.bf16 %v11036_v36, %v11035_v63 }
 0xad8   : > { %v11198_v32 = vld [vmem:[#allocation4 + $0x49] sm:$0xff]  ;;  %v11199_v45 = vld [vmem:[#allocation4 + $0x51] sm:$0xff]  ;;  %v11235_v27 = vpack.c.bf16 %v11201_v4, %v11200_v50  ;;  %v11001_v58 = vadd.f32 %v20300_v0, %v25083_v42  ;;  %v10816_v40 = vpop.f32.mrb[101].mxu1 }
 0xad9   : > { %v11234_v37 = vpack.c.bf16 %v11199_v45, %v11198_v32  ;;  %v10999_v29 = vadd.f32 %v25083_v42, %v10816_v40  ;;  %v20301_v48 = vpop.f32.mrb[102].mxu1  ;;  %v23165_v50 = vld [vmem:[#allocation6 + $0x6f8] sm:$0xff]  }
 0xada   : > { %v11041_v52 = vmax.f32 %v11001_v58, 0.0  ;;  %v11002_v38 = vadd.f32 %v20301_v48, %v25083_v42  ;;  %v10819_v23 = vpop.f32.mrb[103].mxu1  ;;  %v25116_v58 = vld [vmem:[#allocation6 + $0x740] sm:$0xff]  }
 0xadb   : > { %20346 = vmatprep.mubr.bf16.mxu0 %v11234_v37  ;;  %v11039_v41 = vmax.f32 %v10999_v29, 0.0  ;;  %v11000_v60 = vadd.f32 %v25083_v42, %v10819_v23 }
 0xadc   : > { %20347 = vmatmul.mubr.bf16.vlgmr.msra.gmra.mrb[48].mxu0 %v11235_v27  ;;  %11081 = vst [vmem:[#allocation4 + $0xc1] sm:$0xff] %v11041_v52  ;;  %v11042_v14 = vmax.f32 %v11002_v38, 0.0 }
 0xadd   : > { %20383 = vmatpush3.bf16.msra.mxu0 %v25080_v61  ;;  %20350 = vmatprep.mubr.bf16.mxu0 %v11236_v35  ;;  %11079 = vst [vmem:[#allocation4 + $0xa9] sm:$0xff] %v11039_v41  ;;  %v11040_v20 = vmax.f32 %v11000_v60, 0.0 }
 0xade   : > { %20384 = vmatprep.subr.bf16.mxu0 %v23159_v11  ;;  %11082 = vst [vmem:[#allocation4 + $0xc9] sm:$0xff] %v11042_v14  ;;  %v11239_v57 = vpack.c.bf16 %v11042_v14, %v11041_v52 }
 0xadf   : > { %11080 = vst [vmem:[#allocation4 + $0xb1] sm:$0xff] %v11040_v20  ;;  %v20304_v49 = vpop.f32.mrb[104].mxu1  ;;  %v11238_v31 = vpack.c.bf16 %v11040_v20, %v11039_v41 }
 0xae0   : > { %v11005_v13 = vadd.f32 %v20304_v49, %v25083_v42  ;;  %v10832_v47 = vpop.f32.mrb[105].mxu1 }
 0xae1   : > { %20385 = vmatpush3.bf16.msra.mxu0 %v23159_v11  ;;  %v11003_v54 = vadd.f32 %v25083_v42, %v10832_v47  ;;  %v20305_v1 = vpop.f32.mrb[106].mxu1 }
 0xae2   : > { %20386 = vmatprep.subr.bf16.mxu0 %v23160_v10  ;;  %v11045_v62 = vmax.f32 %v11005_v13, 0.0  ;;  %v11006_v30 = vadd.f32 %v20305_v1, %v25083_v42  ;;  %v10835_v15 = vpop.f32.mrb[107].mxu1 }
 0xae3   : > { %v11043_v56 = vmax.f32 %v11003_v54, 0.0  ;;  %v11004_v17 = vadd.f32 %v25083_v42, %v10835_v15 }
 0xae4   : > { %20351 = vmatmul.mubr.bf16.gmra.mrb[52].mxu0 %v11237_v34  ;;  %11085 = vst [vmem:[#allocation4 + $0xf1] sm:$0xff] %v11045_v62  ;;  %v11046_v5 = vmax.f32 %v11006_v30, 0.0 }
 0xae5   : > { %20354 = vmatprep.mubr.bf16.mxu0 %v11238_v31  ;;  %20387 = vmatpush3.bf16.msra.mxu0 %v23160_v10  ;;  %11083 = vst [vmem:[#allocation4 + $0xd9] sm:$0xff] %v11043_v56  ;;  %v11044_v61 = vmax.f32 %v11004_v17, 0.0 }
 0xae6   : > { %20388 = vmatprep.subr.bf16.mxu0 %v23161_v46  ;;  %11086 = vst [vmem:[#allocation4 + $0xf9] sm:$0xff] %v11046_v5  ;;  %v11241_v2 = vpack.c.bf16 %v11046_v5, %v11045_v62 }
 0xae7   : > { %11084 = vst [vmem:[#allocation4 + $0xe1] sm:$0xff] %v11044_v61  ;;  %v20308_v43 = vpop.f32.mrb[108].mxu1  ;;  %v11240_v55 = vpack.c.bf16 %v11044_v61, %v11043_v56 }
 0xae8   : > { %v11009_v28 = vadd.f32 %v20308_v43, %v25083_v42  ;;  %v10848_v9 = vpop.f32.mrb[109].mxu1 }
 0xae9   : > { %20389 = vmatpush3.bf16.msra.mxu0 %v23161_v46  ;;  %v11007_v59 = vadd.f32 %v25083_v42, %v10848_v9  ;;  %v20309_v16 = vpop.f32.mrb[110].mxu1 }
 0xaea   : > { %20390 = vmatprep.subr.bf16.mxu0 %v23162_v22  ;;  %v11049_v8 = vmax.f32 %v11009_v28, 0.0  ;;  %v11010_v25 = vadd.f32 %v20309_v16, %v25083_v42  ;;  %v10851_v39 = vpop.f32.mrb[111].mxu1 }
 0xaeb   : > { %v11047_v53 = vmax.f32 %v11007_v59, 0.0  ;;  %v11008_v6 = vadd.f32 %v25083_v42, %v10851_v39 }
 0xaec   : > { %20355 = vmatmul.mubr.bf16.gmra.mrb[56].mxu0 %v11239_v57  ;;  %11089 = vst [vmem:[#allocation4 + $0x121] sm:$0xff] %v11049_v8  ;;  %v11050_v51 = vmax.f32 %v11010_v25, 0.0 }
 0xaed   : > { %20358 = vmatprep.mubr.bf16.mxu0 %v11240_v55  ;;  %20391 = vmatpush3.bf16.msra.mxu0 %v23162_v22  ;;  %11087 = vst [vmem:[#allocation4 + $0x109] sm:$0xff] %v11047_v53  ;;  %v11048_v44 = vmax.f32 %v11008_v6, 0.0 }
 0xaee   : > { %20392 = vmatprep.subr.bf16.mxu0 %v23163_v19  ;;  %11090 = vst [vmem:[#allocation4 + $0x129] sm:$0xff] %v11050_v51  ;;  %v11243_v33 = vpack.c.bf16 %v11050_v51, %v11049_v8 }
 0xaef   : > { %11088 = vst [vmem:[#allocation4 + $0x111] sm:$0xff] %v11048_v44  ;;  %v20312_v18 = vpop.f32.mrb[112].mxu1  ;;  %v11242_v3 = vpack.c.bf16 %v11048_v44, %v11047_v53 }
 0xaf0   : > { %v11013_v63 = vadd.f32 %v20312_v18, %v25083_v42  ;;  %v10864_v7 = vpop.f32.mrb[113].mxu1 }
 0xaf1   : > { %20393 = vmatpush3.bf16.msra.mxu0 %v23163_v19  ;;  %v11011_v12 = vadd.f32 %v25083_v42, %v10864_v7  ;;  %v20313_v36 = vpop.f32.mrb[114].mxu1 }
 0xaf2   : > { %20394 = vmatprep.subr.bf16.mxu0 %v23164_v21  ;;  %v11053_v4 = vmax.f32 %v11013_v63, 0.0  ;;  %v11014_v34 = vadd.f32 %v20313_v36, %v25083_v42  ;;  %v10867_v0 = vpop.f32.mrb[115].mxu1 }
 0xaf3   : > { %v11051_v32 = vmax.f32 %v11011_v12, 0.0  ;;  %v11012_v45 = vadd.f32 %v25083_v42, %v10867_v0 }
 0xaf4   : > { %20359 = vmatmul.mubr.bf16.gmra.mrb[60].mxu0 %v11241_v2  ;;  %11093 = vst [vmem:[#allocation4 + $0x151] sm:$0xff] %v11053_v4  ;;  %v11054_v27 = vmax.f32 %v11014_v34, 0.0 }
 0xaf5   : > { %20362 = vmatprep.mubr.bf16.mxu0 %v11242_v3  ;;  %20395 = vmatpush3.bf16.msra.mxu0 %v23164_v21  ;;  %11091 = vst [vmem:[#allocation4 + $0x139] sm:$0xff] %v11051_v32  ;;  %v11052_v35 = vmax.f32 %v11012_v45, 0.0  ;;  %v23167_v45 = vld [vmem:[#allocation6 + $0x748] sm:$0xff]  }
 0xaf6   : > { %20396 = vmatprep.subr.bf16.mxu0 %v23165_v50  ;;  %11094 = vst [vmem:[#allocation4 + $0x159] sm:$0xff] %v11054_v27  ;;  %v11245_v40 = vpack.c.bf16 %v11054_v27, %v11053_v4 }
 0xaf7   : > { %11092 = vst [vmem:[#allocation4 + $0x141] sm:$0xff] %v11052_v35  ;;  %v20316_v37 = vpop.f32.mrb[116].mxu1  ;;  %v11244_v29 = vpack.c.bf16 %v11052_v35, %v11051_v32  ;;  %v11131_v32 = vld [vmem:[#allocation4 + $0x78] sm:$0xff]  ;;  %v23168_v35 = vld [vmem:[#allocation6 + $0x750] sm:$0xff]  }
 0xaf8   : > { %v11017_v48 = vadd.f32 %v20316_v37, %v25083_v42  ;;  %v10880_v11 = vpop.f32.mrb[117].mxu1  ;;  %v11136_v37 = vld [vmem:[#allocation4 + $0xb0] sm:$0xff] }
 0xaf9   : > { %20397 = vmatpush3.bf16.msra.mxu0 %v23165_v50  ;;  %v11015_v52 = vadd.f32 %v25083_v42, %v10880_v11  ;;  %v20317_v38 = vpop.f32.mrb[118].mxu1  ;;  %v23169_v11 = vld [vmem:[#allocation6 + $0x758] sm:$0xff]  }
 0xafa   : > { %20434 = vmatprep.subr.bf16.mxu0 %v25116_v58  ;;  %v11057_v23 = vmax.f32 %v11017_v48, 0.0  ;;  %v11018_v41 = vadd.f32 %v20317_v38, %v25083_v42  ;;  %v10883_v60 = vpop.f32.mrb[119].mxu1  ;;  %v11135_v48 = vld [vmem:[#allocation4 + $0xa8] sm:$0xff]  ;;  %v11140_v38 = vld [vmem:[#allocation4 + $0xe0] sm:$0xff] }
 0xafb   : > { %v11055_v14 = vmax.f32 %v11015_v52, 0.0  ;;  %v11016_v20 = vadd.f32 %v25083_v42, %v10883_v60  ;;  %v25159_v52 = vpack.c.bf16 %v11136_v37, %v11135_v48  ;;  %v11139_v60 = vld [vmem:[#allocation4 + $0xd8] sm:$0xff]  ;;  %v23176_v37 = vld [vmem:[#allocation6 + $0x790] sm:$0xff]  }
 0xafc   : > { %20363 = vmatmul.mubr.bf16.gmra.mrb[64].mxu0 %v11243_v33  ;;  %11097 = vst [vmem:[#allocation4 + $0x181] sm:$0xff] %v11057_v23  ;;  %v11058_v10 = vmax.f32 %v11018_v41, 0.0  ;;  %v11726_v48 = vld [vmem:[#allocation4 + $0x9a] sm:$0xff] }
 0xafd   : > { %20366 = vmatprep.mubr.bf16.mxu0 %v11244_v29  ;;  %11095 = vst [vmem:[#allocation4 + $0x169] sm:$0xff] %v11055_v14  ;;  %v11056_v57 = vmax.f32 %v11016_v20, 0.0  ;;  %v25165_v20 = vpack.c.bf16 %v11140_v38, %v11139_v60  ;;  %v23177_v38 = vld [vmem:[#allocation6 + $0x798] sm:$0xff]   ;;  %v23178_v60 = vld [vmem:[#allocation6 + $0x7a0] sm:$0xff]  }
 0xafe   : > { %11098 = vst [vmem:[#allocation4 + $0x189] sm:$0xff] %v11058_v10  ;;  %v11247_v49 = vpack.c.bf16 %v11058_v10, %v11057_v23  ;;  %v11137_v23 = vld [vmem:[#allocation4 + $0xc0] sm:$0xff] }
 0xaff   : > { %11096 = vst [vmem:[#allocation4 + $0x171] sm:$0xff] %v11056_v57  ;;  %v20320_v31 = vpop.f32.mrb[120].mxu1  ;;  %v11246_v13 = vpack.c.bf16 %v11056_v57, %v11055_v14  ;;  %v23171_v14 = vld [vmem:[#allocation6 + $0x768] sm:$0xff]   ;;  %v23172_v10 = vld [vmem:[#allocation6 + $0x770] sm:$0xff]  }
 0xb00   : > { %v11021_v47 = vadd.f32 %v20320_v31, %v25083_v42  ;;  %v10896_v54 = vpop.f32.mrb[121].mxu1  ;;  %v11142_v57 = vld [vmem:[#allocation4 + $0xf8] sm:$0xff]  ;;  %v11141_v31 = vld [vmem:[#allocation4 + $0xf0] sm:$0xff] }
 0xb01   : > { %v11019_v1 = vadd.f32 %v25083_v42, %v10896_v54  ;;  %v20321_v46 = vpop.f32.mrb[122].mxu1  ;;  %v23173_v54 = vld [vmem:[#allocation6 + $0x778] sm:$0xff]  }
 0xb02   : > { %v11061_v62 = vmax.f32 %v11021_v47, 0.0  ;;  %v11022_v30 = vadd.f32 %v20321_v46, %v25083_v42  ;;  %v10899_v15 = vpop.f32.mrb[123].mxu1  ;;  %v11143_v47 = vld [vmem:[#allocation4 + $0x108] sm:$0xff]  ;;  %v23174_v46 = vld [vmem:[#allocation6 + $0x780] sm:$0xff]  }
 0xb03   : > { %v11059_v56 = vmax.f32 %v11019_v1, 0.0  ;;  %v11020_v17 = vadd.f32 %v25083_v42, %v10899_v15  ;;  %v11145_v15 = vld [vmem:[#allocation4 + $0x120] sm:$0xff] }
 0xb04   : > { %20367 = vmatmul.mubr.bf16.gmra.mrb[68].mxu0 %v11245_v40  ;;  %11101 = vst [vmem:[#allocation4 + $0x1b1] sm:$0xff] %v11061_v62  ;;  %v11062_v5 = vmax.f32 %v11022_v30, 0.0  ;;  %v11134_v40 = vld [vmem:[#allocation4 + $0x98] sm:$0xff]  ;;  %v11148_v30 = vld [vmem:[#allocation4 + $0x140] sm:$0xff] }
 0xb05   : > { %20370 = vmatprep.mubr.bf16.mxu0 %v11246_v13  ;;  %11099 = vst [vmem:[#allocation4 + $0x199] sm:$0xff] %v11059_v56  ;;  %v25127_v61 = vmax.f32 %v11020_v17, 0.0  ;;  %v25169_v13 = vpack.c.bf16 %v11142_v57, %v11141_v31  ;;  %v11147_v17 = vld [vmem:[#allocation4 + $0x138] sm:$0xff] }
 0xb06   : > { %11102 = vst [vmem:[#allocation4 + $0x1b9] sm:$0xff] %v11062_v5  ;;  %v11249_v22 = vpack.c.bf16 %v11062_v5, %v11061_v62  ;;  %v11146_v62 = vld [vmem:[#allocation4 + $0x128] sm:$0xff]  ;;  %v25177_v5 = vpack.c.bf16 %v11148_v30, %v11147_v17  ;;  %v11731_v57 = vld [vmem:[#allocation4 + $0xda] sm:$0xff]  ;;  %v11736_v17 = vld [vmem:[#allocation4 + $0x112] sm:$0xff] }
 0xb07   : > { %11100 = vst [vmem:[#allocation4 + $0x1a1] sm:$0xff] %v25127_v61  ;;  %v20324_v2 = vpop.f32.mrb[124].mxu1  ;;  %v11248_v43 = vpack.c.bf16 %v25127_v61, %v11059_v56  ;;  %v25175_v56 = vpack.c.bf16 %v11146_v62, %v11145_v15  ;;  %v11733_v62 = vld [vmem:[#allocation4 + $0xf2] sm:$0xff]  ;;  %v11734_v30 = vld [vmem:[#allocation4 + $0xfa] sm:$0xff]  ;;  %v11735_v15 = vld [vmem:[#allocation4 + $0x10a] sm:$0xff] }
 0xb08   : > { %v11025_v55 = vadd.f32 %v20324_v2, %v25083_v42  ;;  %v10912_v28 = vpop.f32.mrb[125].mxu1  ;;  %v11152_v2 = vld [vmem:[#allocation4 + $0x170] sm:$0xff] }
 0xb09   : > { %v11023_v9 = vadd.f32 %v25083_v42, %v10912_v28  ;;  %v20325_v59 = vpop.f32.mrb[126].mxu1  ;;  %v11151_v28 = vld [vmem:[#allocation4 + $0x168] sm:$0xff] }
 0xb0a   : > { %v11065_v16 = vmax.f32 %v11025_v55, 0.0  ;;  %v11026_v19 = vadd.f32 %v20325_v59, %v25083_v42  ;;  %v10915_v8 = vpop.f32.mrb[127].mxu1  ;;  %v11154_v59 = vld [vmem:[#allocation4 + $0x188] sm:$0xff] }
 0xb0b   : > { %v11063_v25 = vmax.f32 %v11023_v9, 0.0  ;;  %v11024_v39 = vadd.f32 %v25083_v42, %v10915_v8  ;;  %v25183_v9 = vpack.c.bf16 %v11152_v2, %v11151_v28  ;;  %v23181_v2 = vld [vmem:[#allocation6 + $0x7b8] sm:$0xff]   ;;  %v23182_v28 = vld [vmem:[#allocation6 + $0x7c0] sm:$0xff]  }
 0xb0c   : > { %20371 = vmatmul.mubr.bf16.gmra.mrb[72].mxu0 %v11247_v49  ;;  %11105 = vst [vmem:[#allocation4 + $0x1e1] sm:$0xff] %v11065_v16  ;;  %v11066_v53 = vmax.f32 %v11026_v19, 0.0  ;;  %v11144_v49 = vld [vmem:[#allocation4 + $0x110] sm:$0xff]  ;;  %v11153_v19 = vld [vmem:[#allocation4 + $0x180] sm:$0xff] }
 0xb0d   : > { %20374 = vmatprep.mubr.bf16.mxu0 %v11248_v43  ;;  %11103 = vst [vmem:[#allocation4 + $0x1c9] sm:$0xff] %v11063_v25  ;;  %v11064_v6 = vmax.f32 %v11024_v39, 0.0  ;;  %v25171_v1 = vpack.c.bf16 %v11144_v49, %v11143_v47  ;;  %v11149_v43 = vld [vmem:[#allocation4 + $0x150] sm:$0xff]  ;;  %v25187_v8 = vpack.c.bf16 %v11154_v59, %v11153_v19  ;;  %v11732_v49 = vld [vmem:[#allocation4 + $0xe2] sm:$0xff]  ;;  %v23179_v47 = vld [vmem:[#allocation6 + $0x7a8] sm:$0xff]  }
 0xb0e   : > { %11106 = vst [vmem:[#allocation4 + $0x1e9] sm:$0xff] %v11066_v53  ;;  %v25135_v51 = vpack.c.bf16 %v11066_v53, %v11065_v16  ;;  %v11156_v16 = vld [vmem:[#allocation4 + $0x1a0] sm:$0xff]  ;;  %v11158_v53 = vld [vmem:[#allocation4 + $0x1b8] sm:$0xff] }
 0xb0f   : > { %11104 = vst [vmem:[#allocation4 + $0x1d1] sm:$0xff] %v11064_v6  ;;  %v20328_v44 = vpop.f32.mrb[128].mxu1  ;;  %v25137_v21 = vpack.c.bf16 %v11064_v6, %v11063_v25  ;;  %v11155_v25 = vld [vmem:[#allocation4 + $0x198] sm:$0xff]  ;;  %v11737_v59 = vld [vmem:[#allocation4 + $0x122] sm:$0xff] }
 0xb10   : > { %v11029_v33 = vadd.f32 %v20328_v44, %v25083_v42  ;;  %v10928_v18 = vpop.f32.mrb[129].mxu1  ;;  %v25189_v39 = vpack.c.bf16 %v11156_v16, %v11155_v25  ;;  %v11157_v44 = vld [vmem:[#allocation4 + $0x1b0] sm:$0xff]  ;;  %v11739_v19 = vld [vmem:[#allocation4 + $0x13a] sm:$0xff]  ;;  %v11740_v25 = vld [vmem:[#allocation4 + $0x142] sm:$0xff] }
 0xb11   : > { %v11027_v3 = vadd.f32 %v25083_v42, %v10928_v18  ;;  %v20329_v63 = vpop.f32.mrb[130].mxu1  ;;  %v11738_v16 = vld [vmem:[#allocation4 + $0x12a] sm:$0xff] }
 0xb12   : > { %v11069_v7 = vmax.f32 %v11029_v33, 0.0  ;;  %v11030_v12 = vadd.f32 %v20329_v63, %v25083_v42  ;;  %v10931_v36 = vpop.f32.mrb[131].mxu1  ;;  %v25193_v33 = vpack.c.bf16 %v11158_v53, %v11157_v44  ;;  %v11719_v63 = vld [vmem:[#allocation4 + $0x4a] sm:$0xff]  ;;  %v25226_v53 = vpack.c.bf16 %v11738_v16, %v11737_v59  ;;  %v11741_v44 = vld [vmem:[#allocation4 + $0x152] sm:$0xff] }
 0xb13   : > { %v11067_v50 = vmax.f32 %v11027_v3, 0.0  ;;  %v11028_v4 = vadd.f32 %v25083_v42, %v10931_v36  ;;  %v11132_v42 = vld [vmem:[#allocation4 + $0x80] sm:$0xff]  ;;  %v23193_v59 = vld [vmem:[#allocation6 + $0x818] sm:$0xff]  }
 0xb14   : > { %20375 = vmatmul.mubr.bf16.gmra.mrb[76].mxu0 %v11249_v22  ;;  %11109 = vst [vmem:[#allocation4 + $0x211] sm:$0xff] %v11069_v7  ;;  %v11070_v34 = vmax.f32 %v11030_v12, 0.0  ;;  %v25152_v27 = vpack.c.bf16 %v11132_v42, %v11131_v32  ;;  %v11150_v22 = vld [vmem:[#allocation4 + $0x158] sm:$0xff]  ;;  %v11159_v18 = vld [vmem:[#allocation4 + $0x1c8] sm:$0xff]  ;;  %v11161_v36 = vld [vmem:[#allocation4 + $0x1e0] sm:$0xff] }
 0xb15   : > { %20378 = vmatprep.mubr.bf16.mxu0 %v25137_v21  ;;  %11107 = vst [vmem:[#allocation4 + $0x1f9] sm:$0xff] %v11067_v50  ;;  %11124 = vst [vmem:[#allocation4 + $0x210] sm:$0xff] %v25050_v26  ;;  %v11068_v0 = vmax.f32 %v11028_v4, 0.0  ;;  %v25181_v55 = vpack.c.bf16 %v11150_v22, %v11149_v43  ;;  %v11720_v7 = vld [vmem:[#allocation4 + $0x52] sm:$0xff]  ;;  %v11162_v12 = vld [vmem:[#allocation4 + $0x1e8] sm:$0xff]  ;;  %v25220_v22 = vpack.c.bf16 %v11734_v30, %v11733_v62 }
 0xb16   : > { %11110 = vst [vmem:[#allocation4 + $0x219] sm:$0xff] %v11070_v34  ;;  %11121 = vst [vmem:[#allocation4 + $0x1f8] sm:$0xff] %v25050_v26  ;;  %v11160_v6 = vld [vmem:[#allocation4 + $0x1d0] sm:$0xff]  ;;  %v11755_v50 = vpack.c.bf16 %v11720_v7, %v11719_v63  ;;  %v25199_v4 = vpack.c.bf16 %v11162_v12, %v11161_v36  ;;  %v11721_v34 = vld [vmem:[#allocation4 + $0x62] sm:$0xff]  ;;  %v25222_v43 = vpack.c.bf16 %v11736_v17, %v11735_v15 }
 0xb17   : > { %11125 = vst [vmem:[#allocation4 + $0x218] sm:$0xff] %v25050_v26  ;;  %11126 = vst [vmem:[#allocation4 + $0x220] sm:$0x3] %v25050_v26  ;;  %v25195_v3 = vpack.c.bf16 %v11160_v6, %v11159_v18  ;;  %v11723_v32 = vld [vmem:[#allocation4 + $0x7a] sm:$0xff]  ;;  %v25228_v6 = vpack.c.bf16 %v11740_v25, %v11739_v19  ;;  %v11743_v63 = vld [vmem:[#allocation4 + $0x16a] sm:$0xff] }
 0xb18   : > { %11108 = vst [vmem:[#allocation4 + $0x201] sm:$0xff] %v11068_v0  ;;  %v11722_v0 = vld [vmem:[#allocation4 + $0x6a] sm:$0xff]  ;;  %v11742_v18 = vld [vmem:[#allocation4 + $0x15a] sm:$0xff]  ;;  %v11744_v7 = vld [vmem:[#allocation4 + $0x172] sm:$0xff] }
 0xb19   : > { %11122 = vst [vmem:[#allocation4 + $0x200] sm:$0xff] %v25050_v26  ;;  %11123 = vst [vmem:[#allocation4 + $0x208] sm:$0x3] %v25050_v26  ;;  %v11133_v26 = vld [vmem:[#allocation4 + $0x90] sm:$0xff]  ;;  %v25202_v42 = vpack.c.bf16 %v11722_v0, %v11721_v34  ;;  %v25232_v12 = vpack.c.bf16 %v11742_v18, %v11741_v44  ;;  %v25234_v36 = vpack.c.bf16 %v11744_v7, %v11743_v63  ;;  %v11747_v0 = vld [vmem:[#allocation4 + $0x19a] sm:$0xff] }
 0xb1a   : > { %v25157_v29 = vpack.c.bf16 %v11134_v40, %v11133_v26  ;;  %v11725_v26 = vld [vmem:[#allocation4 + $0x92] sm:$0xff]  ;;  %v11746_v34 = vld [vmem:[#allocation4 + $0x18a] sm:$0xff]  ;;  %v12395_v25 = vld [vmem:[#allocation4 + $0xe1] sm:$0xff] }
 0xb1b   : > { %v23185_v62 = vld [vmem:[#allocation6 + $0x7d8] sm:$0xff]   ;;  %v23186_v30 = vld [vmem:[#allocation6 + $0x7e0] sm:$0xff]   ;;  %v23187_v15 = vld [vmem:[#allocation6 + $0x7e8] sm:$0xff]  }
 0xb1c   : > { %20379 = vmatmul.mubr.bf16.gmra.mrb[80].mxu0 %v25135_v51  ;;  %v12390_v17 = vld [vmem:[#allocation4 + $0xa9] sm:$0xff]  ;;  %v12397_v44 = vld [vmem:[#allocation4 + $0xf9] sm:$0xff]  ;;  %v12396_v7 = vld [vmem:[#allocation4 + $0xf1] sm:$0xff] }
 0xb1d   : > { %20398 = vmatprep.mubr.bf16.mxu0 %v25054_v24  ;;  %v23194_v19 = vld [vmem:[#allocation6 + $0x820] sm:$0xff]   ;;  %v12394_v18 = vld [vmem:[#allocation4 + $0xd9] sm:$0xff] }
 0xb1e   : > { %v25289_v63 = vpack.c.bf16 %v12395_v25, %v12394_v18  ;;  %v13055_v18 = vld [vmem:[#allocation4 + $0xc0] sm:$0xff] }
 0xb24   : > { %20399 = vmatmul.mubr.bf16.vlgmr.msra.gmra.mrb[48].mxu0 %v25054_v24  ;;  %v23170_v24 = vld [vmem:[#allocation6 + $0x760] sm:$0xff]  }
 0xb25   : > { %20402 = vmatprep.mubr.bf16.mxu0 %v25152_v27  ;;  %20435 = vmatpush3.bf16.msra.mxu0 %v25116_v58  ;;  %v11138_v58 = vld [vmem:[#allocation4 + $0xc8] sm:$0xff] }
 0xb26   : > { %20436 = vmatprep.subr.bf16.mxu0 %v23167_v45  ;;  %v25163_v41 = vpack.c.bf16 %v11138_v58, %v11137_v23  ;;  %v25208_v58 = vpack.c.bf16 %v11726_v48, %v11725_v26  ;;  %v11750_v26 = vld [vmem:[#allocation4 + $0x1ba] sm:$0xff]  ;;  %v11751_v48 = vld [vmem:[#allocation4 + $0x1ca] sm:$0xff] }
 0xb29   : > { %20437 = vmatpush3.bf16.msra.mxu0 %v23167_v45  ;;  %v11724_v45 = vld [vmem:[#allocation4 + $0x82] sm:$0xff] }
 0xb2a   : > { %20438 = vmatprep.subr.bf16.mxu0 %v23168_v35  ;;  %v25204_v40 = vpack.c.bf16 %v11724_v45, %v11723_v32  ;;  %v11748_v32 = vld [vmem:[#allocation4 + $0x1a2] sm:$0xff] }
 0xb2c   : > { %20403 = vmatmul.mubr.bf16.gmra.mrb[52].mxu0 %v25157_v29 }
 0xb2d   : > { %20406 = vmatprep.mubr.bf16.mxu0 %v25159_v52  ;;  %20439 = vmatpush3.bf16.msra.mxu0 %v23168_v35  ;;  %v23175_v35 = vld [vmem:[#allocation6 + $0x788] sm:$0xff]  }
 0xb2e   : > { %20440 = vmatprep.subr.bf16.mxu0 %v23169_v11 }
 0xb31   : > { %20441 = vmatpush3.bf16.msra.mxu0 %v23169_v11  ;;  %v11727_v11 = vld [vmem:[#allocation4 + $0xaa] sm:$0xff] }
 0xb32   : > { %20442 = vmatprep.subr.bf16.mxu0 %v23170_v24 }
 0xb34   : > { %20407 = vmatmul.mubr.bf16.gmra.mrb[56].mxu0 %v25163_v41 }
 0xb35   : > { %20410 = vmatprep.mubr.bf16.mxu0 %v25165_v20  ;;  %20443 = vmatpush3.bf16.msra.mxu0 %v23170_v24  ;;  %v11728_v24 = vld [vmem:[#allocation4 + $0xb2] sm:$0xff] }
 0xb36   : > { %20444 = vmatprep.subr.bf16.mxu0 %v23171_v14  ;;  %v25210_v23 = vpack.c.bf16 %v11728_v24, %v11727_v11  ;;  %v11752_v11 = vld [vmem:[#allocation4 + $0x1d2] sm:$0xff] }
 0xb39   : > { %20445 = vmatpush3.bf16.msra.mxu0 %v23171_v14  ;;  %v11729_v14 = vld [vmem:[#allocation4 + $0xc2] sm:$0xff] }
 0xb3a   : > { %20446 = vmatprep.subr.bf16.mxu0 %v23172_v10 }
 0xb3c   : > { %20411 = vmatmul.mubr.bf16.gmra.mrb[60].mxu0 %v25169_v13 }
 0xb3d   : > { %20414 = vmatprep.mubr.bf16.mxu0 %v25171_v1  ;;  %20447 = vmatpush3.bf16.msra.mxu0 %v23172_v10  ;;  %v11730_v10 = vld [vmem:[#allocation4 + $0xca] sm:$0xff] }
 0xb3e   : > { %20448 = vmatprep.subr.bf16.mxu0 %v23173_v54  ;;  %v25214_v31 = vpack.c.bf16 %v11730_v10, %v11729_v14  ;;  %v11754_v14 = vld [vmem:[#allocation4 + $0x1ea] sm:$0xff] }
 0xb3f   : > { %v25250_v10 = vld [vmem:[#allocation4 + $0x30] sm:$0xff] }
 0xb41   : > { %20449 = vmatpush3.bf16.msra.mxu0 %v23173_v54  ;;  %v25216_v54 = vpack.c.bf16 %v11732_v49, %v11731_v57  ;;  %v25254_v57 = vpack.c.bf16 %v25250_v10, %v25250_v10 }
 0xb42   : > { %20486 = vmatprep.subr.bf16.mxu0 %v23174_v46 }
 0xb44   : > { %20415 = vmatmul.mubr.bf16.gmra.mrb[64].mxu0 %v25175_v56 }
 0xb45   : > { %20418 = vmatprep.mubr.bf16.mxu0 %v25177_v5 }
 0xb4c   : > { %20419 = vmatmul.mubr.bf16.gmra.mrb[68].mxu0 %v25181_v55 }
 0xb4d   : > { %20422 = vmatprep.mubr.bf16.mxu0 %v25183_v9 }
 0xb54   : > { %20423 = vmatmul.mubr.bf16.gmra.mrb[72].mxu0 %v25187_v8 }
 0xb55   : > { %20426 = vmatprep.mubr.bf16.mxu0 %v25189_v39 }
 0xb5c   : > { %20427 = vmatmul.mubr.bf16.gmra.mrb[76].mxu0 %v25193_v33 }
 0xb5d   : > { %20430 = vmatprep.mubr.bf16.mxu0 %v25195_v3 }
 0xb64   : > { %20431 = vmatmul.mubr.bf16.gmra.mrb[80].mxu0 %v25199_v4 }
 0xb65   : > { %20450 = vmatprep.mubr.bf16.mxu0 %v11755_v50  ;;  %v11745_v50 = vld [vmem:[#allocation4 + $0x182] sm:$0xff] }
 0xb66   : > { %v25238_v45 = vpack.c.bf16 %v11746_v34, %v11745_v50  ;;  %v23195_v50 = vld [vmem:[#allocation6 + $0x828] sm:$0xff]   ;;  %v25291_v34 = vpack.c.bf16 %v12397_v44, %v12396_v7  ;;  %v13058_v44 = vld [vmem:[#allocation4 + $0xe0] sm:$0xff] }
 0xb6c   : > { %20451 = vmatmul.mubr.bf16.vlgmr.msra.gmra.mrb[48].mxu0 %v25202_v42 }
 0xb6d   : > { %20454 = vmatprep.mubr.bf16.mxu0 %v25204_v40  ;;  %20487 = vmatpush3.bf16.msra.mxu0 %v23174_v46  ;;  %v23180_v46 = vld [vmem:[#allocation6 + $0x7b0] sm:$0xff]  }
 0xb6e   : > { %20488 = vmatprep.subr.bf16.mxu0 %v23175_v35 }
 0xb71   : > { %20489 = vmatpush3.bf16.msra.mxu0 %v23175_v35  ;;  %v25240_v35 = vpack.c.bf16 %v11748_v32, %v11747_v0  ;;  %v23196_v0 = vld [vmem:[#allocation6 + $0x830] sm:$0xff]   ;;  %v12399_v32 = vld [vmem:[#allocation4 + $0x111] sm:$0xff] }
 0xb72   : > { %20490 = vmatprep.subr.bf16.mxu0 %v23176_v37 }
 0xb74   : > { %20455 = vmatmul.mubr.bf16.gmra.mrb[52].mxu0 %v25208_v58 }
 0xb75   : > { %20458 = vmatprep.mubr.bf16.mxu0 %v25210_v23  ;;  %20491 = vmatpush3.bf16.msra.mxu0 %v23176_v37  ;;  %v11749_v37 = vld [vmem:[#allocation4 + $0x1b2] sm:$0xff] }
 0xb76   : > { %20492 = vmatprep.subr.bf16.mxu0 %v23177_v38  ;;  %v25244_v24 = vpack.c.bf16 %v11750_v26, %v11749_v37  ;;  %v12401_v37 = vld [vmem:[#allocation4 + $0x129] sm:$0xff] }
 0xb77   : > { %v12398_v26 = vld [vmem:[#allocation4 + $0x109] sm:$0xff] }
 0xb79   : > { %20493 = vmatpush3.bf16.msra.mxu0 %v23177_v38  ;;  %v25246_v38 = vpack.c.bf16 %v11752_v11, %v11751_v48  ;;  %v25295_v48 = vpack.c.bf16 %v12399_v32, %v12398_v26  ;;  %v12400_v11 = vld [vmem:[#allocation4 + $0x121] sm:$0xff]  ;;  %v13060_v26 = vld [vmem:[#allocation4 + $0xf8] sm:$0xff] }
 0xb7a   : > { %20494 = vmatprep.subr.bf16.mxu0 %v23178_v60 }
 0xb7c   : > { %20459 = vmatmul.mubr.bf16.gmra.mrb[56].mxu0 %v25214_v31 }
 0xb7d   : > { %20462 = vmatprep.mubr.bf16.mxu0 %v25216_v54  ;;  %20495 = vmatpush3.bf16.msra.mxu0 %v23178_v60  ;;  %v11753_v60 = vld [vmem:[#allocation4 + $0x1e2] sm:$0xff] }
 0xb7e   : > { %20496 = vmatprep.subr.bf16.mxu0 %v23179_v47  ;;  %v25256_v49 = vpack.c.bf16 %v11754_v14, %v11753_v60  ;;  %v23197_v60 = vld [vmem:[#allocation6 + $0x838] sm:$0xff]   ;;  %v25297_v14 = vpack.c.bf16 %v12401_v37, %v12400_v11  ;;  %v23210_v37 = vld [vmem:[#allocation6 + $0x8a0] sm:$0xff]  }
 0xb7f   : > { %v13062_v11 = vld [vmem:[#allocation4 + $0x110] sm:$0xff] }
 0xb81   : > { %20497 = vmatpush3.bf16.msra.mxu0 %v23179_v47  ;;  %v23183_v47 = vld [vmem:[#allocation6 + $0x7c8] sm:$0xff]  }
 0xb82   : > { %20498 = vmatprep.subr.bf16.mxu0 %v23180_v46 }
 0xb84   : > { %20463 = vmatmul.mubr.bf16.gmra.mrb[60].mxu0 %v25220_v22 }
 0xb85   : > { %20466 = vmatprep.mubr.bf16.mxu0 %v25222_v43  ;;  %20499 = vmatpush3.bf16.msra.mxu0 %v23180_v46  ;;  %v23184_v46 = vld [vmem:[#allocation6 + $0x7d0] sm:$0xff]  }
 0xb86   : > { %20500 = vmatprep.subr.bf16.mxu0 %v23181_v2 }
 0xb89   : > { %20501 = vmatpush3.bf16.msra.mxu0 %v23181_v2 }
 0xb8a   : > { %20538 = vmatprep.subr.bf16.mxu0 %v23182_v28 }
 0xb8c   : > { %20467 = vmatmul.mubr.bf16.gmra.mrb[64].mxu0 %v25226_v53 }
 0xb8d   : > { %20470 = vmatprep.mubr.bf16.mxu0 %v25228_v6 }
 0xb94   : > { %20471 = vmatmul.mubr.bf16.gmra.mrb[68].mxu0 %v25232_v12 }
 0xb95   : > { %20474 = vmatprep.mubr.bf16.mxu0 %v25234_v36 }
 0xb9c   : > { %20475 = vmatmul.mubr.bf16.gmra.mrb[72].mxu0 %v25238_v45 }
 0xb9d   : > { %20478 = vmatprep.mubr.bf16.mxu0 %v25240_v35 }
 0xba4   : > { %20479 = vmatmul.mubr.bf16.gmra.mrb[76].mxu0 %v25244_v24 }
 0xba5   : > { %20482 = vmatprep.mubr.bf16.mxu0 %v25246_v38 }
 0xbac   : > { %20483 = vmatmul.mubr.bf16.gmra.mrb[80].mxu0 %v25256_v49 }
 0xbad   : > { %20502 = vmatprep.mubr.bf16.mxu0 %v25254_v57 }
 0xbb4   : > { %20503 = vmatmul.mubr.bf16.vlgmr.msra.gmra.mrb[48].mxu0 %v25152_v27  ;;  %v23188_v27 = vld [vmem:[#allocation6 + $0x7f0] sm:$0xff]  }
 0xbb5   : > { %20506 = vmatprep.mubr.bf16.mxu0 %v25157_v29  ;;  %20539 = vmatpush3.bf16.msra.mxu0 %v23182_v28  ;;  %v23189_v29 = vld [vmem:[#allocation6 + $0x7f8] sm:$0xff]  }
 0xbb6   : > { %20540 = vmatprep.subr.bf16.mxu0 %v23183_v47  ;;  %v12392_v28 = vld [vmem:[#allocation4 + $0xc1] sm:$0xff] }
 0xbb9   : > { %20541 = vmatpush3.bf16.msra.mxu0 %v23183_v47  ;;  %v23198_v47 = vld [vmem:[#allocation6 + $0x840] sm:$0xff]  }
 0xbba   : > { %20542 = vmatprep.subr.bf16.mxu0 %v23184_v46 }
 0xbbc   : > { %20507 = vmatmul.mubr.bf16.gmra.mrb[52].mxu0 %v25159_v52  ;;  %v23190_v52 = vld [vmem:[#allocation6 + $0x800] sm:$0xff]  }
 0xbbd   : > { %20510 = vmatprep.mubr.bf16.mxu0 %v25163_v41  ;;  %20543 = vmatpush3.bf16.msra.mxu0 %v23184_v46  ;;  %v12384_v41 = vld [vmem:[#allocation4 + $0x61] sm:$0xff] }
 0xbbe   : > { %20544 = vmatprep.subr.bf16.mxu0 %v23185_v62  ;;  %v12403_v46 = vld [vmem:[#allocation4 + $0x141] sm:$0xff] }
 0xbc1   : > { %20545 = vmatpush3.bf16.msra.mxu0 %v23185_v62  ;;  %v12405_v62 = vld [vmem:[#allocation4 + $0x159] sm:$0xff] }
 0xbc2   : > { %20546 = vmatprep.subr.bf16.mxu0 %v23186_v30 }
 0xbc4   : > { %20511 = vmatmul.mubr.bf16.gmra.mrb[56].mxu0 %v25165_v20  ;;  %v12385_v20 = vld [vmem:[#allocation4 + $0x69] sm:$0xff] }
 0xbc5   : > { %20514 = vmatprep.mubr.bf16.mxu0 %v25169_v13  ;;  %20547 = vmatpush3.bf16.msra.mxu0 %v23186_v30  ;;  %v12420_v13 = vpack.c.bf16 %v12385_v20, %v12384_v41  ;;  %v12402_v30 = vld [vmem:[#allocation4 + $0x139] sm:$0xff]  ;;  %v12409_v41 = vld [vmem:[#allocation4 + $0x189] sm:$0xff] }
 0xbc6   : > { %20548 = vmatprep.subr.bf16.mxu0 %v23187_v15  ;;  %v12406_v20 = vld [vmem:[#allocation4 + $0x169] sm:$0xff] }
 0xbc9   : > { %20549 = vmatpush3.bf16.msra.mxu0 %v23187_v15  ;;  %v25301_v15 = vpack.c.bf16 %v12403_v46, %v12402_v30  ;;  %v13061_v46 = vld [vmem:[#allocation4 + $0x108] sm:$0xff] }
 0xbca   : > { %20550 = vmatprep.subr.bf16.mxu0 %v23188_v27  ;;  %v13091_v30 = vpack.c.bf16 %v13062_v11, %v13061_v46  ;;  %v13717_v11 = vld [vmem:[#allocation4 + $0xaa] sm:$0xff] }
 0xbcc   : > { %20515 = vmatmul.mubr.bf16.gmra.mrb[60].mxu0 %v25171_v1  ;;  %v12387_v1 = vld [vmem:[#allocation4 + $0x81] sm:$0xff] }
 0xbcd   : > { %20518 = vmatprep.mubr.bf16.mxu0 %v25175_v56  ;;  %20551 = vmatpush3.bf16.msra.mxu0 %v23188_v27  ;;  %v12389_v56 = vld [vmem:[#allocation4 + $0x99] sm:$0xff]  ;;  %v12404_v27 = vld [vmem:[#allocation4 + $0x151] sm:$0xff] }
 0xbce   : > { %20552 = vmatprep.subr.bf16.mxu0 %v23189_v29 }
 0xbd1   : > { %20553 = vmatpush3.bf16.msra.mxu0 %v23189_v29  ;;  %v25303_v29 = vpack.c.bf16 %v12405_v62, %v12404_v27  ;;  %v23211_v62 = vld [vmem:[#allocation6 + $0x8a8] sm:$0xff]   ;;  %v23212_v27 = vld [vmem:[#allocation6 + $0x8b0] sm:$0xff]  }
 0xbd2   : > { %20590 = vmatprep.subr.bf16.mxu0 %v23190_v52 }
 0xbd4   : > { %20519 = vmatmul.mubr.bf16.gmra.mrb[64].mxu0 %v25177_v5  ;;  %v12386_v5 = vld [vmem:[#allocation4 + $0x79] sm:$0xff] }
 0xbd5   : > { %20522 = vmatprep.mubr.bf16.mxu0 %v25181_v55  ;;  %v25277_v55 = vpack.c.bf16 %v12387_v1, %v12386_v5  ;;  %v12408_v1 = vld [vmem:[#allocation4 + $0x181] sm:$0xff]  ;;  %v25313_v5 = vld [vmem:[#allocation4 + $0x199] sm:$0xff] }
 0xbdc   : > { %20523 = vmatmul.mubr.bf16.gmra.mrb[68].mxu0 %v25183_v9  ;;  %v12388_v9 = vld [vmem:[#allocation4 + $0x91] sm:$0xff] }
 0xbdd   : > { %20526 = vmatprep.mubr.bf16.mxu0 %v25187_v8  ;;  %v23191_v8 = vld [vmem:[#allocation6 + $0x808] sm:$0xff]  }
 0xbe4   : > { %20527 = vmatmul.mubr.bf16.gmra.mrb[72].mxu0 %v25189_v39  ;;  %v25279_v39 = vpack.c.bf16 %v12389_v56, %v12388_v9  ;;  %v25309_v56 = vpack.c.bf16 %v12409_v41, %v12408_v1  ;;  %v12413_v9 = vld [vmem:[#allocation4 + $0x1b9] sm:$0xff] }
 0xbe5   : > { %20530 = vmatprep.mubr.bf16.mxu0 %v25193_v33  ;;  %v23192_v33 = vld [vmem:[#allocation6 + $0x810] sm:$0xff]  }
 0xbe6   : > { %v13066_v41 = vld [vmem:[#allocation4 + $0x140] sm:$0xff] }
 0xbec   : > { %20531 = vmatmul.mubr.bf16.gmra.mrb[76].mxu0 %v25195_v3  ;;  %v12391_v3 = vld [vmem:[#allocation4 + $0xb1] sm:$0xff] }
 0xbed   : > { %20534 = vmatprep.mubr.bf16.mxu0 %v25199_v4  ;;  %v12393_v4 = vld [vmem:[#allocation4 + $0xc9] sm:$0xff]  ;;  %v25283_v2 = vpack.c.bf16 %v12391_v3, %v12390_v17  ;;  %v12419_v17 = vld [vmem:[#allocation4 + $0x201] sm:$0xff] }
 0xbee   : > { %v25285_v16 = vpack.c.bf16 %v12393_v4, %v12392_v28  ;;  %v12418_v4 = vld [vmem:[#allocation4 + $0x1f9] sm:$0xff] }
 0xbef   : > { %v25322_v28 = vpack.c.bf16 %v12419_v17, %v12418_v4  ;;  %v23214_v4 = vld [vmem:[#allocation6 + $0x8c0] sm:$0xff]   ;;  %v13068_v17 = vld [vmem:[#allocation4 + $0x158] sm:$0xff] }
 0xbf4   : > { %20535 = vmatmul.mubr.bf16.gmra.mrb[80].mxu0 %v25254_v57 }
 0xbf5   : > { %20554 = vmatprep.mubr.bf16.mxu0 %v12420_v13 }
 0xbfc   : > { %20555 = vmatmul.mubr.bf16.vlgmr.msra.gmra.mrb[48].mxu0 %v25277_v55 }
 0xbfd   : > { %20558 = vmatprep.mubr.bf16.mxu0 %v25279_v39  ;;  %20591 = vmatpush3.bf16.msra.mxu0 %v23190_v52  ;;  %v12407_v52 = vld [vmem:[#allocation4 + $0x171] sm:$0xff] }
 0xbfe   : > { %20592 = vmatprep.subr.bf16.mxu0 %v23191_v8  ;;  %v25307_v13 = vpack.c.bf16 %v12407_v52, %v12406_v20  ;;  %v13064_v52 = vld [vmem:[#allocation4 + $0x128] sm:$0xff]  ;;  %v13063_v20 = vld [vmem:[#allocation4 + $0x120] sm:$0xff] }
 0xbff   : > { %v13092_v1 = vpack.c.bf16 %v13064_v52, %v13063_v20  ;;  %v13722_v52 = vld [vmem:[#allocation4 + $0xe2] sm:$0xff]  ;;  %v23225_v20 = vld [vmem:[#allocation11 + $0x58] sm:$0xff]  }
 0xc01   : > { %20593 = vmatpush3.bf16.msra.mxu0 %v23191_v8  ;;  %v12433_v8 = vpack.c.bf16 %v25127_v61, %v25313_v5  ;;  %v23200_v61 = vld [vmem:[#allocation6 + $0x850] sm:$0xff]  }
 0xc02   : > { %20594 = vmatprep.subr.bf16.mxu0 %v23192_v33 }
 0xc04   : > { %20559 = vmatmul.mubr.bf16.gmra.mrb[52].mxu0 %v25283_v2 }
 0xc05   : > { %20562 = vmatprep.mubr.bf16.mxu0 %v25285_v16  ;;  %20595 = vmatpush3.bf16.msra.mxu0 %v23192_v33  ;;  %v12412_v33 = vld [vmem:[#allocation4 + $0x1b1] sm:$0xff] }
 0xc06   : > { %20596 = vmatprep.subr.bf16.mxu0 %v23193_v59  ;;  %v25317_v3 = vpack.c.bf16 %v12413_v9, %v12412_v33  ;;  %v13065_v9 = vld [vmem:[#allocation4 + $0x138] sm:$0xff] }
 0xc07   : > { %v13093_v33 = vpack.c.bf16 %v13066_v41, %v13065_v9  ;;  %v23226_v9 = vld [vmem:[#allocation11 + $0x60] sm:$0xff]  }
 0xc09   : > { %20597 = vmatpush3.bf16.msra.mxu0 %v23193_v59  ;;  %v23199_v59 = vld [vmem:[#allocation6 + $0x848] sm:$0xff]  }
 0xc0a   : > { %20598 = vmatprep.subr.bf16.mxu0 %v23194_v19 }
 0xc0c   : > { %20563 = vmatmul.mubr.bf16.gmra.mrb[56].mxu0 %v25289_v63 }
 0xc0d   : > { %20566 = vmatprep.mubr.bf16.mxu0 %v25291_v34  ;;  %20599 = vmatpush3.bf16.msra.mxu0 %v23194_v19  ;;  %v13053_v19 = vld [vmem:[#allocation4 + $0xa8] sm:$0xff] }
 0xc0e   : > { %20600 = vmatprep.subr.bf16.mxu0 %v23195_v50 }
 0xc11   : > { %20601 = vmatpush3.bf16.msra.mxu0 %v23195_v50  ;;  %v13057_v50 = vld [vmem:[#allocation4 + $0xd8] sm:$0xff] }
 0xc12   : > { %20602 = vmatprep.subr.bf16.mxu0 %v23196_v0  ;;  %v13089_v32 = vpack.c.bf16 %v13058_v44, %v13057_v50  ;;  %v23217_v44 = vld [vmem:[#allocation6 + $0x8d8] sm:$0xff]  }
 0xc14   : > { %20567 = vmatmul.mubr.bf16.gmra.mrb[60].mxu0 %v25295_v48 }
 0xc15   : > { %20570 = vmatprep.mubr.bf16.mxu0 %v25297_v14  ;;  %20603 = vmatpush3.bf16.msra.mxu0 %v23196_v0  ;;  %v23209_v0 = vld [vmem:[#allocation6 + $0x898] sm:$0xff]  }
 0xc16   : > { %20604 = vmatprep.subr.bf16.mxu0 %v23197_v60 }
 0xc19   : > { %20605 = vmatpush3.bf16.msra.mxu0 %v23197_v60  ;;  %v13059_v60 = vld [vmem:[#allocation4 + $0xf0] sm:$0xff] }
 0xc1a   : > { %20642 = vmatprep.subr.bf16.mxu0 %v23198_v47 }
 0xc1c   : > { %20571 = vmatmul.mubr.bf16.gmra.mrb[64].mxu0 %v25301_v15 }
 0xc1d   : > { %20574 = vmatprep.mubr.bf16.mxu0 %v25303_v29 }
 0xc24   : > { %20575 = vmatmul.mubr.bf16.gmra.mrb[68].mxu0 %v25307_v13 }
 0xc25   : > { %20578 = vmatprep.mubr.bf16.mxu0 %v25309_v56 }
 0xc2c   : > { %20579 = vmatmul.mubr.bf16.gmra.mrb[72].mxu0 %v12433_v8  ;;  %v23213_v8 = vld [vmem:[#allocation6 + $0x8b8] sm:$0xff]  }
 0xc2d   : > { %20582 = vmatprep.mubr.bf16.mxu0 %v25317_v3 }
 0xc34   : > { %20583 = vmatmul.mubr.bf16.gmra.mrb[76].mxu0 %v25137_v21  ;;  %v23201_v21 = vld [vmem:[#allocation6 + $0x858] sm:$0xff]  }
 0xc35   : > { %20586 = vmatprep.mubr.bf16.mxu0 %v25135_v51  ;;  %v23202_v51 = vld [vmem:[#allocation6 + $0x860] sm:$0xff]  }
 0xc3c   : > { %20587 = vmatmul.mubr.bf16.gmra.mrb[80].mxu0 %v25322_v28 }
 0xc3d   : > { %20606 = vmatprep.mubr.bf16.mxu0 %v25202_v42  ;;  %v23203_v42 = vld [vmem:[#allocation6 + $0x868] sm:$0xff]  }
 0xc44   : > { %20607 = vmatmul.mubr.bf16.vlgmr.msra.gmra.mrb[48].mxu0 %v25204_v40  ;;  %v23204_v40 = vld [vmem:[#allocation6 + $0x870] sm:$0xff]  }
 0xc45   : > { %20610 = vmatprep.mubr.bf16.mxu0 %v25208_v58  ;;  %20643 = vmatpush3.bf16.msra.mxu0 %v23198_v47  ;;  %v23205_v58 = vld [vmem:[#allocation6 + $0x878] sm:$0xff]   ;;  %v13090_v47 = vpack.c.bf16 %v13060_v26, %v13059_v60  ;;  %v13716_v26 = vld [vmem:[#allocation4 + $0x9a] sm:$0xff]  ;;  %v13718_v60 = vld [vmem:[#allocation4 + $0xb2] sm:$0xff] }
 0xc46   : > { %20644 = vmatprep.subr.bf16.mxu0 %v23199_v59  ;;  %v13751_v46 = vpack.c.bf16 %v13718_v60, %v13717_v11 }
 0xc49   : > { %20645 = vmatpush3.bf16.msra.mxu0 %v23199_v59  ;;  %v13070_v59 = vld [vmem:[#allocation4 + $0x170] sm:$0xff] }
 0xc4a   : > { %20646 = vmatprep.subr.bf16.mxu0 %v23200_v61 }
 0xc4c   : > { %20611 = vmatmul.mubr.bf16.gmra.mrb[52].mxu0 %v25210_v23  ;;  %v23206_v23 = vld [vmem:[#allocation6 + $0x880] sm:$0xff]  }
 0xc4d   : > { %20614 = vmatprep.mubr.bf16.mxu0 %v25214_v31  ;;  %20647 = vmatpush3.bf16.msra.mxu0 %v23200_v61  ;;  %v12750_v31 = vld [vmem:[#allocation4 + $0x1fa] sm:$0xff]  ;;  %v13067_v61 = vld [vmem:[#allocation4 + $0x150] sm:$0xff] }
 0xc4e   : > { %20648 = vmatprep.subr.bf16.mxu0 %v23201_v21 }
 0xc51   : > { %20649 = vmatpush3.bf16.msra.mxu0 %v23201_v21  ;;  %v13094_v21 = vpack.c.bf16 %v13068_v17, %v13067_v61  ;;  %v13726_v17 = vld [vmem:[#allocation4 + $0x112] sm:$0xff]  ;;  %v23227_v61 = vld [vmem:[#allocation11 + $0x68] sm:$0xff]  }
 0xc52   : > { %20650 = vmatprep.subr.bf16.mxu0 %v23202_v51 }
 0xc54   : > { %20615 = vmatmul.mubr.bf16.gmra.mrb[56].mxu0 %v25216_v54  ;;  %v12751_v54 = vld [vmem:[#allocation4 + $0x202] sm:$0xff] }
 0xc55   : > { %20618 = vmatprep.mubr.bf16.mxu0 %v25220_v22  ;;  %20651 = vmatpush3.bf16.msra.mxu0 %v23202_v51  ;;  %v25342_v22 = vpack.c.bf16 %v12751_v54, %v12750_v31  ;;  %v13069_v51 = vld [vmem:[#allocation4 + $0x168] sm:$0xff]  ;;  %v13073_v54 = vld [vmem:[#allocation4 + $0x198] sm:$0xff] }
 0xc56   : > { %20652 = vmatprep.subr.bf16.mxu0 %v23203_v42 }
 0xc59   : > { %20653 = vmatpush3.bf16.msra.mxu0 %v23203_v42  ;;  %v13095_v42 = vpack.c.bf16 %v13070_v59, %v13069_v51  ;;  %v13727_v51 = vld [vmem:[#allocation4 + $0x122] sm:$0xff] }
 0xc5a   : > { %20654 = vmatprep.subr.bf16.mxu0 %v23204_v40 }
 0xc5c   : > { %20619 = vmatmul.mubr.bf16.gmra.mrb[60].mxu0 %v25222_v43  ;;  %v13050_v43 = vld [vmem:[#allocation4 + $0x80] sm:$0xff] }
 0xc5d   : > { %20622 = vmatprep.mubr.bf16.mxu0 %v25226_v53  ;;  %20655 = vmatpush3.bf16.msra.mxu0 %v23204_v40  ;;  %v13049_v53 = vld [vmem:[#allocation4 + $0x78] sm:$0xff]  ;;  %v13072_v40 = vld [vmem:[#allocation4 + $0x188] sm:$0xff] }
 0xc5e   : > { %20656 = vmatprep.subr.bf16.mxu0 %v23205_v58 }
 0xc61   : > { %20657 = vmatpush3.bf16.msra.mxu0 %v23205_v58  ;;  %v13074_v58 = vld [vmem:[#allocation4 + $0x1a0] sm:$0xff] }
 0xc62   : > { %20694 = vmatprep.subr.bf16.mxu0 %v23206_v23 }
 0xc64   : > { %20623 = vmatmul.mubr.bf16.gmra.mrb[64].mxu0 %v25228_v6  ;;  %v13085_v6 = vpack.c.bf16 %v13050_v43, %v13049_v53  ;;  %v13097_v43 = vpack.c.bf16 %v13074_v58, %v13073_v54  ;;  %v13076_v53 = vld [vmem:[#allocation4 + $0x1b8] sm:$0xff]  ;;  %v13730_v58 = vld [vmem:[#allocation4 + $0x142] sm:$0xff] }
 0xc65   : > { %20626 = vmatprep.mubr.bf16.mxu0 %v25232_v12  ;;  %v13052_v12 = vld [vmem:[#allocation4 + $0x98] sm:$0xff] }
 0xc66   : > { %v13731_v54 = vld [vmem:[#allocation4 + $0x152] sm:$0xff] }
 0xc6c   : > { %20627 = vmatmul.mubr.bf16.gmra.mrb[68].mxu0 %v25234_v36  ;;  %v13054_v36 = vld [vmem:[#allocation4 + $0xb0] sm:$0xff] }
 0xc6d   : > { %20630 = vmatprep.mubr.bf16.mxu0 %v25238_v45  ;;  %v13051_v45 = vld [vmem:[#allocation4 + $0x90] sm:$0xff]  ;;  %v13087_v25 = vpack.c.bf16 %v13054_v36, %v13053_v19  ;;  %v13080_v19 = vld [vmem:[#allocation4 + $0x1e8] sm:$0xff] }
 0xc74   : > { %20631 = vmatmul.mubr.bf16.gmra.mrb[72].mxu0 %v25240_v35  ;;  %v13086_v35 = vpack.c.bf16 %v13052_v12, %v13051_v45  ;;  %v13075_v12 = vld [vmem:[#allocation4 + $0x1b0] sm:$0xff]  ;;  %v13077_v45 = vld [vmem:[#allocation4 + $0x1c8] sm:$0xff] }
 0xc75   : > { %20634 = vmatprep.mubr.bf16.mxu0 %v25244_v24  ;;  %v23207_v24 = vld [vmem:[#allocation6 + $0x888] sm:$0xff]   ;;  %v13098_v36 = vpack.c.bf16 %v13076_v53, %v13075_v12  ;;  %v13733_v53 = vld [vmem:[#allocation4 + $0x16a] sm:$0xff] }
 0xc7c   : > { %20635 = vmatmul.mubr.bf16.gmra.mrb[76].mxu0 %v25246_v38  ;;  %v23208_v38 = vld [vmem:[#allocation6 + $0x890] sm:$0xff]  }
 0xc7d   : > { %20638 = vmatprep.mubr.bf16.mxu0 %v25256_v49  ;;  %v13056_v49 = vld [vmem:[#allocation4 + $0xc8] sm:$0xff] }
 0xc7e   : > { %v13088_v7 = vpack.c.bf16 %v13056_v49, %v13055_v18  ;;  %v23216_v49 = vld [vmem:[#allocation6 + $0x8d0] sm:$0xff]   ;;  %v13409_v18 = vld [vmem:[#allocation4 + $0x1c9] sm:$0xff] }
 0xc84   : > { %20639 = vmatmul.mubr.bf16.gmra.mrb[80].mxu0 %v25342_v22 }
 0xc85   : > { %20658 = vmatprep.mubr.bf16.mxu0 %v13085_v6  ;;  %v13078_v6 = vld [vmem:[#allocation4 + $0x1d0] sm:$0xff] }
 0xc8c   : > { %20659 = vmatmul.mubr.bf16.vlgmr.msra.gmra.mrb[48].mxu0 %v13086_v35  ;;  %v13099_v35 = vpack.c.bf16 %v13078_v6, %v13077_v45  ;;  %v13734_v6 = vld [vmem:[#allocation4 + $0x172] sm:$0xff]  ;;  %v13735_v45 = vld [vmem:[#allocation4 + $0x182] sm:$0xff] }
 0xc8d   : > { %20662 = vmatprep.mubr.bf16.mxu0 %v13087_v25  ;;  %20695 = vmatpush3.bf16.msra.mxu0 %v23206_v23  ;;  %v13071_v23 = vld [vmem:[#allocation4 + $0x180] sm:$0xff] }
 0xc8e   : > { %20696 = vmatprep.subr.bf16.mxu0 %v23207_v24  ;;  %v13096_v31 = vpack.c.bf16 %v13072_v40, %v13071_v23  ;;  %v13729_v40 = vld [vmem:[#allocation4 + $0x13a] sm:$0xff] }
 0xc91   : > { %20697 = vmatpush3.bf16.msra.mxu0 %v23207_v24  ;;  %v13079_v24 = vld [vmem:[#allocation4 + $0x1e0] sm:$0xff] }
 0xc92   : > { %20698 = vmatprep.subr.bf16.mxu0 %v23208_v38  ;;  %v13100_v25 = vpack.c.bf16 %v13080_v19, %v13079_v24  ;;  %v13737_v19 = vld [vmem:[#allocation4 + $0x19a] sm:$0xff]  ;;  %v13738_v24 = vld [vmem:[#allocation4 + $0x1a2] sm:$0xff] }
 0xc94   : > { %20663 = vmatmul.mubr.bf16.gmra.mrb[52].mxu0 %v13088_v7  ;;  %v13411_v7 = vld [vmem:[#allocation4 + $0x1e1] sm:$0xff] }
 0xc95   : > { %20666 = vmatprep.mubr.bf16.mxu0 %v13089_v32  ;;  %20699 = vmatpush3.bf16.msra.mxu0 %v23208_v38  ;;  %v23215_v38 = vld [vmem:[#allocation6 + $0x8c8] sm:$0xff]  }
 0xc96   : > { %20700 = vmatprep.subr.bf16.mxu0 %v23209_v0  ;;  %v13713_v32 = vld [vmem:[#allocation4 + $0x7a] sm:$0xff] }
 0xc99   : > { %20701 = vmatpush3.bf16.msra.mxu0 %v23209_v0 }
 0xc9a   : > { %20702 = vmatprep.subr.bf16.mxu0 %v23210_v37 }
 0xc9c   : > { %20667 = vmatmul.mubr.bf16.gmra.mrb[56].mxu0 %v13090_v47  ;;  %v23223_v47 = vld [vmem:[#allocation11 + $0x48] sm:$0xff]  }
 0xc9d   : > { %20670 = vmatprep.mubr.bf16.mxu0 %v13091_v30  ;;  %20703 = vmatpush3.bf16.msra.mxu0 %v23210_v37  ;;  %v13720_v30 = vld [vmem:[#allocation4 + $0xca] sm:$0xff] }
 0xc9e   : > { %20704 = vmatprep.subr.bf16.mxu0 %v23211_v62 }
 0xca1   : > { %20705 = vmatpush3.bf16.msra.mxu0 %v23211_v62  ;;  %v13719_v62 = vld [vmem:[#allocation4 + $0xc2] sm:$0xff] }
 0xca2   : > { %20706 = vmatprep.subr.bf16.mxu0 %v23212_v27  ;;  %v13752_v41 = vpack.c.bf16 %v13720_v30, %v13719_v62 }
 0xca4   : > { %20671 = vmatmul.mubr.bf16.gmra.mrb[60].mxu0 %v13092_v1 }
 0xca5   : > { %20674 = vmatprep.mubr.bf16.mxu0 %v13093_v33  ;;  %20707 = vmatpush3.bf16.msra.mxu0 %v23212_v27  ;;  %v13721_v27 = vld [vmem:[#allocation4 + $0xda] sm:$0xff] }
 0xca6   : > { %20708 = vmatprep.subr.bf16.mxu0 %v23213_v8  ;;  %v13753_v1 = vpack.c.bf16 %v13722_v52, %v13721_v27  ;;  %v13724_v33 = vld [vmem:[#allocation4 + $0xfa] sm:$0xff] }
 0xca9   : > { %20709 = vmatpush3.bf16.msra.mxu0 %v23213_v8  ;;  %v13723_v8 = vld [vmem:[#allocation4 + $0xf2] sm:$0xff] }
 0xcaa   : > { %20746 = vmatprep.subr.bf16.mxu0 %v23214_v4  ;;  %v13754_v59 = vpack.c.bf16 %v13724_v33, %v13723_v8 }
 0xcac   : > { %20675 = vmatmul.mubr.bf16.gmra.mrb[64].mxu0 %v13094_v21 }
 0xcad   : > { %20678 = vmatprep.mubr.bf16.mxu0 %v13095_v42  ;;  %v13728_v42 = vld [vmem:[#allocation4 + $0x12a] sm:$0xff] }
 0xcae   : > { %v13756_v23 = vpack.c.bf16 %v13728_v42, %v13727_v51 }
 0xcb4   : > { %20679 = vmatmul.mubr.bf16.gmra.mrb[68].mxu0 %v13096_v31  ;;  %v13757_v31 = vpack.c.bf16 %v13730_v58, %v13729_v40 }
 0xcb5   : > { %20682 = vmatprep.mubr.bf16.mxu0 %v13097_v43  ;;  %v13732_v43 = vld [vmem:[#allocation4 + $0x15a] sm:$0xff] }
 0xcb6   : > { %v13758_v12 = vpack.c.bf16 %v13732_v43, %v13731_v54 }
 0xcbc   : > { %20683 = vmatmul.mubr.bf16.gmra.mrb[72].mxu0 %v13098_v36  ;;  %v13759_v36 = vpack.c.bf16 %v13734_v6, %v13733_v53 }
 0xcbd   : > { %20686 = vmatprep.mubr.bf16.mxu0 %v13099_v35  ;;  %v13736_v35 = vld [vmem:[#allocation4 + $0x18a] sm:$0xff] }
 0xcc4   : > { %20687 = vmatmul.mubr.bf16.gmra.mrb[76].mxu0 %v13100_v25  ;;  %v13760_v25 = vpack.c.bf16 %v13736_v35, %v13735_v45  ;;  %v23232_v35 = vld [vmem:[#allocation11 + $0x10] sm:$0xff]  }
 0xcc5   : > { %20690 = vmatprep.mubr.bf16.mxu0 %v25254_v57 }
 0xccc   : > { %20691 = vmatmul.mubr.bf16.gmra.mrb[80].mxu0 %v25254_v57  ;;  %v23218_v57 = vld [vmem:[#allocation6 + $0x8e0] sm:$0xff]  }
 0xccd   : > { %20710 = vmatprep.mubr.bf16.mxu0 %v25277_v55  ;;  %v23219_v55 = vld [vmem:[#allocation6 + $0x8e8] sm:$0xff]  }
 0xcd4   : > { %20711 = vmatmul.mubr.bf16.vlgmr.msra.gmra.mrb[48].mxu0 %v25279_v39  ;;  %v23220_v39 = vld [vmem:[#allocation6 + $0x8f0] sm:$0xff]  }
 0xcd5   : > { %20714 = vmatprep.mubr.bf16.mxu0 %v25283_v2  ;;  %20747 = vmatpush3.bf16.msra.mxu0 %v23214_v4  ;;  %v23221_v2 = vld [vmem:[#allocation6 + $0x8f8] sm:$0xff]  }
 0xcd6   : > { %20748 = vmatprep.subr.bf16.mxu0 %v23215_v38  ;;  %v13725_v4 = vld [vmem:[#allocation4 + $0x10a] sm:$0xff] }
 0xcd7   : > { %v13755_v21 = vpack.c.bf16 %v13726_v17, %v13725_v4 }
 0xcd9   : > { %20749 = vmatpush3.bf16.msra.mxu0 %v23215_v38  ;;  %v13761_v38 = vpack.c.bf16 %v13738_v24, %v13737_v19 }
 0xcda   : > { %20750 = vmatprep.subr.bf16.mxu0 %v23216_v49 }
 0xcdc   : > { %20715 = vmatmul.mubr.bf16.gmra.mrb[52].mxu0 %v25285_v16  ;;  %v23222_v16 = vld [vmem:[#allocation11 + $0x40] sm:$0xff]  }
 0xcdd   : > { %20718 = vmatprep.mubr.bf16.mxu0 %v25289_v63  ;;  %20751 = vmatpush3.bf16.msra.mxu0 %v23216_v49  ;;  %v13406_v63 = vld [vmem:[#allocation4 + $0x1a1] sm:$0xff]  ;;  %v13739_v49 = vld [vmem:[#allocation4 + $0x1b2] sm:$0xff] }
 0xcde   : > { %20752 = vmatprep.subr.bf16.mxu0 %v23217_v44 }
 0xce1   : > { %20753 = vmatpush3.bf16.msra.mxu0 %v23217_v44  ;;  %v13740_v44 = vld [vmem:[#allocation4 + $0x1ba] sm:$0xff] }
 0xce2   : > { %20754 = vmatprep.subr.bf16.mxu0 %v23218_v57 }
 0xce4   : > { %20719 = vmatmul.mubr.bf16.gmra.mrb[56].mxu0 %v25291_v34  ;;  %v13429_v34 = vpack.c.bf16 %v13406_v63, %v25313_v5  ;;  %v13714_v5 = vld [vmem:[#allocation4 + $0x82] sm:$0xff]  ;;  %v13744_v63 = vld [vmem:[#allocation4 + $0x1ea] sm:$0xff] }
 0xce5   : > { %20722 = vmatprep.mubr.bf16.mxu0 %v25295_v48  ;;  %20755 = vmatpush3.bf16.msra.mxu0 %v23218_v57  ;;  %v13410_v48 = vld [vmem:[#allocation4 + $0x1d1] sm:$0xff]  ;;  %v13749_v37 = vpack.c.bf16 %v13714_v5, %v13713_v32 }
 0xce6   : > { %20756 = vmatprep.subr.bf16.mxu0 %v23219_v55  ;;  %v13741_v57 = vld [vmem:[#allocation4 + $0x1ca] sm:$0xff] }
 0xce9   : > { %20757 = vmatpush3.bf16.msra.mxu0 %v23219_v55  ;;  %v13742_v55 = vld [vmem:[#allocation4 + $0x1d2] sm:$0xff] }
 0xcea   : > { %20758 = vmatprep.subr.bf16.mxu0 %v23220_v39 }
 0xcec   : > { %20723 = vmatmul.mubr.bf16.gmra.mrb[60].mxu0 %v25297_v14  ;;  %v13431_v14 = vpack.c.bf16 %v13410_v48, %v13409_v18  ;;  %v13747_v48 = vld [vmem:[#allocation4 + $0x212] sm:$0xff]  ;;  %v13748_v18 = vld [vmem:[#allocation4 + $0x21a] sm:$0xff] }
 0xced   : > { %20726 = vmatprep.mubr.bf16.mxu0 %v25301_v15  ;;  %20759 = vmatpush3.bf16.msra.mxu0 %v23220_v39  ;;  %v13412_v15 = vld [vmem:[#allocation4 + $0x1e9] sm:$0xff]  ;;  %v13762_v39 = vpack.c.bf16 %v13740_v44, %v13739_v49 }
 0xcee   : > { %20760 = vmatprep.subr.bf16.mxu0 %v23221_v2  ;;  %v13432_v50 = vpack.c.bf16 %v13412_v15, %v13411_v7  ;;  %v23228_v15 = vld [vmem:[#allocation11 + $0x70] sm:$0xff]   ;;  %v23229_v7 = vld [vmem:[#allocation11 + $0x78] sm:$0xff]  }
 0xcf1   : > { %20761 = vmatpush3.bf16.msra.mxu0 %v23221_v2  ;;  %v13763_v2 = vpack.c.bf16 %v13742_v55, %v13741_v57  ;;  %v23233_v55 = vld [vmem:[#allocation11 + $0x18] sm:$0xff]  }
 0xcf2   : > { %20798 = vmatprep.subr.bf16.mxu0 %v23222_v16 }
 0xcf4   : > { %20727 = vmatmul.mubr.bf16.gmra.mrb[64].mxu0 %v25303_v29  ;;  %v13415_v29 = vld [vmem:[#allocation4 + $0x211] sm:$0xff] }
 0xcf5   : > { %20730 = vmatprep.mubr.bf16.mxu0 %v25307_v13  ;;  %v13416_v13 = vld [vmem:[#allocation4 + $0x219] sm:$0xff] }
 0xcf6   : > { %v13434_v0 = vpack.c.bf16 %v13416_v13, %v13415_v29  ;;  %v25363_v29 = vld [vmem:[#allocation9 + $0x3] ss:$0 sm:$0xff] }
 0xcfc   : > { %20731 = vmatmul.mubr.bf16.gmra.mrb[68].mxu0 %v25309_v56  ;;  %v13715_v56 = vld [vmem:[#allocation4 + $0x92] sm:$0xff] }
 0xcfd   : > { %20734 = vmatprep.mubr.bf16.mxu0 %v13429_v34 }
 0xd04   : > { %20735 = vmatmul.mubr.bf16.gmra.mrb[72].mxu0 %v25317_v3  ;;  %v13750_v3 = vpack.c.bf16 %v13716_v26, %v13715_v56 }
 0xd05   : > { %20738 = vmatprep.mubr.bf16.mxu0 %v13431_v14  ;;  %v13766_v14 = vpack.c.bf16 %v13748_v18, %v13747_v48 }
 0xd0c   : > { %20739 = vmatmul.mubr.bf16.gmra.mrb[76].mxu0 %v13432_v50  ;;  %v23230_v50 = vld [vmem:[#allocation11] sm:$0xff]  }
 0xd0d   : > { %20742 = vmatprep.mubr.bf16.mxu0 %v25322_v28  ;;  %v23224_v28 = vld [vmem:[#allocation11 + $0x50] sm:$0xff]  }
 0xd14   : > { %20743 = vmatmul.mubr.bf16.gmra.mrb[80].mxu0 %v13434_v0 }
 0xd15   : > { %20762 = vmatprep.mubr.bf16.mxu0 %v13749_v37 }
 0xd1c   : > { %20763 = vmatmul.mubr.bf16.vlgmr.msra.gmra.mrb[48].mxu0 %v13750_v3 }
 0xd1d   : > { %20766 = vmatprep.mubr.bf16.mxu0 %v13751_v46  ;;  %20799 = vmatpush3.bf16.msra.mxu0 %v23222_v16  ;;  %v13743_v16 = vld [vmem:[#allocation4 + $0x1e2] sm:$0xff] }
 0xd1e   : > { %20800 = vmatprep.subr.bf16.mxu0 %v23223_v47  ;;  %v13764_v34 = vpack.c.bf16 %v13744_v63, %v13743_v16 }
 0xd21   : > { %20801 = vmatpush3.bf16.msra.mxu0 %v23223_v47 }
 0xd22   : > { %20802 = vmatprep.subr.bf16.mxu0 %v23224_v28 }
 0xd24   : > { %20767 = vmatmul.mubr.bf16.gmra.mrb[52].mxu0 %v13752_v41 }
 0xd25   : > { %20770 = vmatprep.mubr.bf16.mxu0 %v13753_v1  ;;  %20803 = vmatpush3.bf16.msra.mxu0 %v23224_v28 }
 0xd26   : > { %20804 = vmatprep.subr.bf16.mxu0 %v23225_v20 }
 0xd29   : > { %20805 = vmatpush3.bf16.msra.mxu0 %v23225_v20 }
 0xd2a   : > { %20806 = vmatprep.subr.bf16.mxu0 %v23226_v9 }
 0xd2c   : > { %20771 = vmatmul.mubr.bf16.gmra.mrb[56].mxu0 %v13754_v59 }
 0xd2d   : > { %20774 = vmatprep.mubr.bf16.mxu0 %v13755_v21  ;;  %20807 = vmatpush3.bf16.msra.mxu0 %v23226_v9 }
 0xd2e   : > { %20808 = vmatprep.subr.bf16.mxu0 %v23227_v61 }
 0xd31   : > { %20809 = vmatpush3.bf16.msra.mxu0 %v23227_v61 }
 0xd32   : > { %20810 = vmatprep.subr.bf16.mxu0 %v23228_v15 }
 0xd34   : > { %20775 = vmatmul.mubr.bf16.gmra.mrb[60].mxu0 %v13756_v23 }
 0xd35   : > { %20778 = vmatprep.mubr.bf16.mxu0 %v13757_v31  ;;  %20811 = vmatpush3.bf16.msra.mxu0 %v23228_v15  ;;  %v23231_v31 = vld [vmem:[#allocation11 + $0x8] sm:$0xff]  }
 0xd36   : > { %20812 = vmatprep.subr.bf16.mxu0 %v23229_v7 }
 0xd39   : > { %20813 = vmatpush3.bf16.msra.mxu0 %v23229_v7 }
 0xd3a   : > { %20846 = vmatprep.subr.bf16.mxu0 %v23230_v50 }
 0xd3c   : > { %20779 = vmatmul.mubr.bf16.gmra.mrb[64].mxu0 %v13758_v12 }
 0xd3d   : > { %20782 = vmatprep.mubr.bf16.mxu0 %v13759_v36 }
 0xd44   : > { %20783 = vmatmul.mubr.bf16.gmra.mrb[68].mxu0 %v13760_v25 }
 0xd45   : > { %20786 = vmatprep.mubr.bf16.mxu0 %v13761_v38 }
 0xd4c   : > { %20787 = vmatmul.mubr.bf16.gmra.mrb[72].mxu0 %v13762_v39 }
 0xd4d   : > { %20790 = vmatprep.mubr.bf16.mxu0 %v13763_v2 }
 0xd54   : > { %20791 = vmatmul.mubr.bf16.gmra.mrb[76].mxu0 %v13764_v34 }
 0xd55   : > { %20794 = vmatprep.mubr.bf16.mxu0 %v25342_v22 }
 0xd5c   : > { %20795 = vmatmul.mubr.bf16.gmra.mrb[80].mxu0 %v13766_v14  ;;  %v23234_v14 = vld [vmem:[#allocation11 + $0x20] sm:$0xff]  }
 0xdef   : > { %v20764_v13 = vpop.f32.mrb[48].mxu0 }
 0xdf0   : > { %v14055_v0 = vadd.f32 %v20764_v13, %v25363_v29  ;;  %v13866_v32 = vpop.f32.mrb[49].mxu0 }
 0xdf1   : > { %v14053_v22 = vadd.f32 %v25363_v29, %v13866_v32  ;;  %v20765_v5 = vpop.f32.mrb[50].mxu0 }
 0xdf2   : > { %v14091_v37 = vmax.f32 %v14055_v0, 0.0  ;;  %v14056_v56 = vadd.f32 %v20765_v5, %v25363_v29  ;;  %v13869_v26 = vpop.f32.mrb[51].mxu0  ;;  %v23235_v5 = vld [vmem:[#allocation11 + $0x28] sm:$0xff]  }
 0xdf3   : > { %v14089_v11 = vmax.f32 %v14053_v22, 0.0  ;;  %v14054_v60 = vadd.f32 %v25363_v29, %v13869_v26 }
 0xdf4   : > { %14127 = vst [vmem:[#allocation3 + $0x79] sm:$0xff] %v14091_v37  ;;  %v14092_v3 = vmax.f32 %v14056_v56, 0.0 }
 0xdf5   : > { %14125 = vst [vmem:[#allocation3 + $0x61] sm:$0xff] %v14089_v11  ;;  %v14090_v47 = vmax.f32 %v14054_v60, 0.0 }
 0xdf6   : > { %14128 = vst [vmem:[#allocation3 + $0x81] sm:$0xff] %v14092_v3  ;;  %14164 = vst [vmem:[#allocation3 + $0x60] sm:$0xff] %v25250_v10  ;;  %v14268_v46 = vpack.c.bf16 %v14092_v3, %v14091_v37 }
 0xdf7   : > { %14126 = vst [vmem:[#allocation3 + $0x69] sm:$0xff] %v14090_v47  ;;  %v20768_v28 = vpop.f32.mrb[52].mxu0 }
 0xdf8   : > { %14165 = vst [vmem:[#allocation3 + $0x68] sm:$0xff] %v25250_v10  ;;  %14166 = vst [vmem:[#allocation3 + $0x70] sm:$0x3] %v25250_v10  ;;  %v14059_v62 = vadd.f32 %v20768_v28, %v25363_v29  ;;  %v13882_v30 = vpop.f32.mrb[53].mxu0 }
 0xdf9   : > { %v14057_v27 = vadd.f32 %v25363_v29, %v13882_v30  ;;  %v20769_v52 = vpop.f32.mrb[54].mxu0 }
 0xdfa   : > { %v14095_v41 = vmax.f32 %v14059_v62, 0.0  ;;  %v14060_v20 = vadd.f32 %v20769_v52, %v25363_v29  ;;  %v13885_v1 = vpop.f32.mrb[55].mxu0 }
 0xdfb   : > { %v14093_v9 = vmax.f32 %v14057_v27, 0.0  ;;  %v14058_v8 = vadd.f32 %v25363_v29, %v13885_v1  ;;  %v23237_v1 = vld [vmem:[#allocation11 + $0x38] sm:$0xff]  }
 0xdfc   : > { %14131 = vst [vmem:[#allocation3 + $0xa9] sm:$0xff] %v14095_v41  ;;  %v14096_v33 = vmax.f32 %v14060_v20, 0.0 }
 0xdfd   : > { %14129 = vst [vmem:[#allocation3 + $0x91] sm:$0xff] %v14093_v9  ;;  %v14094_v4 = vmax.f32 %v14058_v8, 0.0 }
 0xdfe   : > { %14132 = vst [vmem:[#allocation3 + $0xb1] sm:$0xff] %v14096_v33  ;;  %v14270_v17 = vpack.c.bf16 %v14096_v33, %v14095_v41 }
 0xdff   : > { %14130 = vst [vmem:[#allocation3 + $0x99] sm:$0xff] %v14094_v4  ;;  %v20772_v10 = vpop.f32.mrb[56].mxu0  ;;  %v14235_v59 = vld [vmem:[#allocation3 + $0x61] sm:$0xff]  ;;  %v14236_v61 = vld [vmem:[#allocation3 + $0x69] sm:$0xff]  ;;  %v14269_v21 = vpack.c.bf16 %v14094_v4, %v14093_v9 }
 0xe00   : > { %v14063_v51 = vadd.f32 %v20772_v10, %v25363_v29  ;;  %v13898_v42 = vpop.f32.mrb[57].mxu0  ;;  %v14267_v40 = vpack.c.bf16 %v14236_v61, %v14235_v59  ;;  %v25395_v61 = vld [vmem:[#allocation11 + $0x80] sm:$0xff]  }
 0xe01   : > { %v14061_v58 = vadd.f32 %v25363_v29, %v13898_v42  ;;  %v20773_v23 = vpop.f32.mrb[58].mxu0 }
 0xe02   : > { %v14099_v54 = vmax.f32 %v14063_v51, 0.0  ;;  %v14064_v43 = vadd.f32 %v20773_v23, %v25363_v29  ;;  %v13901_v53 = vpop.f32.mrb[59].mxu0  ;;  %20814 = vmatprep.mubr.bf16.mxu0 %v14267_v40 }
 0xe03   : > { %v14097_v6 = vmax.f32 %v14061_v58, 0.0  ;;  %v14062_v12 = vadd.f32 %v25363_v29, %v13901_v53  ;;  %20815 = vmatmul.mubr.bf16.vlgmr.msra.gmra.mrb[84].mxu0 %v14268_v46  ;;  %v23236_v46 = vld [vmem:[#allocation11 + $0x30] sm:$0xff]  }
 0xe04   : > { %14135 = vst [vmem:[#allocation3 + $0xd9] sm:$0xff] %v14099_v54  ;;  %v14100_v36 = vmax.f32 %v14064_v43, 0.0  ;;  %20847 = vmatpush3.bf16.msra.mxu0 %v23230_v50  ;;  %20818 = vmatprep.mubr.bf16.mxu0 %v14269_v21 }
 0xe05   : > { %14133 = vst [vmem:[#allocation3 + $0xc1] sm:$0xff] %v14097_v6  ;;  %v14098_v45 = vmax.f32 %v14062_v12, 0.0  ;;  %20848 = vmatprep.subr.bf16.mxu0 %v23231_v31 }
 0xe06   : > { %14136 = vst [vmem:[#allocation3 + $0xe1] sm:$0xff] %v14100_v36  ;;  %v14272_v19 = vpack.c.bf16 %v14100_v36, %v14099_v54 }
 0xe07   : > { %14134 = vst [vmem:[#allocation3 + $0xc9] sm:$0xff] %v14098_v45  ;;  %v20776_v24 = vpop.f32.mrb[60].mxu0  ;;  %v14271_v25 = vpack.c.bf16 %v14098_v45, %v14097_v6 }
 0xe08   : > { %v14067_v38 = vadd.f32 %v20776_v24, %v25363_v29  ;;  %v13914_v49 = vpop.f32.mrb[61].mxu0  ;;  %20849 = vmatpush3.bf16.msra.mxu0 %v23231_v31 }
 0xe09   : > { %v14065_v44 = vadd.f32 %v25363_v29, %v13914_v49  ;;  %v20777_v57 = vpop.f32.mrb[62].mxu0  ;;  %20850 = vmatprep.subr.bf16.mxu0 %v23232_v35 }
 0xe0a   : > { %v14103_v39 = vmax.f32 %v14067_v38, 0.0  ;;  %v14068_v2 = vadd.f32 %v20777_v57, %v25363_v29  ;;  %v13917_v16 = vpop.f32.mrb[63].mxu0 }
 0xe0b   : > { %v14101_v63 = vmax.f32 %v14065_v44, 0.0  ;;  %v14066_v34 = vadd.f32 %v25363_v29, %v13917_v16  ;;  %20819 = vmatmul.mubr.bf16.gmra.mrb[88].mxu0 %v14270_v17 }
 0xe0c   : > { %14139 = vst [vmem:[#allocation3 + $0x109] sm:$0xff] %v14103_v39  ;;  %v14104_v48 = vmax.f32 %v14068_v2, 0.0  ;;  %20822 = vmatprep.mubr.bf16.mxu0 %v14271_v25  ;;  %20851 = vmatpush3.bf16.msra.mxu0 %v23232_v35 }
 0xe0d   : > { %14137 = vst [vmem:[#allocation3 + $0xf1] sm:$0xff] %v14101_v63  ;;  %v14102_v18 = vmax.f32 %v14066_v34, 0.0  ;;  %20852 = vmatprep.subr.bf16.mxu0 %v23233_v55 }
 0xe0e   : > { %14140 = vst [vmem:[#allocation3 + $0x111] sm:$0xff] %v14104_v48  ;;  %v14274_v15 = vpack.c.bf16 %v14104_v48, %v14103_v39 }
 0xe0f   : > { %14138 = vst [vmem:[#allocation3 + $0xf9] sm:$0xff] %v14102_v18  ;;  %v20780_v7 = vpop.f32.mrb[64].mxu0  ;;  %v14273_v50 = vpack.c.bf16 %v14102_v18, %v14101_v63 }
 0xe10   : > { %v14071_v13 = vadd.f32 %v20780_v7, %v25363_v29  ;;  %v13930_v0 = vpop.f32.mrb[65].mxu0  ;;  %20853 = vmatpush3.bf16.msra.mxu0 %v23233_v55 }
 0xe11   : > { %v14069_v32 = vadd.f32 %v25363_v29, %v13930_v0  ;;  %v20781_v22 = vpop.f32.mrb[66].mxu0  ;;  %20854 = vmatprep.subr.bf16.mxu0 %v23234_v14 }
 0xe12   : > { %v14107_v37 = vmax.f32 %v14071_v13, 0.0  ;;  %v14072_v56 = vadd.f32 %v20781_v22, %v25363_v29  ;;  %v13933_v26 = vpop.f32.mrb[67].mxu0 }
 0xe13   : > { %v14105_v11 = vmax.f32 %v14069_v32, 0.0  ;;  %v14070_v60 = vadd.f32 %v25363_v29, %v13933_v26  ;;  %20823 = vmatmul.mubr.bf16.gmra.mrb[92].mxu0 %v14272_v19  ;;  %v23298_v26 = vld [vmem:[#allocation4 + $0x30] sm:$0xff] }
 0xe14   : > { %14143 = vst [vmem:[#allocation3 + $0x139] sm:$0xff] %v14107_v37  ;;  %v14108_v3 = vmax.f32 %v14072_v56, 0.0  ;;  %20826 = vmatprep.mubr.bf16.mxu0 %v14273_v50  ;;  %20855 = vmatpush3.bf16.msra.mxu0 %v23234_v14 }
 0xe15   : > { %14141 = vst [vmem:[#allocation3 + $0x121] sm:$0xff] %v14105_v11  ;;  %v14106_v47 = vmax.f32 %v14070_v60, 0.0  ;;  %20856 = vmatprep.subr.bf16.mxu0 %v23235_v5 }
 0xe16   : > { %14144 = vst [vmem:[#allocation3 + $0x141] sm:$0xff] %v14108_v3  ;;  %v14276_v28 = vpack.c.bf16 %v14108_v3, %v14107_v37  ;;  %v25429_v3 = vpack.c.bf16 %v23298_v26, %v23298_v26 }
 0xe17   : > { %14142 = vst [vmem:[#allocation3 + $0x129] sm:$0xff] %v14106_v47  ;;  %v20784_v62 = vpop.f32.mrb[68].mxu0  ;;  %v25388_v30 = vpack.c.bf16 %v14106_v47, %v14105_v11  ;;  %v14176_v47 = vld [vmem:[#allocation3 + $0x98] sm:$0xff] }
 0xe18   : > { %v14075_v27 = vadd.f32 %v20784_v62, %v25363_v29  ;;  %v13946_v52 = vpop.f32.mrb[69].mxu0  ;;  %20857 = vmatpush3.bf16.msra.mxu0 %v23235_v5  ;;  %v14175_v62 = vld [vmem:[#allocation3 + $0x90] sm:$0xff] }
 0xe19   : > { %v14073_v41 = vadd.f32 %v25363_v29, %v13946_v52  ;;  %v20785_v20 = vpop.f32.mrb[70].mxu0  ;;  %20858 = vmatprep.subr.bf16.mxu0 %v23236_v46  ;;  %v25435_v52 = vpack.c.bf16 %v14176_v47, %v14175_v62  ;;  %v14720_v47 = vld [vmem:[#allocation3 + $0x7a] sm:$0xff]  ;;  %v14722_v62 = vld [vmem:[#allocation3 + $0x92] sm:$0xff] }
 0xe1a   : > { %v14111_v9 = vmax.f32 %v14075_v27, 0.0  ;;  %v14076_v8 = vadd.f32 %v20785_v20, %v25363_v29  ;;  %v13949_v33 = vpop.f32.mrb[71].mxu0  ;;  %v23239_v27 = vld [vmem:[#allocation11 + $0x88] sm:$0xff]  }
 0xe1b   : > { %v14109_v4 = vmax.f32 %v14073_v41, 0.0  ;;  %v14074_v17 = vadd.f32 %v25363_v29, %v13949_v33  ;;  %20827 = vmatmul.mubr.bf16.gmra.mrb[96].mxu0 %v14274_v15  ;;  %v23240_v41 = vld [vmem:[#allocation11 + $0x90] sm:$0xff]   ;;  %v14179_v33 = vld [vmem:[#allocation3 + $0xc0] sm:$0xff] }
 0xe1c   : > { %14147 = vst [vmem:[#allocation3 + $0x169] sm:$0xff] %v14111_v9  ;;  %v14112_v10 = vmax.f32 %v14076_v8, 0.0  ;;  %20830 = vmatprep.mubr.bf16.mxu0 %v25388_v30  ;;  %20859 = vmatpush3.bf16.msra.mxu0 %v23236_v46  ;;  %v14173_v46 = vld [vmem:[#allocation3 + $0x78] sm:$0xff]  ;;  %v14178_v20 = vld [vmem:[#allocation3 + $0xb0] sm:$0xff] }
 0xe1d   : > { %14145 = vst [vmem:[#allocation3 + $0x151] sm:$0xff] %v14109_v4  ;;  %v14110_v59 = vmax.f32 %v14074_v17, 0.0  ;;  %20860 = vmatprep.subr.bf16.mxu0 %v23237_v1 }
 0xe1e   : > { %14148 = vst [vmem:[#allocation3 + $0x171] sm:$0xff] %v14112_v10  ;;  %v25397_v21 = vpack.c.bf16 %v14112_v10, %v14111_v9  ;;  %v14177_v9 = vld [vmem:[#allocation3 + $0xa8] sm:$0xff] }
 0xe1f   : > { %14146 = vst [vmem:[#allocation3 + $0x159] sm:$0xff] %v14110_v59  ;;  %v20788_v51 = vpop.f32.mrb[72].mxu0  ;;  %v25399_v42 = vpack.c.bf16 %v14110_v59, %v14109_v4  ;;  %v25440_v8 = vpack.c.bf16 %v14178_v20, %v14177_v9  ;;  %v23241_v4 = vld [vmem:[#allocation11 + $0x98] sm:$0xff]   ;;  %v23242_v10 = vld [vmem:[#allocation11 + $0xa0] sm:$0xff]   ;;  %v23247_v20 = vld [vmem:[#allocation11 + $0xc8] sm:$0xff]  }
 0xe20   : > { %v14079_v40 = vadd.f32 %v20788_v51, %v25363_v29  ;;  %v13962_v58 = vpop.f32.mrb[73].mxu0  ;;  %20861 = vmatpush3.bf16.msra.mxu0 %v23237_v1  ;;  %v14180_v1 = vld [vmem:[#allocation3 + $0xc8] sm:$0xff]  ;;  %v14182_v59 = vld [vmem:[#allocation3 + $0xe0] sm:$0xff]  ;;  %v14181_v51 = vld [vmem:[#allocation3 + $0xd8] sm:$0xff] }
 0xe21   : > { %v14077_v23 = vadd.f32 %v25363_v29, %v13962_v58  ;;  %v20789_v31 = vpop.f32.mrb[74].mxu0  ;;  %20894 = vmatprep.subr.bf16.mxu0 %v25395_v61  ;;  %v25442_v17 = vpack.c.bf16 %v14180_v1, %v14179_v33  ;;  %v14183_v58 = vld [vmem:[#allocation3 + $0xf0] sm:$0xff] }
 0xe22   : > { %v14115_v54 = vmax.f32 %v14079_v40, 0.0  ;;  %v14080_v43 = vadd.f32 %v20789_v31, %v25363_v29  ;;  %v13965_v53 = vpop.f32.mrb[75].mxu0  ;;  %v25446_v40 = vpack.c.bf16 %v14182_v59, %v14181_v51  ;;  %v23248_v9 = vld [vmem:[#allocation11 + $0xd0] sm:$0xff]   ;;  %v14724_v33 = vld [vmem:[#allocation3 + $0xaa] sm:$0xff]  ;;  %v23249_v51 = vld [vmem:[#allocation11 + $0xd8] sm:$0xff]  }
 0xe23   : > { %v14113_v6 = vmax.f32 %v14077_v23, 0.0  ;;  %v14078_v12 = vadd.f32 %v25363_v29, %v13965_v53  ;;  %20831 = vmatmul.mubr.bf16.gmra.mrb[100].mxu0 %v14276_v28  ;;  %v23243_v23 = vld [vmem:[#allocation11 + $0xa8] sm:$0xff]  }
 0xe24   : > { %14151 = vst [vmem:[#allocation3 + $0x199] sm:$0xff] %v14115_v54  ;;  %v14116_v36 = vmax.f32 %v14080_v43, 0.0  ;;  %20834 = vmatprep.mubr.bf16.mxu0 %v25399_v42  ;;  %v14186_v43 = vld [vmem:[#allocation3 + $0x110] sm:$0xff]  ;;  %v14188_v53 = vld [vmem:[#allocation3 + $0x128] sm:$0xff] }
 0xe25   : > { %14149 = vst [vmem:[#allocation3 + $0x181] sm:$0xff] %v14113_v6  ;;  %v14114_v45 = vmax.f32 %v14078_v12, 0.0  ;;  %v14727_v59 = vld [vmem:[#allocation3 + $0xca] sm:$0xff] }
 0xe26   : > { %14152 = vst [vmem:[#allocation3 + $0x1a1] sm:$0xff] %v14116_v36  ;;  %v25407_v35 = vpack.c.bf16 %v14116_v36, %v14115_v54  ;;  %v23244_v54 = vld [vmem:[#allocation11 + $0xb0] sm:$0xff]   ;;  %v14187_v36 = vld [vmem:[#allocation3 + $0x120] sm:$0xff] }
 0xe27   : > { %14150 = vst [vmem:[#allocation3 + $0x189] sm:$0xff] %v14114_v45  ;;  %v20792_v19 = vpop.f32.mrb[76].mxu0  ;;  %v25409_v24 = vpack.c.bf16 %v14114_v45, %v14113_v6  ;;  %v14185_v6 = vld [vmem:[#allocation3 + $0x108] sm:$0xff]  ;;  %v23245_v45 = vld [vmem:[#allocation11 + $0xb8] sm:$0xff]  }
 0xe28   : > { %v14083_v25 = vadd.f32 %v20792_v19, %v25363_v29  ;;  %v13978_v38 = vpop.f32.mrb[77].mxu0  ;;  %v25452_v12 = vpack.c.bf16 %v14186_v43, %v14185_v6  ;;  %v25454_v19 = vpack.c.bf16 %v14188_v53, %v14187_v36  ;;  %v14729_v43 = vld [vmem:[#allocation3 + $0xe2] sm:$0xff]  ;;  %v14730_v53 = vld [vmem:[#allocation3 + $0xf2] sm:$0xff]  ;;  %v14731_v6 = vld [vmem:[#allocation3 + $0xfa] sm:$0xff] }
 0xe29   : > { %v14081_v49 = vadd.f32 %v25363_v29, %v13978_v38  ;;  %v20793_v44 = vpop.f32.mrb[78].mxu0  ;;  %v14190_v38 = vld [vmem:[#allocation3 + $0x140] sm:$0xff] }
 0xe2a   : > { %v14119_v57 = vmax.f32 %v14083_v25, 0.0  ;;  %v14084_v55 = vadd.f32 %v20793_v44, %v25363_v29  ;;  %v13981_v39 = vpop.f32.mrb[79].mxu0  ;;  %v23246_v25 = vld [vmem:[#allocation11 + $0xc0] sm:$0xff]   ;;  %v14189_v44 = vld [vmem:[#allocation3 + $0x138] sm:$0xff] }
 0xe2b   : > { %v14117_v2 = vmax.f32 %v14081_v49, 0.0  ;;  %v14082_v16 = vadd.f32 %v25363_v29, %v13981_v39  ;;  %20835 = vmatmul.mubr.bf16.gmra.mrb[104].mxu0 %v25397_v21  ;;  %v14192_v49 = vld [vmem:[#allocation3 + $0x158] sm:$0xff] }
 0xe2c   : > { %14155 = vst [vmem:[#allocation3 + $0x1c9] sm:$0xff] %v14119_v57  ;;  %v14120_v63 = vmax.f32 %v14084_v55, 0.0  ;;  %20838 = vmatprep.mubr.bf16.mxu0 %v25409_v24  ;;  %v14191_v55 = vld [vmem:[#allocation3 + $0x150] sm:$0xff] }
 0xe2d   : > { %14153 = vst [vmem:[#allocation3 + $0x1b1] sm:$0xff] %v14117_v2  ;;  %v14118_v34 = vmax.f32 %v14082_v16, 0.0  ;;  %v25460_v39 = vpack.c.bf16 %v14192_v49, %v14191_v55  ;;  %v14732_v49 = vld [vmem:[#allocation3 + $0x10a] sm:$0xff]  ;;  %v14734_v55 = vld [vmem:[#allocation3 + $0x122] sm:$0xff] }
 0xe2e   : > { %14156 = vst [vmem:[#allocation3 + $0x1d1] sm:$0xff] %v14120_v63  ;;  %v25417_v48 = vpack.c.bf16 %v14120_v63, %v14119_v57  ;;  %v25458_v57 = vpack.c.bf16 %v14190_v38, %v14189_v44  ;;  %v14196_v16 = vld [vmem:[#allocation3 + $0x188] sm:$0xff]  ;;  %v23252_v38 = vld [vmem:[#allocation11 + $0xf0] sm:$0xff]  }
 0xe2f   : > { %14154 = vst [vmem:[#allocation3 + $0x1b9] sm:$0xff] %v14118_v34  ;;  %v20796_v18 = vpop.f32.mrb[80].mxu0  ;;  %v25419_v14 = vpack.c.bf16 %v14118_v34, %v14117_v2  ;;  %v14194_v2 = vld [vmem:[#allocation3 + $0x170] sm:$0xff]  ;;  %v14193_v63 = vld [vmem:[#allocation3 + $0x168] sm:$0xff] }
 0xe30   : > { %v14087_v15 = vadd.f32 %v20796_v18, %v25363_v29  ;;  %v13994_v7 = vpop.f32.mrb[81].mxu0  ;;  %v25464_v34 = vpack.c.bf16 %v14194_v2, %v14193_v63  ;;  %v14195_v18 = vld [vmem:[#allocation3 + $0x180] sm:$0xff]  ;;  %v14733_v44 = vld [vmem:[#allocation3 + $0x112] sm:$0xff]  ;;  %v14735_v2 = vld [vmem:[#allocation3 + $0x12a] sm:$0xff] }
 0xe31   : > { %v14085_v50 = vadd.f32 %v25363_v29, %v13994_v7  ;;  %v20797_v13 = vpop.f32.mrb[82].mxu0  ;;  %v14198_v7 = vld [vmem:[#allocation3 + $0x1a0] sm:$0xff] }
 0xe32   : > { %v14123_v0 = vmax.f32 %v14087_v15, 0.0  ;;  %v14088_v32 = vadd.f32 %v20797_v13, %v25363_v29  ;;  %v13997_v22 = vpop.f32.mrb[83].mxu0  ;;  %v25466_v15 = vpack.c.bf16 %v14196_v16, %v14195_v18  ;;  %v14197_v13 = vld [vmem:[#allocation3 + $0x198] sm:$0xff]  ;;  %v25497_v16 = vpack.c.bf16 %v14733_v44, %v14732_v49  ;;  %v23262_v44 = vld [vmem:[#allocation11 + $0x140] sm:$0xff]  }
 0xe33   : > { %v14121_v5 = vmax.f32 %v14085_v50, 0.0  ;;  %v14086_v37 = vadd.f32 %v25363_v29, %v13997_v22  ;;  %20839 = vmatmul.mubr.bf16.gmra.mrb[108].mxu0 %v25407_v35  ;;  %v14174_v29 = vld [vmem:[#allocation3 + $0x80] sm:$0xff]  ;;  %v25499_v18 = vpack.c.bf16 %v14735_v2, %v14734_v55 }
 0xe34   : > { %14159 = vst [vmem:[#allocation3 + $0x1f9] sm:$0xff] %v14123_v0  ;;  %v14124_v56 = vmax.f32 %v14088_v32, 0.0  ;;  %20842 = vmatprep.mubr.bf16.mxu0 %v25419_v14  ;;  %v25433_v28 = vpack.c.bf16 %v14174_v29, %v14173_v46  ;;  %v25470_v0 = vpack.c.bf16 %v14198_v7, %v14197_v13  ;;  %v14199_v32 = vld [vmem:[#allocation3 + $0x1b0] sm:$0xff]  ;;  %v14721_v46 = vld [vmem:[#allocation3 + $0x82] sm:$0xff] }
 0xe35   : > { %14157 = vst [vmem:[#allocation3 + $0x1e1] sm:$0xff] %v14121_v5  ;;  %14168 = vst [vmem:[#allocation3 + $0x1f8] sm:$0xff] %v23298_v26  ;;  %v14122_v11 = vmax.f32 %v14086_v37, 0.0  ;;  %v14719_v37 = vld [vmem:[#allocation3 + $0x6a] sm:$0xff]  ;;  %v23253_v63 = vld [vmem:[#allocation11 + $0xf8] sm:$0xff]  }
 0xe36   : > { %14160 = vst [vmem:[#allocation3 + $0x201] sm:$0xff] %v14124_v56  ;;  %v14200_v50 = vld [vmem:[#allocation3 + $0x1b8] sm:$0xff]  ;;  %v14202_v56 = vld [vmem:[#allocation3 + $0x1d0] sm:$0xff]  ;;  %v23254_v7 = vld [vmem:[#allocation11 + $0x100] sm:$0xff]  }
 0xe37   : > { %14169 = vst [vmem:[#allocation3 + $0x200] sm:$0xff] %v23298_v26  ;;  %14170 = vst [vmem:[#allocation3 + $0x208] sm:$0x3] %v23298_v26  ;;  %v25427_v60 = vpack.c.bf16 %v14122_v11, %v14121_v5  ;;  %v25472_v22 = vpack.c.bf16 %v14200_v50, %v14199_v32  ;;  %v14718_v5 = vld [vmem:[#allocation3 + $0x62] sm:$0xff]  ;;  %v14736_v50 = vld [vmem:[#allocation3 + $0x13a] sm:$0xff] }
 0xe38   : > { %14158 = vst [vmem:[#allocation3 + $0x1e9] sm:$0xff] %v14122_v11  ;;  %v14201_v26 = vld [vmem:[#allocation3 + $0x1c8] sm:$0xff]  ;;  %v14750_v11 = vpack.c.bf16 %v14719_v37, %v14718_v5  ;;  %v14738_v32 = vld [vmem:[#allocation3 + $0x152] sm:$0xff]  ;;  %v14739_v5 = vld [vmem:[#allocation3 + $0x15a] sm:$0xff] }
 0xe39   : > { %v25476_v29 = vpack.c.bf16 %v14202_v56, %v14201_v26  ;;  %v14737_v13 = vld [vmem:[#allocation3 + $0x142] sm:$0xff]  ;;  %v25505_v56 = vpack.c.bf16 %v14739_v5, %v14738_v32  ;;  %v14740_v26 = vld [vmem:[#allocation3 + $0x16a] sm:$0xff]  ;;  %v15334_v32 = vld [vmem:[#allocation3 + $0x99] sm:$0xff] }
 0xe3a   : > { %v25503_v37 = vpack.c.bf16 %v14737_v13, %v14736_v50  ;;  %v23261_v49 = vld [vmem:[#allocation11 + $0x138] sm:$0xff]   ;;  %v15336_v5 = vld [vmem:[#allocation3 + $0xb1] sm:$0xff] }
 0xe3b   : > { %20843 = vmatmul.mubr.bf16.gmra.mrb[112].mxu0 %v25417_v48  ;;  %v15332_v2 = vld [vmem:[#allocation3 + $0x81] sm:$0xff]  ;;  %v15331_v50 = vld [vmem:[#allocation3 + $0x79] sm:$0xff] }
 0xe3c   : > { %20862 = vmatprep.mubr.bf16.mxu0 %v25429_v3  ;;  %v15363_v13 = vpack.c.bf16 %v15332_v2, %v15331_v50  ;;  %v23267_v2 = vld [vmem:[#allocation11 + $0x168] sm:$0xff]   ;;  %v23268_v50 = vld [vmem:[#allocation11 + $0x170] sm:$0xff]  }
 0xe3f   : > { %v15056_v55 = vld [vmem:[#allocation3 + $0x1e8] sm:$0xff] }
 0xe43   : > { %20863 = vmatmul.mubr.bf16.vlgmr.msra.gmra.mrb[84].mxu0 %v25433_v28 }
 0xe44   : > { %20866 = vmatprep.mubr.bf16.mxu0 %v25435_v52  ;;  %20895 = vmatpush3.bf16.msra.mxu0 %v25395_v61  ;;  %v14184_v61 = vld [vmem:[#allocation3 + $0xf8] sm:$0xff] }
 0xe45   : > { %20896 = vmatprep.subr.bf16.mxu0 %v23239_v27  ;;  %v25448_v31 = vpack.c.bf16 %v14184_v61, %v14183_v58 }
 0xe48   : > { %20897 = vmatpush3.bf16.msra.mxu0 %v23239_v27  ;;  %v14723_v27 = vld [vmem:[#allocation3 + $0x9a] sm:$0xff] }
 0xe49   : > { %20898 = vmatprep.subr.bf16.mxu0 %v23240_v41  ;;  %v25481_v1 = vpack.c.bf16 %v14723_v27, %v14722_v62 }
 0xe4b   : > { %20867 = vmatmul.mubr.bf16.gmra.mrb[88].mxu0 %v25440_v8 }
 0xe4c   : > { %20870 = vmatprep.mubr.bf16.mxu0 %v25442_v17  ;;  %20899 = vmatpush3.bf16.msra.mxu0 %v23240_v41  ;;  %v25479_v41 = vpack.c.bf16 %v14721_v46, %v14720_v47  ;;  %v14742_v47 = vld [vmem:[#allocation3 + $0x182] sm:$0xff]  ;;  %v14743_v46 = vld [vmem:[#allocation3 + $0x18a] sm:$0xff] }
 0xe4d   : > { %20900 = vmatprep.subr.bf16.mxu0 %v23241_v4  ;;  %v25511_v27 = vpack.c.bf16 %v14743_v46, %v14742_v47  ;;  %v15335_v47 = vld [vmem:[#allocation3 + $0xa9] sm:$0xff] }
 0xe4e   : > { %v23263_v46 = vld [vmem:[#allocation11 + $0x148] sm:$0xff]  }
 0xe50   : > { %20901 = vmatpush3.bf16.msra.mxu0 %v23241_v4  ;;  %v14725_v4 = vld [vmem:[#allocation3 + $0xb2] sm:$0xff] }
 0xe51   : > { %20902 = vmatprep.subr.bf16.mxu0 %v23242_v10  ;;  %v25485_v61 = vpack.c.bf16 %v14725_v4, %v14724_v33  ;;  %v14746_v33 = vld [vmem:[#allocation3 + $0x1b2] sm:$0xff]  ;;  %v14747_v4 = vld [vmem:[#allocation3 + $0x1ba] sm:$0xff] }
 0xe53   : > { %20871 = vmatmul.mubr.bf16.gmra.mrb[92].mxu0 %v25446_v40 }
 0xe54   : > { %20874 = vmatprep.mubr.bf16.mxu0 %v25448_v31  ;;  %20903 = vmatpush3.bf16.msra.mxu0 %v23242_v10  ;;  %v14726_v10 = vld [vmem:[#allocation3 + $0xc2] sm:$0xff] }
 0xe55   : > { %20904 = vmatprep.subr.bf16.mxu0 %v23243_v23  ;;  %v25487_v58 = vpack.c.bf16 %v14727_v59, %v14726_v10  ;;  %v25517_v59 = vpack.c.bf16 %v14747_v4, %v14746_v33  ;;  %v15338_v33 = vld [vmem:[#allocation3 + $0xc9] sm:$0xff]  ;;  %v15340_v4 = vld [vmem:[#allocation3 + $0xe1] sm:$0xff] }
 0xe58   : > { %20905 = vmatpush3.bf16.msra.mxu0 %v23243_v23  ;;  %v23250_v23 = vld [vmem:[#allocation11 + $0xe0] sm:$0xff]  }
 0xe59   : > { %20906 = vmatprep.subr.bf16.mxu0 %v23244_v54 }
 0xe5b   : > { %20875 = vmatmul.mubr.bf16.gmra.mrb[96].mxu0 %v25452_v12 }
 0xe5c   : > { %20878 = vmatprep.mubr.bf16.mxu0 %v25454_v19  ;;  %20907 = vmatpush3.bf16.msra.mxu0 %v23244_v54  ;;  %v14728_v54 = vld [vmem:[#allocation3 + $0xda] sm:$0xff] }
 0xe5d   : > { %20908 = vmatprep.subr.bf16.mxu0 %v23245_v45  ;;  %v25491_v36 = vpack.c.bf16 %v14729_v43, %v14728_v54  ;;  %v23255_v43 = vld [vmem:[#allocation11 + $0x108] sm:$0xff]  }
 0xe60   : > { %20909 = vmatpush3.bf16.msra.mxu0 %v23245_v45  ;;  %v23251_v45 = vld [vmem:[#allocation11 + $0xe8] sm:$0xff]  }
 0xe61   : > { %20942 = vmatprep.subr.bf16.mxu0 %v23246_v25 }
 0xe63   : > { %20879 = vmatmul.mubr.bf16.gmra.mrb[100].mxu0 %v25458_v57 }
 0xe64   : > { %20882 = vmatprep.mubr.bf16.mxu0 %v25460_v39 }
 0xe6b   : > { %20883 = vmatmul.mubr.bf16.gmra.mrb[104].mxu0 %v25464_v34 }
 0xe6c   : > { %20886 = vmatprep.mubr.bf16.mxu0 %v25466_v15 }
 0xe73   : > { %20887 = vmatmul.mubr.bf16.gmra.mrb[108].mxu0 %v25470_v0 }
 0xe74   : > { %20890 = vmatprep.mubr.bf16.mxu0 %v25472_v22 }
 0xe7b   : > { %20891 = vmatmul.mubr.bf16.gmra.mrb[112].mxu0 %v25476_v29 }
 0xe7c   : > { %20910 = vmatprep.mubr.bf16.mxu0 %v14750_v11  ;;  %v14741_v11 = vld [vmem:[#allocation3 + $0x172] sm:$0xff] }
 0xe7d   : > { %v25509_v62 = vpack.c.bf16 %v14741_v11, %v14740_v26  ;;  %v15333_v26 = vld [vmem:[#allocation3 + $0x91] sm:$0xff] }
 0xe7e   : > { %v25542_v11 = vpack.c.bf16 %v15334_v32, %v15333_v26  ;;  %v15347_v32 = vld [vmem:[#allocation3 + $0x139] sm:$0xff] }
 0xe83   : > { %20911 = vmatmul.mubr.bf16.vlgmr.msra.gmra.mrb[84].mxu0 %v25479_v41 }
 0xe84   : > { %20914 = vmatprep.mubr.bf16.mxu0 %v25481_v1  ;;  %20943 = vmatpush3.bf16.msra.mxu0 %v23246_v25  ;;  %v25493_v25 = vpack.c.bf16 %v14731_v6, %v14730_v53  ;;  %v23256_v53 = vld [vmem:[#allocation11 + $0x110] sm:$0xff]   ;;  %v23257_v6 = vld [vmem:[#allocation11 + $0x118] sm:$0xff]  }
 0xe85   : > { %20944 = vmatprep.subr.bf16.mxu0 %v23247_v20 }
 0xe88   : > { %20945 = vmatpush3.bf16.msra.mxu0 %v23247_v20  ;;  %v14744_v20 = vld [vmem:[#allocation3 + $0x19a] sm:$0xff] }
 0xe89   : > { %20946 = vmatprep.subr.bf16.mxu0 %v23248_v9 }
 0xe8b   : > { %20915 = vmatmul.mubr.bf16.gmra.mrb[88].mxu0 %v25485_v61 }
 0xe8c   : > { %20918 = vmatprep.mubr.bf16.mxu0 %v25487_v58  ;;  %20947 = vmatpush3.bf16.msra.mxu0 %v23248_v9  ;;  %v14745_v9 = vld [vmem:[#allocation3 + $0x1a2] sm:$0xff] }
 0xe8d   : > { %20948 = vmatprep.subr.bf16.mxu0 %v23249_v51  ;;  %v25515_v10 = vpack.c.bf16 %v14745_v9, %v14744_v20  ;;  %v25544_v20 = vpack.c.bf16 %v15336_v5, %v15335_v47  ;;  %v23264_v9 = vld [vmem:[#allocation11 + $0x150] sm:$0xff]   ;;  %v23269_v5 = vld [vmem:[#allocation11 + $0x178] sm:$0xff]   ;;  %v23270_v47 = vld [vmem:[#allocation11 + $0x180] sm:$0xff]  }
 0xe90   : > { %20949 = vmatpush3.bf16.msra.mxu0 %v23249_v51  ;;  %v14748_v51 = vld [vmem:[#allocation3 + $0x1ca] sm:$0xff] }
 0xe91   : > { %20950 = vmatprep.subr.bf16.mxu0 %v23250_v23 }
 0xe93   : > { %20919 = vmatmul.mubr.bf16.gmra.mrb[92].mxu0 %v25491_v36 }
 0xe94   : > { %20922 = vmatprep.mubr.bf16.mxu0 %v25493_v25  ;;  %20951 = vmatpush3.bf16.msra.mxu0 %v23250_v23  ;;  %v14749_v23 = vld [vmem:[#allocation3 + $0x1d2] sm:$0xff] }
 0xe95   : > { %20952 = vmatprep.subr.bf16.mxu0 %v23251_v45  ;;  %v25521_v54 = vpack.c.bf16 %v14749_v23, %v14748_v51  ;;  %v15337_v51 = vld [vmem:[#allocation3 + $0xc1] sm:$0xff] }
 0xe96   : > { %v25548_v23 = vpack.c.bf16 %v15338_v33, %v15337_v51  ;;  %v16279_v51 = vld [vmem:[#allocation3 + $0x1e9] sm:$0xff] }
 0xe98   : > { %20953 = vmatpush3.bf16.msra.mxu0 %v23251_v45  ;;  %v23258_v45 = vld [vmem:[#allocation11 + $0x120] sm:$0xff]  }
 0xe99   : > { %20954 = vmatprep.subr.bf16.mxu0 %v23252_v38 }
 0xe9b   : > { %20923 = vmatmul.mubr.bf16.gmra.mrb[96].mxu0 %v25497_v16 }
 0xe9c   : > { %20926 = vmatprep.mubr.bf16.mxu0 %v25499_v18  ;;  %20955 = vmatpush3.bf16.msra.mxu0 %v23252_v38  ;;  %v23260_v38 = vld [vmem:[#allocation11 + $0x130] sm:$0xff]  }
 0xe9d   : > { %20956 = vmatprep.subr.bf16.mxu0 %v23253_v63 }
 0xea0   : > { %20957 = vmatpush3.bf16.msra.mxu0 %v23253_v63  ;;  %v15055_v63 = vld [vmem:[#allocation3 + $0x1e0] sm:$0xff] }
 0xea1   : > { %20990 = vmatprep.subr.bf16.mxu0 %v23254_v7 }
 0xea3   : > { %20927 = vmatmul.mubr.bf16.gmra.mrb[100].mxu0 %v25503_v37 }
 0xea4   : > { %20930 = vmatprep.mubr.bf16.mxu0 %v25505_v56 }
 0xeab   : > { %20931 = vmatmul.mubr.bf16.gmra.mrb[104].mxu0 %v25509_v62 }
 0xeac   : > { %20934 = vmatprep.mubr.bf16.mxu0 %v25511_v27 }
 0xeb3   : > { %20935 = vmatmul.mubr.bf16.gmra.mrb[108].mxu0 %v25515_v10 }
 0xeb4   : > { %20938 = vmatprep.mubr.bf16.mxu0 %v25517_v59 }
 0xebb   : > { %20939 = vmatmul.mubr.bf16.gmra.mrb[112].mxu0 %v25521_v54 }
 0xebc   : > { %20958 = vmatprep.mubr.bf16.mxu0 %v25433_v28  ;;  %v23259_v28 = vld [vmem:[#allocation11 + $0x128] sm:$0xff]  }
 0xec3   : > { %20959 = vmatmul.mubr.bf16.vlgmr.msra.gmra.mrb[84].mxu0 %v25435_v52 }
 0xec4   : > { %20962 = vmatprep.mubr.bf16.mxu0 %v25440_v8  ;;  %20991 = vmatpush3.bf16.msra.mxu0 %v23254_v7  ;;  %v25539_v7 = vpack.c.bf16 %v15056_v55, %v15055_v63  ;;  %v15343_v55 = vld [vmem:[#allocation3 + $0x109] sm:$0xff] }
 0xec5   : > { %20992 = vmatprep.subr.bf16.mxu0 %v23255_v43 }
 0xec8   : > { %20993 = vmatpush3.bf16.msra.mxu0 %v23255_v43  ;;  %v15339_v43 = vld [vmem:[#allocation3 + $0xd9] sm:$0xff] }
 0xec9   : > { %20994 = vmatprep.subr.bf16.mxu0 %v23256_v53 }
 0xecb   : > { %20963 = vmatmul.mubr.bf16.gmra.mrb[88].mxu0 %v25442_v17 }
 0xecc   : > { %20966 = vmatprep.mubr.bf16.mxu0 %v25446_v40  ;;  %20995 = vmatpush3.bf16.msra.mxu0 %v23256_v53  ;;  %v23265_v53 = vld [vmem:[#allocation11 + $0x158] sm:$0xff]  }
 0xecd   : > { %20996 = vmatprep.subr.bf16.mxu0 %v23257_v6 }
 0xed0   : > { %20997 = vmatpush3.bf16.msra.mxu0 %v23257_v6  ;;  %v25550_v6 = vpack.c.bf16 %v15340_v4, %v15339_v43  ;;  %v16277_v4 = vld [vmem:[#allocation3 + $0x1d1] sm:$0xff] }
 0xed1   : > { %20998 = vmatprep.subr.bf16.mxu0 %v23258_v45 }
 0xed3   : > { %20967 = vmatmul.mubr.bf16.gmra.mrb[92].mxu0 %v25448_v31 }
 0xed4   : > { %20970 = vmatprep.mubr.bf16.mxu0 %v25452_v12  ;;  %20999 = vmatpush3.bf16.msra.mxu0 %v23258_v45  ;;  %v23266_v45 = vld [vmem:[#allocation11 + $0x160] sm:$0xff]  }
 0xed5   : > { %21000 = vmatprep.subr.bf16.mxu0 %v23259_v28 }
 0xed8   : > { %21001 = vmatpush3.bf16.msra.mxu0 %v23259_v28  ;;  %v15342_v28 = vld [vmem:[#allocation3 + $0xf9] sm:$0xff] }
 0xed9   : > { %21002 = vmatprep.subr.bf16.mxu0 %v23260_v38 }
 0xedb   : > { %20971 = vmatmul.mubr.bf16.gmra.mrb[96].mxu0 %v25454_v19 }
 0xedc   : > { %20974 = vmatprep.mubr.bf16.mxu0 %v25458_v57  ;;  %21003 = vmatpush3.bf16.msra.mxu0 %v23260_v38  ;;  %v15344_v38 = vld [vmem:[#allocation3 + $0x111] sm:$0xff] }
 0xedd   : > { %21004 = vmatprep.subr.bf16.mxu0 %v23261_v49  ;;  %v25556_v63 = vpack.c.bf16 %v15344_v38, %v15343_v55 }
 0xee0   : > { %21005 = vmatpush3.bf16.msra.mxu0 %v23261_v49  ;;  %v15341_v49 = vld [vmem:[#allocation3 + $0xf1] sm:$0xff] }
 0xee1   : > { %21038 = vmatprep.subr.bf16.mxu0 %v23262_v44 }
 0xee3   : > { %20975 = vmatmul.mubr.bf16.gmra.mrb[100].mxu0 %v25460_v39 }
 0xee4   : > { %20978 = vmatprep.mubr.bf16.mxu0 %v25464_v34 }
 0xeeb   : > { %20979 = vmatmul.mubr.bf16.gmra.mrb[104].mxu0 %v25466_v15 }
 0xeec   : > { %20982 = vmatprep.mubr.bf16.mxu0 %v25470_v0 }
 0xef3   : > { %20983 = vmatmul.mubr.bf16.gmra.mrb[108].mxu0 %v25472_v22 }
 0xef4   : > { %20986 = vmatprep.mubr.bf16.mxu0 %v25476_v29 }
 0xefb   : > { %20987 = vmatmul.mubr.bf16.gmra.mrb[112].mxu0 %v25539_v7 }
 0xefc   : > { %21006 = vmatprep.mubr.bf16.mxu0 %v15363_v13  ;;  %v15348_v13 = vld [vmem:[#allocation3 + $0x141] sm:$0xff] }
 0xefd   : > { %v25560_v26 = vpack.c.bf16 %v15348_v13, %v15347_v32  ;;  %v16561_v13 = vld [vmem:[#allocation3 + $0xca] sm:$0xff] }
 0xf03   : > { %21007 = vmatmul.mubr.bf16.vlgmr.msra.gmra.mrb[84].mxu0 %v25542_v11 }
 0xf04   : > { %21010 = vmatprep.mubr.bf16.mxu0 %v25544_v20  ;;  %21039 = vmatpush3.bf16.msra.mxu0 %v23262_v44  ;;  %v25554_v44 = vpack.c.bf16 %v15342_v28, %v15341_v49  ;;  %v16281_v28 = vld [vmem:[#allocation3 + $0x201] sm:$0xff]  ;;  %v16556_v49 = vld [vmem:[#allocation3 + $0x92] sm:$0xff] }
 0xf05   : > { %21040 = vmatprep.subr.bf16.mxu0 %v23263_v46 }
 0xf08   : > { %21041 = vmatpush3.bf16.msra.mxu0 %v23263_v46  ;;  %v16272_v46 = vld [vmem:[#allocation3 + $0x199] sm:$0xff] }
 0xf09   : > { %21042 = vmatprep.subr.bf16.mxu0 %v23264_v9 }
 0xf0b   : > { %21011 = vmatmul.mubr.bf16.gmra.mrb[88].mxu0 %v25548_v23 }
 0xf0c   : > { %21014 = vmatprep.mubr.bf16.mxu0 %v25550_v6  ;;  %21043 = vmatpush3.bf16.msra.mxu0 %v23264_v9  ;;  %v16274_v9 = vld [vmem:[#allocation3 + $0x1b1] sm:$0xff] }
 0xf0d   : > { %21044 = vmatprep.subr.bf16.mxu0 %v23265_v53 }
 0xf10   : > { %21045 = vmatpush3.bf16.msra.mxu0 %v23265_v53  ;;  %v16278_v53 = vld [vmem:[#allocation3 + $0x1e1] sm:$0xff] }
 0xf11   : > { %21046 = vmatprep.subr.bf16.mxu0 %v23266_v45 }
 0xf13   : > { %21015 = vmatmul.mubr.bf16.gmra.mrb[92].mxu0 %v25554_v44 }
 0xf14   : > { %21018 = vmatprep.mubr.bf16.mxu0 %v25556_v63  ;;  %21047 = vmatpush3.bf16.msra.mxu0 %v23266_v45  ;;  %v16280_v45 = vld [vmem:[#allocation3 + $0x1f9] sm:$0xff] }
 0xf15   : > { %21048 = vmatprep.subr.bf16.mxu0 %v23267_v2  ;;  %v16297_v38 = vpack.c.bf16 %v16281_v28, %v16280_v45 }
 0xf18   : > { %21049 = vmatpush3.bf16.msra.mxu0 %v23267_v2  ;;  %v16558_v2 = vld [vmem:[#allocation3 + $0xaa] sm:$0xff] }
 0xf19   : > { %21050 = vmatprep.subr.bf16.mxu0 %v23268_v50 }
 0xf1b   : > { %21019 = vmatmul.mubr.bf16.gmra.mrb[96].mxu0 %v25388_v30  ;;  %v23271_v30 = vld [vmem:[#allocation11 + $0x188] sm:$0xff]  }
 0xf1c   : > { %21022 = vmatprep.mubr.bf16.mxu0 %v25560_v26  ;;  %21051 = vmatpush3.bf16.msra.mxu0 %v23268_v50  ;;  %v16560_v50 = vld [vmem:[#allocation3 + $0xc2] sm:$0xff] }
 0xf1d   : > { %21052 = vmatprep.subr.bf16.mxu0 %v23269_v5 }
 0xf20   : > { %21053 = vmatpush3.bf16.msra.mxu0 %v23269_v5  ;;  %v16590_v5 = vpack.c.bf16 %v16561_v13, %v16560_v50 }
 0xf21   : > { %21086 = vmatprep.subr.bf16.mxu0 %v23270_v47 }
 0xf23   : > { %21023 = vmatmul.mubr.bf16.gmra.mrb[100].mxu0 %v25399_v42  ;;  %v23273_v42 = vld [vmem:[#allocation11 + $0x198] sm:$0xff]  }
 0xf24   : > { %21026 = vmatprep.mubr.bf16.mxu0 %v25397_v21  ;;  %v23272_v21 = vld [vmem:[#allocation11 + $0x190] sm:$0xff]  }
 0xf2b   : > { %21027 = vmatmul.mubr.bf16.gmra.mrb[104].mxu0 %v25409_v24  ;;  %v23275_v24 = vld [vmem:[#allocation11 + $0x1a8] sm:$0xff]  }
 0xf2c   : > { %21030 = vmatprep.mubr.bf16.mxu0 %v25407_v35  ;;  %v23274_v35 = vld [vmem:[#allocation11 + $0x1a0] sm:$0xff]  }
 0xf33   : > { %21031 = vmatmul.mubr.bf16.gmra.mrb[108].mxu0 %v25419_v14  ;;  %v23277_v14 = vld [vmem:[#allocation11 + $0x1b8] sm:$0xff]  }
 0xf34   : > { %21034 = vmatprep.mubr.bf16.mxu0 %v25417_v48  ;;  %v23276_v48 = vld [vmem:[#allocation11 + $0x1b0] sm:$0xff]  }
 0xf3b   : > { %21035 = vmatmul.mubr.bf16.gmra.mrb[112].mxu0 %v25427_v60  ;;  %v23278_v60 = vld [vmem:[#allocation11 + $0x1c0] sm:$0xff]  }
 0xf3c   : > { %21054 = vmatprep.mubr.bf16.mxu0 %v25479_v41  ;;  %v15667_v41 = vld [vmem:[#allocation3 + $0x1e2] sm:$0xff] }
 0xf43   : > { %21055 = vmatmul.mubr.bf16.vlgmr.msra.gmra.mrb[84].mxu0 %v25481_v1  ;;  %v15668_v1 = vld [vmem:[#allocation3 + $0x1ea] sm:$0xff] }
 0xf44   : > { %21058 = vmatprep.mubr.bf16.mxu0 %v25485_v61  ;;  %21087 = vmatpush3.bf16.msra.mxu0 %v23270_v47  ;;  %v25586_v61 = vpack.c.bf16 %v15668_v1, %v15667_v41  ;;  %v16563_v47 = vld [vmem:[#allocation3 + $0xe2] sm:$0xff] }
 0xf45   : > { %21088 = vmatprep.subr.bf16.mxu0 %v23271_v30 }
 0xf48   : > { %21089 = vmatpush3.bf16.msra.mxu0 %v23271_v30  ;;  %v16564_v30 = vld [vmem:[#allocation3 + $0xf2] sm:$0xff] }
 0xf49   : > { %21090 = vmatprep.subr.bf16.mxu0 %v23272_v21 }
 0xf4b   : > { %21059 = vmatmul.mubr.bf16.gmra.mrb[88].mxu0 %v25487_v58  ;;  %v23279_v58 = vld [vmem:[#allocation11 + $0x1c8] sm:$0xff]  }
 0xf4c   : > { %21062 = vmatprep.mubr.bf16.mxu0 %v25491_v36  ;;  %21091 = vmatpush3.bf16.msra.mxu0 %v23272_v21  ;;  %v23280_v36 = vld [vmem:[#allocation11 + $0x1d0] sm:$0xff]  }
 0xf4d   : > { %21092 = vmatprep.subr.bf16.mxu0 %v23273_v42  ;;  %v16565_v21 = vld [vmem:[#allocation3 + $0xfa] sm:$0xff] }
 0xf50   : > { %21093 = vmatpush3.bf16.msra.mxu0 %v23273_v42 }
 0xf51   : > { %21094 = vmatprep.subr.bf16.mxu0 %v23274_v35 }
 0xf53   : > { %21063 = vmatmul.mubr.bf16.gmra.mrb[92].mxu0 %v25493_v25  ;;  %v23281_v25 = vld [vmem:[#allocation11 + $0x1d8] sm:$0xff]  }
 0xf54   : > { %21066 = vmatprep.mubr.bf16.mxu0 %v25497_v16  ;;  %21095 = vmatpush3.bf16.msra.mxu0 %v23274_v35  ;;  %v23282_v16 = vld [vmem:[#allocation11 + $0x1e0] sm:$0xff]   ;;  %v16592_v35 = vpack.c.bf16 %v16565_v21, %v16564_v30 }
 0xf55   : > { %21096 = vmatprep.subr.bf16.mxu0 %v23275_v24 }
 0xf58   : > { %21097 = vmatpush3.bf16.msra.mxu0 %v23275_v24  ;;  %v16566_v24 = vld [vmem:[#allocation3 + $0x10a] sm:$0xff] }
 0xf59   : > { %21098 = vmatprep.subr.bf16.mxu0 %v23276_v48 }
 0xf5b   : > { %21067 = vmatmul.mubr.bf16.gmra.mrb[96].mxu0 %v25499_v18  ;;  %v23293_v18 = vld [vmem:[#allocation11 + $0x238] sm:$0xff]  }
 0xf5c   : > { %21070 = vmatprep.mubr.bf16.mxu0 %v25503_v37  ;;  %21099 = vmatpush3.bf16.msra.mxu0 %v23276_v48  ;;  %v16567_v48 = vld [vmem:[#allocation3 + $0x112] sm:$0xff] }
 0xf5d   : > { %21100 = vmatprep.subr.bf16.mxu0 %v23277_v14  ;;  %v16593_v41 = vpack.c.bf16 %v16567_v48, %v16566_v24 }
 0xf60   : > { %21101 = vmatpush3.bf16.msra.mxu0 %v23277_v14  ;;  %v16568_v14 = vld [vmem:[#allocation3 + $0x122] sm:$0xff] }
 0xf61   : > { %21134 = vmatprep.subr.bf16.mxu0 %v23278_v60 }
 0xf63   : > { %21071 = vmatmul.mubr.bf16.gmra.mrb[100].mxu0 %v25505_v56  ;;  %v16269_v56 = vld [vmem:[#allocation3 + $0x171] sm:$0xff] }
 0xf64   : > { %21074 = vmatprep.mubr.bf16.mxu0 %v25509_v62  ;;  %v16271_v62 = vld [vmem:[#allocation3 + $0x189] sm:$0xff] }
 0xf6b   : > { %21075 = vmatmul.mubr.bf16.gmra.mrb[104].mxu0 %v25511_v27  ;;  %v16268_v27 = vld [vmem:[#allocation3 + $0x169] sm:$0xff] }
 0xf6c   : > { %21078 = vmatprep.mubr.bf16.mxu0 %v25515_v10  ;;  %v16291_v10 = vpack.c.bf16 %v16269_v56, %v16268_v27  ;;  %v16586_v56 = vld [vmem:[#allocation3 + $0x1fa] sm:$0xff] }
 0xf73   : > { %21079 = vmatmul.mubr.bf16.gmra.mrb[108].mxu0 %v25517_v59  ;;  %v16270_v59 = vld [vmem:[#allocation3 + $0x181] sm:$0xff] }
 0xf74   : > { %21082 = vmatprep.mubr.bf16.mxu0 %v25521_v54  ;;  %v16292_v54 = vpack.c.bf16 %v16271_v62, %v16270_v59  ;;  %v16587_v62 = vld [vmem:[#allocation3 + $0x202] sm:$0xff] }
 0xf75   : > { %v16603_v27 = vpack.c.bf16 %v16587_v62, %v16586_v56 }
 0xf7b   : > { %21083 = vmatmul.mubr.bf16.gmra.mrb[112].mxu0 %v25586_v61 }
 0xf7c   : > { %21102 = vmatprep.mubr.bf16.mxu0 %v25435_v52  ;;  %v23283_v52 = vld [vmem:[#allocation11 + $0x1e8] sm:$0xff]  }
 0xf83   : > { %21103 = vmatmul.mubr.bf16.vlgmr.msra.gmra.mrb[84].mxu0 %v25440_v8  ;;  %v23284_v8 = vld [vmem:[#allocation11 + $0x1f0] sm:$0xff]  }
 0xf84   : > { %21106 = vmatprep.mubr.bf16.mxu0 %v25442_v17  ;;  %21135 = vmatpush3.bf16.msra.mxu0 %v23278_v60  ;;  %v23285_v17 = vld [vmem:[#allocation11 + $0x1f8] sm:$0xff]   ;;  %v16569_v60 = vld [vmem:[#allocation3 + $0x12a] sm:$0xff] }
 0xf85   : > { %21136 = vmatprep.subr.bf16.mxu0 %v23279_v58  ;;  %v16594_v1 = vpack.c.bf16 %v16569_v60, %v16568_v14 }
 0xf88   : > { %21137 = vmatpush3.bf16.msra.mxu0 %v23279_v58  ;;  %v16570_v58 = vld [vmem:[#allocation3 + $0x13a] sm:$0xff] }
 0xf89   : > { %21138 = vmatprep.subr.bf16.mxu0 %v23280_v36 }
 0xf8b   : > { %21107 = vmatmul.mubr.bf16.gmra.mrb[88].mxu0 %v25446_v40  ;;  %v23286_v40 = vld [vmem:[#allocation11 + $0x200] sm:$0xff]  }
 0xf8c   : > { %21110 = vmatprep.mubr.bf16.mxu0 %v25448_v31  ;;  %21139 = vmatpush3.bf16.msra.mxu0 %v23280_v36  ;;  %v23287_v31 = vld [vmem:[#allocation11 + $0x208] sm:$0xff]   ;;  %v16571_v36 = vld [vmem:[#allocation3 + $0x142] sm:$0xff] }
 0xf8d   : > { %21140 = vmatprep.subr.bf16.mxu0 %v23281_v25 }
 0xf90   : > { %21141 = vmatpush3.bf16.msra.mxu0 %v23281_v25  ;;  %v16572_v25 = vld [vmem:[#allocation3 + $0x152] sm:$0xff] }
 0xf91   : > { %21142 = vmatprep.subr.bf16.mxu0 %v23282_v16 }
 0xf93   : > { %21111 = vmatmul.mubr.bf16.gmra.mrb[92].mxu0 %v25452_v12  ;;  %v23288_v12 = vld [vmem:[#allocation11 + $0x210] sm:$0xff]  }
 0xf94   : > { %21114 = vmatprep.mubr.bf16.mxu0 %v25454_v19  ;;  %21143 = vmatpush3.bf16.msra.mxu0 %v23282_v16  ;;  %v23289_v19 = vld [vmem:[#allocation11 + $0x218] sm:$0xff]  }
 0xf95   : > { %21144 = vmatprep.subr.bf16.mxu0 %v23283_v52  ;;  %v16573_v16 = vld [vmem:[#allocation3 + $0x15a] sm:$0xff] }
 0xf98   : > { %21145 = vmatpush3.bf16.msra.mxu0 %v23283_v52  ;;  %v16595_v52 = vpack.c.bf16 %v16571_v36, %v16570_v58 }
 0xf99   : > { %21146 = vmatprep.subr.bf16.mxu0 %v23284_v8 }
 0xf9b   : > { %21115 = vmatmul.mubr.bf16.gmra.mrb[96].mxu0 %v25458_v57  ;;  %v16263_v57 = vld [vmem:[#allocation3 + $0x129] sm:$0xff] }
 0xf9c   : > { %21118 = vmatprep.mubr.bf16.mxu0 %v25460_v39  ;;  %21147 = vmatpush3.bf16.msra.mxu0 %v23284_v8  ;;  %v16262_v39 = vld [vmem:[#allocation3 + $0x121] sm:$0xff]  ;;  %v16596_v8 = vpack.c.bf16 %v16573_v16, %v16572_v25 }
 0xf9d   : > { %21148 = vmatprep.subr.bf16.mxu0 %v23285_v17 }
 0xfa0   : > { %21149 = vmatpush3.bf16.msra.mxu0 %v23285_v17  ;;  %v16574_v17 = vld [vmem:[#allocation3 + $0x16a] sm:$0xff] }
 0xfa1   : > { %21182 = vmatprep.subr.bf16.mxu0 %v23286_v40 }
 0xfa3   : > { %21119 = vmatmul.mubr.bf16.gmra.mrb[100].mxu0 %v25464_v34  ;;  %v23291_v34 = vld [vmem:[#allocation11 + $0x228] sm:$0xff]  }
 0xfa4   : > { %21122 = vmatprep.mubr.bf16.mxu0 %v25466_v15  ;;  %v16288_v15 = vpack.c.bf16 %v16263_v57, %v16262_v39  ;;  %v16578_v57 = vld [vmem:[#allocation3 + $0x19a] sm:$0xff]  ;;  %v16579_v39 = vld [vmem:[#allocation3 + $0x1a2] sm:$0xff] }
 0xfab   : > { %21123 = vmatmul.mubr.bf16.gmra.mrb[104].mxu0 %v25470_v0  ;;  %v23292_v0 = vld [vmem:[#allocation11 + $0x230] sm:$0xff]  }
 0xfac   : > { %21126 = vmatprep.mubr.bf16.mxu0 %v25472_v22  ;;  %v16267_v22 = vld [vmem:[#allocation3 + $0x159] sm:$0xff] }
 0xfb3   : > { %21127 = vmatmul.mubr.bf16.gmra.mrb[108].mxu0 %v25476_v29  ;;  %v16266_v29 = vld [vmem:[#allocation3 + $0x151] sm:$0xff] }
 0xfb4   : > { %21130 = vmatprep.mubr.bf16.mxu0 %v25539_v7  ;;  %v16290_v37 = vpack.c.bf16 %v16267_v22, %v16266_v29  ;;  %v16273_v7 = vld [vmem:[#allocation3 + $0x1a1] sm:$0xff]  ;;  %v16582_v29 = vld [vmem:[#allocation3 + $0x1ca] sm:$0xff] }
 0xfbb   : > { %21131 = vmatmul.mubr.bf16.gmra.mrb[112].mxu0 %v25429_v3  ;;  %v23290_v3 = vld [vmem:[#allocation11 + $0x220] sm:$0xff]  }
 0xfbc   : > { %21150 = vmatprep.mubr.bf16.mxu0 %v25542_v11  ;;  %v16275_v11 = vld [vmem:[#allocation3 + $0x1b9] sm:$0xff] }
 0xfbd   : > { %v16294_v33 = vpack.c.bf16 %v16275_v11, %v16274_v9 }
 0xfc3   : > { %21151 = vmatmul.mubr.bf16.vlgmr.msra.gmra.mrb[84].mxu0 %v25544_v20  ;;  %v16293_v20 = vpack.c.bf16 %v16273_v7, %v16272_v46 }
 0xfc4   : > { %21154 = vmatprep.mubr.bf16.mxu0 %v25548_v23  ;;  %21183 = vmatpush3.bf16.msra.mxu0 %v23286_v40  ;;  %v16276_v23 = vld [vmem:[#allocation3 + $0x1c9] sm:$0xff]  ;;  %v16575_v40 = vld [vmem:[#allocation3 + $0x172] sm:$0xff] }
 0xfc5   : > { %21184 = vmatprep.subr.bf16.mxu0 %v23287_v31  ;;  %v16295_v43 = vpack.c.bf16 %v16277_v4, %v16276_v23 }
 0xfc8   : > { %21185 = vmatpush3.bf16.msra.mxu0 %v23287_v31  ;;  %v16576_v31 = vld [vmem:[#allocation3 + $0x182] sm:$0xff] }
 0xfc9   : > { %21186 = vmatprep.subr.bf16.mxu0 %v23288_v12 }
 0xfcb   : > { %21155 = vmatmul.mubr.bf16.gmra.mrb[88].mxu0 %v25550_v6  ;;  %v16296_v6 = vpack.c.bf16 %v16279_v51, %v16278_v53 }
 0xfcc   : > { %21158 = vmatprep.mubr.bf16.mxu0 %v25554_v44  ;;  %21187 = vmatpush3.bf16.msra.mxu0 %v23288_v12  ;;  %v16557_v44 = vld [vmem:[#allocation3 + $0x9a] sm:$0xff]  ;;  %v16577_v12 = vld [vmem:[#allocation3 + $0x18a] sm:$0xff] }
 0xfcd   : > { %21188 = vmatprep.subr.bf16.mxu0 %v23289_v19  ;;  %v16588_v55 = vpack.c.bf16 %v16557_v44, %v16556_v49 }
 0xfd0   : > { %21189 = vmatpush3.bf16.msra.mxu0 %v23289_v19  ;;  %v16597_v19 = vpack.c.bf16 %v16575_v40, %v16574_v17 }
 0xfd1   : > { %21190 = vmatprep.subr.bf16.mxu0 %v23290_v3 }
 0xfd3   : > { %21159 = vmatmul.mubr.bf16.gmra.mrb[92].mxu0 %v25556_v63  ;;  %v16559_v63 = vld [vmem:[#allocation3 + $0xb2] sm:$0xff] }
 0xfd4   : > { %21162 = vmatprep.mubr.bf16.mxu0 %v16288_v15  ;;  %21191 = vmatpush3.bf16.msra.mxu0 %v23290_v3  ;;  %v16589_v32 = vpack.c.bf16 %v16559_v63, %v16558_v2  ;;  %v16598_v3 = vpack.c.bf16 %v16577_v12, %v16576_v31  ;;  %v16581_v15 = vld [vmem:[#allocation3 + $0x1ba] sm:$0xff] }
 0xfd5   : > { %21192 = vmatprep.subr.bf16.mxu0 %v23291_v34 }
 0xfd8   : > { %21193 = vmatpush3.bf16.msra.mxu0 %v23291_v34  ;;  %v16580_v34 = vld [vmem:[#allocation3 + $0x1b2] sm:$0xff] }
 0xfd9   : > { %21194 = vmatprep.subr.bf16.mxu0 %v23292_v0  ;;  %v16600_v22 = vpack.c.bf16 %v16581_v15, %v16580_v34 }
 0xfdb   : > { %21163 = vmatmul.mubr.bf16.gmra.mrb[96].mxu0 %v25560_v26  ;;  %v16562_v26 = vld [vmem:[#allocation3 + $0xda] sm:$0xff] }
 0xfdc   : > { %21166 = vmatprep.mubr.bf16.mxu0 %v16290_v37  ;;  %21195 = vmatpush3.bf16.msra.mxu0 %v23292_v0  ;;  %v16591_v42 = vpack.c.bf16 %v16563_v47, %v16562_v26  ;;  %v16599_v0 = vpack.c.bf16 %v16579_v39, %v16578_v57 }
 0xfdd   : > { %21196 = vmatprep.subr.bf16.mxu0 %v23293_v18 }
 0xfe0   : > { %21197 = vmatpush3.bf16.msra.mxu0 %v23293_v18  ;;  %v16583_v18 = vld [vmem:[#allocation3 + $0x1d2] sm:$0xff] }
 0xfe1   : > { %v16601_v37 = vpack.c.bf16 %v16583_v18, %v16582_v29 }
 0xfe3   : > { %21167 = vmatmul.mubr.bf16.gmra.mrb[100].mxu0 %v16291_v10  ;;  %v25613_v10 = vld [vmem:[#allocation12] ss:$0 sm:$0xff] }
 0xfe4   : > { %21170 = vmatprep.mubr.bf16.mxu0 %v16292_v54 }
 0xfeb   : > { %21171 = vmatmul.mubr.bf16.gmra.mrb[104].mxu0 %v16293_v20 }
 0xfec   : > { %21174 = vmatprep.mubr.bf16.mxu0 %v16294_v33 }
 0xff3   : > { %21175 = vmatmul.mubr.bf16.gmra.mrb[108].mxu0 %v16295_v43 }
 0xff4   : > { %21178 = vmatprep.mubr.bf16.mxu0 %v16296_v6 }
 0xffb   : > { %21179 = vmatmul.mubr.bf16.gmra.mrb[112].mxu0 %v16297_v38 }
 0xffc   : > { %21198 = vmatprep.mubr.bf16.mxu0 %v16588_v55 }
0x1003   : > { %21199 = vmatmul.mubr.bf16.vlgmr.msra.gmra.mrb[84].mxu0 %v16589_v32 }
0x1004   : > { %21202 = vmatprep.mubr.bf16.mxu0 %v16590_v5 }
0x100b   : > { %21203 = vmatmul.mubr.bf16.gmra.mrb[88].mxu0 %v16591_v42 }
0x100c   : > { %21206 = vmatprep.mubr.bf16.mxu0 %v16592_v35 }
0x1013   : > { %21207 = vmatmul.mubr.bf16.gmra.mrb[92].mxu0 %v16593_v41 }
0x1014   : > { %21210 = vmatprep.mubr.bf16.mxu0 %v16594_v1 }
0x101b   : > { %21211 = vmatmul.mubr.bf16.gmra.mrb[96].mxu0 %v16595_v52 }
0x101c   : > { %21214 = vmatprep.mubr.bf16.mxu0 %v16596_v8 }
0x1023   : > { %21215 = vmatmul.mubr.bf16.gmra.mrb[100].mxu0 %v16597_v19 }
0x1024   : > { %21218 = vmatprep.mubr.bf16.mxu0 %v16598_v3 }
0x102b   : > { %21219 = vmatmul.mubr.bf16.gmra.mrb[104].mxu0 %v16599_v0 }
0x102c   : > { %21222 = vmatprep.mubr.bf16.mxu0 %v16600_v22 }
0x1033   : > { %21223 = vmatmul.mubr.bf16.gmra.mrb[108].mxu0 %v16601_v37 }
0x1034   : > { %21226 = vmatprep.mubr.bf16.mxu0 %v25586_v61 }
0x103b   : > { %21227 = vmatmul.mubr.bf16.gmra.mrb[112].mxu0 %v16603_v27 }
0x10d6   : > { %v21200_v59 = vpop.f32.mrb[84].mxu0 }
0x10d7   : > { %v16871_v54 = vadd.f32 %v21200_v59, %v25613_v10  ;;  %v16703_v7 = vpop.f32.mrb[85].mxu0 }
0x10d8   : > { %v16869_v11 = vadd.f32 %v25613_v10, %v16703_v7  ;;  %v21201_v46 = vpop.f32.mrb[86].mxu0 }
0x10d9   : > { %16903 = vst [vmem:[%s23904_s29 + $0x10] sm:$0xff] %v16871_v54  ;;  %v16872_v61 = vadd.f32 %v21201_v46, %v25613_v10  ;;  %v16706_v20 = vpop.f32.mrb[87].mxu0 }
0x10da   : > { %16901 = vst [vmem:[%s23904_s29] sm:$0xff] %v16869_v11  ;;  %v16870_v9 = vadd.f32 %v25613_v10, %v16706_v20 }
0x10db   : > { %16904 = vst [vmem:[%s23904_s29 + $0x18] sm:$0xff] %v16872_v61 }
0x10dc   : > { %16902 = vst [vmem:[%s23904_s29 + $0x8] sm:$0xff] %v16870_v9 }
0x10de   : > { %v21204_v33 = vpop.f32.mrb[88].mxu0 }
0x10df   : > { %v16875_v4 = vadd.f32 %v21204_v33, %v25613_v10  ;;  %v16719_v51 = vpop.f32.mrb[89].mxu0 }
0x10e0   : > { %v16873_v23 = vadd.f32 %v25613_v10, %v16719_v51  ;;  %v21205_v43 = vpop.f32.mrb[90].mxu0 }
0x10e1   : > { %16907 = vst [vmem:[%s23904_s29 + $0x30] sm:$0xff] %v16875_v4  ;;  %v16876_v53 = vadd.f32 %v21205_v43, %v25613_v10  ;;  %v16722_v6 = vpop.f32.mrb[91].mxu0 }
0x10e2   : > { %16905 = vst [vmem:[%s23904_s29 + $0x20] sm:$0xff] %v16873_v23  ;;  %v16874_v45 = vadd.f32 %v25613_v10, %v16722_v6 }
0x10e3   : > { %16908 = vst [vmem:[%s23904_s29 + $0x38] sm:$0xff] %v16876_v53 }
0x10e4   : > { %16906 = vst [vmem:[%s23904_s29 + $0x28] sm:$0xff] %v16874_v45 }
0x10e6   : > { %v21208_v28 = vpop.f32.mrb[92].mxu0 }
0x10e7   : > { %v16879_v38 = vadd.f32 %v21208_v28, %v25613_v10  ;;  %v16735_v49 = vpop.f32.mrb[93].mxu0 }
0x10e8   : > { %v16877_v44 = vadd.f32 %v25613_v10, %v16735_v49  ;;  %v21209_v55 = vpop.f32.mrb[94].mxu0 }
0x10e9   : > { %16911 = vst [vmem:[%s23904_s29 + $0x50] sm:$0xff] %v16879_v38  ;;  %v16880_v2 = vadd.f32 %v21209_v55, %v25613_v10  ;;  %v16738_v63 = vpop.f32.mrb[95].mxu0 }
0x10ea   : > { %16909 = vst [vmem:[%s23904_s29 + $0x40] sm:$0xff] %v16877_v44  ;;  %v16878_v50 = vadd.f32 %v25613_v10, %v16738_v63 }
0x10eb   : > { %16912 = vst [vmem:[%s23904_s29 + $0x58] sm:$0xff] %v16880_v2 }
0x10ec   : > { %16910 = vst [vmem:[%s23904_s29 + $0x48] sm:$0xff] %v16878_v50 }
0x10ee   : > { %v21212_v13 = vpop.f32.mrb[96].mxu0 }
0x10ef   : > { %v16883_v32 = vadd.f32 %v21212_v13, %v25613_v10  ;;  %v16751_v5 = vpop.f32.mrb[97].mxu0 }
0x10f0   : > { %v16881_v26 = vadd.f32 %v25613_v10, %v16751_v5  ;;  %v21213_v47 = vpop.f32.mrb[98].mxu0 }
0x10f1   : > { %16915 = vst [vmem:[%s23904_s29 + $0x70] sm:$0xff] %v16883_v32  ;;  %v16884_v30 = vadd.f32 %v21213_v47, %v25613_v10  ;;  %v16754_v21 = vpop.f32.mrb[99].mxu0 }
0x10f2   : > { %16913 = vst [vmem:[%s23904_s29 + $0x60] sm:$0xff] %v16881_v26  ;;  %v16882_v42 = vadd.f32 %v25613_v10, %v16754_v21 }
0x10f3   : > { %16916 = vst [vmem:[%s23904_s29 + $0x78] sm:$0xff] %v16884_v30 }
0x10f4   : > { %16914 = vst [vmem:[%s23904_s29 + $0x68] sm:$0xff] %v16882_v42 }
0x10f6   : > { %v21216_v35 = vpop.f32.mrb[100].mxu0 }
0x10f7   : > { %v16887_v24 = vadd.f32 %v21216_v35, %v25613_v10  ;;  %v16767_v48 = vpop.f32.mrb[101].mxu0 }
0x10f8   : > { %v16885_v14 = vadd.f32 %v25613_v10, %v16767_v48  ;;  %v21217_v60 = vpop.f32.mrb[102].mxu0 }
0x10f9   : > { %16919 = vst [vmem:[%s23904_s29 + $0x90] sm:$0xff] %v16887_v24  ;;  %v16888_v41 = vadd.f32 %v21217_v60, %v25613_v10  ;;  %v16770_v1 = vpop.f32.mrb[103].mxu0 }
0x10fa   : > { %16917 = vst [vmem:[%s23904_s29 + $0x80] sm:$0xff] %v16885_v14  ;;  %v16886_v58 = vadd.f32 %v25613_v10, %v16770_v1 }
0x10fb   : > { %16920 = vst [vmem:[%s23904_s29 + $0x98] sm:$0xff] %v16888_v41 }
0x10fc   : > { %16918 = vst [vmem:[%s23904_s29 + $0x88] sm:$0xff] %v16886_v58 }
0x10fe   : > { %v21220_v36 = vpop.f32.mrb[104].mxu0 }
0x10ff   : > { %v16891_v25 = vadd.f32 %v21220_v36, %v25613_v10  ;;  %v16783_v16 = vpop.f32.mrb[105].mxu0 }
0x1100   : > { %v16889_v52 = vadd.f32 %v25613_v10, %v16783_v16  ;;  %v21221_v8 = vpop.f32.mrb[106].mxu0 }
0x1101   : > { %16923 = vst [vmem:[%s23904_s29 + $0xb0] sm:$0xff] %v16891_v25  ;;  %v16892_v17 = vadd.f32 %v21221_v8, %v25613_v10  ;;  %v16786_v40 = vpop.f32.mrb[107].mxu0 }
0x1102   : > { %16921 = vst [vmem:[%s23904_s29 + $0xa0] sm:$0xff] %v16889_v52  ;;  %v16890_v31 = vadd.f32 %v25613_v10, %v16786_v40 }
0x1103   : > { %16924 = vst [vmem:[%s23904_s29 + $0xb8] sm:$0xff] %v16892_v17 }
0x1104   : > { %16922 = vst [vmem:[%s23904_s29 + $0xa8] sm:$0xff] %v16890_v31 }
0x1106   : > { %v21224_v12 = vpop.f32.mrb[108].mxu0 }
0x1107   : > { %v16895_v19 = vadd.f32 %v21224_v12, %v25613_v10  ;;  %v16799_v3 = vpop.f32.mrb[109].mxu0 }
0x1108   : > { %v16893_v57 = vadd.f32 %v25613_v10, %v16799_v3  ;;  %v21225_v39 = vpop.f32.mrb[110].mxu0 }
0x1109   : > { %16927 = vst [vmem:[%s23904_s29 + $0xd0] sm:$0xff] %v16895_v19  ;;  %v16896_v34 = vadd.f32 %v21225_v39, %v25613_v10  ;;  %v16802_v15 = vpop.f32.mrb[111].mxu0 }
0x110a   : > { %16925 = vst [vmem:[%s23904_s29 + $0xc0] sm:$0xff] %v16893_v57  ;;  %v16894_v0 = vadd.f32 %v25613_v10, %v16802_v15 }
0x110b   : > { %16928 = vst [vmem:[%s23904_s29 + $0xd8] sm:$0xff] %v16896_v34 }
0x110c   : > { %16926 = vst [vmem:[%s23904_s29 + $0xc8] sm:$0xff] %v16894_v0 }
0x110e   : > { %v21228_v22 = vpop.f32.mrb[112].mxu0 }
0x110f   : > { %v16899_v29 = vadd.f32 %v21228_v22, %v25613_v10  ;;  %v16815_v18 = vpop.f32.mrb[113].mxu0 }
0x1110   : > { %v16897_v37 = vadd.f32 %v25613_v10, %v16815_v18  ;;  %v21229_v56 = vpop.f32.mrb[114].mxu0 }
0x1111   : > { %16931 = vst [vmem:[%s23904_s29 + $0xf0] sm:$0xff] %v16899_v29  ;;  %v16900_v62 = vadd.f32 %v21229_v56, %v25613_v10  ;;  %v16818_v27 = vpop.f32.mrb[115].mxu0 }
0x1112   : > { %16929 = vst [vmem:[%s23904_s29 + $0xe0] sm:$0xff] %v16897_v37  ;;  %v16898_v59 = vadd.f32 %v25613_v10, %v16818_v27 }
0x1113   : > { %16932 = vst [vmem:[%s23904_s29 + $0xf8] sm:$0xff] %v16900_v62 }
0x1114   : > { %16930 = vst [vmem:[%s23904_s29 + $0xe8] sm:$0xff] %v16898_v59 }
0x1115   : > { %23448 = shalt.err (!%p23445_p2)
}
0x1116   : > { %s23449_s7 = scalar_lea.hbm %s25680_s11, 4096  ;;  %s23453_s22 = scalar_lea.hbm %s25741_s5, 8192 }
0x1117   : > { %p23450_p3 = scmp.ne.s32.totalorder %s25680_s11, %s23449_s7  ;;  %p23454_p7 = scmp.lt.u32.totalorder %s25680_s11, %s25741_s5 }
0x1118   : > { %p23455_p9 = scmp.lt.u32.totalorder %s23453_s22, %s23449_s7  ;;  %p23457_p4 = scmp.lt.u32.totalorder %s23449_s7, %s25680_s11 }
0x1119   : > { %p23451_p5 = pnand %p23450_p3, %p25774_p8 }
0x111a   : > { %p23456_p12 = por %p23455_p9, %p23454_p7 }
0x111b   : > { %p23452_p6 = pneg %p23451_p5 }
0x111c   : > { %p23458_p13 = por %p23457_p4, %p23456_p12 }
0x111e   : > { %p23459_p1 = pnand %p23458_p13, %p23452_p6 }
0x1120   : > { %23462 = shalt.err (!%p23459_p1)
}
0x1121   : > { %s23541_s12 = smov 128   ;;  %s23542_s14 = smov 8  }
0x1122   : > { %22846 = dma.vmem_to_hbm [thread:$0]  (%p25774_p8), %s25682_s26, 4096, %s25680_s11, %s25690_s21, %s23541_s12, %s23541_s12, %s23542_s14  }
0x1123 PF: > { %p22873_p10 = scmp.ge.s32.totalorder %s23527_s23, 2  ;;  %s16965_s17 = sand.u32 1, %s23507_s18  }
0x1124   : > { %p25775_p11 = scmp.ne.s32.totalorder %s25756_s30, 0  ;;  %s16966_s27 = scalar_lea.sflag [#allocation8], %s16965_s17 }
0x1126   : > { %p22862_p0 = pnand %p22873_p10, %p25775_p11 }
0x1128   : > { %23502 = dma.done.wait (!%p22862_p0), %s16966_s27, 4096  }
0x1129   : > { %23504 = vsyncadd (!%p22862_p0), %s16966_s27, 4294963200  ;;  %s21_s23 = sadd.s32 1, %s23527_s23   ;;  %s25776_s29 = sld [smem:[#allocation24_spill]] }
0x112a   : > { %p18_p2 = scmp.ge.s32.totalorder %s21_s23, 4   ;;  %s25777_s20 = sld [smem:[#allocation27_spill]] }
0x112b   : > { %s25778_s21 = sld [smem:[#allocation25_spill]]  ;;  %s25779_s22 = sld [smem:[#allocation26_spill]] }
0x112c   : > { %s25780_s18 = smov %s23511_s19  ;;  %20 = sbr.rel (!%p18_p2) target bundleno = 9 (0x9), region = 167 }
0x112f   : > { %s25781_s19 = smov %s25776_s29 }
0x1133   :  { %16971 = vsyncpa [#allocation7], 1 }
0x1134   :  { %16973 = vsyncpa [#allocation7 + $0x1], 1 }
0x1135   :  { %16974 = vsyncpa [#allocation10], 1 }
0x1136   :  { %16975 = vsyncpa [#allocation13], 1 }
0x1137   :  { %16976 = vsyncpa [#allocation8], 1 }
0x1138   :  { %16978 = vsyncpa [#allocation8 + $0x1], 1 }
0x1139   :  { %16979 = vsyncmov [#allocation5] }
0x113c   :  { %s16980_s28 = vpop.sfrf %16979 }
0x113d   :  { %p17447_p8 = scmp.ne.s32.totalorder %s16980_s28, 0 }
0x113f   :  { %16984 = shalt.err (%p17447_p8)  }

</bundles_post_ra>
